<compile_context>
chip_gen: v7x
topology: tpu7x:2x2x1
jax: 0.10.0
libtpu: 0.0.40
codegen_flags: <defaults>
</compile_context>

<pallas_src>
import jax
import jax.numpy as jnp
from jax.experimental import pallas as pl
from jax.experimental.pallas import tpu as pltpu


# ---------------------------------------------------------------------------
# Model dimensions (fixed by TestModel4: view(10*8*8) implies 1x3x32x32 input)
# ---------------------------------------------------------------------------
H, W, CIN = 32, 32, 3
C1, C2 = 32, 10            # conv1 / conv2 output channels
HP1, WP1 = 16, 16          # spatial size after pool1
HP2, WP2 = 8, 8            # spatial size after pool2
FLAT = C2 * HP2 * WP2      # 640
HID = 128
NOUT = 10

_PAD2_W = 32               # sublane extent of the padded conv2 input scratch
_OFF2_W = 8                # conv2 data starts at sublane 8 (vreg-aligned store)

_VMEM = pl.BlockSpec(memory_space=pltpu.MemorySpace.VMEM)


# ---------------------------------------------------------------------------
# Fused kernel: conv1+relu+pool1+conv2+relu+pool2+flatten+linear1+relu+linear2
# ---------------------------------------------------------------------------
def fused_forward_kernel(xpad_ref, w1_ref, b1_ref, w2_ref, b2_ref,
                         w3t_ref, b3_ref, w4_ref, b4_ref,
                         out_ref,
                         xp2_ref, pool1_scr, pool2_scr):
    # ---------------- conv1 (3x3, pad 1) + ReLU : (34,34,3) -> (1024, 32) ----
    acc1 = None
    for ky in range(3):
        for kx in range(3):
            t = ky * 3 + kx
            win = xpad_ref[pl.ds(ky, H), pl.ds(kx, W), :]            # (32,32,3)
            patch = win.reshape(H * W, CIN)                          # (1024,3)
            d = jnp.dot(patch, w1_ref[t],
                        preferred_element_type=jnp.float32)          # (1024,32)
            acc1 = d if acc1 is None else acc1 + d
    y1 = jnp.maximum(acc1 + b1_ref[...], 0.0)                        # (1024,32)

    # ---------------- pool1 (2x2 max) : (32,32,C1) -> (16,16,C1) -------------
    # row-pair max over a major axis (free reshape, 32 % 8 == 0)
    y1r = y1.reshape(H // 2, 2, W, C1)                               # (16,2,32,32)
    hmax = jnp.maximum(y1r[:, 0], y1r[:, 1]).reshape(H // 2 * W, C1)  # (512,32)
    pool1_scr[...] = hmax
    # column-pair max via stride-2 sublane reads
    ev = pool1_scr[pl.ds(0, HP1 * WP1, 2), :]                        # (256,32)
    od = pool1_scr[pl.ds(1, HP1 * WP1, 2), :]
    pooled1 = jnp.maximum(ev, od)                                    # rows = hp*16+wp

    # ------------- zero-padded conv2 input tile, built in VMEM ---------------
    # data at [1:17, 8:24, :]; sublane offset 8 keeps the store vreg-aligned,
    # the zeroed border supplies the conv padding.
    xp2_ref[...] = jnp.zeros((HP1 + 2, _PAD2_W, C1), jnp.float32)
    xp2_ref[pl.ds(1, HP1), pl.ds(_OFF2_W, WP1), :] = pooled1.reshape(HP1, WP1, C1)

    # ---------------- conv2 (3x3, pad 1) + ReLU : -> (256, 10) ---------------
    acc2 = None
    for ky in range(3):
        for kx in range(3):
            t = ky * 3 + kx
            win = xp2_ref[pl.ds(ky, HP1), pl.ds(_OFF2_W - 1 + kx, WP1), :]  # (16,16,32)
            patch = win.reshape(HP1 * WP1, C1)                       # (256,32)
            d = jnp.dot(patch, w2_ref[t],
                        preferred_element_type=jnp.float32)          # (256,10)
            acc2 = d if acc2 is None else acc2 + d
    y2 = jnp.maximum(acc2 + b2_ref[...], 0.0)                        # (256,10)

    # ---------------- pool2 (2x2 max) : (16,16,C2) -> (8,8,C2) ---------------
    y2r = y2.reshape(HP1 // 2, 2, WP1, C2)                           # (8,2,16,10)
    hmax2 = jnp.maximum(y2r[:, 0], y2r[:, 1]).reshape(HP1 // 2 * WP1, C2)  # (128,10)
    pool2_scr[...] = hmax2
    ev2 = pool2_scr[pl.ds(0, HP2 * WP2, 2), :]                       # (64,10)
    od2 = pool2_scr[pl.ds(1, HP2 * WP2, 2), :]
    pooled2 = jnp.maximum(ev2, od2)                                  # rows = hp*8+wp

    # ---------------- dense block (transposed / column-vector form) ----------
    # PyTorch flatten order is (C, H, W): flat[c*64 + hw] = pooled2[hw, c], so
    #   hT(128,1) = sum_c W3[:, c*64:(c+1)*64] @ pooled2[:, c]  -- no transpose
    p2_bf = pooled2.astype(jnp.bfloat16)
    hT = None
    for c in range(C2):
        col = p2_bf[:, c:c + 1]                                      # (64,1) bf16
        d = jnp.dot(w3t_ref[c], col,
                    preferred_element_type=jnp.float32)              # (128,1) f32
        hT = d if hT is None else hT + d
    hT = jnp.maximum(hT + b3_ref[...], 0.0)                          # (128,1)

    # linear2: out(10,1) = W4(10,128) @ hT(128,1) + b4
    out = jnp.dot(w4_ref[...], hT, preferred_element_type=jnp.float32)
    out_ref[...] = out + b4_ref[...]


def fused_forward(x_pad_hwc, p):
    out = pl.pallas_call(
        fused_forward_kernel,
        out_shape=jax.ShapeDtypeStruct((NOUT, 1), jnp.float32),
        in_specs=[_VMEM] * 9,
        out_specs=_VMEM,
        scratch_shapes=[
            pltpu.VMEM((HP1 + 2, _PAD2_W, C1), jnp.float32),   # padded conv2 input
            pltpu.VMEM((H // 2 * W, C1), jnp.float32),         # (512, 32) pool1 stage
            pltpu.VMEM((HP1 // 2 * WP1, C2), jnp.float32),     # (128, 10) pool2 stage
        ],
    )(x_pad_hwc, p["w1"], p["b1"], p["w2"], p["b2"],
      p["w3t"], p["b3"], p["w4"], p["b4"])
    return out.reshape(NOUT)


# ---------------------------------------------------------------------------
# Parameters.  Synthetic weights are generated in PyTorch's native layouts and
# then permuted into the kernel layouts, documenting the transform needed if
# real nn.Conv2d / nn.Linear weights were ever loaded.
# ---------------------------------------------------------------------------
def init_params(key):
    ks = jax.random.split(key, 8)
    s = 0.05
    w1_t = s * jax.random.normal(ks[0], (C1, CIN, 3, 3), jnp.float32)  # (cout,cin,kh,kw)
    b1_t = s * jax.random.normal(ks[1], (C1,), jnp.float32)
    w2_t = s * jax.random.normal(ks[2], (C2, C1, 3, 3), jnp.float32)
    b2_t = s * jax.random.normal(ks[3], (C2,), jnp.float32)
    w3_t = s * jax.random.normal(ks[4], (HID, FLAT), jnp.float32)      # (out, in)
    b3_t = s * jax.random.normal(ks[5], (HID,), jnp.float32)
    w4_t = s * jax.random.normal(ks[6], (NOUT, HID), jnp.float32)
    b4_t = s * jax.random.normal(ks[7], (NOUT,), jnp.float32)

    # conv taps: (cout,cin,kh,kw) -> (kh,kw,cin,cout) -> (9, cin, cout)
    w1 = jnp.transpose(w1_t, (2, 3, 1, 0)).reshape(9, CIN, C1)
    w2 = jnp.transpose(w2_t, (2, 3, 1, 0)).reshape(9, C1, C2)
    # linear1: torch flat index = c*64 + hw  ->  per-channel (HID, 64) blocks,
    # cast to bf16 (the only large weight; f32 accumulation in-kernel).
    w3t = jnp.transpose(w3_t.reshape(HID, C2, HP2 * WP2), (1, 0, 2)).astype(jnp.bfloat16)
    return dict(
        w1=w1, b1=b1_t.reshape(1, C1),
        w2=w2, b2=b2_t.reshape(1, C2),
        w3t=w3t, b3=b3_t.reshape(HID, 1),
        w4=w4_t, b4=b4_t.reshape(NOUT, 1),
    )


# ---------------------------------------------------------------------------
# Forward pass (matches TestModel4.forward; batch must be 1 due to view(640))
# ---------------------------------------------------------------------------
def forward(x_nchw, params):
    x_hwc = jnp.transpose(x_nchw[0], (1, 2, 0))              # (32, 32, 3) HWC
    x_pad = jnp.pad(x_hwc, ((1, 1), (1, 1), (0, 0)))         # (34, 34, 3) zero pad
    return fused_forward(x_pad, params)


if __name__ == "__main__":
    key = jax.random.PRNGKey(0)
    k_x, k_p = jax.random.split(key)

    x = jax.random.normal(k_x, (1, 3, 32, 32), jnp.float32)
    params = init_params(k_p)

    out = jax.jit(forward)(x, params)
    out = jax.block_until_ready(out)
    assert out.shape == (NOUT,) and out.dtype == jnp.float32
    print("KERNEL_OK")
</pallas_src>

<mosaic_0001>
module attributes {stable_mosaic.version = 11 : i64} {
  func.func @fused_forward_kernel(%arg0: memref<34x34x3xf32, #tpu.memory_space<vmem>>, %arg1: memref<9x3x32xf32, #tpu.memory_space<vmem>>, %arg2: memref<1x32xf32, #tpu.memory_space<vmem>>, %arg3: memref<9x32x10xf32, #tpu.memory_space<vmem>>, %arg4: memref<1x10xf32, #tpu.memory_space<vmem>>, %arg5: memref<10x128x64xbf16, #tpu.memory_space<vmem>>, %arg6: memref<128x1xf32, #tpu.memory_space<vmem>>, %arg7: memref<10x128xf32, #tpu.memory_space<vmem>>, %arg8: memref<10x1xf32, #tpu.memory_space<vmem>>, %arg9: memref<10x1xf32, #tpu.memory_space<vmem>>, %arg10: memref<18x32x32xf32, #tpu.memory_space<vmem>>, %arg11: memref<512x32xf32, #tpu.memory_space<vmem>>, %arg12: memref<128x10xf32, #tpu.memory_space<vmem>>) attributes {dimension_semantics = [], scalar_prefetch = 0 : i64, scratch_operands = 3 : i64, tpu.core_type = #tpu.core_type<tc>} {
    %c0 = arith.constant 0 : index
    %c0_0 = arith.constant 0 : index
    %c0_1 = arith.constant 0 : index
    %0 = vector.load %arg0[%c0, %c0_0, %c0_1] : memref<34x34x3xf32, #tpu.memory_space<vmem>>, vector<32x32x3xf32>
    %1 = vector.shape_cast %0 : vector<32x32x3xf32> to vector<1024x3xf32>
    %c0_2 = arith.constant 0 : index
    %c0_3 = arith.constant 0 : index
    %c0_4 = arith.constant 0 : index
    %2 = vector.load %arg1[%c0_2, %c0_3, %c0_4] : memref<9x3x32xf32, #tpu.memory_space<vmem>>, vector<1x3x32xf32>
    %3 = vector.shape_cast %2 : vector<1x3x32xf32> to vector<3x32xf32>
    %cst = arith.constant dense<0.000000e+00> : vector<1024x32xf32>
    %4 = tpu.matmul %1, %3, %cst {dimension_numbers = #tpu.dot_dimension_numbers<[1], [0], [0], [1], [0, 0, 1, 1], [], []>} : vector<1024x3xf32>, vector<3x32xf32>, vector<1024x32xf32> -> vector<1024x32xf32>
    %c0_5 = arith.constant 0 : index
    %c1 = arith.constant 1 : index
    %c0_6 = arith.constant 0 : index
    %5 = vector.load %arg0[%c0_5, %c1, %c0_6] : memref<34x34x3xf32, #tpu.memory_space<vmem>>, vector<32x32x3xf32>
    %6 = vector.shape_cast %5 : vector<32x32x3xf32> to vector<1024x3xf32>
    %c1_7 = arith.constant 1 : index
    %c0_8 = arith.constant 0 : index
    %c0_9 = arith.constant 0 : index
    %7 = vector.load %arg1[%c1_7, %c0_8, %c0_9] : memref<9x3x32xf32, #tpu.memory_space<vmem>>, vector<1x3x32xf32>
    %8 = vector.shape_cast %7 : vector<1x3x32xf32> to vector<3x32xf32>
    %cst_10 = arith.constant dense<0.000000e+00> : vector<1024x32xf32>
    %9 = tpu.matmul %6, %8, %cst_10 {dimension_numbers = #tpu.dot_dimension_numbers<[1], [0], [0], [1], [0, 0, 1, 1], [], []>} : vector<1024x3xf32>, vector<3x32xf32>, vector<1024x32xf32> -> vector<1024x32xf32>
    %10 = arith.addf %4, %9 : vector<1024x32xf32>
    %c0_11 = arith.constant 0 : index
    %c2 = arith.constant 2 : index
    %c0_12 = arith.constant 0 : index
    %11 = vector.load %arg0[%c0_11, %c2, %c0_12] : memref<34x34x3xf32, #tpu.memory_space<vmem>>, vector<32x32x3xf32>
    %12 = vector.shape_cast %11 : vector<32x32x3xf32> to vector<1024x3xf32>
    %c2_13 = arith.constant 2 : index
    %c0_14 = arith.constant 0 : index
    %c0_15 = arith.constant 0 : index
    %13 = vector.load %arg1[%c2_13, %c0_14, %c0_15] : memref<9x3x32xf32, #tpu.memory_space<vmem>>, vector<1x3x32xf32>
    %14 = vector.shape_cast %13 : vector<1x3x32xf32> to vector<3x32xf32>
    %cst_16 = arith.constant dense<0.000000e+00> : vector<1024x32xf32>
    %15 = tpu.matmul %12, %14, %cst_16 {dimension_numbers = #tpu.dot_dimension_numbers<[1], [0], [0], [1], [0, 0, 1, 1], [], []>} : vector<1024x3xf32>, vector<3x32xf32>, vector<1024x32xf32> -> vector<1024x32xf32>
    %16 = arith.addf %10, %15 : vector<1024x32xf32>
    %c1_17 = arith.constant 1 : index
    %c0_18 = arith.constant 0 : index
    %c0_19 = arith.constant 0 : index
    %17 = vector.load %arg0[%c1_17, %c0_18, %c0_19] : memref<34x34x3xf32, #tpu.memory_space<vmem>>, vector<32x32x3xf32>
    %18 = vector.shape_cast %17 : vector<32x32x3xf32> to vector<1024x3xf32>
    %c3 = arith.constant 3 : index
    %c0_20 = arith.constant 0 : index
    %c0_21 = arith.constant 0 : index
    %19 = vector.load %arg1[%c3, %c0_20, %c0_21] : memref<9x3x32xf32, #tpu.memory_space<vmem>>, vector<1x3x32xf32>
    %20 = vector.shape_cast %19 : vector<1x3x32xf32> to vector<3x32xf32>
    %cst_22 = arith.constant dense<0.000000e+00> : vector<1024x32xf32>
    %21 = tpu.matmul %18, %20, %cst_22 {dimension_numbers = #tpu.dot_dimension_numbers<[1], [0], [0], [1], [0, 0, 1, 1], [], []>} : vector<1024x3xf32>, vector<3x32xf32>, vector<1024x32xf32> -> vector<1024x32xf32>
    %22 = arith.addf %16, %21 : vector<1024x32xf32>
    %c1_23 = arith.constant 1 : index
    %c1_24 = arith.constant 1 : index
    %c0_25 = arith.constant 0 : index
    %23 = vector.load %arg0[%c1_23, %c1_24, %c0_25] : memref<34x34x3xf32, #tpu.memory_space<vmem>>, vector<32x32x3xf32>
    %24 = vector.shape_cast %23 : vector<32x32x3xf32> to vector<1024x3xf32>
    %c4 = arith.constant 4 : index
    %c0_26 = arith.constant 0 : index
    %c0_27 = arith.constant 0 : index
    %25 = vector.load %arg1[%c4, %c0_26, %c0_27] : memref<9x3x32xf32, #tpu.memory_space<vmem>>, vector<1x3x32xf32>
    %26 = vector.shape_cast %25 : vector<1x3x32xf32> to vector<3x32xf32>
    %cst_28 = arith.constant dense<0.000000e+00> : vector<1024x32xf32>
    %27 = tpu.matmul %24, %26, %cst_28 {dimension_numbers = #tpu.dot_dimension_numbers<[1], [0], [0], [1], [0, 0, 1, 1], [], []>} : vector<1024x3xf32>, vector<3x32xf32>, vector<1024x32xf32> -> vector<1024x32xf32>
    %28 = arith.addf %22, %27 : vector<1024x32xf32>
    %c1_29 = arith.constant 1 : index
    %c2_30 = arith.constant 2 : index
    %c0_31 = arith.constant 0 : index
    %29 = vector.load %arg0[%c1_29, %c2_30, %c0_31] : memref<34x34x3xf32, #tpu.memory_space<vmem>>, vector<32x32x3xf32>
    %30 = vector.shape_cast %29 : vector<32x32x3xf32> to vector<1024x3xf32>
    %c5 = arith.constant 5 : index
    %c0_32 = arith.constant 0 : index
    %c0_33 = arith.constant 0 : index
    %31 = vector.load %arg1[%c5, %c0_32, %c0_33] : memref<9x3x32xf32, #tpu.memory_space<vmem>>, vector<1x3x32xf32>
    %32 = vector.shape_cast %31 : vector<1x3x32xf32> to vector<3x32xf32>
    %cst_34 = arith.constant dense<0.000000e+00> : vector<1024x32xf32>
    %33 = tpu.matmul %30, %32, %cst_34 {dimension_numbers = #tpu.dot_dimension_numbers<[1], [0], [0], [1], [0, 0, 1, 1], [], []>} : vector<1024x3xf32>, vector<3x32xf32>, vector<1024x32xf32> -> vector<1024x32xf32>
    %34 = arith.addf %28, %33 : vector<1024x32xf32>
    %c2_35 = arith.constant 2 : index
    %c0_36 = arith.constant 0 : index
    %c0_37 = arith.constant 0 : index
    %35 = vector.load %arg0[%c2_35, %c0_36, %c0_37] : memref<34x34x3xf32, #tpu.memory_space<vmem>>, vector<32x32x3xf32>
    %36 = vector.shape_cast %35 : vector<32x32x3xf32> to vector<1024x3xf32>
    %c6 = arith.constant 6 : index
    %c0_38 = arith.constant 0 : index
    %c0_39 = arith.constant 0 : index
    %37 = vector.load %arg1[%c6, %c0_38, %c0_39] : memref<9x3x32xf32, #tpu.memory_space<vmem>>, vector<1x3x32xf32>
    %38 = vector.shape_cast %37 : vector<1x3x32xf32> to vector<3x32xf32>
    %cst_40 = arith.constant dense<0.000000e+00> : vector<1024x32xf32>
    %39 = tpu.matmul %36, %38, %cst_40 {dimension_numbers = #tpu.dot_dimension_numbers<[1], [0], [0], [1], [0, 0, 1, 1], [], []>} : vector<1024x3xf32>, vector<3x32xf32>, vector<1024x32xf32> -> vector<1024x32xf32>
    %40 = arith.addf %34, %39 : vector<1024x32xf32>
    %c2_41 = arith.constant 2 : index
    %c1_42 = arith.constant 1 : index
    %c0_43 = arith.constant 0 : index
    %41 = vector.load %arg0[%c2_41, %c1_42, %c0_43] : memref<34x34x3xf32, #tpu.memory_space<vmem>>, vector<32x32x3xf32>
    %42 = vector.shape_cast %41 : vector<32x32x3xf32> to vector<1024x3xf32>
    %c7 = arith.constant 7 : index
    %c0_44 = arith.constant 0 : index
    %c0_45 = arith.constant 0 : index
    %43 = vector.load %arg1[%c7, %c0_44, %c0_45] : memref<9x3x32xf32, #tpu.memory_space<vmem>>, vector<1x3x32xf32>
    %44 = vector.shape_cast %43 : vector<1x3x32xf32> to vector<3x32xf32>
    %cst_46 = arith.constant dense<0.000000e+00> : vector<1024x32xf32>
    %45 = tpu.matmul %42, %44, %cst_46 {dimension_numbers = #tpu.dot_dimension_numbers<[1], [0], [0], [1], [0, 0, 1, 1], [], []>} : vector<1024x3xf32>, vector<3x32xf32>, vector<1024x32xf32> -> vector<1024x32xf32>
    %46 = arith.addf %40, %45 : vector<1024x32xf32>
    %c2_47 = arith.constant 2 : index
    %c2_48 = arith.constant 2 : index
    %c0_49 = arith.constant 0 : index
    %47 = vector.load %arg0[%c2_47, %c2_48, %c0_49] : memref<34x34x3xf32, #tpu.memory_space<vmem>>, vector<32x32x3xf32>
    %48 = vector.shape_cast %47 : vector<32x32x3xf32> to vector<1024x3xf32>
    %c8 = arith.constant 8 : index
    %c0_50 = arith.constant 0 : index
    %c0_51 = arith.constant 0 : index
    %49 = vector.load %arg1[%c8, %c0_50, %c0_51] : memref<9x3x32xf32, #tpu.memory_space<vmem>>, vector<1x3x32xf32>
    %50 = vector.shape_cast %49 : vector<1x3x32xf32> to vector<3x32xf32>
    %cst_52 = arith.constant dense<0.000000e+00> : vector<1024x32xf32>
    %51 = tpu.matmul %48, %50, %cst_52 {dimension_numbers = #tpu.dot_dimension_numbers<[1], [0], [0], [1], [0, 0, 1, 1], [], []>} : vector<1024x3xf32>, vector<3x32xf32>, vector<1024x32xf32> -> vector<1024x32xf32>
    %52 = arith.addf %46, %51 : vector<1024x32xf32>
    %c0_53 = arith.constant 0 : index
    %c0_54 = arith.constant 0 : index
    %53 = vector.load %arg2[%c0_53, %c0_54] : memref<1x32xf32, #tpu.memory_space<vmem>>, vector<1x32xf32>
    %54 = vector.broadcast %53 : vector<1x32xf32> to vector<1024x32xf32>
    %55 = arith.addf %52, %54 : vector<1024x32xf32>
    %cst_55 = arith.constant 0.000000e+00 : f32
    %56 = vector.broadcast %cst_55 : f32 to vector<1024x32xf32>
    %57 = arith.maximumf %55, %56 : vector<1024x32xf32>
    %58 = vector.shape_cast %57 : vector<1024x32xf32> to vector<16x2x32x32xf32>
    %59 = vector.extract_strided_slice %58 {offsets = [0, 0, 0, 0], sizes = [16, 1, 32, 32], strides = [1, 1, 1, 1]} : vector<16x2x32x32xf32> to vector<16x1x32x32xf32>
    %60 = vector.shape_cast %59 : vector<16x1x32x32xf32> to vector<16x32x32xf32>
    %61 = vector.extract_strided_slice %58 {offsets = [0, 1, 0, 0], sizes = [16, 1, 32, 32], strides = [1, 1, 1, 1]} : vector<16x2x32x32xf32> to vector<16x1x32x32xf32>
    %62 = vector.shape_cast %61 : vector<16x1x32x32xf32> to vector<16x32x32xf32>
    %63 = arith.maximumf %60, %62 : vector<16x32x32xf32>
    %64 = vector.shape_cast %63 : vector<16x32x32xf32> to vector<512x32xf32>
    %c0_56 = arith.constant 0 : index
    %c0_57 = arith.constant 0 : index
    %65 = vector.load %arg11[%c0_56, %c0_57] : memref<512x32xf32, #tpu.memory_space<vmem>>, vector<512x32xf32>
    tpu.vector_store %arg11[%c0_56, %c0_57], %64 {strides = array<i32>} : memref<512x32xf32, #tpu.memory_space<vmem>>, vector<512x32xf32>,
    %c0_58 = arith.constant 0 : index
    %c0_59 = arith.constant 0 : index
    %66 = tpu.strided_load %arg11[%c0_58, %c0_59] {strides = array<i32: 2, 1>} : memref<512x32xf32, #tpu.memory_space<vmem>>, vector<256x32xf32>
    %c1_60 = arith.constant 1 : index
    %c0_61 = arith.constant 0 : index
    %67 = tpu.strided_load %arg11[%c1_60, %c0_61] {strides = array<i32: 2, 1>} : memref<512x32xf32, #tpu.memory_space<vmem>>, vector<256x32xf32>
    %68 = arith.maximumf %66, %67 : vector<256x32xf32>
    %cst_62 = arith.constant 0.000000e+00 : f32
    %69 = vector.broadcast %cst_62 : f32 to vector<18x32x32xf32>
    %c0_63 = arith.constant 0 : index
    %c0_64 = arith.constant 0 : index
    %c0_65 = arith.constant 0 : index
    %70 = vector.load %arg10[%c0_63, %c0_64, %c0_65] : memref<18x32x32xf32, #tpu.memory_space<vmem>>, vector<18x32x32xf32>
    tpu.vector_store %arg10[%c0_63, %c0_64, %c0_65], %69 {strides = array<i32>} : memref<18x32x32xf32, #tpu.memory_space<vmem>>, vector<18x32x32xf32>,
    %71 = vector.shape_cast %68 : vector<256x32xf32> to vector<16x16x32xf32>
    %c1_66 = arith.constant 1 : index
    %c8_67 = arith.constant 8 : index
    %c0_68 = arith.constant 0 : index
    %72 = vector.load %arg10[%c1_66, %c8_67, %c0_68] : memref<18x32x32xf32, #tpu.memory_space<vmem>>, vector<16x16x32xf32>
    tpu.vector_store %arg10[%c1_66, %c8_67, %c0_68], %71 {strides = array<i32>} : memref<18x32x32xf32, #tpu.memory_space<vmem>>, vector<16x16x32xf32>,
    %c0_69 = arith.constant 0 : index
    %c7_70 = arith.constant 7 : index
    %c0_71 = arith.constant 0 : index
    %73 = vector.load %arg10[%c0_69, %c7_70, %c0_71] : memref<18x32x32xf32, #tpu.memory_space<vmem>>, vector<16x16x32xf32>
    %74 = vector.shape_cast %73 : vector<16x16x32xf32> to vector<256x32xf32>
    %c0_72 = arith.constant 0 : index
    %c0_73 = arith.constant 0 : index
    %c0_74 = arith.constant 0 : index
    %75 = vector.load %arg3[%c0_72, %c0_73, %c0_74] : memref<9x32x10xf32, #tpu.memory_space<vmem>>, vector<1x32x10xf32>
    %76 = vector.shape_cast %75 : vector<1x32x10xf32> to vector<32x10xf32>
    %cst_75 = arith.constant dense<0.000000e+00> : vector<256x10xf32>
    %77 = tpu.matmul %74, %76, %cst_75 {dimension_numbers = #tpu.dot_dimension_numbers<[1], [0], [0], [1], [0, 0, 1, 1], [], []>} : vector<256x32xf32>, vector<32x10xf32>, vector<256x10xf32> -> vector<256x10xf32>
    %c0_76 = arith.constant 0 : index
    %c8_77 = arith.constant 8 : index
    %c0_78 = arith.constant 0 : index
    %78 = vector.load %arg10[%c0_76, %c8_77, %c0_78] : memref<18x32x32xf32, #tpu.memory_space<vmem>>, vector<16x16x32xf32>
    %79 = vector.shape_cast %78 : vector<16x16x32xf32> to vector<256x32xf32>
    %c1_79 = arith.constant 1 : index
    %c0_80 = arith.constant 0 : index
    %c0_81 = arith.constant 0 : index
    %80 = vector.load %arg3[%c1_79, %c0_80, %c0_81] : memref<9x32x10xf32, #tpu.memory_space<vmem>>, vector<1x32x10xf32>
    %81 = vector.shape_cast %80 : vector<1x32x10xf32> to vector<32x10xf32>
    %cst_82 = arith.constant dense<0.000000e+00> : vector<256x10xf32>
    %82 = tpu.matmul %79, %81, %cst_82 {dimension_numbers = #tpu.dot_dimension_numbers<[1], [0], [0], [1], [0, 0, 1, 1], [], []>} : vector<256x32xf32>, vector<32x10xf32>, vector<256x10xf32> -> vector<256x10xf32>
    %83 = arith.addf %77, %82 : vector<256x10xf32>
    %c0_83 = arith.constant 0 : index
    %c9 = arith.constant 9 : index
    %c0_84 = arith.constant 0 : index
    %84 = vector.load %arg10[%c0_83, %c9, %c0_84] : memref<18x32x32xf32, #tpu.memory_space<vmem>>, vector<16x16x32xf32>
    %85 = vector.shape_cast %84 : vector<16x16x32xf32> to vector<256x32xf32>
    %c2_85 = arith.constant 2 : index
    %c0_86 = arith.constant 0 : index
    %c0_87 = arith.constant 0 : index
    %86 = vector.load %arg3[%c2_85, %c0_86, %c0_87] : memref<9x32x10xf32, #tpu.memory_space<vmem>>, vector<1x32x10xf32>
    %87 = vector.shape_cast %86 : vector<1x32x10xf32> to vector<32x10xf32>
    %cst_88 = arith.constant dense<0.000000e+00> : vector<256x10xf32>
    %88 = tpu.matmul %85, %87, %cst_88 {dimension_numbers = #tpu.dot_dimension_numbers<[1], [0], [0], [1], [0, 0, 1, 1], [], []>} : vector<256x32xf32>, vector<32x10xf32>, vector<256x10xf32> -> vector<256x10xf32>
    %89 = arith.addf %83, %88 : vector<256x10xf32>
    %c1_89 = arith.constant 1 : index
    %c7_90 = arith.constant 7 : index
    %c0_91 = arith.constant 0 : index
    %90 = vector.load %arg10[%c1_89, %c7_90, %c0_91] : memref<18x32x32xf32, #tpu.memory_space<vmem>>, vector<16x16x32xf32>
    %91 = vector.shape_cast %90 : vector<16x16x32xf32> to vector<256x32xf32>
    %c3_92 = arith.constant 3 : index
    %c0_93 = arith.constant 0 : index
    %c0_94 = arith.constant 0 : index
    %92 = vector.load %arg3[%c3_92, %c0_93, %c0_94] : memref<9x32x10xf32, #tpu.memory_space<vmem>>, vector<1x32x10xf32>
    %93 = vector.shape_cast %92 : vector<1x32x10xf32> to vector<32x10xf32>
    %cst_95 = arith.constant dense<0.000000e+00> : vector<256x10xf32>
    %94 = tpu.matmul %91, %93, %cst_95 {dimension_numbers = #tpu.dot_dimension_numbers<[1], [0], [0], [1], [0, 0, 1, 1], [], []>} : vector<256x32xf32>, vector<32x10xf32>, vector<256x10xf32> -> vector<256x10xf32>
    %95 = arith.addf %89, %94 : vector<256x10xf32>
    %c1_96 = arith.constant 1 : index
    %c8_97 = arith.constant 8 : index
    %c0_98 = arith.constant 0 : index
    %96 = vector.load %arg10[%c1_96, %c8_97, %c0_98] : memref<18x32x32xf32, #tpu.memory_space<vmem>>, vector<16x16x32xf32>
    %97 = vector.shape_cast %96 : vector<16x16x32xf32> to vector<256x32xf32>
    %c4_99 = arith.constant 4 : index
    %c0_100 = arith.constant 0 : index
    %c0_101 = arith.constant 0 : index
    %98 = vector.load %arg3[%c4_99, %c0_100, %c0_101] : memref<9x32x10xf32, #tpu.memory_space<vmem>>, vector<1x32x10xf32>
    %99 = vector.shape_cast %98 : vector<1x32x10xf32> to vector<32x10xf32>
    %cst_102 = arith.constant dense<0.000000e+00> : vector<256x10xf32>
    %100 = tpu.matmul %97, %99, %cst_102 {dimension_numbers = #tpu.dot_dimension_numbers<[1], [0], [0], [1], [0, 0, 1, 1], [], []>} : vector<256x32xf32>, vector<32x10xf32>, vector<256x10xf32> -> vector<256x10xf32>
    %101 = arith.addf %95, %100 : vector<256x10xf32>
    %c1_103 = arith.constant 1 : index
    %c9_104 = arith.constant 9 : index
    %c0_105 = arith.constant 0 : index
    %102 = vector.load %arg10[%c1_103, %c9_104, %c0_105] : memref<18x32x32xf32, #tpu.memory_space<vmem>>, vector<16x16x32xf32>
    %103 = vector.shape_cast %102 : vector<16x16x32xf32> to vector<256x32xf32>
    %c5_106 = arith.constant 5 : index
    %c0_107 = arith.constant 0 : index
    %c0_108 = arith.constant 0 : index
    %104 = vector.load %arg3[%c5_106, %c0_107, %c0_108] : memref<9x32x10xf32, #tpu.memory_space<vmem>>, vector<1x32x10xf32>
    %105 = vector.shape_cast %104 : vector<1x32x10xf32> to vector<32x10xf32>
    %cst_109 = arith.constant dense<0.000000e+00> : vector<256x10xf32>
    %106 = tpu.matmul %103, %105, %cst_109 {dimension_numbers = #tpu.dot_dimension_numbers<[1], [0], [0], [1], [0, 0, 1, 1], [], []>} : vector<256x32xf32>, vector<32x10xf32>, vector<256x10xf32> -> vector<256x10xf32>
    %107 = arith.addf %101, %106 : vector<256x10xf32>
    %c2_110 = arith.constant 2 : index
    %c7_111 = arith.constant 7 : index
    %c0_112 = arith.constant 0 : index
    %108 = vector.load %arg10[%c2_110, %c7_111, %c0_112] : memref<18x32x32xf32, #tpu.memory_space<vmem>>, vector<16x16x32xf32>
    %109 = vector.shape_cast %108 : vector<16x16x32xf32> to vector<256x32xf32>
    %c6_113 = arith.constant 6 : index
    %c0_114 = arith.constant 0 : index
    %c0_115 = arith.constant 0 : index
    %110 = vector.load %arg3[%c6_113, %c0_114, %c0_115] : memref<9x32x10xf32, #tpu.memory_space<vmem>>, vector<1x32x10xf32>
    %111 = vector.shape_cast %110 : vector<1x32x10xf32> to vector<32x10xf32>
    %cst_116 = arith.constant dense<0.000000e+00> : vector<256x10xf32>
    %112 = tpu.matmul %109, %111, %cst_116 {dimension_numbers = #tpu.dot_dimension_numbers<[1], [0], [0], [1], [0, 0, 1, 1], [], []>} : vector<256x32xf32>, vector<32x10xf32>, vector<256x10xf32> -> vector<256x10xf32>
    %113 = arith.addf %107, %112 : vector<256x10xf32>
    %c2_117 = arith.constant 2 : index
    %c8_118 = arith.constant 8 : index
    %c0_119 = arith.constant 0 : index
    %114 = vector.load %arg10[%c2_117, %c8_118, %c0_119] : memref<18x32x32xf32, #tpu.memory_space<vmem>>, vector<16x16x32xf32>
    %115 = vector.shape_cast %114 : vector<16x16x32xf32> to vector<256x32xf32>
    %c7_120 = arith.constant 7 : index
    %c0_121 = arith.constant 0 : index
    %c0_122 = arith.constant 0 : index
    %116 = vector.load %arg3[%c7_120, %c0_121, %c0_122] : memref<9x32x10xf32, #tpu.memory_space<vmem>>, vector<1x32x10xf32>
    %117 = vector.shape_cast %116 : vector<1x32x10xf32> to vector<32x10xf32>
    %cst_123 = arith.constant dense<0.000000e+00> : vector<256x10xf32>
    %118 = tpu.matmul %115, %117, %cst_123 {dimension_numbers = #tpu.dot_dimension_numbers<[1], [0], [0], [1], [0, 0, 1, 1], [], []>} : vector<256x32xf32>, vector<32x10xf32>, vector<256x10xf32> -> vector<256x10xf32>
    %119 = arith.addf %113, %118 : vector<256x10xf32>
    %c2_124 = arith.constant 2 : index
    %c9_125 = arith.constant 9 : index
    %c0_126 = arith.constant 0 : index
    %120 = vector.load %arg10[%c2_124, %c9_125, %c0_126] : memref<18x32x32xf32, #tpu.memory_space<vmem>>, vector<16x16x32xf32>
    %121 = vector.shape_cast %120 : vector<16x16x32xf32> to vector<256x32xf32>
    %c8_127 = arith.constant 8 : index
    %c0_128 = arith.constant 0 : index
    %c0_129 = arith.constant 0 : index
    %122 = vector.load %arg3[%c8_127, %c0_128, %c0_129] : memref<9x32x10xf32, #tpu.memory_space<vmem>>, vector<1x32x10xf32>
    %123 = vector.shape_cast %122 : vector<1x32x10xf32> to vector<32x10xf32>
    %cst_130 = arith.constant dense<0.000000e+00> : vector<256x10xf32>
    %124 = tpu.matmul %121, %123, %cst_130 {dimension_numbers = #tpu.dot_dimension_numbers<[1], [0], [0], [1], [0, 0, 1, 1], [], []>} : vector<256x32xf32>, vector<32x10xf32>, vector<256x10xf32> -> vector<256x10xf32>
    %125 = arith.addf %119, %124 : vector<256x10xf32>
    %c0_131 = arith.constant 0 : index
    %c0_132 = arith.constant 0 : index
    %126 = vector.load %arg4[%c0_131, %c0_132] : memref<1x10xf32, #tpu.memory_space<vmem>>, vector<1x10xf32>
    %127 = vector.broadcast %126 : vector<1x10xf32> to vector<256x10xf32>
    %128 = arith.addf %125, %127 : vector<256x10xf32>
    %cst_133 = arith.constant 0.000000e+00 : f32
    %129 = vector.broadcast %cst_133 : f32 to vector<256x10xf32>
    %130 = arith.maximumf %128, %129 : vector<256x10xf32>
    %131 = vector.shape_cast %130 : vector<256x10xf32> to vector<8x2x16x10xf32>
    %132 = vector.extract_strided_slice %131 {offsets = [0, 0, 0, 0], sizes = [8, 1, 16, 10], strides = [1, 1, 1, 1]} : vector<8x2x16x10xf32> to vector<8x1x16x10xf32>
    %133 = vector.shape_cast %132 : vector<8x1x16x10xf32> to vector<8x16x10xf32>
    %134 = vector.extract_strided_slice %131 {offsets = [0, 1, 0, 0], sizes = [8, 1, 16, 10], strides = [1, 1, 1, 1]} : vector<8x2x16x10xf32> to vector<8x1x16x10xf32>
    %135 = vector.shape_cast %134 : vector<8x1x16x10xf32> to vector<8x16x10xf32>
    %136 = arith.maximumf %133, %135 : vector<8x16x10xf32>
    %137 = vector.shape_cast %136 : vector<8x16x10xf32> to vector<128x10xf32>
    %c0_134 = arith.constant 0 : index
    %c0_135 = arith.constant 0 : index
    %138 = vector.load %arg12[%c0_134, %c0_135] : memref<128x10xf32, #tpu.memory_space<vmem>>, vector<128x10xf32>
    tpu.vector_store %arg12[%c0_134, %c0_135], %137 {strides = array<i32>} : memref<128x10xf32, #tpu.memory_space<vmem>>, vector<128x10xf32>,
    %c0_136 = arith.constant 0 : index
    %c0_137 = arith.constant 0 : index
    %139 = tpu.strided_load %arg12[%c0_136, %c0_137] {strides = array<i32: 2, 1>} : memref<128x10xf32, #tpu.memory_space<vmem>>, vector<64x10xf32>
    %c1_138 = arith.constant 1 : index
    %c0_139 = arith.constant 0 : index
    %140 = tpu.strided_load %arg12[%c1_138, %c0_139] {strides = array<i32: 2, 1>} : memref<128x10xf32, #tpu.memory_space<vmem>>, vector<64x10xf32>
    %141 = arith.maximumf %139, %140 : vector<64x10xf32>
    %142 = arith.truncf %141 : vector<64x10xf32> to vector<64x10xbf16>
    %143 = vector.extract_strided_slice %142 {offsets = [0, 0], sizes = [64, 1], strides = [1, 1]} : vector<64x10xbf16> to vector<64x1xbf16>
    %c0_140 = arith.constant 0 : index
    %c0_141 = arith.constant 0 : index
    %c0_142 = arith.constant 0 : index
    %144 = vector.load %arg5[%c0_140, %c0_141, %c0_142] : memref<10x128x64xbf16, #tpu.memory_space<vmem>>, vector<1x128x64xbf16>
    %145 = vector.shape_cast %144 : vector<1x128x64xbf16> to vector<128x64xbf16>
    %cst_143 = arith.constant dense<0.000000e+00> : vector<128x1xf32>
    %146 = tpu.matmul %145, %143, %cst_143 {dimension_numbers = #tpu.dot_dimension_numbers<[1], [0], [0], [1], [0, 0, 1, 1], [], []>} : vector<128x64xbf16>, vector<64x1xbf16>, vector<128x1xf32> -> vector<128x1xf32>
    %147 = vector.extract_strided_slice %142 {offsets = [0, 1], sizes = [64, 1], strides = [1, 1]} : vector<64x10xbf16> to vector<64x1xbf16>
    %c1_144 = arith.constant 1 : index
    %c0_145 = arith.constant 0 : index
    %c0_146 = arith.constant 0 : index
    %148 = vector.load %arg5[%c1_144, %c0_145, %c0_146] : memref<10x128x64xbf16, #tpu.memory_space<vmem>>, vector<1x128x64xbf16>
    %149 = vector.shape_cast %148 : vector<1x128x64xbf16> to vector<128x64xbf16>
    %cst_147 = arith.constant dense<0.000000e+00> : vector<128x1xf32>
    %150 = tpu.matmul %149, %147, %cst_147 {dimension_numbers = #tpu.dot_dimension_numbers<[1], [0], [0], [1], [0, 0, 1, 1], [], []>} : vector<128x64xbf16>, vector<64x1xbf16>, vector<128x1xf32> -> vector<128x1xf32>
    %151 = arith.addf %146, %150 : vector<128x1xf32>
    %152 = vector.extract_strided_slice %142 {offsets = [0, 2], sizes = [64, 1], strides = [1, 1]} : vector<64x10xbf16> to vector<64x1xbf16>
    %c2_148 = arith.constant 2 : index
    %c0_149 = arith.constant 0 : index
    %c0_150 = arith.constant 0 : index
    %153 = vector.load %arg5[%c2_148, %c0_149, %c0_150] : memref<10x128x64xbf16, #tpu.memory_space<vmem>>, vector<1x128x64xbf16>
    %154 = vector.shape_cast %153 : vector<1x128x64xbf16> to vector<128x64xbf16>
    %cst_151 = arith.constant dense<0.000000e+00> : vector<128x1xf32>
    %155 = tpu.matmul %154, %152, %cst_151 {dimension_numbers = #tpu.dot_dimension_numbers<[1], [0], [0], [1], [0, 0, 1, 1], [], []>} : vector<128x64xbf16>, vector<64x1xbf16>, vector<128x1xf32> -> vector<128x1xf32>
    %156 = arith.addf %151, %155 : vector<128x1xf32>
    %157 = vector.extract_strided_slice %142 {offsets = [0, 3], sizes = [64, 1], strides = [1, 1]} : vector<64x10xbf16> to vector<64x1xbf16>
    %c3_152 = arith.constant 3 : index
    %c0_153 = arith.constant 0 : index
    %c0_154 = arith.constant 0 : index
    %158 = vector.load %arg5[%c3_152, %c0_153, %c0_154] : memref<10x128x64xbf16, #tpu.memory_space<vmem>>, vector<1x128x64xbf16>
    %159 = vector.shape_cast %158 : vector<1x128x64xbf16> to vector<128x64xbf16>
    %cst_155 = arith.constant dense<0.000000e+00> : vector<128x1xf32>
    %160 = tpu.matmul %159, %157, %cst_155 {dimension_numbers = #tpu.dot_dimension_numbers<[1], [0], [0], [1], [0, 0, 1, 1], [], []>} : vector<128x64xbf16>, vector<64x1xbf16>, vector<128x1xf32> -> vector<128x1xf32>
    %161 = arith.addf %156, %160 : vector<128x1xf32>
    %162 = vector.extract_strided_slice %142 {offsets = [0, 4], sizes = [64, 1], strides = [1, 1]} : vector<64x10xbf16> to vector<64x1xbf16>
    %c4_156 = arith.constant 4 : index
    %c0_157 = arith.constant 0 : index
    %c0_158 = arith.constant 0 : index
    %163 = vector.load %arg5[%c4_156, %c0_157, %c0_158] : memref<10x128x64xbf16, #tpu.memory_space<vmem>>, vector<1x128x64xbf16>
    %164 = vector.shape_cast %163 : vector<1x128x64xbf16> to vector<128x64xbf16>
    %cst_159 = arith.constant dense<0.000000e+00> : vector<128x1xf32>
    %165 = tpu.matmul %164, %162, %cst_159 {dimension_numbers = #tpu.dot_dimension_numbers<[1], [0], [0], [1], [0, 0, 1, 1], [], []>} : vector<128x64xbf16>, vector<64x1xbf16>, vector<128x1xf32> -> vector<128x1xf32>
    %166 = arith.addf %161, %165 : vector<128x1xf32>
    %167 = vector.extract_strided_slice %142 {offsets = [0, 5], sizes = [64, 1], strides = [1, 1]} : vector<64x10xbf16> to vector<64x1xbf16>
    %c5_160 = arith.constant 5 : index
    %c0_161 = arith.constant 0 : index
    %c0_162 = arith.constant 0 : index
    %168 = vector.load %arg5[%c5_160, %c0_161, %c0_162] : memref<10x128x64xbf16, #tpu.memory_space<vmem>>, vector<1x128x64xbf16>
    %169 = vector.shape_cast %168 : vector<1x128x64xbf16> to vector<128x64xbf16>
    %cst_163 = arith.constant dense<0.000000e+00> : vector<128x1xf32>
    %170 = tpu.matmul %169, %167, %cst_163 {dimension_numbers = #tpu.dot_dimension_numbers<[1], [0], [0], [1], [0, 0, 1, 1], [], []>} : vector<128x64xbf16>, vector<64x1xbf16>, vector<128x1xf32> -> vector<128x1xf32>
    %171 = arith.addf %166, %170 : vector<128x1xf32>
    %172 = vector.extract_strided_slice %142 {offsets = [0, 6], sizes = [64, 1], strides = [1, 1]} : vector<64x10xbf16> to vector<64x1xbf16>
    %c6_164 = arith.constant 6 : index
    %c0_165 = arith.constant 0 : index
    %c0_166 = arith.constant 0 : index
    %173 = vector.load %arg5[%c6_164, %c0_165, %c0_166] : memref<10x128x64xbf16, #tpu.memory_space<vmem>>, vector<1x128x64xbf16>
    %174 = vector.shape_cast %173 : vector<1x128x64xbf16> to vector<128x64xbf16>
    %cst_167 = arith.constant dense<0.000000e+00> : vector<128x1xf32>
    %175 = tpu.matmul %174, %172, %cst_167 {dimension_numbers = #tpu.dot_dimension_numbers<[1], [0], [0], [1], [0, 0, 1, 1], [], []>} : vector<128x64xbf16>, vector<64x1xbf16>, vector<128x1xf32> -> vector<128x1xf32>
    %176 = arith.addf %171, %175 : vector<128x1xf32>
    %177 = vector.extract_strided_slice %142 {offsets = [0, 7], sizes = [64, 1], strides = [1, 1]} : vector<64x10xbf16> to vector<64x1xbf16>
    %c7_168 = arith.constant 7 : index
    %c0_169 = arith.constant 0 : index
    %c0_170 = arith.constant 0 : index
    %178 = vector.load %arg5[%c7_168, %c0_169, %c0_170] : memref<10x128x64xbf16, #tpu.memory_space<vmem>>, vector<1x128x64xbf16>
    %179 = vector.shape_cast %178 : vector<1x128x64xbf16> to vector<128x64xbf16>
    %cst_171 = arith.constant dense<0.000000e+00> : vector<128x1xf32>
    %180 = tpu.matmul %179, %177, %cst_171 {dimension_numbers = #tpu.dot_dimension_numbers<[1], [0], [0], [1], [0, 0, 1, 1], [], []>} : vector<128x64xbf16>, vector<64x1xbf16>, vector<128x1xf32> -> vector<128x1xf32>
    %181 = arith.addf %176, %180 : vector<128x1xf32>
    %182 = vector.extract_strided_slice %142 {offsets = [0, 8], sizes = [64, 1], strides = [1, 1]} : vector<64x10xbf16> to vector<64x1xbf16>
    %c8_172 = arith.constant 8 : index
    %c0_173 = arith.constant 0 : index
    %c0_174 = arith.constant 0 : index
    %183 = vector.load %arg5[%c8_172, %c0_173, %c0_174] : memref<10x128x64xbf16, #tpu.memory_space<vmem>>, vector<1x128x64xbf16>
    %184 = vector.shape_cast %183 : vector<1x128x64xbf16> to vector<128x64xbf16>
    %cst_175 = arith.constant dense<0.000000e+00> : vector<128x1xf32>
    %185 = tpu.matmul %184, %182, %cst_175 {dimension_numbers = #tpu.dot_dimension_numbers<[1], [0], [0], [1], [0, 0, 1, 1], [], []>} : vector<128x64xbf16>, vector<64x1xbf16>, vector<128x1xf32> -> vector<128x1xf32>
    %186 = arith.addf %181, %185 : vector<128x1xf32>
    %187 = vector.extract_strided_slice %142 {offsets = [0, 9], sizes = [64, 1], strides = [1, 1]} : vector<64x10xbf16> to vector<64x1xbf16>
    %c9_176 = arith.constant 9 : index
    %c0_177 = arith.constant 0 : index
    %c0_178 = arith.constant 0 : index
    %188 = vector.load %arg5[%c9_176, %c0_177, %c0_178] : memref<10x128x64xbf16, #tpu.memory_space<vmem>>, vector<1x128x64xbf16>
    %189 = vector.shape_cast %188 : vector<1x128x64xbf16> to vector<128x64xbf16>
    %cst_179 = arith.constant dense<0.000000e+00> : vector<128x1xf32>
    %190 = tpu.matmul %189, %187, %cst_179 {dimension_numbers = #tpu.dot_dimension_numbers<[1], [0], [0], [1], [0, 0, 1, 1], [], []>} : vector<128x64xbf16>, vector<64x1xbf16>, vector<128x1xf32> -> vector<128x1xf32>
    %191 = arith.addf %186, %190 : vector<128x1xf32>
    %c0_180 = arith.constant 0 : index
    %c0_181 = arith.constant 0 : index
    %192 = vector.load %arg6[%c0_180, %c0_181] : memref<128x1xf32, #tpu.memory_space<vmem>>, vector<128x1xf32>
    %193 = arith.addf %191, %192 : vector<128x1xf32>
    %cst_182 = arith.constant 0.000000e+00 : f32
    %194 = vector.broadcast %cst_182 : f32 to vector<128x1xf32>
    %195 = arith.maximumf %193, %194 : vector<128x1xf32>
    %c0_183 = arith.constant 0 : index
    %c0_184 = arith.constant 0 : index
    %196 = vector.load %arg7[%c0_183, %c0_184] : memref<10x128xf32, #tpu.memory_space<vmem>>, vector<10x128xf32>
    %cst_185 = arith.constant dense<0.000000e+00> : vector<10x1xf32>
    %197 = tpu.matmul %196, %195, %cst_185 {dimension_numbers = #tpu.dot_dimension_numbers<[1], [0], [0], [1], [0, 0, 1, 1], [], []>} : vector<10x128xf32>, vector<128x1xf32>, vector<10x1xf32> -> vector<10x1xf32>
    %c0_186 = arith.constant 0 : index
    %c0_187 = arith.constant 0 : index
    %198 = vector.load %arg8[%c0_186, %c0_187] : memref<10x1xf32, #tpu.memory_space<vmem>>, vector<10x1xf32>
    %199 = arith.addf %197, %198 : vector<10x1xf32>
    %c0_188 = arith.constant 0 : index
    %c0_189 = arith.constant 0 : index
    %200 = vector.load %arg9[%c0_188, %c0_189] : memref<10x1xf32, #tpu.memory_space<vmem>>, vector<10x1xf32>
    tpu.vector_store %arg9[%c0_188, %c0_189], %199 {strides = array<i32>} : memref<10x1xf32, #tpu.memory_space<vmem>>, vector<10x1xf32>,
    return
  }
}

</mosaic_0001>

<bundles_post_ra>
// kernel: forward.1
= control target key start
LH: loop header
LB: loop body
LE: loop exit
PB: predicated region body
PF: predicated region fallthrough
CT: control target
= control target key end

     0   :  { %vm677_vm0 = vcmask 1042432   ;;  %vm292_vm1 = vcmask 23552   ;;  %vm12257_vm2 = vcmask 261120   ;;  %vm16119_vm3 = vcmask 80896   ;;  %s26669_s17 = smov 126   ;;  %s26670_s18 = smov 125   ;;  %s33244_s1 = inlined_call_operand.vmem [shape: f32[9,3,32], index: 1, kind: input, shape index: {}]   ;;  %s33245_s0 = inlined_call_operand.vmem [shape: f32[34,34,3], index: 0, kind: input, shape index: {}]   ;;  %s33246_s3 = inlined_call_operand.vmem [shape: f32[9,32,10], index: 3, kind: input, shape index: {}]   ;;  %s33247_s2 = inlined_call_operand.vmem [shape: f32[1,32], index: 2, kind: input, shape index: {}]   ;;  %s33248_s4 = inlined_call_operand.vmem [shape: f32[1,10], index: 4, kind: input, shape index: {}]   ;;  %s33249_s5 = inlined_call_operand.vmem [shape: bf16[10,128,64], index: 5, kind: input, shape index: {}]   ;;  %s33250_s7 = inlined_call_operand.vmem [shape: f32[10,128], index: 7, kind: input, shape index: {}]   ;;  %s33251_s6 = inlined_call_operand.vmem [shape: f32[128,1], index: 6, kind: input, shape index: {}]   ;;  %s33252_s8 = inlined_call_operand.vmem [shape: f32[10,1], index: 8, kind: input, shape index: {}]   ;;  %s33253_s9 = inlined_call_operand.vmem [shape: f32[10,1], index: 9, kind: output, shape index: {}]  }
   0x1   :  { %v18593_v0 = vld [vmem:[%s33244_s1 + $0x8] sm:$0x7]  ;;  %v2480_v3 = vld [vmem:[%s33245_s0 + $0x12] sm:$0xff]  ;;  %v18851_v4 = vld [vmem:[%s33244_s1 + $0xc] sm:$0x7]  ;;  %vm16268_vm4 = vcmask 523264  }
   0x2   :  { %v2478_v1 = vld [vmem:[%s33245_s0 + $0x2] sm:$0xff]  ;;  %v2479_v2 = vld [vmem:[%s33245_s0 + $0xa] sm:$0xff]  ;;  %22908 = vmatprep.subr.msk.mxu0 %vm677_vm0, %v18593_v0  ;;  %v2481_v5 = vld [vmem:[%s33245_s0 + $0x1a] sm:$0xff]  ;;  %s26671_s21 = smov 124   ;;  %s26673_s22 = smov 122   ;;  %vm18328_vm5 = vcmask 1024  }
   0x3   :  { %22910 = vmatprep.mubr.msk.f32.mxu0 %vm292_vm1, %v2478_v1  ;;  %22909 = vmatpush3.msk.msra.mxu0 %vm677_vm0, %v18593_v0  ;;  %v2482_v6 = vld [vmem:[%s33245_s0 + $0x2a] sm:$0xff]  ;;  %v2483_v7 = vld [vmem:[%s33245_s0 + $0x32] sm:$0xff]  ;;  %v2484_v8 = vld [vmem:[%s33245_s0 + $0x3a] sm:$0xff]  ;;  %s26674_s23 = smov 121   ;;  %s26675_s24 = smov 120   ;;  %vm18326_vm6 = vcmask 7168  }
   0x4   :  { %22911 = vmatmul.mubr.msk.f32.vlgmr.msra.gmra.mrb[0].mxu0 %vm292_vm1, %v2479_v2  ;;  %23102 = vmatprep.subr.msk.mxu0 %vm677_vm0, %v18851_v4  ;;  %v2485_v9 = vld [vmem:[%s33245_s0 + $0x42] sm:$0xff]  ;;  %v2486_v10 = vld [vmem:[%s33245_s0 + $0x52] sm:$0xff]  ;;  %v2487_v12 = vld [vmem:[%s33245_s0 + $0x5a] sm:$0xff]  ;;  %s26676_s25 = smov 119  }
   0x5   :  { %22913 = vmatprep.mubr.msk.f32.mxu0 %vm292_vm1, %v2480_v3  ;;  %23103 = vmatpush3.msk.msra.mxu0 %vm677_vm0, %v18851_v4  ;;  %v19109_v11 = vld [vmem:[%s33244_s1 + $0x10] sm:$0x7]  ;;  %v2488_v13 = vld [vmem:[%s33245_s0 + $0x62] sm:$0xff]  ;;  %v2490_v15 = vld [vmem:[%s33245_s0 + $0x7a] sm:$0xff] }
   0x6   :  { %23296 = vmatprep.subr.msk.mxu0 %vm677_vm0, %v19109_v11  ;;  %v2489_v14 = vld [vmem:[%s33245_s0 + $0x6a] sm:$0xff]  ;;  %v2491_v16 = vld [vmem:[%s33245_s0 + $0x82] sm:$0xff]  ;;  %v2493_v18 = vld [vmem:[%s33245_s0 + $0x92] sm:$0xff] }
   0x7   :  { %v2492_v17 = vld [vmem:[%s33245_s0 + $0x8a] sm:$0xff]  ;;  %v2494_v19 = vld [vmem:[%s33245_s0 + $0xa2] sm:$0xff]  ;;  %v2496_v21 = vld [vmem:[%s33245_s0 + $0xb2] sm:$0xff] }
   0x8   :  { %22914 = vmatmul.mubr.msk.f32.gmra.mrb[2].mxu0 %vm292_vm1, %v2481_v5  ;;  %v2495_v20 = vld [vmem:[%s33245_s0 + $0xaa] sm:$0xff]  ;;  %v2497_v22 = vld [vmem:[%s33245_s0 + $0xba] sm:$0xff]  ;;  %v2499_v24 = vld [vmem:[%s33245_s0 + $0xd2] sm:$0xff] }
   0x9   :  { %22916 = vmatprep.mubr.msk.f32.mxu0 %vm292_vm1, %v2482_v6  ;;  %v2498_v23 = vld [vmem:[%s33245_s0 + $0xca] sm:$0xff]  ;;  %v2500_v25 = vld [vmem:[%s33245_s0 + $0xda] sm:$0xff]  ;;  %v2501_v26 = vld [vmem:[%s33245_s0 + $0xe2] sm:$0xff] }
   0xa   :  { %v2502_v27 = vld [vmem:[%s33245_s0 + $0xf2] sm:$0xff]  ;;  %v2503_v28 = vld [vmem:[%s33245_s0 + $0xfa] sm:$0xff]  ;;  %v2504_v29 = vld [vmem:[%s33245_s0 + $0x102] sm:$0xff] }
   0xb   :  { %v2505_v30 = vld [vmem:[%s33245_s0 + $0x10a] sm:$0xff]  ;;  %v2506_v31 = vld [vmem:[%s33245_s0 + $0x11a] sm:$0xff]  ;;  %v2507_v32 = vld [vmem:[%s33245_s0 + $0x122] sm:$0xff] }
   0xc   :  { %22917 = vmatmul.mubr.msk.f32.gmra.mrb[4].mxu0 %vm292_vm1, %v2483_v7  ;;  %v2508_v33 = vld [vmem:[%s33245_s0 + $0x12a] sm:$0xff]  ;;  %v2509_v34 = vld [vmem:[%s33245_s0 + $0x132] sm:$0xff]  ;;  %v2510_v35 = vld [vmem:[%s33245_s0 + $0x142] sm:$0xff] }
   0xd   :  { %22919 = vmatprep.mubr.msk.f32.mxu0 %vm292_vm1, %v2484_v8  ;;  %v2511_v36 = vld [vmem:[%s33245_s0 + $0x14a] sm:$0xff]  ;;  %v18725_v39 = vld [vmem:[%s33245_s0 + $0x38] sm:$0xff]  ;;  %v18726_v40 = vld [vmem:[%s33245_s0 + $0x40] sm:$0xff] }
   0xe   :  { %v18723_v37 = vld [vmem:[%s33245_s0 + $0x28] sm:$0xff]  ;;  %v18724_v38 = vld [vmem:[%s33245_s0 + $0x30] sm:$0xff]  ;;  %v18728_v42 = vld [vmem:[%s33245_s0 + $0x58] sm:$0xff] }
   0xf   :  { %v18727_v41 = vld [vmem:[%s33245_s0 + $0x50] sm:$0xff]  ;;  %v18729_v43 = vld [vmem:[%s33245_s0 + $0x60] sm:$0xff]  ;;  %v18730_v44 = vld [vmem:[%s33245_s0 + $0x68] sm:$0xff] }
  0x10   :  { %22920 = vmatmul.mubr.msk.f32.gmra.mrb[6].mxu0 %vm292_vm1, %v2485_v9  ;;  %v18731_v45 = vld [vmem:[%s33245_s0 + $0x78] sm:$0xff]  ;;  %v18732_v46 = vld [vmem:[%s33245_s0 + $0x80] sm:$0xff]  ;;  %v18733_v47 = vld [vmem:[%s33245_s0 + $0x88] sm:$0xff] }
  0x11   :  { %22922 = vmatprep.mubr.msk.f32.mxu0 %vm292_vm1, %v2486_v10  ;;  %v18734_v48 = vld [vmem:[%s33245_s0 + $0x90] sm:$0xff]  ;;  %v18735_v49 = vld [vmem:[%s33245_s0 + $0xa0] sm:$0xff]  ;;  %v18736_v50 = vld [vmem:[%s33245_s0 + $0xa8] sm:$0xff] }
  0x12   :  { %v18737_v51 = vld [vmem:[%s33245_s0 + $0xb0] sm:$0xff]  ;;  %v18738_v52 = vld [vmem:[%s33245_s0 + $0xb8] sm:$0xff]  ;;  %v18739_v53 = vld [vmem:[%s33245_s0 + $0xc8] sm:$0xff] }
  0x13   :  { %v18740_v54 = vld [vmem:[%s33245_s0 + $0xd0] sm:$0xff]  ;;  %v18741_v55 = vld [vmem:[%s33245_s0 + $0xd8] sm:$0xff]  ;;  %v18742_v56 = vld [vmem:[%s33245_s0 + $0xe0] sm:$0xff] }
  0x14   :  { %22923 = vmatmul.mubr.msk.f32.gmra.mrb[8].mxu0 %vm292_vm1, %v2487_v12  ;;  %v18743_v57 = vld [vmem:[%s33245_s0 + $0xf0] sm:$0xff]  ;;  %v18744_v58 = vld [vmem:[%s33245_s0 + $0xf8] sm:$0xff]  ;;  %v18745_v59 = vld [vmem:[%s33245_s0 + $0x100] sm:$0xff] }
  0x15   :  { %22925 = vmatprep.mubr.msk.f32.mxu0 %vm292_vm1, %v2488_v13  ;;  %v18746_v60 = vld [vmem:[%s33245_s0 + $0x108] sm:$0xff]  ;;  %v18747_v61 = vld [vmem:[%s33245_s0 + $0x118] sm:$0xff]  ;;  %v18748_v62 = vld [vmem:[%s33245_s0 + $0x120] sm:$0xff] }
  0x16   :  { %v18749_v63 = vld [vmem:[%s33245_s0 + $0x128] sm:$0xff]  ;;  %v18750_v0 = vld [vmem:[%s33245_s0 + $0x130] sm:$0xff]  ;;  %v18751_v1 = vld [vmem:[%s33245_s0 + $0x140] sm:$0xff] }
  0x17   :  { %v18752_v2 = vld [vmem:[%s33245_s0 + $0x148] sm:$0xff]  ;;  %v18753_v3 = vld [vmem:[%s33245_s0 + $0x150] sm:$0xff]  ;;  %v18754_v4 = vld [vmem:[%s33245_s0 + $0x158] sm:$0xff] }
  0x18   :  { %22926 = vmatmul.mubr.msk.f32.gmra.mrb[10].mxu0 %vm292_vm1, %v2489_v14  ;;  %v18755_v5 = vld [vmem:[%s33245_s0 + $0x168] sm:$0xff]  ;;  %v18756_v6 = vld [vmem:[%s33245_s0 + $0x170] sm:$0xff]  ;;  %v18757_v7 = vld [vmem:[%s33245_s0 + $0x178] sm:$0xff] }
  0x19   :  { %22928 = vmatprep.mubr.msk.f32.mxu0 %vm292_vm1, %v2490_v15  ;;  %v18758_v8 = vld [vmem:[%s33245_s0 + $0x180] sm:$0xff]  ;;  %v18759_v9 = vld [vmem:[%s33245_s0 + $0x190] sm:$0xff]  ;;  %v18760_v10 = vld [vmem:[%s33245_s0 + $0x198] sm:$0xff] }
  0x1a   :  { %v18762_v12 = vld [vmem:[%s33245_s0 + $0x1a8] sm:$0xff]  ;;  %v18763_v13 = vld [vmem:[%s33245_s0 + $0x1b8] sm:$0xff]  ;;  %v18764_v14 = vld [vmem:[%s33245_s0 + $0x1c0] sm:$0xff] }
  0x1b   :  { %v18765_v15 = vld [vmem:[%s33245_s0 + $0x1c8] sm:$0xff] }
  0x1c   :  { %22929 = vmatmul.mubr.msk.f32.gmra.mrb[12].mxu0 %vm292_vm1, %v2491_v16  ;;  %v18766_v16 = vld [vmem:[%s33245_s0 + $0x1d0] sm:$0xff] }
  0x1d   :  { %22931 = vmatprep.mubr.msk.f32.mxu0 %vm292_vm1, %v2492_v17  ;;  %v18767_v17 = vld [vmem:[%s33245_s0 + $0x1e0] sm:$0xff] }
  0x20   :  { %22932 = vmatmul.mubr.msk.f32.gmra.mrb[14].mxu0 %vm292_vm1, %v2493_v18  ;;  %v18768_v18 = vld [vmem:[%s33245_s0 + $0x1e8] sm:$0xff] }
  0x21   :  { %22934 = vmatprep.mubr.msk.f32.mxu0 %vm292_vm1, %v2494_v19  ;;  %v18769_v19 = vld [vmem:[%s33245_s0 + $0x1f0] sm:$0xff] }
  0x24   :  { %22935 = vmatmul.mubr.msk.f32.gmra.mrb[16].mxu0 %vm292_vm1, %v2495_v20  ;;  %v18770_v20 = vld [vmem:[%s33245_s0 + $0x1f8] sm:$0xff] }
  0x25   :  { %22937 = vmatprep.mubr.msk.f32.mxu0 %vm292_vm1, %v2496_v21  ;;  %v18771_v21 = vld [vmem:[%s33245_s0 + $0x208] sm:$0xff] }
  0x28   :  { %22938 = vmatmul.mubr.msk.f32.gmra.mrb[18].mxu0 %vm292_vm1, %v2497_v22  ;;  %v18772_v22 = vld [vmem:[%s33245_s0 + $0x210] sm:$0xff] }
  0x29   :  { %22940 = vmatprep.mubr.msk.f32.mxu0 %vm292_vm1, %v2498_v23  ;;  %v18773_v23 = vld [vmem:[%s33245_s0 + $0x218] sm:$0xff] }
  0x2c   :  { %22941 = vmatmul.mubr.msk.f32.gmra.mrb[20].mxu0 %vm292_vm1, %v2499_v24  ;;  %v18774_v24 = vld [vmem:[%s33245_s0 + $0x220] sm:$0xff] }
  0x2d   :  { %22943 = vmatprep.mubr.msk.f32.mxu0 %vm292_vm1, %v2500_v25  ;;  %v18775_v25 = vld [vmem:[%s33245_s0 + $0x230] sm:$0xff] }
  0x30   :  { %22944 = vmatmul.mubr.msk.f32.gmra.mrb[22].mxu0 %vm292_vm1, %v2501_v26  ;;  %v18776_v26 = vld [vmem:[%s33245_s0 + $0x238] sm:$0xff] }
  0x31   :  { %22946 = vmatprep.mubr.msk.f32.mxu0 %vm292_vm1, %v2502_v27  ;;  %v18777_v27 = vld [vmem:[%s33245_s0 + $0x240] sm:$0xff] }
  0x34   :  { %22947 = vmatmul.mubr.msk.f32.gmra.mrb[24].mxu0 %vm292_vm1, %v2503_v28  ;;  %v18778_v28 = vld [vmem:[%s33245_s0 + $0x248] sm:$0xff] }
  0x35   :  { %22949 = vmatprep.mubr.msk.f32.mxu0 %vm292_vm1, %v2504_v29  ;;  %v18779_v29 = vld [vmem:[%s33245_s0 + $0x258] sm:$0xff] }
  0x38   :  { %22950 = vmatmul.mubr.msk.f32.gmra.mrb[26].mxu0 %vm292_vm1, %v2505_v30  ;;  %v18780_v30 = vld [vmem:[%s33245_s0 + $0x260] sm:$0xff] }
  0x39   :  { %22952 = vmatprep.mubr.msk.f32.mxu0 %vm292_vm1, %v2506_v31  ;;  %v18781_v31 = vld [vmem:[%s33245_s0 + $0x268] sm:$0xff] }
  0x3c   :  { %22953 = vmatmul.mubr.msk.f32.gmra.mrb[28].mxu0 %vm292_vm1, %v2507_v32  ;;  %v18782_v32 = vld [vmem:[%s33245_s0 + $0x270] sm:$0xff] }
  0x3d   :  { %22955 = vmatprep.mubr.msk.f32.mxu0 %vm292_vm1, %v2508_v33  ;;  %v18783_v33 = vld [vmem:[%s33245_s0 + $0x280] sm:$0xff] }
  0x40   :  { %22956 = vmatmul.mubr.msk.f32.gmra.mrb[30].mxu0 %vm292_vm1, %v2509_v34  ;;  %v18784_v34 = vld [vmem:[%s33245_s0 + $0x288] sm:$0xff] }
  0x41   :  { %22958 = vmatprep.mubr.msk.f32.mxu0 %vm292_vm1, %v2510_v35  ;;  %v18785_v35 = vld [vmem:[%s33245_s0 + $0x290] sm:$0xff] }
  0x44   :  { %22959 = vmatmul.mubr.msk.f32.gmra.mrb[32].mxu0 %vm292_vm1, %v2511_v36  ;;  %v18786_v36 = vld [vmem:[%s33245_s0 + $0x298] sm:$0xff] }
  0x45   :  { %23104 = vmatprep.mubr.msk.f32.mxu0 %vm292_vm1, %v18723_v37  ;;  %v18787_v37 = vld [vmem:[%s33245_s0 + $0x2a8] sm:$0xff] }
  0x48   :  { %23105 = vmatmul.mubr.msk.f32.vlgmr.msra.gmra.mrb[0].mxu0 %vm292_vm1, %v18724_v38  ;;  %v18788_v38 = vld [vmem:[%s33245_s0 + $0x2b0] sm:$0xff] }
  0x49   :  { %23107 = vmatprep.mubr.msk.f32.mxu0 %vm292_vm1, %v18725_v39  ;;  %23297 = vmatpush3.msk.msra.mxu0 %vm677_vm0, %v19109_v11  ;;  %v18761_v11 = vld [vmem:[%s33245_s0 + $0x1a0] sm:$0xff]  ;;  %v18789_v39 = vld [vmem:[%s33245_s0 + $0x2b8] sm:$0xff] }
  0x4c   :  { %23108 = vmatmul.mubr.msk.f32.gmra.mrb[2].mxu0 %vm292_vm1, %v18726_v40  ;;  %v18790_v40 = vld [vmem:[%s33245_s0 + $0x2c0] sm:$0xff] }
  0x4d   :  { %23110 = vmatprep.mubr.msk.f32.mxu0 %vm292_vm1, %v18727_v41  ;;  %v18791_v41 = vld [vmem:[%s33245_s0 + $0x2d0] sm:$0xff] }
  0x50   :  { %23111 = vmatmul.mubr.msk.f32.gmra.mrb[4].mxu0 %vm292_vm1, %v18728_v42  ;;  %v18792_v42 = vld [vmem:[%s33245_s0 + $0x2d8] sm:$0xff] }
  0x51   :  { %23113 = vmatprep.mubr.msk.f32.mxu0 %vm292_vm1, %v18729_v43  ;;  %v18793_v43 = vld [vmem:[%s33245_s0 + $0x2e0] sm:$0xff] }
  0x54   :  { %23114 = vmatmul.mubr.msk.f32.gmra.mrb[6].mxu0 %vm292_vm1, %v18730_v44  ;;  %v18794_v44 = vld [vmem:[%s33245_s0 + $0x2e8] sm:$0xff] }
  0x55   :  { %23116 = vmatprep.mubr.msk.f32.mxu0 %vm292_vm1, %v18731_v45  ;;  %v18795_v45 = vld [vmem:[%s33245_s0 + $0x2f8] sm:$0xff] }
  0x58   :  { %23117 = vmatmul.mubr.msk.f32.gmra.mrb[8].mxu0 %vm292_vm1, %v18732_v46  ;;  %v27172_v46 = vld [vmem:[%s33244_s1 + $0x14] sm:$0x7] }
  0x59   :  { %23119 = vmatprep.mubr.msk.f32.mxu0 %vm292_vm1, %v18733_v47  ;;  %v18796_v47 = vld [vmem:[%s33245_s0 + $0x300] sm:$0xff]  ;;  %23490 = vmatprep.subr.msk.mxu0 %vm677_vm0, %v27172_v46 }
  0x5c   :  { %23120 = vmatmul.mubr.msk.f32.gmra.mrb[10].mxu0 %vm292_vm1, %v18734_v48  ;;  %v18797_v48 = vld [vmem:[%s33245_s0 + $0x308] sm:$0xff] }
  0x5d   :  { %23122 = vmatprep.mubr.msk.f32.mxu0 %vm292_vm1, %v18735_v49  ;;  %v18798_v49 = vld [vmem:[%s33245_s0 + $0x310] sm:$0xff] }
  0x60   :  { %23123 = vmatmul.mubr.msk.f32.gmra.mrb[12].mxu0 %vm292_vm1, %v18736_v50  ;;  %v18799_v50 = vld [vmem:[%s33245_s0 + $0x320] sm:$0xff] }
  0x61   :  { %23125 = vmatprep.mubr.msk.f32.mxu0 %vm292_vm1, %v18737_v51  ;;  %v18800_v51 = vld [vmem:[%s33245_s0 + $0x328] sm:$0xff] }
  0x64   :  { %23126 = vmatmul.mubr.msk.f32.gmra.mrb[14].mxu0 %vm292_vm1, %v18738_v52  ;;  %v18801_v52 = vld [vmem:[%s33245_s0 + $0x330] sm:$0xff] }
  0x65   :  { %23128 = vmatprep.mubr.msk.f32.mxu0 %vm292_vm1, %v18739_v53  ;;  %v18802_v53 = vld [vmem:[%s33245_s0 + $0x338] sm:$0xff] }
  0x68   :  { %23129 = vmatmul.mubr.msk.f32.gmra.mrb[16].mxu0 %vm292_vm1, %v18740_v54  ;;  %v18803_v54 = vld [vmem:[%s33245_s0 + $0x348] sm:$0xff] }
  0x69   :  { %23131 = vmatprep.mubr.msk.f32.mxu0 %vm292_vm1, %v18741_v55  ;;  %v18804_v55 = vld [vmem:[%s33245_s0 + $0x350] sm:$0xff] }
  0x6c   :  { %23132 = vmatmul.mubr.msk.f32.gmra.mrb[18].mxu0 %vm292_vm1, %v18742_v56  ;;  %v18805_v56 = vld [vmem:[%s33245_s0 + $0x358] sm:$0xff] }
  0x6d   :  { %23134 = vmatprep.mubr.msk.f32.mxu0 %vm292_vm1, %v18743_v57  ;;  %v18806_v57 = vld [vmem:[%s33245_s0 + $0x360] sm:$0xff] }
  0x70   :  { %23135 = vmatmul.mubr.msk.f32.gmra.mrb[20].mxu0 %vm292_vm1, %v18744_v58  ;;  %v18807_v58 = vld [vmem:[%s33245_s0 + $0x370] sm:$0xff] }
  0x71   :  { %23137 = vmatprep.mubr.msk.f32.mxu0 %vm292_vm1, %v18745_v59  ;;  %v18808_v59 = vld [vmem:[%s33245_s0 + $0x378] sm:$0xff] }
  0x74   :  { %23138 = vmatmul.mubr.msk.f32.gmra.mrb[22].mxu0 %vm292_vm1, %v18746_v60  ;;  %v18809_v60 = vld [vmem:[%s33245_s0 + $0x380] sm:$0xff] }
  0x75   :  { %23140 = vmatprep.mubr.msk.f32.mxu0 %vm292_vm1, %v18747_v61  ;;  %v18810_v61 = vld [vmem:[%s33245_s0 + $0x388] sm:$0xff] }
  0x78   :  { %23141 = vmatmul.mubr.msk.f32.gmra.mrb[24].mxu0 %vm292_vm1, %v18748_v62  ;;  %v18811_v62 = vld [vmem:[%s33245_s0 + $0x398] sm:$0xff] }
  0x79   :  { %23143 = vmatprep.mubr.msk.f32.mxu0 %vm292_vm1, %v18749_v63  ;;  %v18812_v63 = vld [vmem:[%s33245_s0 + $0x3a0] sm:$0xff] }
  0x7c   :  { %23144 = vmatmul.mubr.msk.f32.gmra.mrb[26].mxu0 %vm292_vm1, %v18750_v0  ;;  %v18813_v0 = vld [vmem:[%s33245_s0 + $0x3a8] sm:$0xff] }
  0x7d   :  { %23146 = vmatprep.mubr.msk.f32.mxu0 %vm292_vm1, %v18751_v1  ;;  %v18814_v1 = vld [vmem:[%s33245_s0 + $0x3b0] sm:$0xff] }
  0x80   :  { %23147 = vmatmul.mubr.msk.f32.gmra.mrb[28].mxu0 %vm292_vm1, %v18752_v2  ;;  %v18815_v2 = vld [vmem:[%s33245_s0 + $0x3c0] sm:$0xff] }
  0x81   :  { %23149 = vmatprep.mubr.msk.f32.mxu0 %vm292_vm1, %v18753_v3  ;;  %v18816_v3 = vld [vmem:[%s33245_s0 + $0x3c8] sm:$0xff] }
  0x84   :  { %23150 = vmatmul.mubr.msk.f32.gmra.mrb[30].mxu0 %vm292_vm1, %v18754_v4  ;;  %v18817_v4 = vld [vmem:[%s33245_s0 + $0x3d0] sm:$0xff] }
  0x85   :  { %23152 = vmatprep.mubr.msk.f32.mxu0 %vm292_vm1, %v18755_v5  ;;  %v18818_v5 = vld [vmem:[%s33245_s0 + $0x3d8] sm:$0xff] }
  0x88   :  { %23153 = vmatmul.mubr.msk.f32.gmra.mrb[32].mxu0 %vm292_vm1, %v18756_v6  ;;  %v18819_v6 = vld [vmem:[%s33245_s0 + $0x3e8] sm:$0xff] }
  0x89   :  { %23155 = vmatprep.mubr.msk.f32.mxu0 %vm292_vm1, %v18757_v7  ;;  %v18820_v7 = vld [vmem:[%s33245_s0 + $0x3f0] sm:$0xff] }
  0x8c   :  { %23156 = vmatmul.mubr.msk.f32.gmra.mrb[34].mxu0 %vm292_vm1, %v18758_v8  ;;  %v18821_v8 = vld [vmem:[%s33245_s0 + $0x3f8] sm:$0xff] }
  0x8d   :  { %23158 = vmatprep.mubr.msk.f32.mxu0 %vm292_vm1, %v18759_v9  ;;  %v18822_v9 = vld [vmem:[%s33245_s0 + $0x400] sm:$0xff] }
  0x90   :  { %23159 = vmatmul.mubr.msk.f32.gmra.mrb[36].mxu0 %vm292_vm1, %v18760_v10  ;;  %v18823_v10 = vld [vmem:[%s33245_s0 + $0x410] sm:$0xff] }
  0x91   :  { %23161 = vmatprep.mubr.msk.f32.mxu0 %vm292_vm1, %v18761_v11  ;;  %v18824_v11 = vld [vmem:[%s33245_s0 + $0x418] sm:$0xff] }
  0x94   :  { %23162 = vmatmul.mubr.msk.f32.gmra.mrb[38].mxu0 %vm292_vm1, %v18762_v12  ;;  %v18825_v12 = vld [vmem:[%s33245_s0 + $0x420] sm:$0xff] }
  0x95   :  { %23164 = vmatprep.mubr.msk.f32.mxu0 %vm292_vm1, %v18763_v13  ;;  %v18826_v13 = vld [vmem:[%s33245_s0 + $0x428] sm:$0xff] }
  0x98   :  { %23165 = vmatmul.mubr.msk.f32.gmra.mrb[40].mxu0 %vm292_vm1, %v18764_v14  ;;  %v18827_v14 = vld [vmem:[%s33245_s0 + $0x438] sm:$0xff] }
  0x99   :  { %23167 = vmatprep.mubr.msk.f32.mxu0 %vm292_vm1, %v18765_v15  ;;  %v18828_v15 = vld [vmem:[%s33245_s0 + $0x440] sm:$0xff] }
  0x9c   :  { %23168 = vmatmul.mubr.msk.f32.gmra.mrb[42].mxu0 %vm292_vm1, %v18766_v16  ;;  %v18829_v16 = vld [vmem:[%s33245_s0 + $0x448] sm:$0xff] }
  0x9d   :  { %23170 = vmatprep.mubr.msk.f32.mxu0 %vm292_vm1, %v18767_v17  ;;  %v18830_v17 = vld [vmem:[%s33245_s0 + $0x450] sm:$0xff] }
  0xa0   :  { %23171 = vmatmul.mubr.msk.f32.gmra.mrb[44].mxu0 %vm292_vm1, %v18768_v18  ;;  %v18831_v18 = vld [vmem:[%s33245_s0 + $0x460] sm:$0xff] }
  0xa1   :  { %23173 = vmatprep.mubr.msk.f32.mxu0 %vm292_vm1, %v18769_v19  ;;  %v18832_v19 = vld [vmem:[%s33245_s0 + $0x468] sm:$0xff] }
  0xa4   :  { %23174 = vmatmul.mubr.msk.f32.gmra.mrb[46].mxu0 %vm292_vm1, %v18770_v20  ;;  %v18833_v20 = vld [vmem:[%s33245_s0 + $0x470] sm:$0xff] }
  0xa5   :  { %23176 = vmatprep.mubr.msk.f32.mxu0 %vm292_vm1, %v18771_v21  ;;  %v18834_v21 = vld [vmem:[%s33245_s0 + $0x478] sm:$0xff] }
  0xa8   :  { %23177 = vmatmul.mubr.msk.f32.gmra.mrb[48].mxu0 %vm292_vm1, %v18772_v22  ;;  %v18835_v22 = vld [vmem:[%s33245_s0 + $0x488] sm:$0xff] }
  0xa9   :  { %23179 = vmatprep.mubr.msk.f32.mxu0 %vm292_vm1, %v18773_v23  ;;  %v18836_v23 = vld [vmem:[%s33245_s0 + $0x490] sm:$0xff] }
  0xac   :  { %23180 = vmatmul.mubr.msk.f32.gmra.mrb[50].mxu0 %vm292_vm1, %v18774_v24  ;;  %v18837_v24 = vld [vmem:[%s33245_s0 + $0x498] sm:$0xff] }
  0xad   :  { %23182 = vmatprep.mubr.msk.f32.mxu0 %vm292_vm1, %v18775_v25  ;;  %v18838_v25 = vld [vmem:[%s33245_s0 + $0x4a0] sm:$0xff] }
  0xb0   :  { %23183 = vmatmul.mubr.msk.f32.gmra.mrb[52].mxu0 %vm292_vm1, %v18776_v26  ;;  %v18839_v26 = vld [vmem:[%s33245_s0 + $0x4b0] sm:$0xff] }
  0xb1   :  { %23185 = vmatprep.mubr.msk.f32.mxu0 %vm292_vm1, %v18777_v27  ;;  %v18840_v27 = vld [vmem:[%s33245_s0 + $0x4b8] sm:$0xff] }
  0xb4   :  { %23186 = vmatmul.mubr.msk.f32.gmra.mrb[54].mxu0 %vm292_vm1, %v18778_v28  ;;  %v18841_v28 = vld [vmem:[%s33245_s0 + $0x4c0] sm:$0xff] }
  0xb5   :  { %23188 = vmatprep.mubr.msk.f32.mxu0 %vm292_vm1, %v18779_v29  ;;  %v18842_v29 = vld [vmem:[%s33245_s0 + $0x4c8] sm:$0xff] }
  0xb8   :  { %23189 = vmatmul.mubr.msk.f32.gmra.mrb[56].mxu0 %vm292_vm1, %v18780_v30  ;;  %v18843_v30 = vld [vmem:[%s33245_s0 + $0x4d8] sm:$0xff] }
  0xb9   :  { %23191 = vmatprep.mubr.msk.f32.mxu0 %vm292_vm1, %v18781_v31  ;;  %v18844_v31 = vld [vmem:[%s33245_s0 + $0x4e0] sm:$0xff] }
  0xbc   :  { %23192 = vmatmul.mubr.msk.f32.gmra.mrb[58].mxu0 %vm292_vm1, %v18782_v32  ;;  %v18845_v32 = vld [vmem:[%s33245_s0 + $0x4e8] sm:$0xff] }
  0xbd   :  { %23194 = vmatprep.mubr.msk.f32.mxu0 %vm292_vm1, %v18783_v33  ;;  %v18846_v33 = vld [vmem:[%s33245_s0 + $0x4f0] sm:$0xff] }
  0xc0   :  { %23195 = vmatmul.mubr.msk.f32.gmra.mrb[60].mxu0 %vm292_vm1, %v18784_v34  ;;  %v18847_v34 = vld [vmem:[%s33245_s0 + $0x500] sm:$0xff] }
  0xc1   :  { %23197 = vmatprep.mubr.msk.f32.mxu0 %vm292_vm1, %v18785_v35  ;;  %v18848_v35 = vld [vmem:[%s33245_s0 + $0x508] sm:$0xff] }
  0xc4   :  { %23198 = vmatmul.mubr.msk.f32.gmra.mrb[62].mxu0 %vm292_vm1, %v18786_v36  ;;  %v18849_v36 = vld [vmem:[%s33245_s0 + $0x510] sm:$0xff] }
  0xc5   :  { %23200 = vmatprep.mubr.msk.f32.mxu0 %vm292_vm1, %v18787_v37  ;;  %v18850_v37 = vld [vmem:[%s33245_s0 + $0x518] sm:$0xff] }
  0xc8   :  { %23201 = vmatmul.mubr.msk.f32.gmra.mrb[64].mxu0 %vm292_vm1, %v18788_v38  ;;  %v18981_v38 = vld [vmem:[%s33245_s0 + $0x29] sm:$0xff] }
  0xc9   :  { %23203 = vmatprep.mubr.msk.f32.mxu0 %vm292_vm1, %v18789_v39  ;;  %v18982_v39 = vld [vmem:[%s33245_s0 + $0x31] sm:$0xff] }
  0xcc   :  { %23204 = vmatmul.mubr.msk.f32.gmra.mrb[66].mxu0 %vm292_vm1, %v18790_v40  ;;  %v18983_v40 = vld [vmem:[%s33245_s0 + $0x39] sm:$0xff] }
  0xcd   :  { %23206 = vmatprep.mubr.msk.f32.mxu0 %vm292_vm1, %v18791_v41  ;;  %v18984_v41 = vld [vmem:[%s33245_s0 + $0x41] sm:$0xff] }
  0xd0   :  { %23207 = vmatmul.mubr.msk.f32.gmra.mrb[68].mxu0 %vm292_vm1, %v18792_v42  ;;  %v18985_v42 = vld [vmem:[%s33245_s0 + $0x51] sm:$0xff] }
  0xd1   :  { %23209 = vmatprep.mubr.msk.f32.mxu0 %vm292_vm1, %v18793_v43  ;;  %v18334_v43 = vld [vmem:[%s33244_s1 + $0x4] sm:$0x7] }
  0xd2   :  { %22520 = vmatprep.subr.msk.mxu1 %vm677_vm0, %v18334_v43 }
  0xd3   :  { %22521 = vmatpush3.msk.msra.mxu1 %vm677_vm0, %v18334_v43  ;;  %v19045_v43 = vld [vmem:[%s33245_s0 + $0x2a9] sm:$0xff] }
  0xd4   :  { %23210 = vmatmul.mubr.msk.f32.gmra.mrb[70].mxu0 %vm292_vm1, %v18794_v44  ;;  %v162_v44 = vld [vmem:[%s33245_s0 + $0x1] sm:$0xff] }
  0xd5   :  { %23212 = vmatprep.mubr.msk.f32.mxu0 %vm292_vm1, %v18795_v45  ;;  %v163_v45 = vld [vmem:[%s33245_s0 + $0x9] sm:$0xff]  ;;  %22522 = vmatprep.mubr.msk.f32.mxu1 %vm292_vm1, %v162_v44  ;;  %v19046_v44 = vld [vmem:[%s33245_s0 + $0x2b1] sm:$0xff] }
  0xd6   :  { %22523 = vmatmul.mubr.msk.f32.vlgmr.msra.gmra.mrb[0].mxu1 %vm292_vm1, %v163_v45  ;;  %v19047_v45 = vld [vmem:[%s33245_s0 + $0x2b9] sm:$0xff] }
  0xd8   :  { %23213 = vmatmul.mubr.msk.f32.gmra.mrb[72].mxu0 %vm292_vm1, %v18796_v47  ;;  %v18987_v47 = vld [vmem:[%s33245_s0 + $0x61] sm:$0xff] }
  0xd9   :  { %23215 = vmatprep.mubr.msk.f32.mxu0 %vm292_vm1, %v18797_v48  ;;  %v164_v48 = vld [vmem:[%s33245_s0 + $0x11] sm:$0xff] }
  0xda   :  { %22525 = vmatprep.mubr.msk.f32.mxu1 %vm292_vm1, %v164_v48  ;;  %v19050_v48 = vld [vmem:[%s33245_s0 + $0x2d9] sm:$0xff] }
  0xdc   :  { %23216 = vmatmul.mubr.msk.f32.gmra.mrb[74].mxu0 %vm292_vm1, %v18798_v49  ;;  %v165_v49 = vld [vmem:[%s33245_s0 + $0x19] sm:$0xff] }
  0xdd   :  { %23218 = vmatprep.mubr.msk.f32.mxu0 %vm292_vm1, %v18799_v50  ;;  %v18988_v50 = vld [vmem:[%s33245_s0 + $0x69] sm:$0xff]  ;;  %22526 = vmatmul.mubr.msk.f32.gmra.mrb[2].mxu1 %vm292_vm1, %v165_v49  ;;  %v19051_v49 = vld [vmem:[%s33245_s0 + $0x2e1] sm:$0xff] }
  0xde   :  { %22528 = vmatprep.mubr.msk.f32.mxu1 %vm292_vm1, %v18981_v38 }
  0xe0   :  { %23219 = vmatmul.mubr.msk.f32.gmra.mrb[76].mxu0 %vm292_vm1, %v18800_v51  ;;  %v18989_v51 = vld [vmem:[%s33245_s0 + $0x79] sm:$0xff] }
  0xe1   :  { %23221 = vmatprep.mubr.msk.f32.mxu0 %vm292_vm1, %v18801_v52  ;;  %v18990_v52 = vld [vmem:[%s33245_s0 + $0x81] sm:$0xff]  ;;  %22529 = vmatmul.mubr.msk.f32.gmra.mrb[4].mxu1 %vm292_vm1, %v18982_v39 }
  0xe2   :  { %22531 = vmatprep.mubr.msk.f32.mxu1 %vm292_vm1, %v18983_v40 }
  0xe4   :  { %23222 = vmatmul.mubr.msk.f32.gmra.mrb[78].mxu0 %vm292_vm1, %v18802_v53  ;;  %v18991_v53 = vld [vmem:[%s33245_s0 + $0x89] sm:$0xff] }
  0xe5   :  { %23224 = vmatprep.mubr.msk.f32.mxu0 %vm292_vm1, %v18803_v54  ;;  %v18992_v54 = vld [vmem:[%s33245_s0 + $0x91] sm:$0xff]  ;;  %22532 = vmatmul.mubr.msk.f32.gmra.mrb[6].mxu1 %vm292_vm1, %v18984_v41 }
  0xe6   :  { %22534 = vmatprep.mubr.msk.f32.mxu1 %vm292_vm1, %v18985_v42 }
  0xe8   :  { %23225 = vmatmul.mubr.msk.f32.gmra.mrb[80].mxu0 %vm292_vm1, %v18804_v55  ;;  %v18993_v55 = vld [vmem:[%s33245_s0 + $0xa1] sm:$0xff] }
  0xe9   :  { %23227 = vmatprep.mubr.msk.f32.mxu0 %vm292_vm1, %v18805_v56  ;;  %v18994_v56 = vld [vmem:[%s33245_s0 + $0xa9] sm:$0xff] }
  0xec   :  { %23228 = vmatmul.mubr.msk.f32.gmra.mrb[82].mxu0 %vm292_vm1, %v18806_v57  ;;  %v18995_v57 = vld [vmem:[%s33245_s0 + $0xb1] sm:$0xff] }
  0xed   :  { %23230 = vmatprep.mubr.msk.f32.mxu0 %vm292_vm1, %v18807_v58  ;;  %v18996_v58 = vld [vmem:[%s33245_s0 + $0xb9] sm:$0xff] }
  0xf0   :  { %23231 = vmatmul.mubr.msk.f32.gmra.mrb[84].mxu0 %vm292_vm1, %v18808_v59  ;;  %v18997_v59 = vld [vmem:[%s33245_s0 + $0xc9] sm:$0xff] }
  0xf1   :  { %23233 = vmatprep.mubr.msk.f32.mxu0 %vm292_vm1, %v18809_v60  ;;  %v18998_v60 = vld [vmem:[%s33245_s0 + $0xd1] sm:$0xff] }
  0xf4   :  { %23234 = vmatmul.mubr.msk.f32.gmra.mrb[86].mxu0 %vm292_vm1, %v18810_v61  ;;  %v18999_v61 = vld [vmem:[%s33245_s0 + $0xd9] sm:$0xff] }
  0xf5   :  { %23236 = vmatprep.mubr.msk.f32.mxu0 %vm292_vm1, %v18811_v62  ;;  %v19000_v62 = vld [vmem:[%s33245_s0 + $0xe1] sm:$0xff] }
  0xf8   :  { %23237 = vmatmul.mubr.msk.f32.gmra.mrb[88].mxu0 %vm292_vm1, %v18812_v63  ;;  %v19001_v63 = vld [vmem:[%s33245_s0 + $0xf1] sm:$0xff] }
  0xf9   :  { %23239 = vmatprep.mubr.msk.f32.mxu0 %vm292_vm1, %v18813_v0  ;;  %v19002_v0 = vld [vmem:[%s33245_s0 + $0xf9] sm:$0xff] }
  0xfc   :  { %23240 = vmatmul.mubr.msk.f32.gmra.mrb[90].mxu0 %vm292_vm1, %v18814_v1  ;;  %v19003_v1 = vld [vmem:[%s33245_s0 + $0x101] sm:$0xff] }
  0xfd   :  { %23242 = vmatprep.mubr.msk.f32.mxu0 %vm292_vm1, %v18815_v2  ;;  %v19004_v2 = vld [vmem:[%s33245_s0 + $0x109] sm:$0xff] }
 0x100   :  { %23243 = vmatmul.mubr.msk.f32.gmra.mrb[92].mxu0 %vm292_vm1, %v18816_v3  ;;  %v19005_v3 = vld [vmem:[%s33245_s0 + $0x119] sm:$0xff] }
 0x101   :  { %23245 = vmatprep.mubr.msk.f32.mxu0 %vm292_vm1, %v18817_v4  ;;  %v19006_v4 = vld [vmem:[%s33245_s0 + $0x121] sm:$0xff] }
 0x104   :  { %23246 = vmatmul.mubr.msk.f32.gmra.mrb[94].mxu0 %vm292_vm1, %v18818_v5  ;;  %v19007_v5 = vld [vmem:[%s33245_s0 + $0x129] sm:$0xff] }
 0x105   :  { %23248 = vmatprep.mubr.msk.f32.mxu0 %vm292_vm1, %v18819_v6  ;;  %v19008_v6 = vld [vmem:[%s33245_s0 + $0x131] sm:$0xff] }
 0x108   :  { %23249 = vmatmul.mubr.msk.f32.gmra.mrb[96].mxu0 %vm292_vm1, %v18820_v7  ;;  %v19009_v7 = vld [vmem:[%s33245_s0 + $0x141] sm:$0xff] }
 0x109   :  { %23251 = vmatprep.mubr.msk.f32.mxu0 %vm292_vm1, %v18821_v8  ;;  %v19010_v8 = vld [vmem:[%s33245_s0 + $0x149] sm:$0xff] }
 0x10c   :  { %23252 = vmatmul.mubr.msk.f32.gmra.mrb[98].mxu0 %vm292_vm1, %v18822_v9  ;;  %v19011_v9 = vld [vmem:[%s33245_s0 + $0x151] sm:$0xff] }
 0x10d   :  { %23254 = vmatprep.mubr.msk.f32.mxu0 %vm292_vm1, %v18823_v10  ;;  %v19012_v10 = vld [vmem:[%s33245_s0 + $0x159] sm:$0xff] }
 0x110   :  { %23255 = vmatmul.mubr.msk.f32.gmra.mrb[100].mxu0 %vm292_vm1, %v18824_v11  ;;  %v19013_v11 = vld [vmem:[%s33245_s0 + $0x169] sm:$0xff] }
 0x111   :  { %23257 = vmatprep.mubr.msk.f32.mxu0 %vm292_vm1, %v18825_v12  ;;  %v19014_v12 = vld [vmem:[%s33245_s0 + $0x171] sm:$0xff] }
 0x114   :  { %23258 = vmatmul.mubr.msk.f32.gmra.mrb[102].mxu0 %vm292_vm1, %v18826_v13  ;;  %v19015_v13 = vld [vmem:[%s33245_s0 + $0x179] sm:$0xff] }
 0x115   :  { %23260 = vmatprep.mubr.msk.f32.mxu0 %vm292_vm1, %v18827_v14  ;;  %v19016_v14 = vld [vmem:[%s33245_s0 + $0x181] sm:$0xff] }
 0x118   :  { %23261 = vmatmul.mubr.msk.f32.gmra.mrb[104].mxu0 %vm292_vm1, %v18828_v15  ;;  %v19017_v15 = vld [vmem:[%s33245_s0 + $0x191] sm:$0xff] }
 0x119   :  { %23263 = vmatprep.mubr.msk.f32.mxu0 %vm292_vm1, %v18829_v16  ;;  %v19018_v16 = vld [vmem:[%s33245_s0 + $0x199] sm:$0xff] }
 0x11c   :  { %23264 = vmatmul.mubr.msk.f32.gmra.mrb[106].mxu0 %vm292_vm1, %v18830_v17  ;;  %v19019_v17 = vld [vmem:[%s33245_s0 + $0x1a1] sm:$0xff] }
 0x11d   :  { %23266 = vmatprep.mubr.msk.f32.mxu0 %vm292_vm1, %v18831_v18  ;;  %v19020_v18 = vld [vmem:[%s33245_s0 + $0x1a9] sm:$0xff] }
 0x120   :  { %23267 = vmatmul.mubr.msk.f32.gmra.mrb[108].mxu0 %vm292_vm1, %v18832_v19  ;;  %v19021_v19 = vld [vmem:[%s33245_s0 + $0x1b9] sm:$0xff] }
 0x121   :  { %23269 = vmatprep.mubr.msk.f32.mxu0 %vm292_vm1, %v18833_v20  ;;  %v19022_v20 = vld [vmem:[%s33245_s0 + $0x1c1] sm:$0xff] }
 0x124   :  { %23270 = vmatmul.mubr.msk.f32.gmra.mrb[110].mxu0 %vm292_vm1, %v18834_v21  ;;  %v19023_v21 = vld [vmem:[%s33245_s0 + $0x1c9] sm:$0xff] }
 0x125   :  { %23272 = vmatprep.mubr.msk.f32.mxu0 %vm292_vm1, %v18835_v22  ;;  %v19024_v22 = vld [vmem:[%s33245_s0 + $0x1d1] sm:$0xff] }
 0x128   :  { %23273 = vmatmul.mubr.msk.f32.gmra.mrb[112].mxu0 %vm292_vm1, %v18836_v23  ;;  %v19025_v23 = vld [vmem:[%s33245_s0 + $0x1e1] sm:$0xff] }
 0x129   :  { %23275 = vmatprep.mubr.msk.f32.mxu0 %vm292_vm1, %v18837_v24  ;;  %v19026_v24 = vld [vmem:[%s33245_s0 + $0x1e9] sm:$0xff] }
 0x12c   :  { %23276 = vmatmul.mubr.msk.f32.gmra.mrb[114].mxu0 %vm292_vm1, %v18838_v25  ;;  %v19027_v25 = vld [vmem:[%s33245_s0 + $0x1f1] sm:$0xff] }
 0x12d   :  { %23278 = vmatprep.mubr.msk.f32.mxu0 %vm292_vm1, %v18839_v26  ;;  %v19028_v26 = vld [vmem:[%s33245_s0 + $0x1f9] sm:$0xff] }
 0x130   :  { %23279 = vmatmul.mubr.msk.f32.gmra.mrb[116].mxu0 %vm292_vm1, %v18840_v27  ;;  %v19029_v27 = vld [vmem:[%s33245_s0 + $0x209] sm:$0xff] }
 0x131   :  { %23281 = vmatprep.mubr.msk.f32.mxu0 %vm292_vm1, %v18841_v28  ;;  %v19030_v28 = vld [vmem:[%s33245_s0 + $0x211] sm:$0xff] }
 0x134   :  { %23282 = vmatmul.mubr.msk.f32.gmra.mrb[118].mxu0 %vm292_vm1, %v18842_v29  ;;  %v19031_v29 = vld [vmem:[%s33245_s0 + $0x219] sm:$0xff] }
 0x135   :  { %23284 = vmatprep.mubr.msk.f32.mxu0 %vm292_vm1, %v18843_v30  ;;  %v19032_v30 = vld [vmem:[%s33245_s0 + $0x221] sm:$0xff] }
 0x138   :  { %23285 = vmatmul.mubr.msk.f32.gmra.mrb[120].mxu0 %vm292_vm1, %v18844_v31  ;;  %v19033_v31 = vld [vmem:[%s33245_s0 + $0x231] sm:$0xff] }
 0x139   :  { %23287 = vmatprep.mubr.msk.f32.mxu0 %vm292_vm1, %v18845_v32  ;;  %v19034_v32 = vld [vmem:[%s33245_s0 + $0x239] sm:$0xff] }
 0x13c   :  { %23288 = vmatmul.mubr.msk.f32.gmra.mrb[122].mxu0 %vm292_vm1, %v18846_v33  ;;  %v19035_v33 = vld [vmem:[%s33245_s0 + $0x241] sm:$0xff] }
 0x13d   :  { %23290 = vmatprep.mubr.msk.f32.mxu0 %vm292_vm1, %v18847_v34  ;;  %v19036_v34 = vld [vmem:[%s33245_s0 + $0x249] sm:$0xff] }
 0x140   :  { %23291 = vmatmul.mubr.msk.f32.gmra.mrb[124].mxu0 %vm292_vm1, %v18848_v35  ;;  %v19037_v35 = vld [vmem:[%s33245_s0 + $0x259] sm:$0xff] }
 0x141   :  { %23293 = vmatprep.mubr.msk.f32.mxu0 %vm292_vm1, %v18849_v36  ;;  %v19038_v36 = vld [vmem:[%s33245_s0 + $0x261] sm:$0xff] }
 0x144   :  { %23294 = vmatmul.mubr.msk.f32.gmra.mrb[126].mxu0 %vm292_vm1, %v18850_v37  ;;  %v19039_v37 = vld [vmem:[%s33245_s0 + $0x269] sm:$0xff] }
 0x145   :  { %23298 = vmatprep.mubr.msk.f32.mxu0 %vm292_vm1, %v18981_v38  ;;  %v19040_v38 = vld [vmem:[%s33245_s0 + $0x271] sm:$0xff] }
 0x148   :  { %23299 = vmatmul.mubr.msk.f32.vlgmr.msra.gmra.mrb[0].mxu0 %vm292_vm1, %v18982_v39  ;;  %v19041_v39 = vld [vmem:[%s33245_s0 + $0x281] sm:$0xff] }
 0x149   :  { %23301 = vmatprep.mubr.msk.f32.mxu0 %vm292_vm1, %v18983_v40  ;;  %23491 = vmatpush3.msk.msra.mxu0 %vm677_vm0, %v27172_v46  ;;  %v18986_v46 = vld [vmem:[%s33245_s0 + $0x59] sm:$0xff]  ;;  %v19042_v40 = vld [vmem:[%s33245_s0 + $0x289] sm:$0xff] }
 0x14a   :  { %22535 = vmatmul.mubr.msk.f32.gmra.mrb[8].mxu1 %vm292_vm1, %v18986_v46 }
 0x14b   :  { %22537 = vmatprep.mubr.msk.f32.mxu1 %vm292_vm1, %v18987_v47 }
 0x14c   :  { %23302 = vmatmul.mubr.msk.f32.gmra.mrb[2].mxu0 %vm292_vm1, %v18984_v41  ;;  %v19043_v41 = vld [vmem:[%s33245_s0 + $0x291] sm:$0xff] }
 0x14d   :  { %23304 = vmatprep.mubr.msk.f32.mxu0 %vm292_vm1, %v18985_v42  ;;  %v19044_v42 = vld [vmem:[%s33245_s0 + $0x299] sm:$0xff] }
 0x14e   :  { %22538 = vmatmul.mubr.msk.f32.gmra.mrb[10].mxu1 %vm292_vm1, %v18988_v50 }
 0x14f   :  { %22540 = vmatprep.mubr.msk.f32.mxu1 %vm292_vm1, %v18989_v51 }
 0x150   :  { %23305 = vmatmul.mubr.msk.f32.gmra.mrb[4].mxu0 %vm292_vm1, %v18986_v46  ;;  %v19048_v46 = vld [vmem:[%s33245_s0 + $0x2c1] sm:$0xff] }
 0x151   :  { %23307 = vmatprep.mubr.msk.f32.mxu0 %vm292_vm1, %v18987_v47  ;;  %v19049_v47 = vld [vmem:[%s33245_s0 + $0x2d1] sm:$0xff] }
 0x152   :  { %22541 = vmatmul.mubr.msk.f32.gmra.mrb[12].mxu1 %vm292_vm1, %v18990_v52 }
 0x153   :  { %22543 = vmatprep.mubr.msk.f32.mxu1 %vm292_vm1, %v18991_v53 }
 0x154   :  { %23308 = vmatmul.mubr.msk.f32.gmra.mrb[6].mxu0 %vm292_vm1, %v18988_v50  ;;  %v19052_v50 = vld [vmem:[%s33245_s0 + $0x2e9] sm:$0xff] }
 0x155   :  { %23310 = vmatprep.mubr.msk.f32.mxu0 %vm292_vm1, %v18989_v51  ;;  %v19053_v51 = vld [vmem:[%s33245_s0 + $0x2f9] sm:$0xff] }
 0x156   :  { %22544 = vmatmul.mubr.msk.f32.gmra.mrb[14].mxu1 %vm292_vm1, %v18992_v54 }
 0x157   :  { %22546 = vmatprep.mubr.msk.f32.mxu1 %vm292_vm1, %v18993_v55 }
 0x158   :  { %23311 = vmatmul.mubr.msk.f32.gmra.mrb[8].mxu0 %vm292_vm1, %v18990_v52  ;;  %v27778_v52 = vld [vmem:[%s33244_s1 + $0x18] sm:$0x7] }
 0x159   :  { %23313 = vmatprep.mubr.msk.f32.mxu0 %vm292_vm1, %v18991_v53  ;;  %v19054_v53 = vld [vmem:[%s33245_s0 + $0x301] sm:$0xff]  ;;  %23684 = vmatprep.subr.msk.mxu0 %vm677_vm0, %v27778_v52 }
 0x15a   :  { %22547 = vmatmul.mubr.msk.f32.gmra.mrb[16].mxu1 %vm292_vm1, %v18994_v56 }
 0x15b   :  { %22549 = vmatprep.mubr.msk.f32.mxu1 %vm292_vm1, %v18995_v57 }
 0x15c   :  { %23314 = vmatmul.mubr.msk.f32.gmra.mrb[10].mxu0 %vm292_vm1, %v18992_v54  ;;  %v19055_v54 = vld [vmem:[%s33245_s0 + $0x309] sm:$0xff] }
 0x15d   :  { %23316 = vmatprep.mubr.msk.f32.mxu0 %vm292_vm1, %v18993_v55  ;;  %v19056_v55 = vld [vmem:[%s33245_s0 + $0x311] sm:$0xff] }
 0x15e   :  { %22550 = vmatmul.mubr.msk.f32.gmra.mrb[18].mxu1 %vm292_vm1, %v18996_v58 }
 0x15f   :  { %22552 = vmatprep.mubr.msk.f32.mxu1 %vm292_vm1, %v18997_v59 }
 0x160   :  { %23317 = vmatmul.mubr.msk.f32.gmra.mrb[12].mxu0 %vm292_vm1, %v18994_v56  ;;  %v19057_v56 = vld [vmem:[%s33245_s0 + $0x321] sm:$0xff] }
 0x161   :  { %23319 = vmatprep.mubr.msk.f32.mxu0 %vm292_vm1, %v18995_v57  ;;  %v19058_v57 = vld [vmem:[%s33245_s0 + $0x329] sm:$0xff] }
 0x162   :  { %22553 = vmatmul.mubr.msk.f32.gmra.mrb[20].mxu1 %vm292_vm1, %v18998_v60 }
 0x163   :  { %22555 = vmatprep.mubr.msk.f32.mxu1 %vm292_vm1, %v18999_v61 }
 0x164   :  { %23320 = vmatmul.mubr.msk.f32.gmra.mrb[14].mxu0 %vm292_vm1, %v18996_v58  ;;  %v19059_v58 = vld [vmem:[%s33245_s0 + $0x331] sm:$0xff] }
 0x165   :  { %23322 = vmatprep.mubr.msk.f32.mxu0 %vm292_vm1, %v18997_v59  ;;  %v19060_v59 = vld [vmem:[%s33245_s0 + $0x339] sm:$0xff] }
 0x166   :  { %22556 = vmatmul.mubr.msk.f32.gmra.mrb[22].mxu1 %vm292_vm1, %v19000_v62 }
 0x167   :  { %22558 = vmatprep.mubr.msk.f32.mxu1 %vm292_vm1, %v19001_v63 }
 0x168   :  { %23323 = vmatmul.mubr.msk.f32.gmra.mrb[16].mxu0 %vm292_vm1, %v18998_v60  ;;  %v19061_v60 = vld [vmem:[%s33245_s0 + $0x349] sm:$0xff] }
 0x169   :  { %23325 = vmatprep.mubr.msk.f32.mxu0 %vm292_vm1, %v18999_v61  ;;  %v19062_v61 = vld [vmem:[%s33245_s0 + $0x351] sm:$0xff] }
 0x16a   :  { %22559 = vmatmul.mubr.msk.f32.gmra.mrb[24].mxu1 %vm292_vm1, %v19002_v0 }
 0x16b   :  { %22561 = vmatprep.mubr.msk.f32.mxu1 %vm292_vm1, %v19003_v1 }
 0x16c   :  { %23326 = vmatmul.mubr.msk.f32.gmra.mrb[18].mxu0 %vm292_vm1, %v19000_v62  ;;  %v19063_v62 = vld [vmem:[%s33245_s0 + $0x359] sm:$0xff] }
 0x16d   :  { %23328 = vmatprep.mubr.msk.f32.mxu0 %vm292_vm1, %v19001_v63  ;;  %v19064_v63 = vld [vmem:[%s33245_s0 + $0x361] sm:$0xff] }
 0x16e   :  { %22562 = vmatmul.mubr.msk.f32.gmra.mrb[26].mxu1 %vm292_vm1, %v19004_v2 }
 0x16f   :  { %22564 = vmatprep.mubr.msk.f32.mxu1 %vm292_vm1, %v19005_v3 }
 0x170   :  { %23329 = vmatmul.mubr.msk.f32.gmra.mrb[20].mxu0 %vm292_vm1, %v19002_v0  ;;  %v19065_v0 = vld [vmem:[%s33245_s0 + $0x371] sm:$0xff] }
 0x171   :  { %23331 = vmatprep.mubr.msk.f32.mxu0 %vm292_vm1, %v19003_v1  ;;  %v19066_v1 = vld [vmem:[%s33245_s0 + $0x379] sm:$0xff] }
 0x172   :  { %22565 = vmatmul.mubr.msk.f32.gmra.mrb[28].mxu1 %vm292_vm1, %v19006_v4 }
 0x173   :  { %22567 = vmatprep.mubr.msk.f32.mxu1 %vm292_vm1, %v19007_v5 }
 0x174   :  { %23332 = vmatmul.mubr.msk.f32.gmra.mrb[22].mxu0 %vm292_vm1, %v19004_v2  ;;  %v19067_v2 = vld [vmem:[%s33245_s0 + $0x381] sm:$0xff] }
 0x175   :  { %23334 = vmatprep.mubr.msk.f32.mxu0 %vm292_vm1, %v19005_v3  ;;  %v19068_v3 = vld [vmem:[%s33245_s0 + $0x389] sm:$0xff] }
 0x176   :  { %22568 = vmatmul.mubr.msk.f32.gmra.mrb[30].mxu1 %vm292_vm1, %v19008_v6 }
 0x177   :  { %22570 = vmatprep.mubr.msk.f32.mxu1 %vm292_vm1, %v19009_v7 }
 0x178   :  { %23335 = vmatmul.mubr.msk.f32.gmra.mrb[24].mxu0 %vm292_vm1, %v19006_v4  ;;  %v19069_v4 = vld [vmem:[%s33245_s0 + $0x399] sm:$0xff] }
 0x179   :  { %23337 = vmatprep.mubr.msk.f32.mxu0 %vm292_vm1, %v19007_v5  ;;  %v19070_v5 = vld [vmem:[%s33245_s0 + $0x3a1] sm:$0xff] }
 0x17a   :  { %22571 = vmatmul.mubr.msk.f32.gmra.mrb[32].mxu1 %vm292_vm1, %v19010_v8 }
 0x17b   :  { %22573 = vmatprep.mubr.msk.f32.mxu1 %vm292_vm1, %v19011_v9 }
 0x17c   :  { %23338 = vmatmul.mubr.msk.f32.gmra.mrb[26].mxu0 %vm292_vm1, %v19008_v6  ;;  %v19071_v6 = vld [vmem:[%s33245_s0 + $0x3a9] sm:$0xff] }
 0x17d   :  { %23340 = vmatprep.mubr.msk.f32.mxu0 %vm292_vm1, %v19009_v7  ;;  %v19072_v7 = vld [vmem:[%s33245_s0 + $0x3b1] sm:$0xff] }
 0x17e   :  { %22574 = vmatmul.mubr.msk.f32.gmra.mrb[34].mxu1 %vm292_vm1, %v19012_v10 }
 0x17f   :  { %22576 = vmatprep.mubr.msk.f32.mxu1 %vm292_vm1, %v19013_v11 }
 0x180   :  { %23341 = vmatmul.mubr.msk.f32.gmra.mrb[28].mxu0 %vm292_vm1, %v19010_v8  ;;  %v19073_v8 = vld [vmem:[%s33245_s0 + $0x3c1] sm:$0xff] }
 0x181   :  { %23343 = vmatprep.mubr.msk.f32.mxu0 %vm292_vm1, %v19011_v9  ;;  %v19074_v9 = vld [vmem:[%s33245_s0 + $0x3c9] sm:$0xff] }
 0x182   :  { %22577 = vmatmul.mubr.msk.f32.gmra.mrb[36].mxu1 %vm292_vm1, %v19014_v12 }
 0x183   :  { %22579 = vmatprep.mubr.msk.f32.mxu1 %vm292_vm1, %v19015_v13 }
 0x184   :  { %23344 = vmatmul.mubr.msk.f32.gmra.mrb[30].mxu0 %vm292_vm1, %v19012_v10  ;;  %v19075_v10 = vld [vmem:[%s33245_s0 + $0x3d1] sm:$0xff] }
 0x185   :  { %23346 = vmatprep.mubr.msk.f32.mxu0 %vm292_vm1, %v19013_v11  ;;  %v19076_v11 = vld [vmem:[%s33245_s0 + $0x3d9] sm:$0xff] }
 0x186   :  { %22580 = vmatmul.mubr.msk.f32.gmra.mrb[38].mxu1 %vm292_vm1, %v19016_v14 }
 0x187   :  { %22582 = vmatprep.mubr.msk.f32.mxu1 %vm292_vm1, %v19017_v15 }
 0x188   :  { %23347 = vmatmul.mubr.msk.f32.gmra.mrb[32].mxu0 %vm292_vm1, %v19014_v12  ;;  %v19077_v12 = vld [vmem:[%s33245_s0 + $0x3e9] sm:$0xff] }
 0x189   :  { %23349 = vmatprep.mubr.msk.f32.mxu0 %vm292_vm1, %v19015_v13  ;;  %v19078_v13 = vld [vmem:[%s33245_s0 + $0x3f1] sm:$0xff] }
 0x18a   :  { %22583 = vmatmul.mubr.msk.f32.gmra.mrb[40].mxu1 %vm292_vm1, %v19018_v16 }
 0x18b   :  { %22585 = vmatprep.mubr.msk.f32.mxu1 %vm292_vm1, %v19019_v17 }
 0x18c   :  { %23350 = vmatmul.mubr.msk.f32.gmra.mrb[34].mxu0 %vm292_vm1, %v19016_v14  ;;  %v19079_v14 = vld [vmem:[%s33245_s0 + $0x3f9] sm:$0xff] }
 0x18d   :  { %23352 = vmatprep.mubr.msk.f32.mxu0 %vm292_vm1, %v19017_v15  ;;  %v19080_v15 = vld [vmem:[%s33245_s0 + $0x401] sm:$0xff] }
 0x18e   :  { %22586 = vmatmul.mubr.msk.f32.gmra.mrb[42].mxu1 %vm292_vm1, %v19020_v18 }
 0x18f   :  { %22588 = vmatprep.mubr.msk.f32.mxu1 %vm292_vm1, %v19021_v19 }
 0x190   :  { %23353 = vmatmul.mubr.msk.f32.gmra.mrb[36].mxu0 %vm292_vm1, %v19018_v16  ;;  %v19081_v16 = vld [vmem:[%s33245_s0 + $0x411] sm:$0xff] }
 0x191   :  { %23355 = vmatprep.mubr.msk.f32.mxu0 %vm292_vm1, %v19019_v17  ;;  %v19082_v17 = vld [vmem:[%s33245_s0 + $0x419] sm:$0xff] }
 0x192   :  { %22589 = vmatmul.mubr.msk.f32.gmra.mrb[44].mxu1 %vm292_vm1, %v19022_v20 }
 0x193   :  { %22591 = vmatprep.mubr.msk.f32.mxu1 %vm292_vm1, %v19023_v21 }
 0x194   :  { %23356 = vmatmul.mubr.msk.f32.gmra.mrb[38].mxu0 %vm292_vm1, %v19020_v18  ;;  %v19083_v18 = vld [vmem:[%s33245_s0 + $0x421] sm:$0xff] }
 0x195   :  { %23358 = vmatprep.mubr.msk.f32.mxu0 %vm292_vm1, %v19021_v19  ;;  %v19084_v19 = vld [vmem:[%s33245_s0 + $0x429] sm:$0xff] }
 0x196   :  { %22592 = vmatmul.mubr.msk.f32.gmra.mrb[46].mxu1 %vm292_vm1, %v19024_v22 }
 0x197   :  { %22594 = vmatprep.mubr.msk.f32.mxu1 %vm292_vm1, %v19025_v23 }
 0x198   :  { %23359 = vmatmul.mubr.msk.f32.gmra.mrb[40].mxu0 %vm292_vm1, %v19022_v20  ;;  %v19085_v20 = vld [vmem:[%s33245_s0 + $0x439] sm:$0xff] }
 0x199   :  { %23361 = vmatprep.mubr.msk.f32.mxu0 %vm292_vm1, %v19023_v21  ;;  %v19086_v21 = vld [vmem:[%s33245_s0 + $0x441] sm:$0xff] }
 0x19a   :  { %22595 = vmatmul.mubr.msk.f32.gmra.mrb[48].mxu1 %vm292_vm1, %v19026_v24 }
 0x19b   :  { %22597 = vmatprep.mubr.msk.f32.mxu1 %vm292_vm1, %v19027_v25 }
 0x19c   :  { %23362 = vmatmul.mubr.msk.f32.gmra.mrb[42].mxu0 %vm292_vm1, %v19024_v22  ;;  %v19087_v22 = vld [vmem:[%s33245_s0 + $0x449] sm:$0xff] }
 0x19d   :  { %23364 = vmatprep.mubr.msk.f32.mxu0 %vm292_vm1, %v19025_v23  ;;  %v19088_v23 = vld [vmem:[%s33245_s0 + $0x451] sm:$0xff] }
 0x19e   :  { %22598 = vmatmul.mubr.msk.f32.gmra.mrb[50].mxu1 %vm292_vm1, %v19028_v26 }
 0x19f   :  { %22600 = vmatprep.mubr.msk.f32.mxu1 %vm292_vm1, %v19029_v27 }
 0x1a0   :  { %23365 = vmatmul.mubr.msk.f32.gmra.mrb[44].mxu0 %vm292_vm1, %v19026_v24  ;;  %v19089_v24 = vld [vmem:[%s33245_s0 + $0x461] sm:$0xff] }
 0x1a1   :  { %23367 = vmatprep.mubr.msk.f32.mxu0 %vm292_vm1, %v19027_v25  ;;  %v19090_v25 = vld [vmem:[%s33245_s0 + $0x469] sm:$0xff] }
 0x1a2   :  { %22601 = vmatmul.mubr.msk.f32.gmra.mrb[52].mxu1 %vm292_vm1, %v19030_v28 }
 0x1a3   :  { %22603 = vmatprep.mubr.msk.f32.mxu1 %vm292_vm1, %v19031_v29 }
 0x1a4   :  { %23368 = vmatmul.mubr.msk.f32.gmra.mrb[46].mxu0 %vm292_vm1, %v19028_v26  ;;  %v19091_v26 = vld [vmem:[%s33245_s0 + $0x471] sm:$0xff] }
 0x1a5   :  { %23370 = vmatprep.mubr.msk.f32.mxu0 %vm292_vm1, %v19029_v27  ;;  %v19092_v27 = vld [vmem:[%s33245_s0 + $0x479] sm:$0xff] }
 0x1a6   :  { %22604 = vmatmul.mubr.msk.f32.gmra.mrb[54].mxu1 %vm292_vm1, %v19032_v30 }
 0x1a7   :  { %22606 = vmatprep.mubr.msk.f32.mxu1 %vm292_vm1, %v19033_v31 }
 0x1a8   :  { %23371 = vmatmul.mubr.msk.f32.gmra.mrb[48].mxu0 %vm292_vm1, %v19030_v28  ;;  %v19093_v28 = vld [vmem:[%s33245_s0 + $0x489] sm:$0xff] }
 0x1a9   :  { %23373 = vmatprep.mubr.msk.f32.mxu0 %vm292_vm1, %v19031_v29  ;;  %v19094_v29 = vld [vmem:[%s33245_s0 + $0x491] sm:$0xff] }
 0x1aa   :  { %22607 = vmatmul.mubr.msk.f32.gmra.mrb[56].mxu1 %vm292_vm1, %v19034_v32 }
 0x1ab   :  { %22609 = vmatprep.mubr.msk.f32.mxu1 %vm292_vm1, %v19035_v33 }
 0x1ac   :  { %23374 = vmatmul.mubr.msk.f32.gmra.mrb[50].mxu0 %vm292_vm1, %v19032_v30  ;;  %v19095_v30 = vld [vmem:[%s33245_s0 + $0x499] sm:$0xff] }
 0x1ad   :  { %23376 = vmatprep.mubr.msk.f32.mxu0 %vm292_vm1, %v19033_v31  ;;  %v19096_v31 = vld [vmem:[%s33245_s0 + $0x4a1] sm:$0xff] }
 0x1ae   :  { %22610 = vmatmul.mubr.msk.f32.gmra.mrb[58].mxu1 %vm292_vm1, %v19036_v34 }
 0x1af   :  { %22612 = vmatprep.mubr.msk.f32.mxu1 %vm292_vm1, %v19037_v35 }
 0x1b0   :  { %23377 = vmatmul.mubr.msk.f32.gmra.mrb[52].mxu0 %vm292_vm1, %v19034_v32  ;;  %v19097_v32 = vld [vmem:[%s33245_s0 + $0x4b1] sm:$0xff] }
 0x1b1   :  { %23379 = vmatprep.mubr.msk.f32.mxu0 %vm292_vm1, %v19035_v33  ;;  %v19098_v33 = vld [vmem:[%s33245_s0 + $0x4b9] sm:$0xff] }
 0x1b2   :  { %22613 = vmatmul.mubr.msk.f32.gmra.mrb[60].mxu1 %vm292_vm1, %v19038_v36 }
 0x1b3   :  { %22615 = vmatprep.mubr.msk.f32.mxu1 %vm292_vm1, %v19039_v37 }
 0x1b4   :  { %23380 = vmatmul.mubr.msk.f32.gmra.mrb[54].mxu0 %vm292_vm1, %v19036_v34  ;;  %v19099_v34 = vld [vmem:[%s33245_s0 + $0x4c1] sm:$0xff] }
 0x1b5   :  { %23382 = vmatprep.mubr.msk.f32.mxu0 %vm292_vm1, %v19037_v35  ;;  %v19100_v35 = vld [vmem:[%s33245_s0 + $0x4c9] sm:$0xff] }
 0x1b6   :  { %22616 = vmatmul.mubr.msk.f32.gmra.mrb[62].mxu1 %vm292_vm1, %v19040_v38 }
 0x1b7   :  { %22618 = vmatprep.mubr.msk.f32.mxu1 %vm292_vm1, %v19041_v39 }
 0x1b8   :  { %23383 = vmatmul.mubr.msk.f32.gmra.mrb[56].mxu0 %vm292_vm1, %v19038_v36  ;;  %v19101_v36 = vld [vmem:[%s33245_s0 + $0x4d9] sm:$0xff] }
 0x1b9   :  { %23385 = vmatprep.mubr.msk.f32.mxu0 %vm292_vm1, %v19039_v37  ;;  %v19102_v37 = vld [vmem:[%s33245_s0 + $0x4e1] sm:$0xff] }
 0x1ba   :  { %22619 = vmatmul.mubr.msk.f32.gmra.mrb[64].mxu1 %vm292_vm1, %v19042_v40 }
 0x1bb   :  { %22621 = vmatprep.mubr.msk.f32.mxu1 %vm292_vm1, %v19043_v41 }
 0x1bc   :  { %23386 = vmatmul.mubr.msk.f32.gmra.mrb[58].mxu0 %vm292_vm1, %v19040_v38  ;;  %v19103_v38 = vld [vmem:[%s33245_s0 + $0x4e9] sm:$0xff] }
 0x1bd   :  { %23388 = vmatprep.mubr.msk.f32.mxu0 %vm292_vm1, %v19041_v39  ;;  %v19104_v39 = vld [vmem:[%s33245_s0 + $0x4f1] sm:$0xff] }
 0x1be   :  { %22622 = vmatmul.mubr.msk.f32.gmra.mrb[66].mxu1 %vm292_vm1, %v19044_v42 }
 0x1bf   :  { %22624 = vmatprep.mubr.msk.f32.mxu1 %vm292_vm1, %v19045_v43 }
 0x1c0   :  { %23389 = vmatmul.mubr.msk.f32.gmra.mrb[60].mxu0 %vm292_vm1, %v19042_v40  ;;  %v19105_v40 = vld [vmem:[%s33245_s0 + $0x501] sm:$0xff] }
 0x1c1   :  { %23391 = vmatprep.mubr.msk.f32.mxu0 %vm292_vm1, %v19043_v41  ;;  %v19106_v41 = vld [vmem:[%s33245_s0 + $0x509] sm:$0xff] }
 0x1c2   :  { %22625 = vmatmul.mubr.msk.f32.gmra.mrb[68].mxu1 %vm292_vm1, %v19046_v44 }
 0x1c3   :  { %22627 = vmatprep.mubr.msk.f32.mxu1 %vm292_vm1, %v19047_v45 }
 0x1c4   :  { %23392 = vmatmul.mubr.msk.f32.gmra.mrb[62].mxu0 %vm292_vm1, %v19044_v42  ;;  %v19107_v42 = vld [vmem:[%s33245_s0 + $0x511] sm:$0xff] }
 0x1c5   :  { %23394 = vmatprep.mubr.msk.f32.mxu0 %vm292_vm1, %v19045_v43  ;;  %v19108_v43 = vld [vmem:[%s33245_s0 + $0x519] sm:$0xff] }
 0x1c6   :  { %22628 = vmatmul.mubr.msk.f32.gmra.mrb[70].mxu1 %vm292_vm1, %v19048_v46 }
 0x1c7   :  { %22630 = vmatprep.mubr.msk.f32.mxu1 %vm292_vm1, %v19049_v47 }
 0x1c8   :  { %23395 = vmatmul.mubr.msk.f32.gmra.mrb[64].mxu0 %vm292_vm1, %v19046_v44  ;;  %v19239_v44 = vld [vmem:[%s33245_s0 + $0x2a] sm:$0xff] }
 0x1c9   :  { %23397 = vmatprep.mubr.msk.f32.mxu0 %vm292_vm1, %v19047_v45  ;;  %v19240_v45 = vld [vmem:[%s33245_s0 + $0x32] sm:$0xff] }
 0x1ca   :  { %22631 = vmatmul.mubr.msk.f32.gmra.mrb[72].mxu1 %vm292_vm1, %v19050_v48 }
 0x1cb   :  { %22633 = vmatprep.mubr.msk.f32.mxu1 %vm292_vm1, %v19051_v49 }
 0x1cc   :  { %23398 = vmatmul.mubr.msk.f32.gmra.mrb[66].mxu0 %vm292_vm1, %v19048_v46  ;;  %v19241_v46 = vld [vmem:[%s33245_s0 + $0x3a] sm:$0xff] }
 0x1cd   :  { %23400 = vmatprep.mubr.msk.f32.mxu0 %vm292_vm1, %v19049_v47  ;;  %v19242_v47 = vld [vmem:[%s33245_s0 + $0x42] sm:$0xff] }
 0x1ce   :  { %22634 = vmatmul.mubr.msk.f32.gmra.mrb[74].mxu1 %vm292_vm1, %v19052_v50 }
 0x1cf   :  { %22636 = vmatprep.mubr.msk.f32.mxu1 %vm292_vm1, %v19053_v51 }
 0x1d0   :  { %23401 = vmatmul.mubr.msk.f32.gmra.mrb[68].mxu0 %vm292_vm1, %v19050_v48  ;;  %v19243_v48 = vld [vmem:[%s33245_s0 + $0x52] sm:$0xff] }
 0x1d1   :  { %23403 = vmatprep.mubr.msk.f32.mxu0 %vm292_vm1, %v19051_v49  ;;  %v161_v49 = vld [vmem:[%s33244_s1] sm:$0x7] }
 0x1d2   :  { %22637 = vmatmul.mubr.msk.f32.gmra.mrb[76].mxu1 %vm292_vm1, %v19054_v53  ;;  %22714 = vmatprep.subr.msk.mxu1 %vm677_vm0, %v161_v49 }
 0x1d3   :  { %22639 = vmatprep.mubr.msk.f32.mxu1 %vm292_vm1, %v19055_v54  ;;  %22715 = vmatpush3.msk.msra.mxu1 %vm677_vm0, %v161_v49  ;;  %v19274_v49 = vld [vmem:[%s33245_s0 + $0x182] sm:$0xff] }
 0x1d4   :  { %23404 = vmatmul.mubr.msk.f32.gmra.mrb[70].mxu0 %vm292_vm1, %v19052_v50  ;;  %v33_v50 = vld [vmem:[%s33245_s0] sm:$0xff] }
 0x1d5   :  { %23406 = vmatprep.mubr.msk.f32.mxu0 %vm292_vm1, %v19053_v51  ;;  %v34_v51 = vld [vmem:[%s33245_s0 + $0x8] sm:$0xff] }
 0x1d6   :  { %22640 = vmatmul.mubr.msk.f32.gmra.mrb[78].mxu1 %vm292_vm1, %v19056_v55 }
 0x1d7   :  { %22642 = vmatprep.mubr.msk.f32.mxu1 %vm292_vm1, %v19057_v56 }
 0x1d8   :  { %23407 = vmatmul.mubr.msk.f32.gmra.mrb[72].mxu0 %vm292_vm1, %v19054_v53  ;;  %v19245_v53 = vld [vmem:[%s33245_s0 + $0x62] sm:$0xff] }
 0x1d9   :  { %23409 = vmatprep.mubr.msk.f32.mxu0 %vm292_vm1, %v19055_v54  ;;  %v26665_v54 = vld [vmem:[%s33244_s1 + $0x8] sm:$0x7] }
 0x1da   :  { %22643 = vmatmul.mubr.msk.f32.gmra.mrb[80].mxu1 %vm292_vm1, %v19058_v57  ;;  %25149 = vmatprep.subr.msk.mxu1 %vm677_vm0, %v26665_v54 }
 0x1db   :  { %22645 = vmatprep.mubr.msk.f32.mxu1 %vm292_vm1, %v19059_v58 }
 0x1dc   :  { %23410 = vmatmul.mubr.msk.f32.gmra.mrb[74].mxu0 %vm292_vm1, %v19056_v55  ;;  %v35_v55 = vld [vmem:[%s33245_s0 + $0x10] sm:$0xff] }
 0x1dd   :  { %23412 = vmatprep.mubr.msk.f32.mxu0 %vm292_vm1, %v19057_v56  ;;  %v36_v56 = vld [vmem:[%s33245_s0 + $0x18] sm:$0xff] }
 0x1de   :  { %22646 = vmatmul.mubr.msk.f32.gmra.mrb[82].mxu1 %vm292_vm1, %v19060_v59 }
 0x1df   :  { %22648 = vmatprep.mubr.msk.f32.mxu1 %vm292_vm1, %v19061_v60 }
 0x1e0   :  { %23413 = vmatmul.mubr.msk.f32.gmra.mrb[76].mxu0 %vm292_vm1, %v19058_v57  ;;  %v19246_v57 = vld [vmem:[%s33245_s0 + $0x6a] sm:$0xff] }
 0x1e1   :  { %23415 = vmatprep.mubr.msk.f32.mxu0 %vm292_vm1, %v19059_v58  ;;  %v19247_v58 = vld [vmem:[%s33245_s0 + $0x7a] sm:$0xff] }
 0x1e2   :  { %22649 = vmatmul.mubr.msk.f32.gmra.mrb[84].mxu1 %vm292_vm1, %v19062_v61 }
 0x1e3   :  { %22651 = vmatprep.mubr.msk.f32.mxu1 %vm292_vm1, %v19063_v62 }
 0x1e4   :  { %23416 = vmatmul.mubr.msk.f32.gmra.mrb[78].mxu0 %vm292_vm1, %v19060_v59  ;;  %v37_v59 = vld [vmem:[%s33245_s0 + $0x28] sm:$0xff] }
 0x1e5   :  { %23418 = vmatprep.mubr.msk.f32.mxu0 %vm292_vm1, %v19061_v60  ;;  %v38_v60 = vld [vmem:[%s33245_s0 + $0x30] sm:$0xff] }
 0x1e6   :  { %22652 = vmatmul.mubr.msk.f32.gmra.mrb[86].mxu1 %vm292_vm1, %v19064_v63 }
 0x1e7   :  { %22654 = vmatprep.mubr.msk.f32.mxu1 %vm292_vm1, %v19065_v0 }
 0x1e8   :  { %23419 = vmatmul.mubr.msk.f32.gmra.mrb[80].mxu0 %vm292_vm1, %v19062_v61  ;;  %v19248_v61 = vld [vmem:[%s33245_s0 + $0x82] sm:$0xff] }
 0x1e9   :  { %23421 = vmatprep.mubr.msk.f32.mxu0 %vm292_vm1, %v19063_v62  ;;  %v19249_v62 = vld [vmem:[%s33245_s0 + $0x8a] sm:$0xff] }
 0x1ea   :  { %22655 = vmatmul.mubr.msk.f32.gmra.mrb[88].mxu1 %vm292_vm1, %v19066_v1 }
 0x1eb   :  { %22657 = vmatprep.mubr.msk.f32.mxu1 %vm292_vm1, %v19067_v2 }
 0x1ec   :  { %23422 = vmatmul.mubr.msk.f32.gmra.mrb[82].mxu0 %vm292_vm1, %v19064_v63  ;;  %v39_v63 = vld [vmem:[%s33245_s0 + $0x38] sm:$0xff] }
 0x1ed   :  { %23424 = vmatprep.mubr.msk.f32.mxu0 %vm292_vm1, %v19065_v0  ;;  %v40_v0 = vld [vmem:[%s33245_s0 + $0x40] sm:$0xff] }
 0x1ee   :  { %22658 = vmatmul.mubr.msk.f32.gmra.mrb[90].mxu1 %vm292_vm1, %v19068_v3 }
 0x1ef   :  { %22660 = vmatprep.mubr.msk.f32.mxu1 %vm292_vm1, %v19069_v4 }
 0x1f0   :  { %23425 = vmatmul.mubr.msk.f32.gmra.mrb[84].mxu0 %vm292_vm1, %v19066_v1  ;;  %v19250_v1 = vld [vmem:[%s33245_s0 + $0x92] sm:$0xff] }
 0x1f1   :  { %23427 = vmatprep.mubr.msk.f32.mxu0 %vm292_vm1, %v19067_v2  ;;  %v19251_v2 = vld [vmem:[%s33245_s0 + $0xa2] sm:$0xff] }
 0x1f2   :  { %22661 = vmatmul.mubr.msk.f32.gmra.mrb[92].mxu1 %vm292_vm1, %v19070_v5 }
 0x1f3   :  { %22663 = vmatprep.mubr.msk.f32.mxu1 %vm292_vm1, %v19071_v6 }
 0x1f4   :  { %23428 = vmatmul.mubr.msk.f32.gmra.mrb[86].mxu0 %vm292_vm1, %v19068_v3  ;;  %v28161_v3 = vld [vmem:[%s33245_s0 + $0x50] sm:$0xff] }
 0x1f5   :  { %23430 = vmatprep.mubr.msk.f32.mxu0 %vm292_vm1, %v19069_v4  ;;  %v28166_v4 = vld [vmem:[%s33245_s0 + $0x58] sm:$0xff] }
 0x1f6   :  { %22664 = vmatmul.mubr.msk.f32.gmra.mrb[94].mxu1 %vm292_vm1, %v19072_v7 }
 0x1f7   :  { %22666 = vmatprep.mubr.msk.f32.mxu1 %vm292_vm1, %v19073_v8 }
 0x1f8   :  { %23431 = vmatmul.mubr.msk.f32.gmra.mrb[88].mxu0 %vm292_vm1, %v19070_v5  ;;  %v19252_v5 = vld [vmem:[%s33245_s0 + $0xaa] sm:$0xff] }
 0x1f9   :  { %23433 = vmatprep.mubr.msk.f32.mxu0 %vm292_vm1, %v19071_v6  ;;  %v19253_v6 = vld [vmem:[%s33245_s0 + $0xb2] sm:$0xff] }
 0x1fa   :  { %22667 = vmatmul.mubr.msk.f32.gmra.mrb[96].mxu1 %vm292_vm1, %v19074_v9 }
 0x1fb   :  { %22669 = vmatprep.mubr.msk.f32.mxu1 %vm292_vm1, %v19075_v10 }
 0x1fc   :  { %23434 = vmatmul.mubr.msk.f32.gmra.mrb[90].mxu0 %vm292_vm1, %v19072_v7  ;;  %v28183_v7 = vld [vmem:[%s33245_s0 + $0x60] sm:$0xff] }
 0x1fd   :  { %23436 = vmatprep.mubr.msk.f32.mxu0 %vm292_vm1, %v19073_v8  ;;  %v28188_v8 = vld [vmem:[%s33245_s0 + $0x68] sm:$0xff] }
 0x1fe   :  { %22670 = vmatmul.mubr.msk.f32.gmra.mrb[98].mxu1 %vm292_vm1, %v19076_v11 }
 0x1ff   :  { %22672 = vmatprep.mubr.msk.f32.mxu1 %vm292_vm1, %v19077_v12 }
 0x200   :  { %23437 = vmatmul.mubr.msk.f32.gmra.mrb[92].mxu0 %vm292_vm1, %v19074_v9  ;;  %v19254_v9 = vld [vmem:[%s33245_s0 + $0xba] sm:$0xff] }
 0x201   :  { %23439 = vmatprep.mubr.msk.f32.mxu0 %vm292_vm1, %v19075_v10  ;;  %v19255_v10 = vld [vmem:[%s33245_s0 + $0xca] sm:$0xff] }
 0x202   :  { %22673 = vmatmul.mubr.msk.f32.gmra.mrb[100].mxu1 %vm292_vm1, %v19078_v13 }
 0x203   :  { %22675 = vmatprep.mubr.msk.f32.mxu1 %vm292_vm1, %v19079_v14 }
 0x204   :  { %23440 = vmatmul.mubr.msk.f32.gmra.mrb[94].mxu0 %vm292_vm1, %v19076_v11  ;;  %v28205_v11 = vld [vmem:[%s33245_s0 + $0x78] sm:$0xff] }
 0x205   :  { %23442 = vmatprep.mubr.msk.f32.mxu0 %vm292_vm1, %v19077_v12  ;;  %v28210_v12 = vld [vmem:[%s33245_s0 + $0x80] sm:$0xff] }
 0x206   :  { %22676 = vmatmul.mubr.msk.f32.gmra.mrb[102].mxu1 %vm292_vm1, %v19080_v15 }
 0x207   :  { %22678 = vmatprep.mubr.msk.f32.mxu1 %vm292_vm1, %v19081_v16 }
 0x208   :  { %23443 = vmatmul.mubr.msk.f32.gmra.mrb[96].mxu0 %vm292_vm1, %v19078_v13  ;;  %v19256_v13 = vld [vmem:[%s33245_s0 + $0xd2] sm:$0xff] }
 0x209   :  { %23445 = vmatprep.mubr.msk.f32.mxu0 %vm292_vm1, %v19079_v14  ;;  %v19257_v14 = vld [vmem:[%s33245_s0 + $0xda] sm:$0xff] }
 0x20a   :  { %22679 = vmatmul.mubr.msk.f32.gmra.mrb[104].mxu1 %vm292_vm1, %v19082_v17 }
 0x20b   :  { %22681 = vmatprep.mubr.msk.f32.mxu1 %vm292_vm1, %v19083_v18 }
 0x20c   :  { %23446 = vmatmul.mubr.msk.f32.gmra.mrb[98].mxu0 %vm292_vm1, %v19080_v15  ;;  %v28227_v15 = vld [vmem:[%s33245_s0 + $0x88] sm:$0xff] }
 0x20d   :  { %23448 = vmatprep.mubr.msk.f32.mxu0 %vm292_vm1, %v19081_v16  ;;  %v28232_v16 = vld [vmem:[%s33245_s0 + $0x90] sm:$0xff] }
 0x20e   :  { %22682 = vmatmul.mubr.msk.f32.gmra.mrb[106].mxu1 %vm292_vm1, %v19084_v19 }
 0x20f   :  { %22684 = vmatprep.mubr.msk.f32.mxu1 %vm292_vm1, %v19085_v20 }
 0x210   :  { %23449 = vmatmul.mubr.msk.f32.gmra.mrb[100].mxu0 %vm292_vm1, %v19082_v17  ;;  %v19258_v17 = vld [vmem:[%s33245_s0 + $0xe2] sm:$0xff] }
 0x211   :  { %23451 = vmatprep.mubr.msk.f32.mxu0 %vm292_vm1, %v19083_v18  ;;  %v19259_v18 = vld [vmem:[%s33245_s0 + $0xf2] sm:$0xff] }
 0x212   :  { %22685 = vmatmul.mubr.msk.f32.gmra.mrb[108].mxu1 %vm292_vm1, %v19086_v21 }
 0x213   :  { %22687 = vmatprep.mubr.msk.f32.mxu1 %vm292_vm1, %v19087_v22 }
 0x214   :  { %23452 = vmatmul.mubr.msk.f32.gmra.mrb[102].mxu0 %vm292_vm1, %v19084_v19  ;;  %v28249_v19 = vld [vmem:[%s33245_s0 + $0xa0] sm:$0xff] }
 0x215   :  { %23454 = vmatprep.mubr.msk.f32.mxu0 %vm292_vm1, %v19085_v20  ;;  %v28254_v20 = vld [vmem:[%s33245_s0 + $0xa8] sm:$0xff] }
 0x216   :  { %22688 = vmatmul.mubr.msk.f32.gmra.mrb[110].mxu1 %vm292_vm1, %v19088_v23 }
 0x217   :  { %22690 = vmatprep.mubr.msk.f32.mxu1 %vm292_vm1, %v19089_v24 }
 0x218   :  { %23455 = vmatmul.mubr.msk.f32.gmra.mrb[104].mxu0 %vm292_vm1, %v19086_v21  ;;  %v19260_v21 = vld [vmem:[%s33245_s0 + $0xfa] sm:$0xff] }
 0x219   :  { %23457 = vmatprep.mubr.msk.f32.mxu0 %vm292_vm1, %v19087_v22  ;;  %v19261_v22 = vld [vmem:[%s33245_s0 + $0x102] sm:$0xff] }
 0x21a   :  { %22691 = vmatmul.mubr.msk.f32.gmra.mrb[112].mxu1 %vm292_vm1, %v19090_v25 }
 0x21b   :  { %22693 = vmatprep.mubr.msk.f32.mxu1 %vm292_vm1, %v19091_v26 }
 0x21c   :  { %23458 = vmatmul.mubr.msk.f32.gmra.mrb[106].mxu0 %vm292_vm1, %v19088_v23  ;;  %v28271_v23 = vld [vmem:[%s33245_s0 + $0xb0] sm:$0xff] }
 0x21d   :  { %23460 = vmatprep.mubr.msk.f32.mxu0 %vm292_vm1, %v19089_v24  ;;  %v28276_v24 = vld [vmem:[%s33245_s0 + $0xb8] sm:$0xff] }
 0x21e   :  { %22694 = vmatmul.mubr.msk.f32.gmra.mrb[114].mxu1 %vm292_vm1, %v19092_v27 }
 0x21f   :  { %22696 = vmatprep.mubr.msk.f32.mxu1 %vm292_vm1, %v19093_v28 }
 0x220   :  { %23461 = vmatmul.mubr.msk.f32.gmra.mrb[108].mxu0 %vm292_vm1, %v19090_v25  ;;  %v19262_v25 = vld [vmem:[%s33245_s0 + $0x10a] sm:$0xff] }
 0x221   :  { %23463 = vmatprep.mubr.msk.f32.mxu0 %vm292_vm1, %v19091_v26  ;;  %v19263_v26 = vld [vmem:[%s33245_s0 + $0x11a] sm:$0xff] }
 0x222   :  { %22697 = vmatmul.mubr.msk.f32.gmra.mrb[116].mxu1 %vm292_vm1, %v19094_v29 }
 0x223   :  { %22699 = vmatprep.mubr.msk.f32.mxu1 %vm292_vm1, %v19095_v30 }
 0x224   :  { %23464 = vmatmul.mubr.msk.f32.gmra.mrb[110].mxu0 %vm292_vm1, %v19092_v27  ;;  %v28293_v27 = vld [vmem:[%s33245_s0 + $0xc8] sm:$0xff] }
 0x225   :  { %23466 = vmatprep.mubr.msk.f32.mxu0 %vm292_vm1, %v19093_v28  ;;  %v28298_v28 = vld [vmem:[%s33245_s0 + $0xd0] sm:$0xff] }
 0x226   :  { %22700 = vmatmul.mubr.msk.f32.gmra.mrb[118].mxu1 %vm292_vm1, %v19096_v31 }
 0x227   :  { %22702 = vmatprep.mubr.msk.f32.mxu1 %vm292_vm1, %v19097_v32 }
 0x228   :  { %23467 = vmatmul.mubr.msk.f32.gmra.mrb[112].mxu0 %vm292_vm1, %v19094_v29  ;;  %v19264_v29 = vld [vmem:[%s33245_s0 + $0x122] sm:$0xff] }
 0x229   :  { %23469 = vmatprep.mubr.msk.f32.mxu0 %vm292_vm1, %v19095_v30  ;;  %v19265_v30 = vld [vmem:[%s33245_s0 + $0x12a] sm:$0xff] }
 0x22a   :  { %22703 = vmatmul.mubr.msk.f32.gmra.mrb[120].mxu1 %vm292_vm1, %v19098_v33 }
 0x22b   :  { %22705 = vmatprep.mubr.msk.f32.mxu1 %vm292_vm1, %v19099_v34 }
 0x22c   :  { %23470 = vmatmul.mubr.msk.f32.gmra.mrb[114].mxu0 %vm292_vm1, %v19096_v31  ;;  %v28315_v31 = vld [vmem:[%s33245_s0 + $0xd8] sm:$0xff] }
 0x22d   :  { %23472 = vmatprep.mubr.msk.f32.mxu0 %vm292_vm1, %v19097_v32  ;;  %v28320_v32 = vld [vmem:[%s33245_s0 + $0xe0] sm:$0xff] }
 0x22e   :  { %22706 = vmatmul.mubr.msk.f32.gmra.mrb[122].mxu1 %vm292_vm1, %v19100_v35 }
 0x22f   :  { %22708 = vmatprep.mubr.msk.f32.mxu1 %vm292_vm1, %v19101_v36 }
 0x230   :  { %23473 = vmatmul.mubr.msk.f32.gmra.mrb[116].mxu0 %vm292_vm1, %v19098_v33  ;;  %v19266_v33 = vld [vmem:[%s33245_s0 + $0x132] sm:$0xff] }
 0x231   :  { %23475 = vmatprep.mubr.msk.f32.mxu0 %vm292_vm1, %v19099_v34  ;;  %v19267_v34 = vld [vmem:[%s33245_s0 + $0x142] sm:$0xff] }
 0x232   :  { %22709 = vmatmul.mubr.msk.f32.gmra.mrb[124].mxu1 %vm292_vm1, %v19102_v37 }
 0x233   :  { %22711 = vmatprep.mubr.msk.f32.mxu1 %vm292_vm1, %v19103_v38 }
 0x234   :  { %23476 = vmatmul.mubr.msk.f32.gmra.mrb[118].mxu0 %vm292_vm1, %v19100_v35  ;;  %v28337_v35 = vld [vmem:[%s33245_s0 + $0xf0] sm:$0xff] }
 0x235   :  { %23478 = vmatprep.mubr.msk.f32.mxu0 %vm292_vm1, %v19101_v36  ;;  %v28342_v36 = vld [vmem:[%s33245_s0 + $0xf8] sm:$0xff] }
 0x236   :  { %22712 = vmatmul.mubr.msk.f32.gmra.mrb[126].mxu1 %vm292_vm1, %v19104_v39 }
 0x237   :  { %22716 = vmatprep.mubr.msk.f32.mxu1 %vm292_vm1, %v33_v50  ;;  %v19275_v50 = vld [vmem:[%s33245_s0 + $0x192] sm:$0xff] }
 0x238   :  { %23479 = vmatmul.mubr.msk.f32.gmra.mrb[120].mxu0 %vm292_vm1, %v19102_v37  ;;  %v19268_v37 = vld [vmem:[%s33245_s0 + $0x14a] sm:$0xff] }
 0x239   :  { %23481 = vmatprep.mubr.msk.f32.mxu0 %vm292_vm1, %v19103_v38  ;;  %v19269_v38 = vld [vmem:[%s33245_s0 + $0x152] sm:$0xff] }
 0x23a   :  { %22717 = vmatmul.mubr.msk.f32.vlgmr.msra.gmra.mrb[0].mxu1 %vm292_vm1, %v34_v51  ;;  %v28425_v51 = vld [vmem:[%s33245_s0 + $0x140] sm:$0xff] }
 0x23b   :  { %25150 = vmatpush3.msk.msra.mxu1 %vm677_vm0, %v26665_v54  ;;  %22719 = vmatprep.mubr.msk.f32.mxu1 %vm292_vm1, %v35_v55  ;;  %v19277_v54 = vld [vmem:[%s33245_s0 + $0x1a2] sm:$0xff]  ;;  %v28447_v55 = vld [vmem:[%s33245_s0 + $0x150] sm:$0xff] }
 0x23c   :  { %23482 = vmatmul.mubr.msk.f32.gmra.mrb[122].mxu0 %vm292_vm1, %v19104_v39  ;;  %v28359_v39 = vld [vmem:[%s33245_s0 + $0x100] sm:$0xff] }
 0x23d   :  { %23484 = vmatprep.mubr.msk.f32.mxu0 %vm292_vm1, %v19105_v40  ;;  %v28364_v40 = vld [vmem:[%s33245_s0 + $0x108] sm:$0xff] }
 0x23e   :  { %22720 = vmatmul.mubr.msk.f32.gmra.mrb[2].mxu1 %vm292_vm1, %v36_v56  ;;  %v28452_v56 = vld [vmem:[%s33245_s0 + $0x158] sm:$0xff] }
 0x23f   :  { %22722 = vmatprep.mubr.msk.f32.mxu1 %vm292_vm1, %v37_v59  ;;  %v28469_v59 = vld [vmem:[%s33245_s0 + $0x168] sm:$0xff] }
 0x240   :  { %23485 = vmatmul.mubr.msk.f32.gmra.mrb[124].mxu0 %vm292_vm1, %v19106_v41  ;;  %v19270_v41 = vld [vmem:[%s33245_s0 + $0x15a] sm:$0xff] }
 0x241   :  { %23487 = vmatprep.mubr.msk.f32.mxu0 %vm292_vm1, %v19107_v42  ;;  %v19271_v42 = vld [vmem:[%s33245_s0 + $0x16a] sm:$0xff] }
 0x242   :  { %22723 = vmatmul.mubr.msk.f32.gmra.mrb[4].mxu1 %vm292_vm1, %v38_v60  ;;  %v28474_v60 = vld [vmem:[%s33245_s0 + $0x170] sm:$0xff] }
 0x243   :  { %22725 = vmatprep.mubr.msk.f32.mxu1 %vm292_vm1, %v39_v63  ;;  %v28491_v63 = vld [vmem:[%s33245_s0 + $0x178] sm:$0xff] }
 0x244   :  { %23488 = vmatmul.mubr.msk.f32.gmra.mrb[126].mxu0 %vm292_vm1, %v19108_v43  ;;  %v28381_v43 = vld [vmem:[%s33245_s0 + $0x118] sm:$0xff] }
 0x245   :  { %23492 = vmatprep.mubr.msk.f32.mxu0 %vm292_vm1, %v19239_v44  ;;  %v28386_v44 = vld [vmem:[%s33245_s0 + $0x120] sm:$0xff] }
 0x246   :  { %22726 = vmatmul.mubr.msk.f32.gmra.mrb[6].mxu1 %vm292_vm1, %v40_v0  ;;  %v28496_v0 = vld [vmem:[%s33245_s0 + $0x180] sm:$0xff] }
 0x247   :  { %22728 = vmatprep.mubr.msk.f32.mxu1 %vm292_vm1, %v28161_v3 }
 0x248   :  { %23493 = vmatmul.mubr.msk.f32.vlgmr.msra.gmra.mrb[0].mxu0 %vm292_vm1, %v19240_v45  ;;  %v19272_v45 = vld [vmem:[%s33245_s0 + $0x172] sm:$0xff] }
 0x249   :  { %23495 = vmatprep.mubr.msk.f32.mxu0 %vm292_vm1, %v19241_v46  ;;  %23685 = vmatpush3.msk.msra.mxu0 %vm677_vm0, %v27778_v52  ;;  %v19244_v52 = vld [vmem:[%s33245_s0 + $0x5a] sm:$0xff] }
 0x24a   :  { %22729 = vmatmul.mubr.msk.f32.gmra.mrb[8].mxu1 %vm292_vm1, %v28166_v4  ;;  %v19273_v46 = vld [vmem:[%s33245_s0 + $0x17a] sm:$0xff] }
 0x24b   :  { %22731 = vmatprep.mubr.msk.f32.mxu1 %vm292_vm1, %v28183_v7 }
 0x24c   :  { %23496 = vmatmul.mubr.msk.f32.gmra.mrb[2].mxu0 %vm292_vm1, %v19242_v47  ;;  %v28403_v47 = vld [vmem:[%s33245_s0 + $0x128] sm:$0xff] }
 0x24d   :  { %23498 = vmatprep.mubr.msk.f32.mxu0 %vm292_vm1, %v19243_v48  ;;  %v28408_v48 = vld [vmem:[%s33245_s0 + $0x130] sm:$0xff] }
 0x24e   :  { %22732 = vmatmul.mubr.msk.f32.gmra.mrb[10].mxu1 %vm292_vm1, %v28188_v8 }
 0x24f   :  { %22734 = vmatprep.mubr.msk.f32.mxu1 %vm292_vm1, %v28205_v11 }
 0x250   :  { %23499 = vmatmul.mubr.msk.f32.gmra.mrb[4].mxu0 %vm292_vm1, %v19244_v52  ;;  %v28430_v52 = vld [vmem:[%s33245_s0 + $0x148] sm:$0xff] }
 0x251   :  { %23501 = vmatprep.mubr.msk.f32.mxu0 %vm292_vm1, %v19245_v53  ;;  %v19276_v53 = vld [vmem:[%s33245_s0 + $0x19a] sm:$0xff] }
 0x252   :  { %22735 = vmatmul.mubr.msk.f32.gmra.mrb[12].mxu1 %vm292_vm1, %v28210_v12 }
 0x253   :  { %22737 = vmatprep.mubr.msk.f32.mxu1 %vm292_vm1, %v28227_v15 }
 0x254   :  { %23502 = vmatmul.mubr.msk.f32.gmra.mrb[6].mxu0 %vm292_vm1, %v19246_v57  ;;  %v19278_v57 = vld [vmem:[%s33245_s0 + $0x1aa] sm:$0xff] }
 0x255   :  { %23504 = vmatprep.mubr.msk.f32.mxu0 %vm292_vm1, %v19247_v58  ;;  %v19279_v58 = vld [vmem:[%s33245_s0 + $0x1ba] sm:$0xff] }
 0x256   :  { %22738 = vmatmul.mubr.msk.f32.gmra.mrb[14].mxu1 %vm292_vm1, %v28232_v16 }
 0x257   :  { %22740 = vmatprep.mubr.msk.f32.mxu1 %vm292_vm1, %v28249_v19 }
 0x258   :  { %23505 = vmatmul.mubr.msk.f32.gmra.mrb[8].mxu0 %vm292_vm1, %v19248_v61  ;;  %v19280_v61 = vld [vmem:[%s33245_s0 + $0x1c2] sm:$0xff] }
 0x259   :  { %23507 = vmatprep.mubr.msk.f32.mxu0 %vm292_vm1, %v19249_v62  ;;  %v19281_v62 = vld [vmem:[%s33245_s0 + $0x1ca] sm:$0xff] }
 0x25a   :  { %22741 = vmatmul.mubr.msk.f32.gmra.mrb[16].mxu1 %vm292_vm1, %v28254_v20 }
 0x25b   :  { %22743 = vmatprep.mubr.msk.f32.mxu1 %vm292_vm1, %v28271_v23 }
 0x25c   :  { %23508 = vmatmul.mubr.msk.f32.gmra.mrb[10].mxu0 %vm292_vm1, %v19250_v1  ;;  %v19282_v1 = vld [vmem:[%s33245_s0 + $0x1d2] sm:$0xff] }
 0x25d   :  { %23510 = vmatprep.mubr.msk.f32.mxu0 %vm292_vm1, %v19251_v2  ;;  %v19283_v2 = vld [vmem:[%s33245_s0 + $0x1e2] sm:$0xff] }
 0x25e   :  { %22744 = vmatmul.mubr.msk.f32.gmra.mrb[18].mxu1 %vm292_vm1, %v28276_v24 }
 0x25f   :  { %22746 = vmatprep.mubr.msk.f32.mxu1 %vm292_vm1, %v28293_v27 }
 0x260   :  { %23511 = vmatmul.mubr.msk.f32.gmra.mrb[12].mxu0 %vm292_vm1, %v19252_v5  ;;  %v28513_v5 = vld [vmem:[%s33245_s0 + $0x190] sm:$0xff] }
 0x261   :  { %23513 = vmatprep.mubr.msk.f32.mxu0 %vm292_vm1, %v19253_v6  ;;  %v28518_v6 = vld [vmem:[%s33245_s0 + $0x198] sm:$0xff] }
 0x262   :  { %22747 = vmatmul.mubr.msk.f32.gmra.mrb[20].mxu1 %vm292_vm1, %v28298_v28 }
 0x263   :  { %22749 = vmatprep.mubr.msk.f32.mxu1 %vm292_vm1, %v28315_v31 }
 0x264   :  { %23514 = vmatmul.mubr.msk.f32.gmra.mrb[14].mxu0 %vm292_vm1, %v19254_v9  ;;  %v19284_v9 = vld [vmem:[%s33245_s0 + $0x1ea] sm:$0xff] }
 0x265   :  { %23516 = vmatprep.mubr.msk.f32.mxu0 %vm292_vm1, %v19255_v10  ;;  %v19285_v10 = vld [vmem:[%s33245_s0 + $0x1f2] sm:$0xff] }
 0x266   :  { %22750 = vmatmul.mubr.msk.f32.gmra.mrb[22].mxu1 %vm292_vm1, %v28320_v32 }
 0x267   :  { %22752 = vmatprep.mubr.msk.f32.mxu1 %vm292_vm1, %v28337_v35 }
 0x268   :  { %23517 = vmatmul.mubr.msk.f32.gmra.mrb[16].mxu0 %vm292_vm1, %v19256_v13  ;;  %v28535_v13 = vld [vmem:[%s33245_s0 + $0x1a0] sm:$0xff] }
 0x269   :  { %23519 = vmatprep.mubr.msk.f32.mxu0 %vm292_vm1, %v19257_v14  ;;  %v28540_v14 = vld [vmem:[%s33245_s0 + $0x1a8] sm:$0xff] }
 0x26a   :  { %22753 = vmatmul.mubr.msk.f32.gmra.mrb[24].mxu1 %vm292_vm1, %v28342_v36 }
 0x26b   :  { %22755 = vmatprep.mubr.msk.f32.mxu1 %vm292_vm1, %v28359_v39 }
 0x26c   :  { %23520 = vmatmul.mubr.msk.f32.gmra.mrb[18].mxu0 %vm292_vm1, %v19258_v17  ;;  %v19286_v17 = vld [vmem:[%s33245_s0 + $0x1fa] sm:$0xff] }
 0x26d   :  { %23522 = vmatprep.mubr.msk.f32.mxu0 %vm292_vm1, %v19259_v18  ;;  %v19287_v18 = vld [vmem:[%s33245_s0 + $0x20a] sm:$0xff] }
 0x26e   :  { %22756 = vmatmul.mubr.msk.f32.gmra.mrb[26].mxu1 %vm292_vm1, %v28364_v40 }
 0x26f   :  { %22758 = vmatprep.mubr.msk.f32.mxu1 %vm292_vm1, %v28381_v43 }
 0x270   :  { %23523 = vmatmul.mubr.msk.f32.gmra.mrb[20].mxu0 %vm292_vm1, %v19260_v21  ;;  %v28557_v21 = vld [vmem:[%s33245_s0 + $0x1b8] sm:$0xff] }
 0x271   :  { %23525 = vmatprep.mubr.msk.f32.mxu0 %vm292_vm1, %v19261_v22  ;;  %v28562_v22 = vld [vmem:[%s33245_s0 + $0x1c0] sm:$0xff] }
 0x272   :  { %22759 = vmatmul.mubr.msk.f32.gmra.mrb[28].mxu1 %vm292_vm1, %v28386_v44 }
 0x273   :  { %22761 = vmatprep.mubr.msk.f32.mxu1 %vm292_vm1, %v28403_v47 }
 0x274   :  { %23526 = vmatmul.mubr.msk.f32.gmra.mrb[22].mxu0 %vm292_vm1, %v19262_v25  ;;  %v19288_v25 = vld [vmem:[%s33245_s0 + $0x212] sm:$0xff] }
 0x275   :  { %23528 = vmatprep.mubr.msk.f32.mxu0 %vm292_vm1, %v19263_v26  ;;  %v19289_v26 = vld [vmem:[%s33245_s0 + $0x21a] sm:$0xff] }
 0x276   :  { %22762 = vmatmul.mubr.msk.f32.gmra.mrb[30].mxu1 %vm292_vm1, %v28408_v48 }
 0x277   :  { %22764 = vmatprep.mubr.msk.f32.mxu1 %vm292_vm1, %v28425_v51 }
 0x278   :  { %23529 = vmatmul.mubr.msk.f32.gmra.mrb[24].mxu0 %vm292_vm1, %v19264_v29  ;;  %v28579_v29 = vld [vmem:[%s33245_s0 + $0x1c8] sm:$0xff] }
 0x279   :  { %23531 = vmatprep.mubr.msk.f32.mxu0 %vm292_vm1, %v19265_v30  ;;  %v28584_v30 = vld [vmem:[%s33245_s0 + $0x1d0] sm:$0xff] }
 0x27a   :  { %22765 = vmatmul.mubr.msk.f32.gmra.mrb[32].mxu1 %vm292_vm1, %v28430_v52 }
 0x27b   :  { %22767 = vmatprep.mubr.msk.f32.mxu1 %vm292_vm1, %v28447_v55 }
 0x27c   :  { %23532 = vmatmul.mubr.msk.f32.gmra.mrb[26].mxu0 %vm292_vm1, %v19266_v33  ;;  %v19290_v33 = vld [vmem:[%s33245_s0 + $0x222] sm:$0xff] }
 0x27d   :  { %23534 = vmatprep.mubr.msk.f32.mxu0 %vm292_vm1, %v19267_v34  ;;  %v19291_v34 = vld [vmem:[%s33245_s0 + $0x232] sm:$0xff] }
 0x27e   :  { %22768 = vmatmul.mubr.msk.f32.gmra.mrb[34].mxu1 %vm292_vm1, %v28452_v56 }
 0x27f   :  { %22770 = vmatprep.mubr.msk.f32.mxu1 %vm292_vm1, %v28469_v59 }
 0x280   :  { %23535 = vmatmul.mubr.msk.f32.gmra.mrb[28].mxu0 %vm292_vm1, %v19268_v37  ;;  %v28601_v37 = vld [vmem:[%s33245_s0 + $0x1e0] sm:$0xff] }
 0x281   :  { %23537 = vmatprep.mubr.msk.f32.mxu0 %vm292_vm1, %v19269_v38  ;;  %v28606_v38 = vld [vmem:[%s33245_s0 + $0x1e8] sm:$0xff] }
 0x282   :  { %22771 = vmatmul.mubr.msk.f32.gmra.mrb[36].mxu1 %vm292_vm1, %v28474_v60 }
 0x283   :  { %22773 = vmatprep.mubr.msk.f32.mxu1 %vm292_vm1, %v28491_v63 }
 0x284   :  { %23538 = vmatmul.mubr.msk.f32.gmra.mrb[30].mxu0 %vm292_vm1, %v19270_v41  ;;  %v19292_v41 = vld [vmem:[%s33245_s0 + $0x23a] sm:$0xff] }
 0x285   :  { %23540 = vmatprep.mubr.msk.f32.mxu0 %vm292_vm1, %v19271_v42  ;;  %v19293_v42 = vld [vmem:[%s33245_s0 + $0x242] sm:$0xff] }
 0x286   :  { %22774 = vmatmul.mubr.msk.f32.gmra.mrb[38].mxu1 %vm292_vm1, %v28496_v0 }
 0x287   :  { %22776 = vmatprep.mubr.msk.f32.mxu1 %vm292_vm1, %v28513_v5 }
 0x288   :  { %23541 = vmatmul.mubr.msk.f32.gmra.mrb[32].mxu0 %vm292_vm1, %v19272_v45  ;;  %v28623_v45 = vld [vmem:[%s33245_s0 + $0x1f0] sm:$0xff] }
 0x289   :  { %23543 = vmatprep.mubr.msk.f32.mxu0 %vm292_vm1, %v19273_v46  ;;  %v28628_v46 = vld [vmem:[%s33245_s0 + $0x1f8] sm:$0xff] }
 0x28a   :  { %22777 = vmatmul.mubr.msk.f32.gmra.mrb[40].mxu1 %vm292_vm1, %v28518_v6 }
 0x28b   :  { %22779 = vmatprep.mubr.msk.f32.mxu1 %vm292_vm1, %v28535_v13 }
 0x28c   :  { %23544 = vmatmul.mubr.msk.f32.gmra.mrb[34].mxu0 %vm292_vm1, %v19274_v49  ;;  %v19294_v49 = vld [vmem:[%s33245_s0 + $0x24a] sm:$0xff] }
 0x28d   :  { %23546 = vmatprep.mubr.msk.f32.mxu0 %vm292_vm1, %v19275_v50  ;;  %v19295_v50 = vld [vmem:[%s33245_s0 + $0x25a] sm:$0xff] }
 0x28e   :  { %22780 = vmatmul.mubr.msk.f32.gmra.mrb[42].mxu1 %vm292_vm1, %v28540_v14 }
 0x28f   :  { %22782 = vmatprep.mubr.msk.f32.mxu1 %vm292_vm1, %v28557_v21 }
 0x290   :  { %23547 = vmatmul.mubr.msk.f32.gmra.mrb[36].mxu0 %vm292_vm1, %v19276_v53  ;;  %v28645_v53 = vld [vmem:[%s33245_s0 + $0x208] sm:$0xff] }
 0x291   :  { %23549 = vmatprep.mubr.msk.f32.mxu0 %vm292_vm1, %v19277_v54  ;;  %v28650_v54 = vld [vmem:[%s33245_s0 + $0x210] sm:$0xff] }
 0x292   :  { %22783 = vmatmul.mubr.msk.f32.gmra.mrb[44].mxu1 %vm292_vm1, %v28562_v22 }
 0x293   :  { %22785 = vmatprep.mubr.msk.f32.mxu1 %vm292_vm1, %v28579_v29 }
 0x294   :  { %23550 = vmatmul.mubr.msk.f32.gmra.mrb[38].mxu0 %vm292_vm1, %v19278_v57  ;;  %v19296_v57 = vld [vmem:[%s33245_s0 + $0x262] sm:$0xff] }
 0x295   :  { %23552 = vmatprep.mubr.msk.f32.mxu0 %vm292_vm1, %v19279_v58  ;;  %v19297_v58 = vld [vmem:[%s33245_s0 + $0x26a] sm:$0xff] }
 0x296   :  { %22786 = vmatmul.mubr.msk.f32.gmra.mrb[46].mxu1 %vm292_vm1, %v28584_v30 }
 0x297   :  { %22788 = vmatprep.mubr.msk.f32.mxu1 %vm292_vm1, %v28601_v37 }
 0x298   :  { %23553 = vmatmul.mubr.msk.f32.gmra.mrb[40].mxu0 %vm292_vm1, %v19280_v61  ;;  %v28667_v61 = vld [vmem:[%s33245_s0 + $0x218] sm:$0xff] }
 0x299   :  { %23555 = vmatprep.mubr.msk.f32.mxu0 %vm292_vm1, %v19281_v62  ;;  %v28672_v62 = vld [vmem:[%s33245_s0 + $0x220] sm:$0xff] }
 0x29a   :  { %22789 = vmatmul.mubr.msk.f32.gmra.mrb[48].mxu1 %vm292_vm1, %v28606_v38 }
 0x29b   :  { %22791 = vmatprep.mubr.msk.f32.mxu1 %vm292_vm1, %v28623_v45 }
 0x29c   :  { %23556 = vmatmul.mubr.msk.f32.gmra.mrb[42].mxu0 %vm292_vm1, %v19282_v1  ;;  %v19298_v1 = vld [vmem:[%s33245_s0 + $0x272] sm:$0xff] }
 0x29d   :  { %23558 = vmatprep.mubr.msk.f32.mxu0 %vm292_vm1, %v19283_v2  ;;  %v19299_v2 = vld [vmem:[%s33245_s0 + $0x282] sm:$0xff] }
 0x29e   :  { %22792 = vmatmul.mubr.msk.f32.gmra.mrb[50].mxu1 %vm292_vm1, %v28628_v46 }
 0x29f   :  { %22794 = vmatprep.mubr.msk.f32.mxu1 %vm292_vm1, %v28645_v53 }
 0x2a0   :  { %23559 = vmatmul.mubr.msk.f32.gmra.mrb[44].mxu0 %vm292_vm1, %v19284_v9  ;;  %v28689_v9 = vld [vmem:[%s33245_s0 + $0x230] sm:$0xff] }
 0x2a1   :  { %23561 = vmatprep.mubr.msk.f32.mxu0 %vm292_vm1, %v19285_v10  ;;  %v28694_v10 = vld [vmem:[%s33245_s0 + $0x238] sm:$0xff] }
 0x2a2   :  { %22795 = vmatmul.mubr.msk.f32.gmra.mrb[52].mxu1 %vm292_vm1, %v28650_v54 }
 0x2a3   :  { %22797 = vmatprep.mubr.msk.f32.mxu1 %vm292_vm1, %v28667_v61 }
 0x2a4   :  { %23562 = vmatmul.mubr.msk.f32.gmra.mrb[46].mxu0 %vm292_vm1, %v19286_v17  ;;  %v19300_v17 = vld [vmem:[%s33245_s0 + $0x28a] sm:$0xff] }
 0x2a5   :  { %23564 = vmatprep.mubr.msk.f32.mxu0 %vm292_vm1, %v19287_v18  ;;  %v19301_v18 = vld [vmem:[%s33245_s0 + $0x292] sm:$0xff] }
 0x2a6   :  { %22798 = vmatmul.mubr.msk.f32.gmra.mrb[54].mxu1 %vm292_vm1, %v28672_v62 }
 0x2a7   :  { %22800 = vmatprep.mubr.msk.f32.mxu1 %vm292_vm1, %v28689_v9 }
 0x2a8   :  { %23565 = vmatmul.mubr.msk.f32.gmra.mrb[48].mxu0 %vm292_vm1, %v19288_v25  ;;  %v28711_v25 = vld [vmem:[%s33245_s0 + $0x240] sm:$0xff] }
 0x2a9   :  { %23567 = vmatprep.mubr.msk.f32.mxu0 %vm292_vm1, %v19289_v26  ;;  %v28716_v26 = vld [vmem:[%s33245_s0 + $0x248] sm:$0xff] }
 0x2aa   :  { %22801 = vmatmul.mubr.msk.f32.gmra.mrb[56].mxu1 %vm292_vm1, %v28694_v10 }
 0x2ab   :  { %22803 = vmatprep.mubr.msk.f32.mxu1 %vm292_vm1, %v28711_v25 }
 0x2ac   :  { %23568 = vmatmul.mubr.msk.f32.gmra.mrb[50].mxu0 %vm292_vm1, %v19290_v33  ;;  %v19302_v33 = vld [vmem:[%s33245_s0 + $0x29a] sm:$0xff] }
 0x2ad   :  { %23570 = vmatprep.mubr.msk.f32.mxu0 %vm292_vm1, %v19291_v34  ;;  %v19303_v34 = vld [vmem:[%s33245_s0 + $0x2aa] sm:$0xff] }
 0x2ae   :  { %22804 = vmatmul.mubr.msk.f32.gmra.mrb[58].mxu1 %vm292_vm1, %v28716_v26 }
 0x2b0   :  { %23571 = vmatmul.mubr.msk.f32.gmra.mrb[52].mxu0 %vm292_vm1, %v19292_v41  ;;  %v28733_v41 = vld [vmem:[%s33245_s0 + $0x258] sm:$0xff] }
 0x2b1   :  { %23573 = vmatprep.mubr.msk.f32.mxu0 %vm292_vm1, %v19293_v42  ;;  %v28738_v42 = vld [vmem:[%s33245_s0 + $0x260] sm:$0xff]  ;;  %22806 = vmatprep.mubr.msk.f32.mxu1 %vm292_vm1, %v28733_v41 }
 0x2b2   :  { %22807 = vmatmul.mubr.msk.f32.gmra.mrb[60].mxu1 %vm292_vm1, %v28738_v42 }
 0x2b4   :  { %23574 = vmatmul.mubr.msk.f32.gmra.mrb[54].mxu0 %vm292_vm1, %v19294_v49  ;;  %v19304_v49 = vld [vmem:[%s33245_s0 + $0x2b2] sm:$0xff] }
 0x2b5   :  { %23576 = vmatprep.mubr.msk.f32.mxu0 %vm292_vm1, %v19295_v50  ;;  %v19305_v50 = vld [vmem:[%s33245_s0 + $0x2ba] sm:$0xff] }
 0x2b8   :  { %23577 = vmatmul.mubr.msk.f32.gmra.mrb[56].mxu0 %vm292_vm1, %v19296_v57  ;;  %v28755_v57 = vld [vmem:[%s33245_s0 + $0x268] sm:$0xff] }
 0x2b9   :  { %23579 = vmatprep.mubr.msk.f32.mxu0 %vm292_vm1, %v19297_v58  ;;  %v28760_v58 = vld [vmem:[%s33245_s0 + $0x270] sm:$0xff]  ;;  %22809 = vmatprep.mubr.msk.f32.mxu1 %vm292_vm1, %v28755_v57 }
 0x2ba   :  { %22810 = vmatmul.mubr.msk.f32.gmra.mrb[62].mxu1 %vm292_vm1, %v28760_v58 }
 0x2bc   :  { %23580 = vmatmul.mubr.msk.f32.gmra.mrb[58].mxu0 %vm292_vm1, %v19298_v1  ;;  %v19306_v1 = vld [vmem:[%s33245_s0 + $0x2c2] sm:$0xff] }
 0x2bd   :  { %23582 = vmatprep.mubr.msk.f32.mxu0 %vm292_vm1, %v19299_v2  ;;  %v19307_v2 = vld [vmem:[%s33245_s0 + $0x2d2] sm:$0xff] }
 0x2c0   :  { %23583 = vmatmul.mubr.msk.f32.gmra.mrb[60].mxu0 %vm292_vm1, %v19300_v17  ;;  %v28777_v17 = vld [vmem:[%s33245_s0 + $0x280] sm:$0xff] }
 0x2c1   :  { %23585 = vmatprep.mubr.msk.f32.mxu0 %vm292_vm1, %v19301_v18  ;;  %v28782_v18 = vld [vmem:[%s33245_s0 + $0x288] sm:$0xff]  ;;  %22812 = vmatprep.mubr.msk.f32.mxu1 %vm292_vm1, %v28777_v17 }
 0x2c2   :  { %33351 = vst [vmem:[#allocation5_spill] sm:$0xff] %v28782_v18  ;;  %22813 = vmatmul.mubr.msk.f32.gmra.mrb[64].mxu1 %vm292_vm1, %v28782_v18  ;;  %v28855_v18 = vld [vmem:[%s33245_s0 + $0x2c0] sm:$0xff] }
 0x2c3   :  { %33357 = vst [vmem:[#allocation11_spill] sm:$0xff] %v28855_v18 }
 0x2c4   :  { %23586 = vmatmul.mubr.msk.f32.gmra.mrb[62].mxu0 %vm292_vm1, %v19302_v33  ;;  %v19308_v33 = vld [vmem:[%s33245_s0 + $0x2da] sm:$0xff] }
 0x2c5   :  { %23588 = vmatprep.mubr.msk.f32.mxu0 %vm292_vm1, %v19303_v34  ;;  %v19309_v34 = vld [vmem:[%s33245_s0 + $0x2e2] sm:$0xff] }
 0x2c8   :  { %23589 = vmatmul.mubr.msk.f32.gmra.mrb[64].mxu0 %vm292_vm1, %v19304_v49  ;;  %v28799_v49 = vld [vmem:[%s33245_s0 + $0x290] sm:$0xff] }
 0x2c9   :  { %23591 = vmatprep.mubr.msk.f32.mxu0 %vm292_vm1, %v19305_v50  ;;  %33352 = vst [vmem:[#allocation6_spill] sm:$0xff] %v28799_v49  ;;  %v28804_v50 = vld [vmem:[%s33245_s0 + $0x298] sm:$0xff]  ;;  %22815 = vmatprep.mubr.msk.f32.mxu1 %vm292_vm1, %v28799_v49  ;;  %v28831_v49 = vld [vmem:[%s33245_s0 + $0x2b0] sm:$0xff] }
 0x2ca   :  { %33353 = vst [vmem:[#allocation7_spill] sm:$0xff] %v28804_v50  ;;  %22816 = vmatmul.mubr.msk.f32.gmra.mrb[66].mxu1 %vm292_vm1, %v28804_v50  ;;  %33355 = vst [vmem:[#allocation9_spill] sm:$0xff] %v28831_v49  ;;  %v19313_v50 = vld [vmem:[%s33245_s0 + $0x30a] sm:$0xff] }
 0x2cc   :  { %23592 = vmatmul.mubr.msk.f32.gmra.mrb[66].mxu0 %vm292_vm1, %v19306_v1  ;;  %v19310_v1 = vld [vmem:[%s33245_s0 + $0x2ea] sm:$0xff] }
 0x2cd   :  { %23594 = vmatprep.mubr.msk.f32.mxu0 %vm292_vm1, %v19307_v2  ;;  %v19311_v2 = vld [vmem:[%s33245_s0 + $0x2fa] sm:$0xff] }
 0x2d0   :  { %23595 = vmatmul.mubr.msk.f32.gmra.mrb[68].mxu0 %vm292_vm1, %v19308_v33  ;;  %v28821_v33 = vld [vmem:[%s33244_s1 + $0x1c] sm:$0x7] }
 0x2d1   :  { %23597 = vmatprep.mubr.msk.f32.mxu0 %vm292_vm1, %v19309_v34  ;;  %v28826_v34 = vld [vmem:[%s33245_s0 + $0x2a8] sm:$0xff]  ;;  %23878 = vmatprep.subr.msk.mxu0 %vm677_vm0, %v28821_v33 }
 0x2d2   :  { %33354 = vst [vmem:[#allocation8_spill] sm:$0xff] %v28826_v34  ;;  %22818 = vmatprep.mubr.msk.f32.mxu1 %vm292_vm1, %v28826_v34  ;;  %v19314_v34 = vld [vmem:[%s33245_s0 + $0x312] sm:$0xff] }
 0x2d3   :  { %22819 = vmatmul.mubr.msk.f32.gmra.mrb[68].mxu1 %vm292_vm1, %v28831_v49  ;;  %v28877_v49 = vld [vmem:[%s33245_s0 + $0x2d8] sm:$0xff] }
 0x2d4   :  { %23598 = vmatmul.mubr.msk.f32.gmra.mrb[70].mxu0 %vm292_vm1, %v19310_v1  ;;  %v19312_v1 = vld [vmem:[%s33245_s0 + $0x302] sm:$0xff]  ;;  %33359 = vst [vmem:[#allocation13_spill] sm:$0xff] %v28877_v49 }
 0x2d5   :  { %23600 = vmatprep.mubr.msk.f32.mxu0 %vm292_vm1, %v19311_v2  ;;  %v28850_v2 = vld [vmem:[%s33245_s0 + $0x2b8] sm:$0xff] }
 0x2d6   :  { %33356 = vst [vmem:[#allocation10_spill] sm:$0xff] %v28850_v2  ;;  %22821 = vmatprep.mubr.msk.f32.mxu1 %vm292_vm1, %v28850_v2  ;;  %v19316_v2 = vld [vmem:[%s33245_s0 + $0x32a] sm:$0xff] }
 0x2d7   :  { %22822 = vmatmul.mubr.msk.f32.gmra.mrb[70].mxu1 %vm292_vm1, %v28855_v18  ;;  %v28899_v18 = vld [vmem:[%s33245_s0 + $0x2e8] sm:$0xff] }
 0x2d8   :  { %23601 = vmatmul.mubr.msk.f32.gmra.mrb[72].mxu0 %vm292_vm1, %v19312_v1  ;;  %v19315_v1 = vld [vmem:[%s33245_s0 + $0x322] sm:$0xff]  ;;  %33361 = vst [vmem:[#allocation15_spill] sm:$0xff] %v28899_v18 }
 0x2d9   :  { %23603 = vmatprep.mubr.msk.f32.mxu0 %vm292_vm1, %v19313_v50  ;;  %v28872_v50 = vld [vmem:[%s33245_s0 + $0x2d0] sm:$0xff] }
 0x2da   :  { %33358 = vst [vmem:[#allocation12_spill] sm:$0xff] %v28872_v50  ;;  %22824 = vmatprep.mubr.msk.f32.mxu1 %vm292_vm1, %v28872_v50  ;;  %v19318_v50 = vld [vmem:[%s33245_s0 + $0x33a] sm:$0xff] }
 0x2db   :  { %22825 = vmatmul.mubr.msk.f32.gmra.mrb[72].mxu1 %vm292_vm1, %v28877_v49  ;;  %v28921_v49 = vld [vmem:[%s33245_s0 + $0x300] sm:$0xff] }
 0x2dc   :  { %23604 = vmatmul.mubr.msk.f32.gmra.mrb[74].mxu0 %vm292_vm1, %v19314_v34  ;;  %v19317_v34 = vld [vmem:[%s33245_s0 + $0x332] sm:$0xff]  ;;  %33363 = vst [vmem:[#allocation17_spill] sm:$0xff] %v28921_v49 }
 0x2dd   :  { %23606 = vmatprep.mubr.msk.f32.mxu0 %vm292_vm1, %v19315_v1  ;;  %v28894_v1 = vld [vmem:[%s33245_s0 + $0x2e0] sm:$0xff] }
 0x2de   :  { %33360 = vst [vmem:[#allocation14_spill] sm:$0xff] %v28894_v1  ;;  %22827 = vmatprep.mubr.msk.f32.mxu1 %vm292_vm1, %v28894_v1  ;;  %v19320_v1 = vld [vmem:[%s33245_s0 + $0x352] sm:$0xff] }
 0x2df   :  { %22828 = vmatmul.mubr.msk.f32.gmra.mrb[74].mxu1 %vm292_vm1, %v28899_v18  ;;  %v28943_v18 = vld [vmem:[%s33245_s0 + $0x310] sm:$0xff] }
 0x2e0   :  { %23607 = vmatmul.mubr.msk.f32.gmra.mrb[76].mxu0 %vm292_vm1, %v19316_v2  ;;  %v19319_v2 = vld [vmem:[%s33245_s0 + $0x34a] sm:$0xff]  ;;  %33365 = vst [vmem:[#allocation19_spill] sm:$0xff] %v28943_v18 }
 0x2e1   :  { %23609 = vmatprep.mubr.msk.f32.mxu0 %vm292_vm1, %v19317_v34  ;;  %v28916_v34 = vld [vmem:[%s33245_s0 + $0x2f8] sm:$0xff] }
 0x2e2   :  { %33362 = vst [vmem:[#allocation16_spill] sm:$0xff] %v28916_v34  ;;  %22830 = vmatprep.mubr.msk.f32.mxu1 %vm292_vm1, %v28916_v34  ;;  %v19322_v34 = vld [vmem:[%s33245_s0 + $0x362] sm:$0xff] }
 0x2e3   :  { %22831 = vmatmul.mubr.msk.f32.gmra.mrb[76].mxu1 %vm292_vm1, %v28921_v49  ;;  %v28965_v49 = vld [vmem:[%s33245_s0 + $0x328] sm:$0xff] }
 0x2e4   :  { %23610 = vmatmul.mubr.msk.f32.gmra.mrb[78].mxu0 %vm292_vm1, %v19318_v50  ;;  %v19321_v50 = vld [vmem:[%s33245_s0 + $0x35a] sm:$0xff]  ;;  %33367 = vst [vmem:[#allocation21_spill] sm:$0xff] %v28965_v49 }
 0x2e5   :  { %23612 = vmatprep.mubr.msk.f32.mxu0 %vm292_vm1, %v19319_v2  ;;  %v28938_v2 = vld [vmem:[%s33245_s0 + $0x308] sm:$0xff] }
 0x2e6   :  { %33364 = vst [vmem:[#allocation18_spill] sm:$0xff] %v28938_v2  ;;  %22833 = vmatprep.mubr.msk.f32.mxu1 %vm292_vm1, %v28938_v2  ;;  %v19324_v2 = vld [vmem:[%s33245_s0 + $0x37a] sm:$0xff] }
 0x2e7   :  { %22834 = vmatmul.mubr.msk.f32.gmra.mrb[78].mxu1 %vm292_vm1, %v28943_v18  ;;  %v28987_v18 = vld [vmem:[%s33245_s0 + $0x338] sm:$0xff] }
 0x2e8   :  { %23613 = vmatmul.mubr.msk.f32.gmra.mrb[80].mxu0 %vm292_vm1, %v19320_v1  ;;  %v19323_v1 = vld [vmem:[%s33245_s0 + $0x372] sm:$0xff]  ;;  %33369 = vst [vmem:[#allocation23_spill] sm:$0xff] %v28987_v18 }
 0x2e9   :  { %23615 = vmatprep.mubr.msk.f32.mxu0 %vm292_vm1, %v19321_v50  ;;  %v28960_v50 = vld [vmem:[%s33245_s0 + $0x320] sm:$0xff] }
 0x2ea   :  { %33366 = vst [vmem:[#allocation20_spill] sm:$0xff] %v28960_v50  ;;  %22836 = vmatprep.mubr.msk.f32.mxu1 %vm292_vm1, %v28960_v50  ;;  %v19326_v50 = vld [vmem:[%s33245_s0 + $0x38a] sm:$0xff] }
 0x2eb   :  { %22837 = vmatmul.mubr.msk.f32.gmra.mrb[80].mxu1 %vm292_vm1, %v28965_v49  ;;  %v29009_v49 = vld [vmem:[%s33245_s0 + $0x350] sm:$0xff] }
 0x2ec   :  { %23616 = vmatmul.mubr.msk.f32.gmra.mrb[82].mxu0 %vm292_vm1, %v19322_v34  ;;  %v19325_v34 = vld [vmem:[%s33245_s0 + $0x382] sm:$0xff]  ;;  %33371 = vst [vmem:[#allocation25_spill] sm:$0xff] %v29009_v49 }
 0x2ed   :  { %23618 = vmatprep.mubr.msk.f32.mxu0 %vm292_vm1, %v19323_v1  ;;  %v28982_v1 = vld [vmem:[%s33245_s0 + $0x330] sm:$0xff] }
 0x2ee   :  { %33368 = vst [vmem:[#allocation22_spill] sm:$0xff] %v28982_v1  ;;  %22839 = vmatprep.mubr.msk.f32.mxu1 %vm292_vm1, %v28982_v1  ;;  %v19328_v1 = vld [vmem:[%s33245_s0 + $0x3a2] sm:$0xff] }
 0x2ef   :  { %22840 = vmatmul.mubr.msk.f32.gmra.mrb[82].mxu1 %vm292_vm1, %v28987_v18  ;;  %v29031_v18 = vld [vmem:[%s33245_s0 + $0x360] sm:$0xff] }
 0x2f0   :  { %23619 = vmatmul.mubr.msk.f32.gmra.mrb[84].mxu0 %vm292_vm1, %v19324_v2  ;;  %v19327_v2 = vld [vmem:[%s33245_s0 + $0x39a] sm:$0xff]  ;;  %33373 = vst [vmem:[#allocation27_spill] sm:$0xff] %v29031_v18 }
 0x2f1   :  { %23621 = vmatprep.mubr.msk.f32.mxu0 %vm292_vm1, %v19325_v34  ;;  %v29004_v34 = vld [vmem:[%s33245_s0 + $0x348] sm:$0xff] }
 0x2f2   :  { %33370 = vst [vmem:[#allocation24_spill] sm:$0xff] %v29004_v34  ;;  %22842 = vmatprep.mubr.msk.f32.mxu1 %vm292_vm1, %v29004_v34  ;;  %v19330_v34 = vld [vmem:[%s33245_s0 + $0x3b2] sm:$0xff] }
 0x2f3   :  { %22843 = vmatmul.mubr.msk.f32.gmra.mrb[84].mxu1 %vm292_vm1, %v29009_v49  ;;  %v29053_v49 = vld [vmem:[%s33245_s0 + $0x378] sm:$0xff] }
 0x2f4   :  { %23622 = vmatmul.mubr.msk.f32.gmra.mrb[86].mxu0 %vm292_vm1, %v19326_v50  ;;  %v19329_v50 = vld [vmem:[%s33245_s0 + $0x3aa] sm:$0xff]  ;;  %33375 = vst [vmem:[#allocation29_spill] sm:$0xff] %v29053_v49 }
 0x2f5   :  { %23624 = vmatprep.mubr.msk.f32.mxu0 %vm292_vm1, %v19327_v2  ;;  %v29026_v2 = vld [vmem:[%s33245_s0 + $0x358] sm:$0xff] }
 0x2f6   :  { %33372 = vst [vmem:[#allocation26_spill] sm:$0xff] %v29026_v2  ;;  %22845 = vmatprep.mubr.msk.f32.mxu1 %vm292_vm1, %v29026_v2  ;;  %v19332_v2 = vld [vmem:[%s33245_s0 + $0x3ca] sm:$0xff] }
 0x2f7   :  { %22846 = vmatmul.mubr.msk.f32.gmra.mrb[86].mxu1 %vm292_vm1, %v29031_v18  ;;  %v29075_v18 = vld [vmem:[%s33245_s0 + $0x388] sm:$0xff] }
 0x2f8   :  { %23625 = vmatmul.mubr.msk.f32.gmra.mrb[88].mxu0 %vm292_vm1, %v19328_v1  ;;  %v19331_v1 = vld [vmem:[%s33245_s0 + $0x3c2] sm:$0xff]  ;;  %33377 = vst [vmem:[#allocation31_spill] sm:$0xff] %v29075_v18 }
 0x2f9   :  { %23627 = vmatprep.mubr.msk.f32.mxu0 %vm292_vm1, %v19329_v50  ;;  %v29048_v50 = vld [vmem:[%s33245_s0 + $0x370] sm:$0xff] }
 0x2fa   :  { %33374 = vst [vmem:[#allocation28_spill] sm:$0xff] %v29048_v50  ;;  %22848 = vmatprep.mubr.msk.f32.mxu1 %vm292_vm1, %v29048_v50  ;;  %v19334_v50 = vld [vmem:[%s33245_s0 + $0x3da] sm:$0xff] }
 0x2fb   :  { %22849 = vmatmul.mubr.msk.f32.gmra.mrb[88].mxu1 %vm292_vm1, %v29053_v49  ;;  %v29097_v49 = vld [vmem:[%s33245_s0 + $0x3a0] sm:$0xff] }
 0x2fc   :  { %23628 = vmatmul.mubr.msk.f32.gmra.mrb[90].mxu0 %vm292_vm1, %v19330_v34  ;;  %v19333_v34 = vld [vmem:[%s33245_s0 + $0x3d2] sm:$0xff]  ;;  %33379 = vst [vmem:[#allocation33_spill] sm:$0xff] %v29097_v49 }
 0x2fd   :  { %23630 = vmatprep.mubr.msk.f32.mxu0 %vm292_vm1, %v19331_v1  ;;  %v29070_v1 = vld [vmem:[%s33245_s0 + $0x380] sm:$0xff] }
 0x2fe   :  { %33376 = vst [vmem:[#allocation30_spill] sm:$0xff] %v29070_v1  ;;  %22851 = vmatprep.mubr.msk.f32.mxu1 %vm292_vm1, %v29070_v1  ;;  %v19336_v1 = vld [vmem:[%s33245_s0 + $0x3f2] sm:$0xff] }
 0x2ff   :  { %22852 = vmatmul.mubr.msk.f32.gmra.mrb[90].mxu1 %vm292_vm1, %v29075_v18  ;;  %v29119_v18 = vld [vmem:[%s33245_s0 + $0x3b0] sm:$0xff] }
 0x300   :  { %23631 = vmatmul.mubr.msk.f32.gmra.mrb[92].mxu0 %vm292_vm1, %v19332_v2  ;;  %v19335_v2 = vld [vmem:[%s33245_s0 + $0x3ea] sm:$0xff]  ;;  %33381 = vst [vmem:[#allocation35_spill] sm:$0xff] %v29119_v18 }
 0x301   :  { %23633 = vmatprep.mubr.msk.f32.mxu0 %vm292_vm1, %v19333_v34  ;;  %v29092_v34 = vld [vmem:[%s33245_s0 + $0x398] sm:$0xff] }
 0x302   :  { %33378 = vst [vmem:[#allocation32_spill] sm:$0xff] %v29092_v34  ;;  %22854 = vmatprep.mubr.msk.f32.mxu1 %vm292_vm1, %v29092_v34  ;;  %v19338_v34 = vld [vmem:[%s33245_s0 + $0x402] sm:$0xff] }
 0x303   :  { %22855 = vmatmul.mubr.msk.f32.gmra.mrb[92].mxu1 %vm292_vm1, %v29097_v49  ;;  %v29141_v49 = vld [vmem:[%s33245_s0 + $0x3c8] sm:$0xff] }
 0x304   :  { %23634 = vmatmul.mubr.msk.f32.gmra.mrb[94].mxu0 %vm292_vm1, %v19334_v50  ;;  %v19337_v50 = vld [vmem:[%s33245_s0 + $0x3fa] sm:$0xff]  ;;  %33383 = vst [vmem:[#allocation37_spill] sm:$0xff] %v29141_v49 }
 0x305   :  { %23636 = vmatprep.mubr.msk.f32.mxu0 %vm292_vm1, %v19335_v2  ;;  %v29114_v2 = vld [vmem:[%s33245_s0 + $0x3a8] sm:$0xff] }
 0x306   :  { %33380 = vst [vmem:[#allocation34_spill] sm:$0xff] %v29114_v2  ;;  %22857 = vmatprep.mubr.msk.f32.mxu1 %vm292_vm1, %v29114_v2  ;;  %v19340_v2 = vld [vmem:[%s33245_s0 + $0x41a] sm:$0xff] }
 0x307   :  { %22858 = vmatmul.mubr.msk.f32.gmra.mrb[94].mxu1 %vm292_vm1, %v29119_v18  ;;  %v29163_v18 = vld [vmem:[%s33245_s0 + $0x3d8] sm:$0xff] }
 0x308   :  { %23637 = vmatmul.mubr.msk.f32.gmra.mrb[96].mxu0 %vm292_vm1, %v19336_v1  ;;  %v19339_v1 = vld [vmem:[%s33245_s0 + $0x412] sm:$0xff]  ;;  %33385 = vst [vmem:[#allocation39_spill] sm:$0xff] %v29163_v18 }
 0x309   :  { %23639 = vmatprep.mubr.msk.f32.mxu0 %vm292_vm1, %v19337_v50  ;;  %v29136_v50 = vld [vmem:[%s33245_s0 + $0x3c0] sm:$0xff] }
 0x30a   :  { %33382 = vst [vmem:[#allocation36_spill] sm:$0xff] %v29136_v50  ;;  %22860 = vmatprep.mubr.msk.f32.mxu1 %vm292_vm1, %v29136_v50  ;;  %v19342_v50 = vld [vmem:[%s33245_s0 + $0x42a] sm:$0xff] }
 0x30b   :  { %22861 = vmatmul.mubr.msk.f32.gmra.mrb[96].mxu1 %vm292_vm1, %v29141_v49  ;;  %v29185_v49 = vld [vmem:[%s33245_s0 + $0x3f0] sm:$0xff] }
 0x30c   :  { %23640 = vmatmul.mubr.msk.f32.gmra.mrb[98].mxu0 %vm292_vm1, %v19338_v34  ;;  %v19341_v34 = vld [vmem:[%s33245_s0 + $0x422] sm:$0xff]  ;;  %33387 = vst [vmem:[#allocation41_spill] sm:$0xff] %v29185_v49 }
 0x30d   :  { %23642 = vmatprep.mubr.msk.f32.mxu0 %vm292_vm1, %v19339_v1  ;;  %v29158_v1 = vld [vmem:[%s33245_s0 + $0x3d0] sm:$0xff] }
 0x30e   :  { %33384 = vst [vmem:[#allocation38_spill] sm:$0xff] %v29158_v1  ;;  %22863 = vmatprep.mubr.msk.f32.mxu1 %vm292_vm1, %v29158_v1  ;;  %v19344_v1 = vld [vmem:[%s33245_s0 + $0x442] sm:$0xff] }
 0x30f   :  { %22864 = vmatmul.mubr.msk.f32.gmra.mrb[98].mxu1 %vm292_vm1, %v29163_v18  ;;  %v29207_v18 = vld [vmem:[%s33245_s0 + $0x400] sm:$0xff] }
 0x310   :  { %23643 = vmatmul.mubr.msk.f32.gmra.mrb[100].mxu0 %vm292_vm1, %v19340_v2  ;;  %v19343_v2 = vld [vmem:[%s33245_s0 + $0x43a] sm:$0xff]  ;;  %33389 = vst [vmem:[#allocation43_spill] sm:$0xff] %v29207_v18 }
 0x311   :  { %23645 = vmatprep.mubr.msk.f32.mxu0 %vm292_vm1, %v19341_v34  ;;  %v29180_v34 = vld [vmem:[%s33245_s0 + $0x3e8] sm:$0xff] }
 0x312   :  { %33386 = vst [vmem:[#allocation40_spill] sm:$0xff] %v29180_v34  ;;  %22866 = vmatprep.mubr.msk.f32.mxu1 %vm292_vm1, %v29180_v34  ;;  %v19346_v34 = vld [vmem:[%s33245_s0 + $0x452] sm:$0xff] }
 0x313   :  { %22867 = vmatmul.mubr.msk.f32.gmra.mrb[100].mxu1 %vm292_vm1, %v29185_v49  ;;  %v29229_v49 = vld [vmem:[%s33245_s0 + $0x418] sm:$0xff] }
 0x314   :  { %23646 = vmatmul.mubr.msk.f32.gmra.mrb[102].mxu0 %vm292_vm1, %v19342_v50  ;;  %v19345_v50 = vld [vmem:[%s33245_s0 + $0x44a] sm:$0xff]  ;;  %33391 = vst [vmem:[#allocation45_spill] sm:$0xff] %v29229_v49 }
 0x315   :  { %23648 = vmatprep.mubr.msk.f32.mxu0 %vm292_vm1, %v19343_v2  ;;  %v29202_v2 = vld [vmem:[%s33245_s0 + $0x3f8] sm:$0xff] }
 0x316   :  { %33388 = vst [vmem:[#allocation42_spill] sm:$0xff] %v29202_v2  ;;  %22869 = vmatprep.mubr.msk.f32.mxu1 %vm292_vm1, %v29202_v2  ;;  %v19348_v2 = vld [vmem:[%s33245_s0 + $0x46a] sm:$0xff] }
 0x317   :  { %22870 = vmatmul.mubr.msk.f32.gmra.mrb[102].mxu1 %vm292_vm1, %v29207_v18  ;;  %v29251_v18 = vld [vmem:[%s33245_s0 + $0x428] sm:$0xff] }
 0x318   :  { %23649 = vmatmul.mubr.msk.f32.gmra.mrb[104].mxu0 %vm292_vm1, %v19344_v1  ;;  %v19347_v1 = vld [vmem:[%s33245_s0 + $0x462] sm:$0xff]  ;;  %33393 = vst [vmem:[#allocation47_spill] sm:$0xff] %v29251_v18 }
 0x319   :  { %23651 = vmatprep.mubr.msk.f32.mxu0 %vm292_vm1, %v19345_v50  ;;  %v29224_v50 = vld [vmem:[%s33245_s0 + $0x410] sm:$0xff] }
 0x31a   :  { %33390 = vst [vmem:[#allocation44_spill] sm:$0xff] %v29224_v50  ;;  %22872 = vmatprep.mubr.msk.f32.mxu1 %vm292_vm1, %v29224_v50  ;;  %v19350_v50 = vld [vmem:[%s33245_s0 + $0x47a] sm:$0xff] }
 0x31b   :  { %22873 = vmatmul.mubr.msk.f32.gmra.mrb[104].mxu1 %vm292_vm1, %v29229_v49  ;;  %v29273_v49 = vld [vmem:[%s33245_s0 + $0x440] sm:$0xff] }
 0x31c   :  { %23652 = vmatmul.mubr.msk.f32.gmra.mrb[106].mxu0 %vm292_vm1, %v19346_v34  ;;  %v19349_v34 = vld [vmem:[%s33245_s0 + $0x472] sm:$0xff]  ;;  %33395 = vst [vmem:[#allocation49_spill] sm:$0xff] %v29273_v49 }
 0x31d   :  { %23654 = vmatprep.mubr.msk.f32.mxu0 %vm292_vm1, %v19347_v1  ;;  %v29246_v1 = vld [vmem:[%s33245_s0 + $0x420] sm:$0xff] }
 0x31e   :  { %33392 = vst [vmem:[#allocation46_spill] sm:$0xff] %v29246_v1  ;;  %22875 = vmatprep.mubr.msk.f32.mxu1 %vm292_vm1, %v29246_v1  ;;  %v19352_v1 = vld [vmem:[%s33245_s0 + $0x492] sm:$0xff] }
 0x31f   :  { %22876 = vmatmul.mubr.msk.f32.gmra.mrb[106].mxu1 %vm292_vm1, %v29251_v18  ;;  %v29295_v18 = vld [vmem:[%s33245_s0 + $0x450] sm:$0xff] }
 0x320   :  { %23655 = vmatmul.mubr.msk.f32.gmra.mrb[108].mxu0 %vm292_vm1, %v19348_v2  ;;  %v19351_v2 = vld [vmem:[%s33245_s0 + $0x48a] sm:$0xff]  ;;  %33397 = vst [vmem:[#allocation51_spill] sm:$0xff] %v29295_v18 }
 0x321   :  { %23657 = vmatprep.mubr.msk.f32.mxu0 %vm292_vm1, %v19349_v34  ;;  %v29268_v34 = vld [vmem:[%s33245_s0 + $0x438] sm:$0xff] }
 0x322   :  { %33394 = vst [vmem:[#allocation48_spill] sm:$0xff] %v29268_v34  ;;  %22878 = vmatprep.mubr.msk.f32.mxu1 %vm292_vm1, %v29268_v34  ;;  %v19354_v34 = vld [vmem:[%s33245_s0 + $0x4a2] sm:$0xff] }
 0x323   :  { %22879 = vmatmul.mubr.msk.f32.gmra.mrb[108].mxu1 %vm292_vm1, %v29273_v49  ;;  %v29317_v49 = vld [vmem:[%s33245_s0 + $0x468] sm:$0xff] }
 0x324   :  { %23658 = vmatmul.mubr.msk.f32.gmra.mrb[110].mxu0 %vm292_vm1, %v19350_v50  ;;  %v19353_v50 = vld [vmem:[%s33245_s0 + $0x49a] sm:$0xff]  ;;  %33399 = vst [vmem:[#allocation53_spill] sm:$0xff] %v29317_v49 }
 0x325   :  { %23660 = vmatprep.mubr.msk.f32.mxu0 %vm292_vm1, %v19351_v2  ;;  %v29290_v2 = vld [vmem:[%s33245_s0 + $0x448] sm:$0xff] }
 0x326   :  { %33396 = vst [vmem:[#allocation50_spill] sm:$0xff] %v29290_v2  ;;  %22881 = vmatprep.mubr.msk.f32.mxu1 %vm292_vm1, %v29290_v2  ;;  %v19356_v2 = vld [vmem:[%s33245_s0 + $0x4ba] sm:$0xff] }
 0x327   :  { %22882 = vmatmul.mubr.msk.f32.gmra.mrb[110].mxu1 %vm292_vm1, %v29295_v18  ;;  %v29339_v18 = vld [vmem:[%s33245_s0 + $0x478] sm:$0xff] }
 0x328   :  { %23661 = vmatmul.mubr.msk.f32.gmra.mrb[112].mxu0 %vm292_vm1, %v19352_v1  ;;  %v19355_v1 = vld [vmem:[%s33245_s0 + $0x4b2] sm:$0xff]  ;;  %33401 = vst [vmem:[#allocation55_spill] sm:$0xff] %v29339_v18 }
 0x329   :  { %23663 = vmatprep.mubr.msk.f32.mxu0 %vm292_vm1, %v19353_v50  ;;  %v29312_v50 = vld [vmem:[%s33245_s0 + $0x460] sm:$0xff] }
 0x32a   :  { %33398 = vst [vmem:[#allocation52_spill] sm:$0xff] %v29312_v50  ;;  %22884 = vmatprep.mubr.msk.f32.mxu1 %vm292_vm1, %v29312_v50  ;;  %v19358_v50 = vld [vmem:[%s33245_s0 + $0x4ca] sm:$0xff] }
 0x32b   :  { %22885 = vmatmul.mubr.msk.f32.gmra.mrb[112].mxu1 %vm292_vm1, %v29317_v49  ;;  %v29361_v49 = vld [vmem:[%s33245_s0 + $0x490] sm:$0xff] }
 0x32c   :  { %23664 = vmatmul.mubr.msk.f32.gmra.mrb[114].mxu0 %vm292_vm1, %v19354_v34  ;;  %v19357_v34 = vld [vmem:[%s33245_s0 + $0x4c2] sm:$0xff]  ;;  %33403 = vst [vmem:[#allocation57_spill] sm:$0xff] %v29361_v49 }
 0x32d   :  { %23666 = vmatprep.mubr.msk.f32.mxu0 %vm292_vm1, %v19355_v1  ;;  %v29334_v1 = vld [vmem:[%s33245_s0 + $0x470] sm:$0xff] }
 0x32e   :  { %33400 = vst [vmem:[#allocation54_spill] sm:$0xff] %v29334_v1  ;;  %22887 = vmatprep.mubr.msk.f32.mxu1 %vm292_vm1, %v29334_v1  ;;  %v19360_v1 = vld [vmem:[%s33245_s0 + $0x4e2] sm:$0xff] }
 0x32f   :  { %22888 = vmatmul.mubr.msk.f32.gmra.mrb[114].mxu1 %vm292_vm1, %v29339_v18  ;;  %v29383_v18 = vld [vmem:[%s33245_s0 + $0x4a0] sm:$0xff] }
 0x330   :  { %23667 = vmatmul.mubr.msk.f32.gmra.mrb[116].mxu0 %vm292_vm1, %v19356_v2  ;;  %v19359_v2 = vld [vmem:[%s33245_s0 + $0x4da] sm:$0xff]  ;;  %33405 = vst [vmem:[#allocation59_spill] sm:$0xff] %v29383_v18 }
 0x331   :  { %23669 = vmatprep.mubr.msk.f32.mxu0 %vm292_vm1, %v19357_v34  ;;  %v29356_v34 = vld [vmem:[%s33245_s0 + $0x488] sm:$0xff] }
 0x332   :  { %33402 = vst [vmem:[#allocation56_spill] sm:$0xff] %v29356_v34  ;;  %22890 = vmatprep.mubr.msk.f32.mxu1 %vm292_vm1, %v29356_v34  ;;  %v19362_v34 = vld [vmem:[%s33245_s0 + $0x4f2] sm:$0xff] }
 0x333   :  { %22891 = vmatmul.mubr.msk.f32.gmra.mrb[116].mxu1 %vm292_vm1, %v29361_v49  ;;  %v29405_v49 = vld [vmem:[%s33245_s0 + $0x4b8] sm:$0xff] }
 0x334   :  { %23670 = vmatmul.mubr.msk.f32.gmra.mrb[118].mxu0 %vm292_vm1, %v19358_v50  ;;  %v19361_v50 = vld [vmem:[%s33245_s0 + $0x4ea] sm:$0xff] }
 0x335   :  { %23672 = vmatprep.mubr.msk.f32.mxu0 %vm292_vm1, %v19359_v2  ;;  %v29378_v2 = vld [vmem:[%s33245_s0 + $0x498] sm:$0xff] }
 0x336   :  { %33404 = vst [vmem:[#allocation58_spill] sm:$0xff] %v29378_v2  ;;  %22893 = vmatprep.mubr.msk.f32.mxu1 %vm292_vm1, %v29378_v2  ;;  %v19364_v2 = vld [vmem:[%s33245_s0 + $0x50a] sm:$0xff] }
 0x337   :  { %22894 = vmatmul.mubr.msk.f32.gmra.mrb[118].mxu1 %vm292_vm1, %v29383_v18  ;;  %v29427_v18 = vld [vmem:[%s33245_s0 + $0x4c8] sm:$0xff] }
 0x338   :  { %23673 = vmatmul.mubr.msk.f32.gmra.mrb[120].mxu0 %vm292_vm1, %v19360_v1  ;;  %v19363_v1 = vld [vmem:[%s33245_s0 + $0x502] sm:$0xff]  ;;  %33407 = vst [vmem:[#allocation61_spill] sm:$0xff] %v29427_v18 }
 0x339   :  { %23675 = vmatprep.mubr.msk.f32.mxu0 %vm292_vm1, %v19361_v50  ;;  %v29400_v50 = vld [vmem:[%s33245_s0 + $0x4b0] sm:$0xff] }
 0x33a   :  { %33406 = vst [vmem:[#allocation60_spill] sm:$0xff] %v29400_v50  ;;  %22896 = vmatprep.mubr.msk.f32.mxu1 %vm292_vm1, %v29400_v50  ;;  %v19366_v50 = vld [vmem:[%s33245_s0 + $0x51a] sm:$0xff] }
 0x33b   :  { %22897 = vmatmul.mubr.msk.f32.gmra.mrb[120].mxu1 %vm292_vm1, %v29405_v49 }
 0x33c   :  { %23676 = vmatmul.mubr.msk.f32.gmra.mrb[122].mxu0 %vm292_vm1, %v19362_v34  ;;  %v19365_v34 = vld [vmem:[%s33245_s0 + $0x512] sm:$0xff] }
 0x33d   :  { %23678 = vmatprep.mubr.msk.f32.mxu0 %vm292_vm1, %v19363_v1  ;;  %v29422_v1 = vld [vmem:[%s33245_s0 + $0x4c0] sm:$0xff] }
 0x33e   :  { %22899 = vmatprep.mubr.msk.f32.mxu1 %vm292_vm1, %v29422_v1 }
 0x33f   :  { %22900 = vmatmul.mubr.msk.f32.gmra.mrb[122].mxu1 %vm292_vm1, %v29427_v18  ;;  %v29464_v18 = vld [vmem:[%s33245_s0 + $0x4f0] sm:$0xff] }
 0x340   :  { %23679 = vmatmul.mubr.msk.f32.gmra.mrb[124].mxu0 %vm292_vm1, %v19364_v2  ;;  %v29441_v2 = vld [vmem:[%s33245_s0 + $0x4d8] sm:$0xff] }
 0x341   :  { %23681 = vmatprep.mubr.msk.f32.mxu0 %vm292_vm1, %v19365_v34  ;;  %v29446_v34 = vld [vmem:[%s33245_s0 + $0x4e0] sm:$0xff]  ;;  %22902 = vmatprep.mubr.msk.f32.mxu1 %vm292_vm1, %v29441_v2 }
 0x343   :  { %22903 = vmatmul.mubr.msk.f32.gmra.mrb[124].mxu1 %vm292_vm1, %v29446_v34 }
 0x344   :  { %23682 = vmatmul.mubr.msk.f32.gmra.mrb[126].mxu0 %vm292_vm1, %v19366_v50  ;;  %v29459_v50 = vld [vmem:[%s33245_s0 + $0x4e8] sm:$0xff] }
 0x345   :  { %23686 = vmatprep.mubr.msk.f32.mxu0 %vm292_vm1, %v28161_v3  ;;  %22905 = vmatprep.mubr.msk.f32.mxu1 %vm292_vm1, %v29459_v50  ;;  %v2512_v3 = vld [vmem:[%s33245_s0 + $0x152] sm:$0xff] }
 0x347   :  { %22906 = vmatmul.mubr.msk.f32.gmra.mrb[126].mxu1 %vm292_vm1, %v29464_v18 }
 0x348   :  { %23687 = vmatmul.mubr.msk.f32.vlgmr.msra.gmra.mrb[0].mxu0 %vm292_vm1, %v28166_v4  ;;  %v2513_v4 = vld [vmem:[%s33245_s0 + $0x15a] sm:$0xff]  ;;  %22961 = vmatprep.mubr.msk.f32.mxu1 %vm292_vm1, %v2512_v3  ;;  %v33409_v3 = vld [vmem:[#allocation6_spill] sm:$0xff] }
 0x349   :  { %23689 = vmatprep.mubr.msk.f32.mxu0 %vm292_vm1, %v28183_v7  ;;  %23879 = vmatpush3.msk.msra.mxu0 %vm677_vm0, %v28821_v33  ;;  %v2514_v7 = vld [vmem:[%s33245_s0 + $0x16a] sm:$0xff]  ;;  %v2567_v33 = vld [vmem:[%s33245_s0 + $0x37a] sm:$0xff] }
 0x34b   :  { %22962 = vmatmul.mubr.msk.f32.vlgmr.msra.gmra.mrb[34].mxu1 %vm292_vm1, %v2513_v4  ;;  %v2568_v4 = vld [vmem:[%s33245_s0 + $0x382] sm:$0xff] }
 0x34c   :  { %23690 = vmatmul.mubr.msk.f32.gmra.mrb[2].mxu0 %vm292_vm1, %v28188_v8  ;;  %v2515_v8 = vld [vmem:[%s33245_s0 + $0x172] sm:$0xff]  ;;  %22964 = vmatprep.mubr.msk.f32.mxu1 %vm292_vm1, %v2514_v7  ;;  %v2569_v7 = vld [vmem:[%s33245_s0 + $0x38a] sm:$0xff] }
 0x34d   :  { %23692 = vmatprep.mubr.msk.f32.mxu0 %vm292_vm1, %v28205_v11  ;;  %v2516_v11 = vld [vmem:[%s33245_s0 + $0x17a] sm:$0xff] }
 0x34f   :  { %22965 = vmatmul.mubr.msk.f32.gmra.mrb[36].mxu1 %vm292_vm1, %v2515_v8  ;;  %v33411_v8 = vld [vmem:[#allocation8_spill] sm:$0xff] }
 0x350   :  { %23693 = vmatmul.mubr.msk.f32.gmra.mrb[4].mxu0 %vm292_vm1, %v28210_v12  ;;  %v2517_v12 = vld [vmem:[%s33245_s0 + $0x182] sm:$0xff]  ;;  %22967 = vmatprep.mubr.msk.f32.mxu1 %vm292_vm1, %v2516_v11 }
 0x351   :  { %23695 = vmatprep.mubr.msk.f32.mxu0 %vm292_vm1, %v28227_v15  ;;  %v2518_v15 = vld [vmem:[%s33245_s0 + $0x192] sm:$0xff]  ;;  %v33412_v11 = vld [vmem:[#allocation9_spill] sm:$0xff] }
 0x353   :  { %22968 = vmatmul.mubr.msk.f32.gmra.mrb[38].mxu1 %vm292_vm1, %v2517_v12  ;;  %v2570_v12 = vld [vmem:[%s33245_s0 + $0x39a] sm:$0xff] }
 0x354   :  { %23696 = vmatmul.mubr.msk.f32.gmra.mrb[6].mxu0 %vm292_vm1, %v28232_v16  ;;  %v2519_v16 = vld [vmem:[%s33245_s0 + $0x19a] sm:$0xff]  ;;  %22970 = vmatprep.mubr.msk.f32.mxu1 %vm292_vm1, %v2518_v15  ;;  %v2571_v15 = vld [vmem:[%s33245_s0 + $0x3a2] sm:$0xff] }
 0x355   :  { %23698 = vmatprep.mubr.msk.f32.mxu0 %vm292_vm1, %v28249_v19  ;;  %v2520_v19 = vld [vmem:[%s33245_s0 + $0x1a2] sm:$0xff] }
 0x357   :  { %22971 = vmatmul.mubr.msk.f32.gmra.mrb[40].mxu1 %vm292_vm1, %v2519_v16  ;;  %v33413_v16 = vld [vmem:[#allocation10_spill] sm:$0xff] }
 0x358   :  { %23699 = vmatmul.mubr.msk.f32.gmra.mrb[8].mxu0 %vm292_vm1, %v28254_v20  ;;  %v2521_v20 = vld [vmem:[%s33245_s0 + $0x1aa] sm:$0xff]  ;;  %22973 = vmatprep.mubr.msk.f32.mxu1 %vm292_vm1, %v2520_v19 }
 0x359   :  { %23701 = vmatprep.mubr.msk.f32.mxu0 %vm292_vm1, %v28271_v23  ;;  %v2522_v23 = vld [vmem:[%s33245_s0 + $0x1ba] sm:$0xff]  ;;  %v33414_v19 = vld [vmem:[#allocation11_spill] sm:$0xff] }
 0x35b   :  { %22974 = vmatmul.mubr.msk.f32.gmra.mrb[42].mxu1 %vm292_vm1, %v2521_v20  ;;  %v2572_v20 = vld [vmem:[%s33245_s0 + $0x3aa] sm:$0xff] }
 0x35c   :  { %23702 = vmatmul.mubr.msk.f32.gmra.mrb[10].mxu0 %vm292_vm1, %v28276_v24  ;;  %v2523_v24 = vld [vmem:[%s33245_s0 + $0x1c2] sm:$0xff]  ;;  %22976 = vmatprep.mubr.msk.f32.mxu1 %vm292_vm1, %v2522_v23  ;;  %v2573_v23 = vld [vmem:[%s33245_s0 + $0x3b2] sm:$0xff] }
 0x35d   :  { %23704 = vmatprep.mubr.msk.f32.mxu0 %vm292_vm1, %v28293_v27  ;;  %v2524_v27 = vld [vmem:[%s33245_s0 + $0x1ca] sm:$0xff] }
 0x35f   :  { %22977 = vmatmul.mubr.msk.f32.gmra.mrb[44].mxu1 %vm292_vm1, %v2523_v24  ;;  %v33415_v24 = vld [vmem:[#allocation12_spill] sm:$0xff] }
 0x360   :  { %23705 = vmatmul.mubr.msk.f32.gmra.mrb[12].mxu0 %vm292_vm1, %v28298_v28  ;;  %v2525_v28 = vld [vmem:[%s33245_s0 + $0x1d2] sm:$0xff]  ;;  %22979 = vmatprep.mubr.msk.f32.mxu1 %vm292_vm1, %v2524_v27  ;;  %v33416_v27 = vld [vmem:[#allocation13_spill] sm:$0xff] }
 0x361   :  { %23707 = vmatprep.mubr.msk.f32.mxu0 %vm292_vm1, %v28315_v31  ;;  %v2526_v31 = vld [vmem:[%s33245_s0 + $0x1e2] sm:$0xff] }
 0x363   :  { %22980 = vmatmul.mubr.msk.f32.gmra.mrb[46].mxu1 %vm292_vm1, %v2525_v28  ;;  %v2574_v28 = vld [vmem:[%s33245_s0 + $0x3c2] sm:$0xff] }
 0x364   :  { %23708 = vmatmul.mubr.msk.f32.gmra.mrb[14].mxu0 %vm292_vm1, %v28320_v32  ;;  %v2527_v32 = vld [vmem:[%s33245_s0 + $0x1ea] sm:$0xff]  ;;  %22982 = vmatprep.mubr.msk.f32.mxu1 %vm292_vm1, %v2526_v31 }
 0x365   :  { %23710 = vmatprep.mubr.msk.f32.mxu0 %vm292_vm1, %v28337_v35  ;;  %v2528_v35 = vld [vmem:[%s33245_s0 + $0x1f2] sm:$0xff]  ;;  %v2575_v31 = vld [vmem:[%s33245_s0 + $0x3ca] sm:$0xff] }
 0x367   :  { %22983 = vmatmul.mubr.msk.f32.gmra.mrb[48].mxu1 %vm292_vm1, %v2527_v32  ;;  %v33417_v32 = vld [vmem:[#allocation14_spill] sm:$0xff] }
 0x368   :  { %23711 = vmatmul.mubr.msk.f32.gmra.mrb[16].mxu0 %vm292_vm1, %v28342_v36  ;;  %v2529_v36 = vld [vmem:[%s33245_s0 + $0x1fa] sm:$0xff]  ;;  %22985 = vmatprep.mubr.msk.f32.mxu1 %vm292_vm1, %v2528_v35  ;;  %v33418_v35 = vld [vmem:[#allocation15_spill] sm:$0xff] }
 0x369   :  { %23713 = vmatprep.mubr.msk.f32.mxu0 %vm292_vm1, %v28359_v39  ;;  %v2530_v39 = vld [vmem:[%s33245_s0 + $0x20a] sm:$0xff] }
 0x36b   :  { %22986 = vmatmul.mubr.msk.f32.gmra.mrb[50].mxu1 %vm292_vm1, %v2529_v36  ;;  %v2576_v36 = vld [vmem:[%s33245_s0 + $0x3d2] sm:$0xff] }
 0x36c   :  { %23714 = vmatmul.mubr.msk.f32.gmra.mrb[18].mxu0 %vm292_vm1, %v28364_v40  ;;  %v2531_v40 = vld [vmem:[%s33245_s0 + $0x212] sm:$0xff]  ;;  %22988 = vmatprep.mubr.msk.f32.mxu1 %vm292_vm1, %v2530_v39  ;;  %v2577_v39 = vld [vmem:[%s33245_s0 + $0x3da] sm:$0xff] }
 0x36d   :  { %23716 = vmatprep.mubr.msk.f32.mxu0 %vm292_vm1, %v28381_v43  ;;  %v2532_v43 = vld [vmem:[%s33245_s0 + $0x21a] sm:$0xff] }
 0x36f   :  { %22989 = vmatmul.mubr.msk.f32.gmra.mrb[52].mxu1 %vm292_vm1, %v2531_v40  ;;  %v33419_v40 = vld [vmem:[#allocation16_spill] sm:$0xff] }
 0x370   :  { %23717 = vmatmul.mubr.msk.f32.gmra.mrb[20].mxu0 %vm292_vm1, %v28386_v44  ;;  %v2533_v44 = vld [vmem:[%s33245_s0 + $0x222] sm:$0xff]  ;;  %22991 = vmatprep.mubr.msk.f32.mxu1 %vm292_vm1, %v2532_v43 }
 0x371   :  { %23719 = vmatprep.mubr.msk.f32.mxu0 %vm292_vm1, %v28403_v47  ;;  %v2534_v47 = vld [vmem:[%s33245_s0 + $0x232] sm:$0xff]  ;;  %v33420_v43 = vld [vmem:[#allocation17_spill] sm:$0xff] }
 0x373   :  { %22992 = vmatmul.mubr.msk.f32.gmra.mrb[54].mxu1 %vm292_vm1, %v2533_v44  ;;  %v2578_v44 = vld [vmem:[%s33245_s0 + $0x3ea] sm:$0xff] }
 0x374   :  { %23720 = vmatmul.mubr.msk.f32.gmra.mrb[22].mxu0 %vm292_vm1, %v28408_v48  ;;  %v2535_v48 = vld [vmem:[%s33245_s0 + $0x23a] sm:$0xff]  ;;  %22994 = vmatprep.mubr.msk.f32.mxu1 %vm292_vm1, %v2534_v47  ;;  %v2579_v47 = vld [vmem:[%s33245_s0 + $0x3f2] sm:$0xff] }
 0x375   :  { %23722 = vmatprep.mubr.msk.f32.mxu0 %vm292_vm1, %v28425_v51  ;;  %v2536_v51 = vld [vmem:[%s33245_s0 + $0x242] sm:$0xff] }
 0x377   :  { %22995 = vmatmul.mubr.msk.f32.gmra.mrb[56].mxu1 %vm292_vm1, %v2535_v48  ;;  %v33421_v48 = vld [vmem:[#allocation18_spill] sm:$0xff] }
 0x378   :  { %23723 = vmatmul.mubr.msk.f32.gmra.mrb[24].mxu0 %vm292_vm1, %v28430_v52  ;;  %v2537_v52 = vld [vmem:[%s33245_s0 + $0x24a] sm:$0xff]  ;;  %22997 = vmatprep.mubr.msk.f32.mxu1 %vm292_vm1, %v2536_v51 }
 0x379   :  { %23725 = vmatprep.mubr.msk.f32.mxu0 %vm292_vm1, %v28447_v55  ;;  %v2538_v55 = vld [vmem:[%s33245_s0 + $0x25a] sm:$0xff]  ;;  %v33422_v51 = vld [vmem:[#allocation19_spill] sm:$0xff] }
 0x37b   :  { %22998 = vmatmul.mubr.msk.f32.gmra.mrb[58].mxu1 %vm292_vm1, %v2537_v52  ;;  %v29887_v52 = vld [vmem:[%s33244_s1 + $0x20] sm:$0x7] }
 0x37c   :  { %23726 = vmatmul.mubr.msk.f32.gmra.mrb[26].mxu0 %vm292_vm1, %v28452_v56  ;;  %v2539_v56 = vld [vmem:[%s33245_s0 + $0x262] sm:$0xff]  ;;  %23000 = vmatprep.mubr.msk.f32.mxu1 %vm292_vm1, %v2538_v55  ;;  %v2580_v55 = vld [vmem:[%s33245_s0 + $0x3fa] sm:$0xff] }
 0x37d   :  { %23728 = vmatprep.mubr.msk.f32.mxu0 %vm292_vm1, %v28469_v59  ;;  %v2540_v59 = vld [vmem:[%s33245_s0 + $0x26a] sm:$0xff]  ;;  %24072 = vmatprep.subr.msk.mxu0 %vm677_vm0, %v29887_v52 }
 0x37f   :  { %23001 = vmatmul.mubr.msk.f32.gmra.mrb[60].mxu1 %vm292_vm1, %v2539_v56  ;;  %v2581_v56 = vld [vmem:[%s33245_s0 + $0x402] sm:$0xff] }
 0x380   :  { %23729 = vmatmul.mubr.msk.f32.gmra.mrb[28].mxu0 %vm292_vm1, %v28474_v60  ;;  %v2541_v60 = vld [vmem:[%s33245_s0 + $0x272] sm:$0xff]  ;;  %23003 = vmatprep.mubr.msk.f32.mxu1 %vm292_vm1, %v2540_v59 }
 0x381   :  { %23731 = vmatprep.mubr.msk.f32.mxu0 %vm292_vm1, %v28491_v63  ;;  %v2542_v63 = vld [vmem:[%s33245_s0 + $0x282] sm:$0xff]  ;;  %v33423_v59 = vld [vmem:[#allocation20_spill] sm:$0xff] }
 0x383   :  { %23004 = vmatmul.mubr.msk.f32.gmra.mrb[62].mxu1 %vm292_vm1, %v2541_v60  ;;  %v33424_v60 = vld [vmem:[#allocation21_spill] sm:$0xff] }
 0x384   :  { %23732 = vmatmul.mubr.msk.f32.gmra.mrb[30].mxu0 %vm292_vm1, %v28496_v0  ;;  %v2543_v0 = vld [vmem:[%s33245_s0 + $0x28a] sm:$0xff]  ;;  %23006 = vmatprep.mubr.msk.f32.mxu1 %vm292_vm1, %v2542_v63  ;;  %v2582_v63 = vld [vmem:[%s33245_s0 + $0x412] sm:$0xff] }
 0x385   :  { %23734 = vmatprep.mubr.msk.f32.mxu0 %vm292_vm1, %v28513_v5  ;;  %v2544_v5 = vld [vmem:[%s33245_s0 + $0x292] sm:$0xff] }
 0x387   :  { %23007 = vmatmul.mubr.msk.f32.gmra.mrb[64].mxu1 %vm292_vm1, %v2543_v0  ;;  %v2583_v0 = vld [vmem:[%s33245_s0 + $0x41a] sm:$0xff] }
 0x388   :  { %23735 = vmatmul.mubr.msk.f32.gmra.mrb[32].mxu0 %vm292_vm1, %v28518_v6  ;;  %v2545_v6 = vld [vmem:[%s33245_s0 + $0x29a] sm:$0xff]  ;;  %23009 = vmatprep.mubr.msk.f32.mxu1 %vm292_vm1, %v2544_v5  ;;  %v33425_v5 = vld [vmem:[#allocation22_spill] sm:$0xff] }
 0x389   :  { %23737 = vmatprep.mubr.msk.f32.mxu0 %vm292_vm1, %v28535_v13  ;;  %v2546_v13 = vld [vmem:[%s33245_s0 + $0x2aa] sm:$0xff] }
 0x38b   :  { %23010 = vmatmul.mubr.msk.f32.gmra.mrb[66].mxu1 %vm292_vm1, %v2545_v6  ;;  %v33426_v6 = vld [vmem:[#allocation23_spill] sm:$0xff] }
 0x38c   :  { %23738 = vmatmul.mubr.msk.f32.gmra.mrb[34].mxu0 %vm292_vm1, %v28540_v14  ;;  %v2547_v14 = vld [vmem:[%s33245_s0 + $0x2b2] sm:$0xff]  ;;  %23012 = vmatprep.mubr.msk.f32.mxu1 %vm292_vm1, %v2546_v13  ;;  %v29915_v13 = vpop.f32.mrb[0].mxu1 }
 0x38d   :  { %23740 = vmatprep.mubr.msk.f32.mxu0 %vm292_vm1, %v28557_v21  ;;  %v2548_v21 = vld [vmem:[%s33245_s0 + $0x2ba] sm:$0xff] }
 0x38f   :  { %23013 = vmatmul.mubr.msk.f32.gmra.mrb[68].mxu1 %vm292_vm1, %v2547_v14  ;;  %v2584_v14 = vld [vmem:[%s33245_s0 + $0x422] sm:$0xff] }
 0x390   :  { %23741 = vmatmul.mubr.msk.f32.gmra.mrb[36].mxu0 %vm292_vm1, %v28562_v22  ;;  %v2549_v22 = vld [vmem:[%s33245_s0 + $0x2c2] sm:$0xff]  ;;  %23015 = vmatprep.mubr.msk.f32.mxu1 %vm292_vm1, %v2548_v21  ;;  %v2585_v21 = vld [vmem:[%s33245_s0 + $0x42a] sm:$0xff] }
 0x391   :  { %23743 = vmatprep.mubr.msk.f32.mxu0 %vm292_vm1, %v28579_v29  ;;  %v2550_v29 = vld [vmem:[%s33245_s0 + $0x2d2] sm:$0xff] }
 0x393   :  { %23016 = vmatmul.mubr.msk.f32.gmra.mrb[70].mxu1 %vm292_vm1, %v2549_v22  ;;  %v33427_v22 = vld [vmem:[#allocation24_spill] sm:$0xff] }
 0x394   :  { %23744 = vmatmul.mubr.msk.f32.gmra.mrb[38].mxu0 %vm292_vm1, %v28584_v30  ;;  %v2551_v30 = vld [vmem:[%s33245_s0 + $0x2da] sm:$0xff]  ;;  %23018 = vmatprep.mubr.msk.f32.mxu1 %vm292_vm1, %v2550_v29  ;;  %v29926_v29 = vpop.f32.mrb[1].mxu1 }
 0x395   :  { %23746 = vmatprep.mubr.msk.f32.mxu0 %vm292_vm1, %v28601_v37  ;;  %v2552_v37 = vld [vmem:[%s33245_s0 + $0x2e2] sm:$0xff] }
 0x397   :  { %23019 = vmatmul.mubr.msk.f32.gmra.mrb[72].mxu1 %vm292_vm1, %v2551_v30  ;;  %v33428_v30 = vld [vmem:[#allocation25_spill] sm:$0xff] }
 0x398   :  { %23747 = vmatmul.mubr.msk.f32.gmra.mrb[40].mxu0 %vm292_vm1, %v28606_v38  ;;  %v2553_v38 = vld [vmem:[%s33245_s0 + $0x2ea] sm:$0xff]  ;;  %23021 = vmatprep.mubr.msk.f32.mxu1 %vm292_vm1, %v2552_v37  ;;  %v29931_v37 = vpop.f32.mrb[2].mxu1 }
 0x399   :  { %23749 = vmatprep.mubr.msk.f32.mxu0 %vm292_vm1, %v28623_v45  ;;  %v2554_v45 = vld [vmem:[%s33245_s0 + $0x2fa] sm:$0xff] }
 0x39b   :  { %23022 = vmatmul.mubr.msk.f32.gmra.mrb[74].mxu1 %vm292_vm1, %v2553_v38  ;;  %v2586_v38 = vld [vmem:[%s33245_s0 + $0x43a] sm:$0xff] }
 0x39c   :  { %23750 = vmatmul.mubr.msk.f32.gmra.mrb[42].mxu0 %vm292_vm1, %v28628_v46  ;;  %v2555_v46 = vld [vmem:[%s33245_s0 + $0x302] sm:$0xff]  ;;  %23024 = vmatprep.mubr.msk.f32.mxu1 %vm292_vm1, %v2554_v45 }
 0x39d   :  { %23752 = vmatprep.mubr.msk.f32.mxu0 %vm292_vm1, %v28645_v53  ;;  %v2556_v53 = vld [vmem:[%s33245_s0 + $0x30a] sm:$0xff]  ;;  %v2587_v45 = vld [vmem:[%s33245_s0 + $0x442] sm:$0xff] }
 0x39f   :  { %23025 = vmatmul.mubr.msk.f32.gmra.mrb[76].mxu1 %vm292_vm1, %v2555_v46  ;;  %v33429_v46 = vld [vmem:[#allocation26_spill] sm:$0xff] }
 0x3a0   :  { %23753 = vmatmul.mubr.msk.f32.gmra.mrb[44].mxu0 %vm292_vm1, %v28650_v54  ;;  %v2557_v54 = vld [vmem:[%s33245_s0 + $0x312] sm:$0xff]  ;;  %23027 = vmatprep.mubr.msk.f32.mxu1 %vm292_vm1, %v2556_v53  ;;  %v29942_v53 = vpop.f32.mrb[3].mxu1 }
 0x3a1   :  { %23755 = vmatprep.mubr.msk.f32.mxu0 %vm292_vm1, %v28667_v61  ;;  %v2558_v61 = vld [vmem:[%s33245_s0 + $0x322] sm:$0xff] }
 0x3a3   :  { %23028 = vmatmul.mubr.msk.f32.gmra.mrb[78].mxu1 %vm292_vm1, %v2557_v54  ;;  %v33430_v54 = vld [vmem:[#allocation27_spill] sm:$0xff] }
 0x3a4   :  { %23756 = vmatmul.mubr.msk.f32.gmra.mrb[46].mxu0 %vm292_vm1, %v28672_v62  ;;  %v2559_v62 = vld [vmem:[%s33245_s0 + $0x32a] sm:$0xff]  ;;  %23030 = vmatprep.mubr.msk.f32.mxu1 %vm292_vm1, %v2558_v61  ;;  %v29947_v61 = vpop.f32.mrb[4].mxu1 }
 0x3a5   :  { %23758 = vmatprep.mubr.msk.f32.mxu0 %vm292_vm1, %v28689_v9  ;;  %v2560_v9 = vld [vmem:[%s33245_s0 + $0x332] sm:$0xff] }
 0x3a7   :  { %23031 = vmatmul.mubr.msk.f32.gmra.mrb[80].mxu1 %vm292_vm1, %v2559_v62  ;;  %v2588_v62 = vld [vmem:[%s33245_s0 + $0x44a] sm:$0xff] }
 0x3a8   :  { %23759 = vmatmul.mubr.msk.f32.gmra.mrb[48].mxu0 %vm292_vm1, %v28694_v10  ;;  %v2561_v10 = vld [vmem:[%s33245_s0 + $0x33a] sm:$0xff]  ;;  %23033 = vmatprep.mubr.msk.f32.mxu1 %vm292_vm1, %v2560_v9  ;;  %v2589_v9 = vld [vmem:[%s33245_s0 + $0x452] sm:$0xff] }
 0x3a9   :  { %23761 = vmatprep.mubr.msk.f32.mxu0 %vm292_vm1, %v28711_v25  ;;  %v2562_v25 = vld [vmem:[%s33245_s0 + $0x34a] sm:$0xff] }
 0x3ab   :  { %23034 = vmatmul.mubr.msk.f32.gmra.mrb[82].mxu1 %vm292_vm1, %v2561_v10  ;;  %v33431_v10 = vld [vmem:[#allocation28_spill] sm:$0xff] }
 0x3ac   :  { %23762 = vmatmul.mubr.msk.f32.gmra.mrb[50].mxu0 %vm292_vm1, %v28716_v26  ;;  %v2563_v26 = vld [vmem:[%s33245_s0 + $0x352] sm:$0xff]  ;;  %23036 = vmatprep.mubr.msk.f32.mxu1 %vm292_vm1, %v2562_v25  ;;  %v29958_v25 = vpop.f32.mrb[5].mxu1 }
 0x3ad   :  { %23764 = vmatprep.mubr.msk.f32.mxu0 %vm292_vm1, %v28733_v41  ;;  %v2564_v41 = vld [vmem:[%s33245_s0 + $0x35a] sm:$0xff] }
 0x3af   :  { %23037 = vmatmul.mubr.msk.f32.gmra.mrb[84].mxu1 %vm292_vm1, %v2563_v26  ;;  %v33432_v26 = vld [vmem:[#allocation29_spill] sm:$0xff] }
 0x3b0   :  { %23765 = vmatmul.mubr.msk.f32.gmra.mrb[52].mxu0 %vm292_vm1, %v28738_v42  ;;  %v2565_v42 = vld [vmem:[%s33245_s0 + $0x362] sm:$0xff]  ;;  %23039 = vmatprep.mubr.msk.f32.mxu1 %vm292_vm1, %v2564_v41  ;;  %v29963_v41 = vpop.f32.mrb[6].mxu1 }
 0x3b1   :  { %23767 = vmatprep.mubr.msk.f32.mxu0 %vm292_vm1, %v28755_v57  ;;  %v33408_v57 = vld [vmem:[#allocation5_spill] sm:$0xff] }
 0x3b3   :  { %23040 = vmatmul.mubr.msk.f32.gmra.mrb[86].mxu1 %vm292_vm1, %v2565_v42  ;;  %v2590_v42 = vld [vmem:[%s33245_s0 + $0x462] sm:$0xff] }
 0x3b4   :  { %23768 = vmatmul.mubr.msk.f32.gmra.mrb[54].mxu0 %vm292_vm1, %v28760_v58  ;;  %v2566_v58 = vld [vmem:[%s33245_s0 + $0x372] sm:$0xff] }
 0x3b5   :  { %23770 = vmatprep.mubr.msk.f32.mxu0 %vm292_vm1, %v28777_v17  ;;  %23042 = vmatprep.mubr.msk.f32.mxu1 %vm292_vm1, %v2566_v58  ;;  %v33410_v17 = vld [vmem:[#allocation7_spill] sm:$0xff]  ;;  %v33433_v58 = vld [vmem:[#allocation30_spill] sm:$0xff] }
 0x3b7   :  { %23043 = vmatmul.mubr.msk.f32.gmra.mrb[88].mxu1 %vm292_vm1, %v2567_v33  ;;  %v29974_v33 = vpop.f32.mrb[7].mxu1 }
 0x3b8   :  { %23771 = vmatmul.mubr.msk.f32.gmra.mrb[56].mxu0 %vm292_vm1, %v33408_v57  ;;  %23045 = vmatprep.mubr.msk.f32.mxu1 %vm292_vm1, %v2568_v4  ;;  %v2591_v57 = vld [vmem:[%s33245_s0 + $0x46a] sm:$0xff]  ;;  %v2592_v4 = vld [vmem:[%s33245_s0 + $0x472] sm:$0xff] }
 0x3b9   :  { %23773 = vmatprep.mubr.msk.f32.mxu0 %vm292_vm1, %v33409_v3  ;;  %v33434_v3 = vld [vmem:[#allocation31_spill] sm:$0xff] }
 0x3bb   :  { %23046 = vmatmul.mubr.msk.f32.gmra.mrb[90].mxu1 %vm292_vm1, %v2569_v7  ;;  %v2593_v7 = vld [vmem:[%s33245_s0 + $0x47a] sm:$0xff] }
 0x3bc   :  { %23774 = vmatmul.mubr.msk.f32.gmra.mrb[58].mxu0 %vm292_vm1, %v33410_v17  ;;  %23048 = vmatprep.mubr.msk.f32.mxu1 %vm292_vm1, %v2570_v12  ;;  %v29979_v17 = vpop.f32.mrb[8].mxu1  ;;  %v33436_v12 = vld [vmem:[#allocation33_spill] sm:$0xff] }
 0x3bd   :  { %23776 = vmatprep.mubr.msk.f32.mxu0 %vm292_vm1, %v33411_v8  ;;  %v33435_v8 = vld [vmem:[#allocation32_spill] sm:$0xff] }
 0x3bf   :  { %23049 = vmatmul.mubr.msk.f32.gmra.mrb[92].mxu1 %vm292_vm1, %v2571_v15 }
 0x3c0   :  { %23777 = vmatmul.mubr.msk.f32.gmra.mrb[60].mxu0 %vm292_vm1, %v33412_v11  ;;  %23051 = vmatprep.mubr.msk.f32.mxu1 %vm292_vm1, %v2572_v20  ;;  %v29990_v11 = vpop.f32.mrb[9].mxu1  ;;  %v33437_v20 = vld [vmem:[#allocation34_spill] sm:$0xff] }
 0x3c1   :  { %23779 = vmatprep.mubr.msk.f32.mxu0 %vm292_vm1, %v33413_v16  ;;  %v29995_v15 = vpop.f32.mrb[10].mxu1  ;;  %v2594_v16 = vld [vmem:[%s33245_s0 + $0x48a] sm:$0xff] }
 0x3c3   :  { %23052 = vmatmul.mubr.msk.f32.gmra.mrb[94].mxu1 %vm292_vm1, %v2573_v23  ;;  %v30006_v23 = vpop.f32.mrb[11].mxu1 }
 0x3c4   :  { %23780 = vmatmul.mubr.msk.f32.gmra.mrb[62].mxu0 %vm292_vm1, %v33414_v19  ;;  %23054 = vmatprep.mubr.msk.f32.mxu1 %vm292_vm1, %v2574_v28  ;;  %v2595_v19 = vld [vmem:[%s33245_s0 + $0x492] sm:$0xff]  ;;  %v2596_v28 = vld [vmem:[%s33245_s0 + $0x49a] sm:$0xff] }
 0x3c5   :  { %23782 = vmatprep.mubr.msk.f32.mxu0 %vm292_vm1, %v33415_v24  ;;  %v33438_v24 = vld [vmem:[#allocation35_spill] sm:$0xff] }
 0x3c7   :  { %23055 = vmatmul.mubr.msk.f32.gmra.mrb[96].mxu1 %vm292_vm1, %v2575_v31  ;;  %v2597_v31 = vld [vmem:[%s33245_s0 + $0x4a2] sm:$0xff] }
 0x3c8   :  { %23783 = vmatmul.mubr.msk.f32.gmra.mrb[64].mxu0 %vm292_vm1, %v33416_v27  ;;  %23057 = vmatprep.mubr.msk.f32.mxu1 %vm292_vm1, %v2576_v36  ;;  %v30011_v27 = vpop.f32.mrb[12].mxu1  ;;  %v33440_v36 = vld [vmem:[#allocation37_spill] sm:$0xff] }
 0x3c9   :  { %23785 = vmatprep.mubr.msk.f32.mxu0 %vm292_vm1, %v33417_v32  ;;  %v33439_v32 = vld [vmem:[#allocation36_spill] sm:$0xff] }
 0x3cb   :  { %23058 = vmatmul.mubr.msk.f32.gmra.mrb[98].mxu1 %vm292_vm1, %v2577_v39 }
 0x3cc   :  { %23786 = vmatmul.mubr.msk.f32.gmra.mrb[66].mxu0 %vm292_vm1, %v33418_v35  ;;  %23060 = vmatprep.mubr.msk.f32.mxu1 %vm292_vm1, %v2578_v44  ;;  %v30022_v35 = vpop.f32.mrb[13].mxu1  ;;  %v33441_v44 = vld [vmem:[#allocation38_spill] sm:$0xff] }
 0x3cd   :  { %23788 = vmatprep.mubr.msk.f32.mxu0 %vm292_vm1, %v33419_v40  ;;  %v30027_v39 = vpop.f32.mrb[14].mxu1  ;;  %v2598_v40 = vld [vmem:[%s33245_s0 + $0x4b2] sm:$0xff] }
 0x3cf   :  { %23061 = vmatmul.mubr.msk.f32.gmra.mrb[100].mxu1 %vm292_vm1, %v2579_v47  ;;  %v30038_v47 = vpop.f32.mrb[15].mxu1 }
 0x3d0   :  { %23789 = vmatmul.mubr.msk.f32.gmra.mrb[68].mxu0 %vm292_vm1, %v33420_v43  ;;  %23063 = vmatprep.mubr.msk.f32.mxu1 %vm292_vm1, %v2580_v55  ;;  %v2599_v43 = vld [vmem:[%s33245_s0 + $0x4ba] sm:$0xff]  ;;  %v2600_v55 = vld [vmem:[%s33245_s0 + $0x4c2] sm:$0xff] }
 0x3d1   :  { %23791 = vmatprep.mubr.msk.f32.mxu0 %vm292_vm1, %v33421_v48  ;;  %v33442_v48 = vld [vmem:[#allocation39_spill] sm:$0xff] }
 0x3d3   :  { %23064 = vmatmul.mubr.msk.f32.gmra.mrb[102].mxu1 %vm292_vm1, %v2581_v56  ;;  %v2601_v56 = vld [vmem:[%s33245_s0 + $0x4ca] sm:$0xff] }
 0x3d4   :  { %23792 = vmatmul.mubr.msk.f32.gmra.mrb[70].mxu0 %vm292_vm1, %v33422_v51  ;;  %23066 = vmatprep.mubr.msk.f32.mxu1 %vm292_vm1, %v2582_v63  ;;  %v30043_v51 = vpop.f32.mrb[16].mxu1  ;;  %v33444_v63 = vld [vmem:[#allocation41_spill] sm:$0xff] }
 0x3d5   :  { %23794 = vmatprep.mubr.msk.f32.mxu0 %vm292_vm1, %v33423_v59  ;;  %v33443_v59 = vld [vmem:[#allocation40_spill] sm:$0xff] }
 0x3d7   :  { %23067 = vmatmul.mubr.msk.f32.gmra.mrb[104].mxu1 %vm292_vm1, %v2583_v0 }
 0x3d8   :  { %23795 = vmatmul.mubr.msk.f32.gmra.mrb[72].mxu0 %vm292_vm1, %v33424_v60  ;;  %23069 = vmatprep.mubr.msk.f32.mxu1 %vm292_vm1, %v2584_v14  ;;  %v30054_v60 = vpop.f32.mrb[17].mxu1  ;;  %v33445_v14 = vld [vmem:[#allocation42_spill] sm:$0xff] }
 0x3d9   :  { %23797 = vmatprep.mubr.msk.f32.mxu0 %vm292_vm1, %v33425_v5  ;;  %v30059_v0 = vpop.f32.mrb[18].mxu1  ;;  %v2602_v5 = vld [vmem:[%s33245_s0 + $0x4da] sm:$0xff] }
 0x3db   :  { %23070 = vmatmul.mubr.msk.f32.gmra.mrb[106].mxu1 %vm292_vm1, %v2585_v21  ;;  %v30070_v21 = vpop.f32.mrb[19].mxu1 }
 0x3dc   :  { %23798 = vmatmul.mubr.msk.f32.gmra.mrb[74].mxu0 %vm292_vm1, %v33426_v6  ;;  %23072 = vmatprep.mubr.msk.f32.mxu1 %vm292_vm1, %v2586_v38  ;;  %v2603_v6 = vld [vmem:[%s33245_s0 + $0x4e2] sm:$0xff]  ;;  %v2604_v38 = vld [vmem:[%s33245_s0 + $0x4ea] sm:$0xff] }
 0x3dd   :  { %23800 = vmatprep.mubr.msk.f32.mxu0 %vm292_vm1, %v33427_v22  ;;  %v33446_v22 = vld [vmem:[#allocation43_spill] sm:$0xff] }
 0x3df   :  { %23073 = vmatmul.mubr.msk.f32.gmra.mrb[108].mxu1 %vm292_vm1, %v2587_v45  ;;  %v2605_v45 = vld [vmem:[%s33245_s0 + $0x4f2] sm:$0xff] }
 0x3e0   :  { %23801 = vmatmul.mubr.msk.f32.gmra.mrb[76].mxu0 %vm292_vm1, %v33428_v30  ;;  %23075 = vmatprep.mubr.msk.f32.mxu1 %vm292_vm1, %v2588_v62  ;;  %v30075_v30 = vpop.f32.mrb[20].mxu1  ;;  %v33448_v62 = vld [vmem:[#allocation45_spill] sm:$0xff] }
 0x3e1   :  { %23803 = vmatprep.mubr.msk.f32.mxu0 %vm292_vm1, %v33429_v46  ;;  %v33447_v46 = vld [vmem:[#allocation44_spill] sm:$0xff] }
 0x3e3   :  { %23076 = vmatmul.mubr.msk.f32.gmra.mrb[110].mxu1 %vm292_vm1, %v2589_v9 }
 0x3e4   :  { %23804 = vmatmul.mubr.msk.f32.gmra.mrb[78].mxu0 %vm292_vm1, %v33430_v54  ;;  %23078 = vmatprep.mubr.msk.f32.mxu1 %vm292_vm1, %v2590_v42  ;;  %v30086_v54 = vpop.f32.mrb[21].mxu1  ;;  %v33450_v42 = vld [vmem:[#allocation47_spill] sm:$0xff] }
 0x3e5   :  { %23806 = vmatprep.mubr.msk.f32.mxu0 %vm292_vm1, %v33431_v10  ;;  %v30091_v9 = vpop.f32.mrb[22].mxu1  ;;  %v33449_v10 = vld [vmem:[#allocation46_spill] sm:$0xff] }
 0x3e7   :  { %23079 = vmatmul.mubr.msk.f32.gmra.mrb[112].mxu1 %vm292_vm1, %v2591_v57 }
 0x3e8   :  { %23807 = vmatmul.mubr.msk.f32.gmra.mrb[80].mxu0 %vm292_vm1, %v33432_v26  ;;  %23081 = vmatprep.mubr.msk.f32.mxu1 %vm292_vm1, %v2592_v4  ;;  %v30095_v26 = vpop.f32.mrb[23].mxu1  ;;  %v33452_v4 = vld [vmem:[#allocation49_spill] sm:$0xff] }
 0x3e9   :  { %23809 = vmatprep.mubr.msk.f32.mxu0 %vm292_vm1, %v33433_v58  ;;  %v30099_v57 = vpop.f32.mrb[24].mxu1  ;;  %v33451_v58 = vld [vmem:[#allocation48_spill] sm:$0xff] }
 0x3eb   :  { %23082 = vmatmul.mubr.msk.f32.gmra.mrb[114].mxu1 %vm292_vm1, %v2593_v7 }
 0x3ec   :  { %23810 = vmatmul.mubr.msk.f32.gmra.mrb[82].mxu0 %vm292_vm1, %v33434_v3  ;;  %23084 = vmatprep.mubr.msk.f32.mxu1 %vm292_vm1, %v2594_v16  ;;  %v30103_v3 = vpop.f32.mrb[25].mxu1  ;;  %v33454_v16 = vld [vmem:[#allocation51_spill] sm:$0xff] }
 0x3ed   :  { %23812 = vmatprep.mubr.msk.f32.mxu0 %vm292_vm1, %v33435_v8  ;;  %v30107_v7 = vpop.f32.mrb[26].mxu1  ;;  %v33453_v8 = vld [vmem:[#allocation50_spill] sm:$0xff] }
 0x3ef   :  { %23085 = vmatmul.mubr.msk.f32.gmra.mrb[116].mxu1 %vm292_vm1, %v2595_v19 }
 0x3f0   :  { %23813 = vmatmul.mubr.msk.f32.gmra.mrb[84].mxu0 %vm292_vm1, %v33436_v12  ;;  %23087 = vmatprep.mubr.msk.f32.mxu1 %vm292_vm1, %v2596_v28  ;;  %v30111_v12 = vpop.f32.mrb[27].mxu1  ;;  %v33456_v28 = vld [vmem:[#allocation53_spill] sm:$0xff] }
 0x3f1   :  { %23815 = vmatprep.mubr.msk.f32.mxu0 %vm292_vm1, %v33437_v20  ;;  %v30115_v19 = vpop.f32.mrb[28].mxu1  ;;  %v33455_v20 = vld [vmem:[#allocation52_spill] sm:$0xff] }
 0x3f3   :  { %23088 = vmatmul.mubr.msk.f32.gmra.mrb[118].mxu1 %vm292_vm1, %v2597_v31 }
 0x3f4   :  { %23816 = vmatmul.mubr.msk.f32.gmra.mrb[86].mxu0 %vm292_vm1, %v33438_v24  ;;  %23090 = vmatprep.mubr.msk.f32.mxu1 %vm292_vm1, %v2598_v40  ;;  %v30119_v24 = vpop.f32.mrb[29].mxu1  ;;  %v33458_v40 = vld [vmem:[#allocation55_spill] sm:$0xff] }
 0x3f5   :  { %23818 = vmatprep.mubr.msk.f32.mxu0 %vm292_vm1, %v33439_v32  ;;  %v30123_v31 = vpop.f32.mrb[30].mxu1  ;;  %v33457_v32 = vld [vmem:[#allocation54_spill] sm:$0xff] }
 0x3f7   :  { %23091 = vmatmul.mubr.msk.f32.gmra.mrb[120].mxu1 %vm292_vm1, %v2599_v43 }
 0x3f8   :  { %23819 = vmatmul.mubr.msk.f32.gmra.mrb[88].mxu0 %vm292_vm1, %v33440_v36  ;;  %23093 = vmatprep.mubr.msk.f32.mxu1 %vm292_vm1, %v2600_v55  ;;  %v30127_v36 = vpop.f32.mrb[31].mxu1  ;;  %v33460_v55 = vld [vmem:[#allocation57_spill] sm:$0xff] }
 0x3f9   :  { %23821 = vmatprep.mubr.msk.f32.mxu0 %vm292_vm1, %v33441_v44  ;;  %v30131_v43 = vpop.f32.mrb[32].mxu1  ;;  %v33459_v44 = vld [vmem:[#allocation56_spill] sm:$0xff] }
 0x3fb   :  { %23094 = vmatmul.mubr.msk.f32.gmra.mrb[122].mxu1 %vm292_vm1, %v2601_v56  ;;  %v33461_v56 = vld [vmem:[#allocation58_spill] sm:$0xff] }
 0x3fc   :  { %23822 = vmatmul.mubr.msk.f32.gmra.mrb[90].mxu0 %vm292_vm1, %v33442_v48  ;;  %23096 = vmatprep.mubr.msk.f32.mxu1 %vm292_vm1, %v2602_v5  ;;  %v30135_v48 = vpop.f32.mrb[33].mxu1  ;;  %v33462_v5 = vld [vmem:[#allocation59_spill] sm:$0xff] }
 0x3fd   :  { %23824 = vmatprep.mubr.msk.f32.mxu0 %vm292_vm1, %v33443_v59 }
 0x3ff   :  { %23097 = vmatmul.mubr.msk.f32.gmra.mrb[124].mxu1 %vm292_vm1, %v2603_v6  ;;  %v33463_v6 = vld [vmem:[#allocation60_spill] sm:$0xff] }
 0x400   :  { %23825 = vmatmul.mubr.msk.f32.gmra.mrb[92].mxu0 %vm292_vm1, %v33444_v63  ;;  %23099 = vmatprep.mubr.msk.f32.mxu1 %vm292_vm1, %v2604_v38 }
 0x401   :  { %23827 = vmatprep.mubr.msk.f32.mxu0 %vm292_vm1, %v33445_v14 }
 0x403   :  { %23100 = vmatmul.mubr.msk.f32.gmra.mrb[126].mxu1 %vm292_vm1, %v2605_v45 }
 0x404   :  { %23828 = vmatmul.mubr.msk.f32.gmra.mrb[94].mxu0 %vm292_vm1, %v33446_v22 }
 0x405   :  { %23830 = vmatprep.mubr.msk.f32.mxu0 %vm292_vm1, %v33447_v46  ;;  %v33464_v46 = vld [vmem:[#allocation61_spill] sm:$0xff] }
 0x408   :  { %23831 = vmatmul.mubr.msk.f32.gmra.mrb[96].mxu0 %vm292_vm1, %v33448_v62 }
 0x409   :  { %23833 = vmatprep.mubr.msk.f32.mxu0 %vm292_vm1, %v33449_v10 }
 0x40c   :  { %23834 = vmatmul.mubr.msk.f32.gmra.mrb[98].mxu0 %vm292_vm1, %v33450_v42 }
 0x40d   :  { %23836 = vmatprep.mubr.msk.f32.mxu0 %vm292_vm1, %v33451_v58 }
 0x410   :  { %23837 = vmatmul.mubr.msk.f32.gmra.mrb[100].mxu0 %vm292_vm1, %v33452_v4  ;;  %v19621_v4 = vld [vmem:[%s33245_s0 + $0x528] sm:$0xff] }
 0x411   :  { %23839 = vmatprep.mubr.msk.f32.mxu0 %vm292_vm1, %v33453_v8 }
 0x414   :  { %23840 = vmatmul.mubr.msk.f32.gmra.mrb[102].mxu0 %vm292_vm1, %v33454_v16 }
 0x415   :  { %23842 = vmatprep.mubr.msk.f32.mxu0 %vm292_vm1, %v33455_v20  ;;  %v19622_v20 = vld [vmem:[%s33245_s0 + $0x530] sm:$0xff] }
 0x418   :  { %23843 = vmatmul.mubr.msk.f32.gmra.mrb[104].mxu0 %vm292_vm1, %v33456_v28  ;;  %v19623_v28 = vld [vmem:[%s33245_s0 + $0x538] sm:$0xff] }
 0x419   :  { %23845 = vmatprep.mubr.msk.f32.mxu0 %vm292_vm1, %v33457_v32 }
 0x41c   :  { %23846 = vmatmul.mubr.msk.f32.gmra.mrb[106].mxu0 %vm292_vm1, %v33458_v40 }
 0x41d   :  { %23848 = vmatprep.mubr.msk.f32.mxu0 %vm292_vm1, %v33459_v44  ;;  %v19624_v44 = vld [vmem:[%s33245_s0 + $0x540] sm:$0xff] }
 0x41e   :  { %v30141_v59 = vpop.f32.mrb[34].mxu1 }
 0x41f   :  { %v30143_v63 = vpop.f32.mrb[35].mxu1 }
 0x420   :  { %23849 = vmatmul.mubr.msk.f32.gmra.mrb[108].mxu0 %vm292_vm1, %v33460_v55  ;;  %v19755_v55 = vld [vmem:[%s33245_s0 + $0x51] sm:$0xff] }
 0x421   :  { %23851 = vmatprep.mubr.msk.f32.mxu0 %vm292_vm1, %v33461_v56 }
 0x422   :  { %v30149_v14 = vpop.f32.mrb[36].mxu1 }
 0x423   :  { %v30151_v22 = vpop.f32.mrb[37].mxu1 }
 0x424   :  { %23852 = vmatmul.mubr.msk.f32.gmra.mrb[110].mxu0 %vm292_vm1, %v33462_v5 }
 0x425   :  { %23854 = vmatprep.mubr.msk.f32.mxu0 %vm292_vm1, %v33463_v6  ;;  %v19756_v6 = vld [vmem:[%s33245_s0 + $0x59] sm:$0xff] }
 0x426   :  { %v30157_v38 = vpop.f32.mrb[38].mxu1 }
 0x427   :  { %v30159_v45 = vpop.f32.mrb[39].mxu1 }
 0x428   :  { %23855 = vmatmul.mubr.msk.f32.gmra.mrb[112].mxu0 %vm292_vm1, %v29405_v49  ;;  %v19617_v49 = vld [vmem:[%s33245_s0 + $0x500] sm:$0xff] }
 0x429   :  { %23857 = vmatprep.mubr.msk.f32.mxu0 %vm292_vm1, %v29422_v1 }
 0x42a   :  { %v30165_v62 = vpop.f32.mrb[40].mxu1 }
 0x42b   :  { %v30167_v10 = vpop.f32.mrb[41].mxu1 }
 0x42c   :  { %23858 = vmatmul.mubr.msk.f32.gmra.mrb[114].mxu0 %vm292_vm1, %v33464_v46  ;;  %v19757_v46 = vld [vmem:[%s33245_s0 + $0x61] sm:$0xff] }
 0x42d   :  { %23860 = vmatprep.mubr.msk.f32.mxu0 %vm292_vm1, %v29441_v2  ;;  %v19618_v2 = vld [vmem:[%s33245_s0 + $0x508] sm:$0xff] }
 0x42e   :  { %v30176_v1 = vpop.f32.mrb[42].mxu1 }
 0x42f   :  { %v30178_v42 = vpop.f32.mrb[43].mxu1 }
 0x430   :  { %23861 = vmatmul.mubr.msk.f32.gmra.mrb[116].mxu0 %vm292_vm1, %v29446_v34  ;;  %v19619_v34 = vld [vmem:[%s33245_s0 + $0x510] sm:$0xff] }
 0x431   :  { %23863 = vmatprep.mubr.msk.f32.mxu0 %vm292_vm1, %v29459_v50 }
 0x432   :  { %v30189_v50 = vpop.f32.mrb[44].mxu1 }
 0x433   :  { %v30191_v58 = vpop.f32.mrb[45].mxu1 }
 0x434   :  { %23864 = vmatmul.mubr.msk.f32.gmra.mrb[118].mxu0 %vm292_vm1, %v29464_v18  ;;  %v19620_v18 = vld [vmem:[%s33245_s0 + $0x518] sm:$0xff] }
 0x435   :  { %23866 = vmatprep.mubr.msk.f32.mxu0 %vm292_vm1, %v19617_v49 }
 0x436   :  { %v30201_v8 = vpop.f32.mrb[46].mxu1 }
 0x437   :  { %v30203_v16 = vpop.f32.mrb[47].mxu1 }
 0x438   :  { %23867 = vmatmul.mubr.msk.f32.gmra.mrb[120].mxu0 %vm292_vm1, %v19618_v2 }
 0x439   :  { %23869 = vmatprep.mubr.msk.f32.mxu0 %vm292_vm1, %v19619_v34  ;;  %v19758_v34 = vld [vmem:[%s33245_s0 + $0x69] sm:$0xff] }
 0x43a   :  { %v30213_v32 = vpop.f32.mrb[48].mxu1 }
 0x43b   :  { %v30215_v40 = vpop.f32.mrb[49].mxu1 }
 0x43c   :  { %23870 = vmatmul.mubr.msk.f32.gmra.mrb[122].mxu0 %vm292_vm1, %v19620_v18  ;;  %v19759_v18 = vld [vmem:[%s33245_s0 + $0x79] sm:$0xff] }
 0x43d   :  { %23872 = vmatprep.mubr.msk.f32.mxu0 %vm292_vm1, %v19621_v4 }
 0x43e   :  { %v30225_v56 = vpop.f32.mrb[50].mxu1 }
 0x43f   :  { %33465 = vst [vmem:[#allocation5_spill] sm:$0xff] %v30225_v56  ;;  %v30227_v5 = vpop.f32.mrb[51].mxu1 }
 0x440   :  { %23873 = vmatmul.mubr.msk.f32.gmra.mrb[124].mxu0 %vm292_vm1, %v19622_v20  ;;  %33466 = vst [vmem:[#allocation6_spill] sm:$0xff] %v30227_v5 }
 0x441   :  { %23875 = vmatprep.mubr.msk.f32.mxu0 %vm292_vm1, %v19623_v28  ;;  %v19760_v28 = vld [vmem:[%s33245_s0 + $0x81] sm:$0xff] }
 0x442   :  { %v30237_v49 = vpop.f32.mrb[52].mxu1 }
 0x443   :  { %33467 = vst [vmem:[#allocation7_spill] sm:$0xff] %v30237_v49  ;;  %v30239_v2 = vpop.f32.mrb[53].mxu1 }
 0x444   :  { %23876 = vmatmul.mubr.msk.f32.gmra.mrb[126].mxu0 %vm292_vm1, %v19624_v44  ;;  %33468 = vst [vmem:[#allocation8_spill] sm:$0xff] %v30239_v2 }
 0x445   :  { %23880 = vmatprep.mubr.msk.f32.mxu0 %vm292_vm1, %v19755_v55 }
 0x446   :  { %v30251_v4 = vpop.f32.mrb[54].mxu1 }
 0x447   :  { %33469 = vst [vmem:[#allocation9_spill] sm:$0xff] %v30251_v4  ;;  %v30253_v20 = vpop.f32.mrb[55].mxu1 }
 0x448   :  { %23881 = vmatmul.mubr.msk.f32.vlgmr.msra.gmra.mrb[0].mxu0 %vm292_vm1, %v19756_v6  ;;  %33470 = vst [vmem:[#allocation10_spill] sm:$0xff] %v30253_v20  ;;  %v19762_v6 = vld [vmem:[%s33245_s0 + $0x91] sm:$0xff] }
 0x449   :  { %23883 = vmatprep.mubr.msk.f32.mxu0 %vm292_vm1, %v19757_v46  ;;  %24073 = vmatpush3.msk.msra.mxu0 %vm677_vm0, %v29887_v52  ;;  %v19761_v52 = vld [vmem:[%s33245_s0 + $0x89] sm:$0xff]  ;;  %v19763_v46 = vld [vmem:[%s33245_s0 + $0xa1] sm:$0xff] }
 0x44a   :  { %v30263_v44 = vpop.f32.mrb[56].mxu1 }
 0x44b   :  { %33471 = vst [vmem:[#allocation11_spill] sm:$0xff] %v30263_v44  ;;  %v30265_v55 = vpop.f32.mrb[57].mxu1 }
 0x44c   :  { %23884 = vmatmul.mubr.msk.f32.gmra.mrb[2].mxu0 %vm292_vm1, %v19758_v34  ;;  %33472 = vst [vmem:[#allocation12_spill] sm:$0xff] %v30265_v55 }
 0x44d   :  { %23886 = vmatprep.mubr.msk.f32.mxu0 %vm292_vm1, %v19759_v18 }
 0x44e   :  { %v30275_v34 = vpop.f32.mrb[58].mxu1 }
 0x44f   :  { %33473 = vst [vmem:[#allocation13_spill] sm:$0xff] %v30275_v34  ;;  %v30277_v18 = vpop.f32.mrb[59].mxu1 }
 0x450   :  { %23887 = vmatmul.mubr.msk.f32.gmra.mrb[4].mxu0 %vm292_vm1, %v19760_v28  ;;  %33474 = vst [vmem:[#allocation14_spill] sm:$0xff] %v30277_v18  ;;  %v19764_v28 = vld [vmem:[%s33245_s0 + $0xa9] sm:$0xff] }
 0x451   :  { %23889 = vmatprep.mubr.msk.f32.mxu0 %vm292_vm1, %v19761_v52  ;;  %v19765_v52 = vld [vmem:[%s33245_s0 + $0xb1] sm:$0xff] }
 0x452   :  { %v30287_v55 = vpop.f32.mrb[60].mxu1 }
 0x453   :  { %33475 = vst [vmem:[#allocation15_spill] sm:$0xff] %v30287_v55  ;;  %v30289_v44 = vpop.f32.mrb[61].mxu1 }
 0x454   :  { %23890 = vmatmul.mubr.msk.f32.gmra.mrb[6].mxu0 %vm292_vm1, %v19762_v6  ;;  %33476 = vst [vmem:[#allocation16_spill] sm:$0xff] %v30289_v44  ;;  %v19766_v6 = vld [vmem:[%s33245_s0 + $0xb9] sm:$0xff] }
 0x455   :  { %23892 = vmatprep.mubr.msk.f32.mxu0 %vm292_vm1, %v19763_v46  ;;  %v19767_v46 = vld [vmem:[%s33245_s0 + $0xc9] sm:$0xff] }
 0x456   :  { %v30299_v18 = vpop.f32.mrb[62].mxu1 }
 0x457   :  { %33477 = vst [vmem:[#allocation17_spill] sm:$0xff] %v30299_v18  ;;  %v30301_v34 = vpop.f32.mrb[63].mxu1 }
 0x458   :  { %23893 = vmatmul.mubr.msk.f32.gmra.mrb[8].mxu0 %vm292_vm1, %v19764_v28  ;;  %33478 = vst [vmem:[#allocation18_spill] sm:$0xff] %v30301_v34  ;;  %v19768_v28 = vld [vmem:[%s33245_s0 + $0xd1] sm:$0xff] }
 0x459   :  { %23895 = vmatprep.mubr.msk.f32.mxu0 %vm292_vm1, %v19765_v52  ;;  %v19769_v52 = vld [vmem:[%s33245_s0 + $0xd9] sm:$0xff] }
 0x45a   :  { %v30311_v44 = vpop.f32.mrb[64].mxu1 }
 0x45b   :  { %33479 = vst [vmem:[#allocation19_spill] sm:$0xff] %v30311_v44  ;;  %v30313_v55 = vpop.f32.mrb[65].mxu1 }
 0x45c   :  { %23896 = vmatmul.mubr.msk.f32.gmra.mrb[10].mxu0 %vm292_vm1, %v19766_v6  ;;  %33480 = vst [vmem:[#allocation20_spill] sm:$0xff] %v30313_v55  ;;  %v19770_v6 = vld [vmem:[%s33245_s0 + $0xe1] sm:$0xff] }
 0x45d   :  { %23898 = vmatprep.mubr.msk.f32.mxu0 %vm292_vm1, %v19767_v46  ;;  %v19771_v46 = vld [vmem:[%s33245_s0 + $0xf1] sm:$0xff] }
 0x45e   :  { %v30323_v34 = vpop.f32.mrb[66].mxu1 }
 0x45f   :  { %33481 = vst [vmem:[#allocation21_spill] sm:$0xff] %v30323_v34  ;;  %v30325_v18 = vpop.f32.mrb[67].mxu1 }
 0x460   :  { %23899 = vmatmul.mubr.msk.f32.gmra.mrb[12].mxu0 %vm292_vm1, %v19768_v28  ;;  %33482 = vst [vmem:[#allocation22_spill] sm:$0xff] %v30325_v18  ;;  %v19772_v28 = vld [vmem:[%s33245_s0 + $0xf9] sm:$0xff] }
 0x461   :  { %23901 = vmatprep.mubr.msk.f32.mxu0 %vm292_vm1, %v19769_v52  ;;  %v19773_v52 = vld [vmem:[%s33245_s0 + $0x101] sm:$0xff] }
 0x462   :  { %v30335_v55 = vpop.f32.mrb[68].mxu1 }
 0x463   :  { %33483 = vst [vmem:[#allocation23_spill] sm:$0xff] %v30335_v55  ;;  %v30337_v44 = vpop.f32.mrb[69].mxu1 }
 0x464   :  { %23902 = vmatmul.mubr.msk.f32.gmra.mrb[14].mxu0 %vm292_vm1, %v19770_v6  ;;  %33484 = vst [vmem:[#allocation24_spill] sm:$0xff] %v30337_v44  ;;  %v19774_v6 = vld [vmem:[%s33245_s0 + $0x109] sm:$0xff] }
 0x465   :  { %23904 = vmatprep.mubr.msk.f32.mxu0 %vm292_vm1, %v19771_v46  ;;  %v19775_v46 = vld [vmem:[%s33245_s0 + $0x119] sm:$0xff] }
 0x466   :  { %v30347_v18 = vpop.f32.mrb[70].mxu1 }
 0x467   :  { %33485 = vst [vmem:[#allocation25_spill] sm:$0xff] %v30347_v18  ;;  %v30349_v34 = vpop.f32.mrb[71].mxu1 }
 0x468   :  { %23905 = vmatmul.mubr.msk.f32.gmra.mrb[16].mxu0 %vm292_vm1, %v19772_v28  ;;  %33486 = vst [vmem:[#allocation26_spill] sm:$0xff] %v30349_v34  ;;  %v19776_v28 = vld [vmem:[%s33245_s0 + $0x121] sm:$0xff] }
 0x469   :  { %23907 = vmatprep.mubr.msk.f32.mxu0 %vm292_vm1, %v19773_v52  ;;  %v19777_v52 = vld [vmem:[%s33245_s0 + $0x129] sm:$0xff] }
 0x46a   :  { %v30359_v44 = vpop.f32.mrb[72].mxu1 }
 0x46b   :  { %33487 = vst [vmem:[#allocation27_spill] sm:$0xff] %v30359_v44  ;;  %v30361_v55 = vpop.f32.mrb[73].mxu1 }
 0x46c   :  { %23908 = vmatmul.mubr.msk.f32.gmra.mrb[18].mxu0 %vm292_vm1, %v19774_v6  ;;  %33488 = vst [vmem:[#allocation28_spill] sm:$0xff] %v30361_v55  ;;  %v19778_v6 = vld [vmem:[%s33245_s0 + $0x131] sm:$0xff] }
 0x46d   :  { %23910 = vmatprep.mubr.msk.f32.mxu0 %vm292_vm1, %v19775_v46  ;;  %v19779_v46 = vld [vmem:[%s33245_s0 + $0x141] sm:$0xff] }
 0x46e   :  { %v30371_v34 = vpop.f32.mrb[74].mxu1 }
 0x46f   :  { %33489 = vst [vmem:[#allocation29_spill] sm:$0xff] %v30371_v34  ;;  %v30373_v18 = vpop.f32.mrb[75].mxu1 }
 0x470   :  { %23911 = vmatmul.mubr.msk.f32.gmra.mrb[20].mxu0 %vm292_vm1, %v19776_v28  ;;  %33490 = vst [vmem:[#allocation30_spill] sm:$0xff] %v30373_v18  ;;  %v19780_v28 = vld [vmem:[%s33245_s0 + $0x149] sm:$0xff] }
 0x471   :  { %23913 = vmatprep.mubr.msk.f32.mxu0 %vm292_vm1, %v19777_v52  ;;  %v19781_v52 = vld [vmem:[%s33245_s0 + $0x151] sm:$0xff] }
 0x472   :  { %v30383_v55 = vpop.f32.mrb[76].mxu1 }
 0x473   :  { %33491 = vst [vmem:[#allocation31_spill] sm:$0xff] %v30383_v55  ;;  %v30385_v44 = vpop.f32.mrb[77].mxu1 }
 0x474   :  { %23914 = vmatmul.mubr.msk.f32.gmra.mrb[22].mxu0 %vm292_vm1, %v19778_v6  ;;  %33492 = vst [vmem:[#allocation32_spill] sm:$0xff] %v30385_v44  ;;  %v19782_v6 = vld [vmem:[%s33245_s0 + $0x159] sm:$0xff] }
 0x475   :  { %23916 = vmatprep.mubr.msk.f32.mxu0 %vm292_vm1, %v19779_v46  ;;  %v19783_v46 = vld [vmem:[%s33245_s0 + $0x169] sm:$0xff] }
 0x476   :  { %v30395_v18 = vpop.f32.mrb[78].mxu1 }
 0x477   :  { %33493 = vst [vmem:[#allocation33_spill] sm:$0xff] %v30395_v18  ;;  %v30397_v34 = vpop.f32.mrb[79].mxu1 }
 0x478   :  { %23917 = vmatmul.mubr.msk.f32.gmra.mrb[24].mxu0 %vm292_vm1, %v19780_v28  ;;  %33494 = vst [vmem:[#allocation34_spill] sm:$0xff] %v30397_v34  ;;  %v19784_v28 = vld [vmem:[%s33245_s0 + $0x171] sm:$0xff] }
 0x479   :  { %23919 = vmatprep.mubr.msk.f32.mxu0 %vm292_vm1, %v19781_v52  ;;  %v19785_v52 = vld [vmem:[%s33245_s0 + $0x179] sm:$0xff] }
 0x47a   :  { %v30407_v44 = vpop.f32.mrb[80].mxu1 }
 0x47b   :  { %33495 = vst [vmem:[#allocation35_spill] sm:$0xff] %v30407_v44  ;;  %v30409_v55 = vpop.f32.mrb[81].mxu1 }
 0x47c   :  { %23920 = vmatmul.mubr.msk.f32.gmra.mrb[26].mxu0 %vm292_vm1, %v19782_v6  ;;  %33496 = vst [vmem:[#allocation36_spill] sm:$0xff] %v30409_v55  ;;  %v19786_v6 = vld [vmem:[%s33245_s0 + $0x181] sm:$0xff] }
 0x47d   :  { %23922 = vmatprep.mubr.msk.f32.mxu0 %vm292_vm1, %v19783_v46  ;;  %v19787_v46 = vld [vmem:[%s33245_s0 + $0x191] sm:$0xff] }
 0x47e   :  { %v30419_v34 = vpop.f32.mrb[82].mxu1 }
 0x47f   :  { %33497 = vst [vmem:[#allocation37_spill] sm:$0xff] %v30419_v34  ;;  %v30421_v18 = vpop.f32.mrb[83].mxu1 }
 0x480   :  { %23923 = vmatmul.mubr.msk.f32.gmra.mrb[28].mxu0 %vm292_vm1, %v19784_v28  ;;  %33498 = vst [vmem:[#allocation38_spill] sm:$0xff] %v30421_v18  ;;  %v19788_v28 = vld [vmem:[%s33245_s0 + $0x199] sm:$0xff] }
 0x481   :  { %23925 = vmatprep.mubr.msk.f32.mxu0 %vm292_vm1, %v19785_v52  ;;  %v19789_v52 = vld [vmem:[%s33245_s0 + $0x1a1] sm:$0xff] }
 0x482   :  { %v30431_v55 = vpop.f32.mrb[84].mxu1 }
 0x483   :  { %33499 = vst [vmem:[#allocation39_spill] sm:$0xff] %v30431_v55  ;;  %v30433_v44 = vpop.f32.mrb[85].mxu1 }
 0x484   :  { %23926 = vmatmul.mubr.msk.f32.gmra.mrb[30].mxu0 %vm292_vm1, %v19786_v6  ;;  %33500 = vst [vmem:[#allocation40_spill] sm:$0xff] %v30433_v44  ;;  %v19790_v6 = vld [vmem:[%s33245_s0 + $0x1a9] sm:$0xff] }
 0x485   :  { %23928 = vmatprep.mubr.msk.f32.mxu0 %vm292_vm1, %v19787_v46  ;;  %v19791_v46 = vld [vmem:[%s33245_s0 + $0x1b9] sm:$0xff] }
 0x486   :  { %v30443_v18 = vpop.f32.mrb[86].mxu1 }
 0x487   :  { %33501 = vst [vmem:[#allocation41_spill] sm:$0xff] %v30443_v18  ;;  %v30445_v34 = vpop.f32.mrb[87].mxu1 }
 0x488   :  { %23929 = vmatmul.mubr.msk.f32.gmra.mrb[32].mxu0 %vm292_vm1, %v19788_v28  ;;  %33502 = vst [vmem:[#allocation42_spill] sm:$0xff] %v30445_v34  ;;  %v19792_v28 = vld [vmem:[%s33245_s0 + $0x1c1] sm:$0xff] }
 0x489   :  { %23931 = vmatprep.mubr.msk.f32.mxu0 %vm292_vm1, %v19789_v52  ;;  %v19793_v52 = vld [vmem:[%s33245_s0 + $0x1c9] sm:$0xff] }
 0x48a   :  { %v30455_v44 = vpop.f32.mrb[88].mxu1 }
 0x48b   :  { %33503 = vst [vmem:[#allocation43_spill] sm:$0xff] %v30455_v44  ;;  %v30457_v55 = vpop.f32.mrb[89].mxu1 }
 0x48c   :  { %23932 = vmatmul.mubr.msk.f32.gmra.mrb[34].mxu0 %vm292_vm1, %v19790_v6  ;;  %33504 = vst [vmem:[#allocation44_spill] sm:$0xff] %v30457_v55  ;;  %v19794_v6 = vld [vmem:[%s33245_s0 + $0x1d1] sm:$0xff] }
 0x48d   :  { %23934 = vmatprep.mubr.msk.f32.mxu0 %vm292_vm1, %v19791_v46  ;;  %v19795_v46 = vld [vmem:[%s33245_s0 + $0x1e1] sm:$0xff] }
 0x48e   :  { %v30467_v34 = vpop.f32.mrb[90].mxu1 }
 0x48f   :  { %33505 = vst [vmem:[#allocation45_spill] sm:$0xff] %v30467_v34  ;;  %v30469_v18 = vpop.f32.mrb[91].mxu1 }
 0x490   :  { %23935 = vmatmul.mubr.msk.f32.gmra.mrb[36].mxu0 %vm292_vm1, %v19792_v28  ;;  %33506 = vst [vmem:[#allocation46_spill] sm:$0xff] %v30469_v18  ;;  %v19796_v28 = vld [vmem:[%s33245_s0 + $0x1e9] sm:$0xff] }
 0x491   :  { %23937 = vmatprep.mubr.msk.f32.mxu0 %vm292_vm1, %v19793_v52  ;;  %v19797_v52 = vld [vmem:[%s33245_s0 + $0x1f1] sm:$0xff] }
 0x492   :  { %v30479_v55 = vpop.f32.mrb[92].mxu1 }
 0x493   :  { %33507 = vst [vmem:[#allocation47_spill] sm:$0xff] %v30479_v55  ;;  %v30481_v44 = vpop.f32.mrb[93].mxu1 }
 0x494   :  { %23938 = vmatmul.mubr.msk.f32.gmra.mrb[38].mxu0 %vm292_vm1, %v19794_v6  ;;  %33508 = vst [vmem:[#allocation48_spill] sm:$0xff] %v30481_v44  ;;  %v19798_v6 = vld [vmem:[%s33245_s0 + $0x1f9] sm:$0xff] }
 0x495   :  { %23940 = vmatprep.mubr.msk.f32.mxu0 %vm292_vm1, %v19795_v46  ;;  %v19799_v46 = vld [vmem:[%s33245_s0 + $0x209] sm:$0xff] }
 0x496   :  { %v30491_v18 = vpop.f32.mrb[94].mxu1 }
 0x497   :  { %33509 = vst [vmem:[#allocation49_spill] sm:$0xff] %v30491_v18  ;;  %v30493_v34 = vpop.f32.mrb[95].mxu1 }
 0x498   :  { %23941 = vmatmul.mubr.msk.f32.gmra.mrb[40].mxu0 %vm292_vm1, %v19796_v28  ;;  %33510 = vst [vmem:[#allocation50_spill] sm:$0xff] %v30493_v34  ;;  %v19800_v28 = vld [vmem:[%s33245_s0 + $0x211] sm:$0xff] }
 0x499   :  { %23943 = vmatprep.mubr.msk.f32.mxu0 %vm292_vm1, %v19797_v52  ;;  %v19801_v52 = vld [vmem:[%s33245_s0 + $0x219] sm:$0xff] }
 0x49a   :  { %v30503_v44 = vpop.f32.mrb[96].mxu1 }
 0x49b   :  { %33511 = vst [vmem:[#allocation51_spill] sm:$0xff] %v30503_v44  ;;  %v30505_v55 = vpop.f32.mrb[97].mxu1 }
 0x49c   :  { %23944 = vmatmul.mubr.msk.f32.gmra.mrb[42].mxu0 %vm292_vm1, %v19798_v6  ;;  %33512 = vst [vmem:[#allocation52_spill] sm:$0xff] %v30505_v55  ;;  %v19802_v6 = vld [vmem:[%s33245_s0 + $0x221] sm:$0xff] }
 0x49d   :  { %23946 = vmatprep.mubr.msk.f32.mxu0 %vm292_vm1, %v19799_v46  ;;  %v19803_v46 = vld [vmem:[%s33245_s0 + $0x231] sm:$0xff] }
 0x49e   :  { %v30515_v34 = vpop.f32.mrb[98].mxu1 }
 0x49f   :  { %33513 = vst [vmem:[#allocation53_spill] sm:$0xff] %v30515_v34  ;;  %v30517_v18 = vpop.f32.mrb[99].mxu1 }
 0x4a0   :  { %23947 = vmatmul.mubr.msk.f32.gmra.mrb[44].mxu0 %vm292_vm1, %v19800_v28  ;;  %33514 = vst [vmem:[#allocation54_spill] sm:$0xff] %v30517_v18  ;;  %v19804_v28 = vld [vmem:[%s33245_s0 + $0x239] sm:$0xff] }
 0x4a1   :  { %23949 = vmatprep.mubr.msk.f32.mxu0 %vm292_vm1, %v19801_v52  ;;  %v19805_v52 = vld [vmem:[%s33245_s0 + $0x241] sm:$0xff] }
 0x4a2   :  { %v30527_v55 = vpop.f32.mrb[100].mxu1 }
 0x4a3   :  { %33515 = vst [vmem:[#allocation55_spill] sm:$0xff] %v30527_v55  ;;  %v30529_v44 = vpop.f32.mrb[101].mxu1 }
 0x4a4   :  { %23950 = vmatmul.mubr.msk.f32.gmra.mrb[46].mxu0 %vm292_vm1, %v19802_v6  ;;  %33516 = vst [vmem:[#allocation56_spill] sm:$0xff] %v30529_v44  ;;  %v19806_v6 = vld [vmem:[%s33245_s0 + $0x249] sm:$0xff] }
 0x4a5   :  { %23952 = vmatprep.mubr.msk.f32.mxu0 %vm292_vm1, %v19803_v46  ;;  %v19807_v46 = vld [vmem:[%s33245_s0 + $0x259] sm:$0xff] }
 0x4a6   :  { %v30539_v18 = vpop.f32.mrb[102].mxu1 }
 0x4a7   :  { %33517 = vst [vmem:[#allocation57_spill] sm:$0xff] %v30539_v18  ;;  %v30541_v34 = vpop.f32.mrb[103].mxu1 }
 0x4a8   :  { %23953 = vmatmul.mubr.msk.f32.gmra.mrb[48].mxu0 %vm292_vm1, %v19804_v28  ;;  %33518 = vst [vmem:[#allocation58_spill] sm:$0xff] %v30541_v34  ;;  %v19808_v28 = vld [vmem:[%s33245_s0 + $0x261] sm:$0xff] }
 0x4a9   :  { %23955 = vmatprep.mubr.msk.f32.mxu0 %vm292_vm1, %v19805_v52  ;;  %v19809_v52 = vld [vmem:[%s33245_s0 + $0x269] sm:$0xff] }
 0x4aa   :  { %v30551_v44 = vpop.f32.mrb[104].mxu1 }
 0x4ab   :  { %33519 = vst [vmem:[#allocation59_spill] sm:$0xff] %v30551_v44  ;;  %v30553_v55 = vpop.f32.mrb[105].mxu1 }
 0x4ac   :  { %23956 = vmatmul.mubr.msk.f32.gmra.mrb[50].mxu0 %vm292_vm1, %v19806_v6  ;;  %33520 = vst [vmem:[#allocation60_spill] sm:$0xff] %v30553_v55  ;;  %v19810_v6 = vld [vmem:[%s33245_s0 + $0x271] sm:$0xff] }
 0x4ad   :  { %23958 = vmatprep.mubr.msk.f32.mxu0 %vm292_vm1, %v19807_v46  ;;  %v19811_v46 = vld [vmem:[%s33245_s0 + $0x281] sm:$0xff] }
 0x4ae   :  { %v30563_v34 = vpop.f32.mrb[106].mxu1 }
 0x4af   :  { %33521 = vst [vmem:[#allocation61_spill] sm:$0xff] %v30563_v34  ;;  %v30565_v18 = vpop.f32.mrb[107].mxu1 }
 0x4b0   :  { %23959 = vmatmul.mubr.msk.f32.gmra.mrb[52].mxu0 %vm292_vm1, %v19808_v28  ;;  %33522 = vst [vmem:[#allocation62_spill] sm:$0xff] %v30565_v18  ;;  %v19812_v28 = vld [vmem:[%s33245_s0 + $0x289] sm:$0xff] }
 0x4b1   :  { %23961 = vmatprep.mubr.msk.f32.mxu0 %vm292_vm1, %v19809_v52  ;;  %v19813_v52 = vld [vmem:[%s33245_s0 + $0x291] sm:$0xff] }
 0x4b2   :  { %v30575_v55 = vpop.f32.mrb[108].mxu1 }
 0x4b3   :  { %33523 = vst [vmem:[#allocation63_spill] sm:$0xff] %v30575_v55  ;;  %v30577_v44 = vpop.f32.mrb[109].mxu1 }
 0x4b4   :  { %23962 = vmatmul.mubr.msk.f32.gmra.mrb[54].mxu0 %vm292_vm1, %v19810_v6  ;;  %33524 = vst [vmem:[#allocation64_spill] sm:$0xff] %v30577_v44  ;;  %v19814_v6 = vld [vmem:[%s33245_s0 + $0x299] sm:$0xff] }
 0x4b5   :  { %23964 = vmatprep.mubr.msk.f32.mxu0 %vm292_vm1, %v19811_v46  ;;  %v19815_v46 = vld [vmem:[%s33245_s0 + $0x2a9] sm:$0xff] }
 0x4b6   :  { %v30587_v18 = vpop.f32.mrb[110].mxu1 }
 0x4b7   :  { %33525 = vst [vmem:[#allocation65_spill] sm:$0xff] %v30587_v18  ;;  %v30589_v34 = vpop.f32.mrb[111].mxu1 }
 0x4b8   :  { %23965 = vmatmul.mubr.msk.f32.gmra.mrb[56].mxu0 %vm292_vm1, %v19812_v28  ;;  %33526 = vst [vmem:[#allocation66_spill] sm:$0xff] %v30589_v34  ;;  %v19816_v28 = vld [vmem:[%s33245_s0 + $0x2b1] sm:$0xff] }
 0x4b9   :  { %23967 = vmatprep.mubr.msk.f32.mxu0 %vm292_vm1, %v19813_v52  ;;  %v19817_v52 = vld [vmem:[%s33245_s0 + $0x2b9] sm:$0xff] }
 0x4ba   :  { %v30599_v44 = vpop.f32.mrb[112].mxu1 }
 0x4bb   :  { %33527 = vst [vmem:[#allocation67_spill] sm:$0xff] %v30599_v44  ;;  %v30601_v55 = vpop.f32.mrb[113].mxu1 }
 0x4bc   :  { %23968 = vmatmul.mubr.msk.f32.gmra.mrb[58].mxu0 %vm292_vm1, %v19814_v6  ;;  %33528 = vst [vmem:[#allocation68_spill] sm:$0xff] %v30601_v55  ;;  %v19818_v6 = vld [vmem:[%s33245_s0 + $0x2c1] sm:$0xff] }
 0x4bd   :  { %23970 = vmatprep.mubr.msk.f32.mxu0 %vm292_vm1, %v19815_v46  ;;  %v19819_v46 = vld [vmem:[%s33245_s0 + $0x2d1] sm:$0xff] }
 0x4be   :  { %v30611_v34 = vpop.f32.mrb[114].mxu1 }
 0x4bf   :  { %33529 = vst [vmem:[#allocation69_spill] sm:$0xff] %v30611_v34  ;;  %v30613_v18 = vpop.f32.mrb[115].mxu1 }
 0x4c0   :  { %23971 = vmatmul.mubr.msk.f32.gmra.mrb[60].mxu0 %vm292_vm1, %v19816_v28  ;;  %33530 = vst [vmem:[#allocation70_spill] sm:$0xff] %v30613_v18  ;;  %v19820_v28 = vld [vmem:[%s33245_s0 + $0x2d9] sm:$0xff] }
 0x4c1   :  { %23973 = vmatprep.mubr.msk.f32.mxu0 %vm292_vm1, %v19817_v52  ;;  %v19821_v52 = vld [vmem:[%s33245_s0 + $0x2e1] sm:$0xff] }
 0x4c2   :  { %v30623_v55 = vpop.f32.mrb[116].mxu1 }
 0x4c3   :  { %33531 = vst [vmem:[#allocation71_spill] sm:$0xff] %v30623_v55  ;;  %v30625_v44 = vpop.f32.mrb[117].mxu1 }
 0x4c4   :  { %23974 = vmatmul.mubr.msk.f32.gmra.mrb[62].mxu0 %vm292_vm1, %v19818_v6  ;;  %33532 = vst [vmem:[#allocation72_spill] sm:$0xff] %v30625_v44  ;;  %v19822_v6 = vld [vmem:[%s33245_s0 + $0x2e9] sm:$0xff] }
 0x4c5   :  { %23976 = vmatprep.mubr.msk.f32.mxu0 %vm292_vm1, %v19819_v46  ;;  %v19823_v46 = vld [vmem:[%s33245_s0 + $0x2f9] sm:$0xff] }
 0x4c6   :  { %v30635_v18 = vpop.f32.mrb[118].mxu1 }
 0x4c7   :  { %33533 = vst [vmem:[#allocation73_spill] sm:$0xff] %v30635_v18  ;;  %v30637_v34 = vpop.f32.mrb[119].mxu1 }
 0x4c8   :  { %23977 = vmatmul.mubr.msk.f32.gmra.mrb[64].mxu0 %vm292_vm1, %v19820_v28  ;;  %33534 = vst [vmem:[#allocation74_spill] sm:$0xff] %v30637_v34  ;;  %v19824_v28 = vld [vmem:[%s33245_s0 + $0x301] sm:$0xff] }
 0x4c9   :  { %23979 = vmatprep.mubr.msk.f32.mxu0 %vm292_vm1, %v19821_v52  ;;  %v19825_v52 = vld [vmem:[%s33245_s0 + $0x309] sm:$0xff] }
 0x4ca   :  { %v30647_v44 = vpop.f32.mrb[120].mxu1 }
 0x4cb   :  { %33535 = vst [vmem:[#allocation75_spill] sm:$0xff] %v30647_v44  ;;  %v30649_v55 = vpop.f32.mrb[121].mxu1 }
 0x4cc   :  { %23980 = vmatmul.mubr.msk.f32.gmra.mrb[66].mxu0 %vm292_vm1, %v19822_v6  ;;  %33536 = vst [vmem:[#allocation76_spill] sm:$0xff] %v30649_v55  ;;  %v19826_v6 = vld [vmem:[%s33245_s0 + $0x311] sm:$0xff] }
 0x4cd   :  { %23982 = vmatprep.mubr.msk.f32.mxu0 %vm292_vm1, %v19823_v46  ;;  %v19827_v46 = vld [vmem:[%s33245_s0 + $0x321] sm:$0xff] }
 0x4ce   :  { %v30659_v34 = vpop.f32.mrb[122].mxu1 }
 0x4cf   :  { %33537 = vst [vmem:[#allocation77_spill] sm:$0xff] %v30659_v34  ;;  %v30661_v18 = vpop.f32.mrb[123].mxu1 }
 0x4d0   :  { %23983 = vmatmul.mubr.msk.f32.gmra.mrb[68].mxu0 %vm292_vm1, %v19824_v28  ;;  %33538 = vst [vmem:[#allocation78_spill] sm:$0xff] %v30661_v18  ;;  %v19828_v28 = vld [vmem:[%s33245_s0 + $0x329] sm:$0xff] }
 0x4d1   :  { %23985 = vmatprep.mubr.msk.f32.mxu0 %vm292_vm1, %v19825_v52  ;;  %v19829_v52 = vld [vmem:[%s33245_s0 + $0x331] sm:$0xff] }
 0x4d2   :  { %v30671_v55 = vpop.f32.mrb[124].mxu1 }
 0x4d3   :  { %33539 = vst [vmem:[#allocation79_spill] sm:$0xff] %v30671_v55  ;;  %v30673_v44 = vpop.f32.mrb[125].mxu1 }
 0x4d4   :  { %23986 = vmatmul.mubr.msk.f32.gmra.mrb[70].mxu0 %vm292_vm1, %v19826_v6  ;;  %33540 = vst [vmem:[#allocation80_spill] sm:$0xff] %v30673_v44  ;;  %v19830_v6 = vld [vmem:[%s33245_s0 + $0x339] sm:$0xff]  ;;  %v26667_v44 = vmov 0.0  }
 0x4d5   :  { %23988 = vmatprep.mubr.msk.f32.mxu0 %vm292_vm1, %v19827_v46  ;;  %v19831_v46 = vld [vmem:[%s33245_s0 + $0x349] sm:$0xff]  ;;  %12482 = vst.msk [vmem:[#allocation2 + $0x8] sm:$0xff] %vm12257_vm2, %v26667_v44  ;;  %12481 = vst.msk [vmem:[#allocation2] sm:$0xff] %vm12257_vm2, %v26667_v44 }
 0x4d6   :  { %v30683_v18 = vpop.f32.mrb[126].mxu1  ;;  %12483 = vst.msk [vmem:[#allocation2 + $0x10] sm:$0xff] %vm12257_vm2, %v26667_v44  ;;  %12484 = vst.msk [vmem:[#allocation2 + $0x18] sm:$0xff] %vm12257_vm2, %v26667_v44 }
 0x4d7   :  { %33541 = vst [vmem:[#allocation81_spill] sm:$0xff] %v30683_v18  ;;  %v30685_v34 = vpop.f32.mrb[127].mxu1  ;;  %v20273_v18 = vld [vmem:[%s33246_s3 + $0x28] sm:$0xff]  ;;  %12485 = vst.msk [vmem:[#allocation2 + $0x20] sm:$0xff] %vm12257_vm2, %v26667_v44 }
 0x4d8   :  { %23989 = vmatmul.mubr.msk.f32.gmra.mrb[72].mxu0 %vm292_vm1, %v19828_v28  ;;  %33542 = vst [vmem:[#allocation82_spill] sm:$0xff] %v30685_v34  ;;  %v19832_v28 = vld [vmem:[%s33245_s0 + $0x351] sm:$0xff]  ;;  %v19834_v34 = vld [vmem:[%s33245_s0 + $0x361] sm:$0xff]  ;;  %12486 = vst.msk [vmem:[#allocation2 + $0x28] sm:$0xff] %vm12257_vm2, %v26667_v44 }
 0x4d9   :  { %23991 = vmatprep.mubr.msk.f32.mxu0 %vm292_vm1, %v19829_v52  ;;  %v19833_v52 = vld [vmem:[%s33245_s0 + $0x359] sm:$0xff]  ;;  %12487 = vst.msk [vmem:[#allocation2 + $0x30] sm:$0xff] %vm12257_vm2, %v26667_v44  ;;  %12488 = vst.msk [vmem:[#allocation2 + $0x38] sm:$0xff] %vm12257_vm2, %v26667_v44 }
 0x4da   :  { %12489 = vst.msk [vmem:[#allocation2 + $0x40] sm:$0xff] %vm12257_vm2, %v26667_v44  ;;  %12490 = vst.msk [vmem:[#allocation2 + $0x48] sm:$0xff] %vm12257_vm2, %v26667_v44 }
 0x4db   :  { %12491 = vst.msk [vmem:[#allocation2 + $0x50] sm:$0xff] %vm12257_vm2, %v26667_v44  ;;  %12492 = vst.msk [vmem:[#allocation2 + $0x58] sm:$0xff] %vm12257_vm2, %v26667_v44 }
 0x4dc   :  { %23992 = vmatmul.mubr.msk.f32.gmra.mrb[74].mxu0 %vm292_vm1, %v19830_v6  ;;  %v19835_v6 = vld [vmem:[%s33245_s0 + $0x371] sm:$0xff]  ;;  %12493 = vst.msk [vmem:[#allocation2 + $0x60] sm:$0xff] %vm12257_vm2, %v26667_v44  ;;  %12494 = vst.msk [vmem:[#allocation2 + $0x68] sm:$0xff] %vm12257_vm2, %v26667_v44  ;;  %v12622_v55 = vld [vmem:[#allocation2 + $0x8] sm:$0xff] }
 0x4dd   :  { %23994 = vmatprep.mubr.msk.f32.mxu0 %vm292_vm1, %v19831_v46  ;;  %v19836_v46 = vld [vmem:[%s33245_s0 + $0x379] sm:$0xff]  ;;  %12495 = vst.msk [vmem:[#allocation2 + $0x70] sm:$0xff] %vm12257_vm2, %v26667_v44  ;;  %12496 = vst.msk [vmem:[#allocation2 + $0x78] sm:$0xff] %vm12257_vm2, %v26667_v44  ;;  %24274 = vmatprep.mubr.msk.f32.mxu1 %vm12257_vm2, %v12622_v55 }
 0x4de   :  { %12497 = vst.msk [vmem:[#allocation2 + $0x80] sm:$0xff] %vm12257_vm2, %v26667_v44  ;;  %12498 = vst.msk [vmem:[#allocation2 + $0x88] sm:$0xff] %vm12257_vm2, %v26667_v44  ;;  %v20078_v55 = vld [vmem:[%s33245_s0 + $0x2da] sm:$0xff] }
 0x4df   :  { %12499 = vst.msk [vmem:[#allocation2 + $0x90] sm:$0xff] %vm12257_vm2, %v26667_v44  ;;  %12500 = vst.msk [vmem:[#allocation2 + $0x98] sm:$0xff] %vm12257_vm2, %v26667_v44 }
 0x4e0   :  { %23995 = vmatmul.mubr.msk.f32.gmra.mrb[76].mxu0 %vm292_vm1, %v19832_v28  ;;  %v19837_v28 = vld [vmem:[%s33245_s0 + $0x381] sm:$0xff]  ;;  %12501 = vst.msk [vmem:[#allocation2 + $0xa0] sm:$0xff] %vm12257_vm2, %v26667_v44  ;;  %12502 = vst.msk [vmem:[#allocation2 + $0xa8] sm:$0xff] %vm12257_vm2, %v26667_v44 }
 0x4e1   :  { %23997 = vmatprep.mubr.msk.f32.mxu0 %vm292_vm1, %v19833_v52  ;;  %v19838_v52 = vld [vmem:[%s33245_s0 + $0x389] sm:$0xff]  ;;  %12503 = vst.msk [vmem:[#allocation2 + $0xb0] sm:$0xff] %vm12257_vm2, %v26667_v44  ;;  %12504 = vst.msk [vmem:[#allocation2 + $0xb8] sm:$0xff] %vm12257_vm2, %v26667_v44 }
 0x4e2   :  { %12505 = vst.msk [vmem:[#allocation2 + $0xc0] sm:$0xff] %vm12257_vm2, %v26667_v44  ;;  %12506 = vst.msk [vmem:[#allocation2 + $0xc8] sm:$0xff] %vm12257_vm2, %v26667_v44 }
 0x4e3   :  { %12507 = vst.msk [vmem:[#allocation2 + $0xd0] sm:$0xff] %vm12257_vm2, %v26667_v44  ;;  %12508 = vst.msk [vmem:[#allocation2 + $0xd8] sm:$0xff] %vm12257_vm2, %v26667_v44 }
 0x4e4   :  { %23998 = vmatmul.mubr.msk.f32.gmra.mrb[78].mxu0 %vm292_vm1, %v19834_v34  ;;  %v19839_v34 = vld [vmem:[%s33245_s0 + $0x399] sm:$0xff]  ;;  %12509 = vst.msk [vmem:[#allocation2 + $0xe0] sm:$0xff] %vm12257_vm2, %v26667_v44  ;;  %12510 = vst.msk [vmem:[#allocation2 + $0xe8] sm:$0xff] %vm12257_vm2, %v26667_v44 }
 0x4e5   :  { %24000 = vmatprep.mubr.msk.f32.mxu0 %vm292_vm1, %v19835_v6  ;;  %v19840_v6 = vld [vmem:[%s33245_s0 + $0x3a1] sm:$0xff]  ;;  %12511 = vst.msk [vmem:[#allocation2 + $0xf0] sm:$0xff] %vm12257_vm2, %v26667_v44  ;;  %12512 = vst.msk [vmem:[#allocation2 + $0xf8] sm:$0xff] %vm12257_vm2, %v26667_v44 }
 0x4e6   :  { %12513 = vst.msk [vmem:[#allocation2 + $0x100] sm:$0xff] %vm12257_vm2, %v26667_v44  ;;  %12514 = vst.msk [vmem:[#allocation2 + $0x108] sm:$0xff] %vm12257_vm2, %v26667_v44 }
 0x4e7   :  { %12515 = vst.msk [vmem:[#allocation2 + $0x110] sm:$0xff] %vm12257_vm2, %v26667_v44  ;;  %12516 = vst.msk [vmem:[#allocation2 + $0x118] sm:$0xff] %vm12257_vm2, %v26667_v44 }
 0x4e8   :  { %24001 = vmatmul.mubr.msk.f32.gmra.mrb[80].mxu0 %vm292_vm1, %v19836_v46  ;;  %v19841_v46 = vld [vmem:[%s33245_s0 + $0x3a9] sm:$0xff]  ;;  %12517 = vst.msk [vmem:[#allocation2 + $0x120] sm:$0xff] %vm12257_vm2, %v26667_v44  ;;  %12518 = vst.msk [vmem:[#allocation2 + $0x128] sm:$0xff] %vm12257_vm2, %v26667_v44 }
 0x4e9   :  { %24003 = vmatprep.mubr.msk.f32.mxu0 %vm292_vm1, %v19837_v28  ;;  %v19842_v28 = vld [vmem:[%s33245_s0 + $0x3b1] sm:$0xff]  ;;  %12519 = vst.msk [vmem:[#allocation2 + $0x130] sm:$0xff] %vm12257_vm2, %v26667_v44  ;;  %12520 = vst.msk [vmem:[#allocation2 + $0x138] sm:$0xff] %vm12257_vm2, %v26667_v44 }
 0x4ea   :  { %12521 = vst.msk [vmem:[#allocation2 + $0x140] sm:$0xff] %vm12257_vm2, %v26667_v44  ;;  %12522 = vst.msk [vmem:[#allocation2 + $0x148] sm:$0xff] %vm12257_vm2, %v26667_v44 }
 0x4eb   :  { %12523 = vst.msk [vmem:[#allocation2 + $0x150] sm:$0xff] %vm12257_vm2, %v26667_v44  ;;  %12524 = vst.msk [vmem:[#allocation2 + $0x158] sm:$0xff] %vm12257_vm2, %v26667_v44 }
 0x4ec   :  { %24004 = vmatmul.mubr.msk.f32.gmra.mrb[82].mxu0 %vm292_vm1, %v19838_v52  ;;  %v19843_v52 = vld [vmem:[%s33245_s0 + $0x3c1] sm:$0xff]  ;;  %12525 = vst.msk [vmem:[#allocation2 + $0x160] sm:$0xff] %vm12257_vm2, %v26667_v44  ;;  %12526 = vst.msk [vmem:[#allocation2 + $0x168] sm:$0xff] %vm12257_vm2, %v26667_v44 }
 0x4ed   :  { %24006 = vmatprep.mubr.msk.f32.mxu0 %vm292_vm1, %v19839_v34  ;;  %v19844_v34 = vld [vmem:[%s33245_s0 + $0x3c9] sm:$0xff]  ;;  %12527 = vst.msk [vmem:[#allocation2 + $0x170] sm:$0xff] %vm12257_vm2, %v26667_v44  ;;  %12528 = vst.msk [vmem:[#allocation2 + $0x178] sm:$0xff] %vm12257_vm2, %v26667_v44 }
 0x4ee   :  { %12529 = vst.msk [vmem:[#allocation2 + $0x180] sm:$0xff] %vm12257_vm2, %v26667_v44  ;;  %12530 = vst.msk [vmem:[#allocation2 + $0x188] sm:$0xff] %vm12257_vm2, %v26667_v44 }
 0x4ef   :  { %12531 = vst.msk [vmem:[#allocation2 + $0x190] sm:$0xff] %vm12257_vm2, %v26667_v44  ;;  %12532 = vst.msk [vmem:[#allocation2 + $0x198] sm:$0xff] %vm12257_vm2, %v26667_v44 }
 0x4f0   :  { %24007 = vmatmul.mubr.msk.f32.gmra.mrb[84].mxu0 %vm292_vm1, %v19840_v6  ;;  %v19845_v6 = vld [vmem:[%s33245_s0 + $0x3d1] sm:$0xff]  ;;  %12533 = vst.msk [vmem:[#allocation2 + $0x1a0] sm:$0xff] %vm12257_vm2, %v26667_v44  ;;  %12534 = vst.msk [vmem:[#allocation2 + $0x1a8] sm:$0xff] %vm12257_vm2, %v26667_v44 }
 0x4f1   :  { %24009 = vmatprep.mubr.msk.f32.mxu0 %vm292_vm1, %v19841_v46  ;;  %v19846_v46 = vld [vmem:[%s33245_s0 + $0x3d9] sm:$0xff]  ;;  %12535 = vst.msk [vmem:[#allocation2 + $0x1b0] sm:$0xff] %vm12257_vm2, %v26667_v44  ;;  %12536 = vst.msk [vmem:[#allocation2 + $0x1b8] sm:$0xff] %vm12257_vm2, %v26667_v44 }
 0x4f2   :  { %12537 = vst.msk [vmem:[#allocation2 + $0x1c0] sm:$0xff] %vm12257_vm2, %v26667_v44  ;;  %12538 = vst.msk [vmem:[#allocation2 + $0x1c8] sm:$0xff] %vm12257_vm2, %v26667_v44 }
 0x4f3   :  { %12539 = vst.msk [vmem:[#allocation2 + $0x1d0] sm:$0xff] %vm12257_vm2, %v26667_v44  ;;  %12540 = vst.msk [vmem:[#allocation2 + $0x1d8] sm:$0xff] %vm12257_vm2, %v26667_v44 }
 0x4f4   :  { %24010 = vmatmul.mubr.msk.f32.gmra.mrb[86].mxu0 %vm292_vm1, %v19842_v28  ;;  %v19847_v28 = vld [vmem:[%s33245_s0 + $0x3e9] sm:$0xff]  ;;  %12541 = vst.msk [vmem:[#allocation2 + $0x1e0] sm:$0xff] %vm12257_vm2, %v26667_v44  ;;  %12542 = vst.msk [vmem:[#allocation2 + $0x1e8] sm:$0xff] %vm12257_vm2, %v26667_v44 }
 0x4f5   :  { %24012 = vmatprep.mubr.msk.f32.mxu0 %vm292_vm1, %v19843_v52  ;;  %v19848_v52 = vld [vmem:[%s33245_s0 + $0x3f1] sm:$0xff]  ;;  %12543 = vst.msk [vmem:[#allocation2 + $0x1f0] sm:$0xff] %vm12257_vm2, %v26667_v44  ;;  %12544 = vst.msk [vmem:[#allocation2 + $0x1f8] sm:$0xff] %vm12257_vm2, %v26667_v44 }
 0x4f6   :  { %12545 = vst.msk [vmem:[#allocation2 + $0x200] sm:$0xff] %vm12257_vm2, %v26667_v44  ;;  %12546 = vst.msk [vmem:[#allocation2 + $0x208] sm:$0xff] %vm12257_vm2, %v26667_v44 }
 0x4f7   :  { %12547 = vst.msk [vmem:[#allocation2 + $0x210] sm:$0xff] %vm12257_vm2, %v26667_v44  ;;  %12548 = vst.msk [vmem:[#allocation2 + $0x218] sm:$0xff] %vm12257_vm2, %v26667_v44 }
 0x4f8   :  { %24013 = vmatmul.mubr.msk.f32.gmra.mrb[88].mxu0 %vm292_vm1, %v19844_v34  ;;  %v19849_v34 = vld [vmem:[%s33245_s0 + $0x3f9] sm:$0xff]  ;;  %12549 = vst.msk [vmem:[#allocation2 + $0x220] sm:$0xff] %vm12257_vm2, %v26667_v44  ;;  %12550 = vst.msk [vmem:[#allocation2 + $0x228] sm:$0xff] %vm12257_vm2, %v26667_v44 }
 0x4f9   :  { %24015 = vmatprep.mubr.msk.f32.mxu0 %vm292_vm1, %v19845_v6  ;;  %v19850_v6 = vld [vmem:[%s33245_s0 + $0x401] sm:$0xff]  ;;  %12551 = vst.msk [vmem:[#allocation2 + $0x230] sm:$0xff] %vm12257_vm2, %v26667_v44  ;;  %12552 = vst.msk [vmem:[#allocation2 + $0x238] sm:$0xff] %vm12257_vm2, %v26667_v44 }
 0x4fc   :  { %24016 = vmatmul.mubr.msk.f32.gmra.mrb[90].mxu0 %vm292_vm1, %v19846_v46  ;;  %v19851_v46 = vld [vmem:[%s33245_s0 + $0x411] sm:$0xff] }
 0x4fd   :  { %24018 = vmatprep.mubr.msk.f32.mxu0 %vm292_vm1, %v19847_v28  ;;  %v19852_v28 = vld [vmem:[%s33245_s0 + $0x419] sm:$0xff] }
 0x500   :  { %24019 = vmatmul.mubr.msk.f32.gmra.mrb[92].mxu0 %vm292_vm1, %v19848_v52  ;;  %v19853_v52 = vld [vmem:[%s33245_s0 + $0x421] sm:$0xff] }
 0x501   :  { %24021 = vmatprep.mubr.msk.f32.mxu0 %vm292_vm1, %v19849_v34  ;;  %v19854_v34 = vld [vmem:[%s33245_s0 + $0x429] sm:$0xff] }
 0x504   :  { %24022 = vmatmul.mubr.msk.f32.gmra.mrb[94].mxu0 %vm292_vm1, %v19850_v6  ;;  %v19855_v6 = vld [vmem:[%s33245_s0 + $0x439] sm:$0xff] }
 0x505   :  { %24024 = vmatprep.mubr.msk.f32.mxu0 %vm292_vm1, %v19851_v46  ;;  %v19856_v46 = vld [vmem:[%s33245_s0 + $0x441] sm:$0xff] }
 0x508   :  { %24025 = vmatmul.mubr.msk.f32.gmra.mrb[96].mxu0 %vm292_vm1, %v19852_v28  ;;  %v19857_v28 = vld [vmem:[%s33245_s0 + $0x449] sm:$0xff] }
 0x509   :  { %24027 = vmatprep.mubr.msk.f32.mxu0 %vm292_vm1, %v19853_v52  ;;  %v19858_v52 = vld [vmem:[%s33245_s0 + $0x451] sm:$0xff] }
 0x50c   :  { %24028 = vmatmul.mubr.msk.f32.gmra.mrb[98].mxu0 %vm292_vm1, %v19854_v34  ;;  %v19859_v34 = vld [vmem:[%s33245_s0 + $0x461] sm:$0xff] }
 0x50d   :  { %24030 = vmatprep.mubr.msk.f32.mxu0 %vm292_vm1, %v19855_v6  ;;  %v19860_v6 = vld [vmem:[%s33245_s0 + $0x469] sm:$0xff] }
 0x510   :  { %24031 = vmatmul.mubr.msk.f32.gmra.mrb[100].mxu0 %vm292_vm1, %v19856_v46  ;;  %v19861_v46 = vld [vmem:[%s33245_s0 + $0x471] sm:$0xff] }
 0x511   :  { %24033 = vmatprep.mubr.msk.f32.mxu0 %vm292_vm1, %v19857_v28  ;;  %v19862_v28 = vld [vmem:[%s33245_s0 + $0x479] sm:$0xff] }
 0x514   :  { %24034 = vmatmul.mubr.msk.f32.gmra.mrb[102].mxu0 %vm292_vm1, %v19858_v52  ;;  %v19863_v52 = vld [vmem:[%s33245_s0 + $0x489] sm:$0xff] }
 0x515   :  { %24036 = vmatprep.mubr.msk.f32.mxu0 %vm292_vm1, %v19859_v34  ;;  %v19864_v34 = vld [vmem:[%s33245_s0 + $0x491] sm:$0xff] }
 0x518   :  { %24037 = vmatmul.mubr.msk.f32.gmra.mrb[104].mxu0 %vm292_vm1, %v19860_v6  ;;  %v19865_v6 = vld [vmem:[%s33245_s0 + $0x499] sm:$0xff] }
 0x519   :  { %24039 = vmatprep.mubr.msk.f32.mxu0 %vm292_vm1, %v19861_v46  ;;  %v19866_v46 = vld [vmem:[%s33245_s0 + $0x4a1] sm:$0xff] }
 0x51c   :  { %24040 = vmatmul.mubr.msk.f32.gmra.mrb[106].mxu0 %vm292_vm1, %v19862_v28  ;;  %v19867_v28 = vld [vmem:[%s33245_s0 + $0x4b1] sm:$0xff] }
 0x51d   :  { %24042 = vmatprep.mubr.msk.f32.mxu0 %vm292_vm1, %v19863_v52  ;;  %v19868_v52 = vld [vmem:[%s33245_s0 + $0x4b9] sm:$0xff] }
 0x520   :  { %24043 = vmatmul.mubr.msk.f32.gmra.mrb[108].mxu0 %vm292_vm1, %v19864_v34  ;;  %v19869_v34 = vld [vmem:[%s33245_s0 + $0x4c1] sm:$0xff] }
 0x521   :  { %24045 = vmatprep.mubr.msk.f32.mxu0 %vm292_vm1, %v19865_v6  ;;  %v19870_v6 = vld [vmem:[%s33245_s0 + $0x4c9] sm:$0xff] }
 0x524   :  { %24046 = vmatmul.mubr.msk.f32.gmra.mrb[110].mxu0 %vm292_vm1, %v19866_v46  ;;  %v19871_v46 = vld [vmem:[%s33245_s0 + $0x4d9] sm:$0xff] }
 0x525   :  { %24048 = vmatprep.mubr.msk.f32.mxu0 %vm292_vm1, %v19867_v28  ;;  %v19872_v28 = vld [vmem:[%s33245_s0 + $0x4e1] sm:$0xff] }
 0x528   :  { %24049 = vmatmul.mubr.msk.f32.gmra.mrb[112].mxu0 %vm292_vm1, %v19868_v52  ;;  %v19873_v52 = vld [vmem:[%s33245_s0 + $0x4e9] sm:$0xff] }
 0x529   :  { %24051 = vmatprep.mubr.msk.f32.mxu0 %vm292_vm1, %v19869_v34  ;;  %v19874_v34 = vld [vmem:[%s33245_s0 + $0x4f1] sm:$0xff] }
 0x52c   :  { %24052 = vmatmul.mubr.msk.f32.gmra.mrb[114].mxu0 %vm292_vm1, %v19870_v6  ;;  %v19875_v6 = vld [vmem:[%s33245_s0 + $0x501] sm:$0xff] }
 0x52d   :  { %24054 = vmatprep.mubr.msk.f32.mxu0 %vm292_vm1, %v19871_v46  ;;  %v19876_v46 = vld [vmem:[%s33245_s0 + $0x509] sm:$0xff] }
 0x530   :  { %24055 = vmatmul.mubr.msk.f32.gmra.mrb[116].mxu0 %vm292_vm1, %v19872_v28  ;;  %v19877_v28 = vld [vmem:[%s33245_s0 + $0x511] sm:$0xff] }
 0x531   :  { %24057 = vmatprep.mubr.msk.f32.mxu0 %vm292_vm1, %v19873_v52  ;;  %v19878_v52 = vld [vmem:[%s33245_s0 + $0x519] sm:$0xff] }
 0x534   :  { %24058 = vmatmul.mubr.msk.f32.gmra.mrb[118].mxu0 %vm292_vm1, %v19874_v34  ;;  %v19879_v34 = vld [vmem:[%s33245_s0 + $0x529] sm:$0xff] }
 0x535   :  { %24060 = vmatprep.mubr.msk.f32.mxu0 %vm292_vm1, %v19875_v6  ;;  %v19880_v6 = vld [vmem:[%s33245_s0 + $0x531] sm:$0xff] }
 0x538   :  { %24061 = vmatmul.mubr.msk.f32.gmra.mrb[120].mxu0 %vm292_vm1, %v19876_v46  ;;  %v19881_v46 = vld [vmem:[%s33245_s0 + $0x539] sm:$0xff] }
 0x539   :  { %24063 = vmatprep.mubr.msk.f32.mxu0 %vm292_vm1, %v19877_v28  ;;  %v19882_v28 = vld [vmem:[%s33245_s0 + $0x541] sm:$0xff] }
 0x53c   :  { %24064 = vmatmul.mubr.msk.f32.gmra.mrb[122].mxu0 %vm292_vm1, %v19878_v52  ;;  %v20013_v52 = vld [vmem:[%s33245_s0 + $0x52] sm:$0xff] }
 0x53d   :  { %24066 = vmatprep.mubr.msk.f32.mxu0 %vm292_vm1, %v19879_v34  ;;  %v20014_v34 = vld [vmem:[%s33245_s0 + $0x5a] sm:$0xff] }
 0x540   :  { %24067 = vmatmul.mubr.msk.f32.gmra.mrb[124].mxu0 %vm292_vm1, %v19880_v6  ;;  %v20015_v6 = vld [vmem:[%s33245_s0 + $0x62] sm:$0xff] }
 0x541   :  { %24069 = vmatprep.mubr.msk.f32.mxu0 %vm292_vm1, %v19881_v46  ;;  %v20016_v46 = vld [vmem:[%s33245_s0 + $0x6a] sm:$0xff] }
 0x544   :  { %24070 = vmatmul.mubr.msk.f32.gmra.mrb[126].mxu0 %vm292_vm1, %v19882_v28  ;;  %v20017_v28 = vld [vmem:[%s33245_s0 + $0x7a] sm:$0xff] }
 0x545   :  { %24074 = vmatprep.mubr.msk.f32.mxu0 %vm292_vm1, %v20013_v52  ;;  %v20018_v52 = vld [vmem:[%s33245_s0 + $0x82] sm:$0xff] }
 0x548   :  { %24075 = vmatmul.mubr.msk.f32.vlgmr.msra.gmra.mrb[0].mxu0 %vm292_vm1, %v20014_v34  ;;  %v20019_v34 = vld [vmem:[%s33245_s0 + $0x8a] sm:$0xff] }
 0x549   :  { %24077 = vmatprep.mubr.msk.f32.mxu0 %vm292_vm1, %v20015_v6  ;;  %v20020_v6 = vld [vmem:[%s33245_s0 + $0x92] sm:$0xff] }
 0x54c   :  { %24078 = vmatmul.mubr.msk.f32.gmra.mrb[2].mxu0 %vm292_vm1, %v20016_v46  ;;  %v20021_v46 = vld [vmem:[%s33245_s0 + $0xa2] sm:$0xff] }
 0x54d   :  { %24080 = vmatprep.mubr.msk.f32.mxu0 %vm292_vm1, %v20017_v28  ;;  %v20022_v28 = vld [vmem:[%s33245_s0 + $0xaa] sm:$0xff] }
 0x550   :  { %24081 = vmatmul.mubr.msk.f32.gmra.mrb[4].mxu0 %vm292_vm1, %v20018_v52  ;;  %v20023_v52 = vld [vmem:[%s33245_s0 + $0xb2] sm:$0xff] }
 0x551   :  { %24083 = vmatprep.mubr.msk.f32.mxu0 %vm292_vm1, %v20019_v34  ;;  %v20024_v34 = vld [vmem:[%s33245_s0 + $0xba] sm:$0xff] }
 0x554   :  { %24084 = vmatmul.mubr.msk.f32.gmra.mrb[6].mxu0 %vm292_vm1, %v20020_v6  ;;  %v20025_v6 = vld [vmem:[%s33245_s0 + $0xca] sm:$0xff] }
 0x555   :  { %24086 = vmatprep.mubr.msk.f32.mxu0 %vm292_vm1, %v20021_v46  ;;  %v20026_v46 = vld [vmem:[%s33245_s0 + $0xd2] sm:$0xff] }
 0x558   :  { %24087 = vmatmul.mubr.msk.f32.gmra.mrb[8].mxu0 %vm292_vm1, %v20022_v28  ;;  %v20027_v28 = vld [vmem:[%s33245_s0 + $0xda] sm:$0xff] }
 0x559   :  { %24089 = vmatprep.mubr.msk.f32.mxu0 %vm292_vm1, %v20023_v52  ;;  %v20028_v52 = vld [vmem:[%s33245_s0 + $0xe2] sm:$0xff] }
 0x55c   :  { %24090 = vmatmul.mubr.msk.f32.gmra.mrb[10].mxu0 %vm292_vm1, %v20024_v34  ;;  %v20029_v34 = vld [vmem:[%s33245_s0 + $0xf2] sm:$0xff] }
 0x55d   :  { %24092 = vmatprep.mubr.msk.f32.mxu0 %vm292_vm1, %v20025_v6  ;;  %v20030_v6 = vld [vmem:[%s33245_s0 + $0xfa] sm:$0xff] }
 0x560   :  { %24093 = vmatmul.mubr.msk.f32.gmra.mrb[12].mxu0 %vm292_vm1, %v20026_v46  ;;  %v20031_v46 = vld [vmem:[%s33245_s0 + $0x102] sm:$0xff] }
 0x561   :  { %24095 = vmatprep.mubr.msk.f32.mxu0 %vm292_vm1, %v20027_v28  ;;  %v20032_v28 = vld [vmem:[%s33245_s0 + $0x10a] sm:$0xff] }
 0x564   :  { %24096 = vmatmul.mubr.msk.f32.gmra.mrb[14].mxu0 %vm292_vm1, %v20028_v52  ;;  %v20033_v52 = vld [vmem:[%s33245_s0 + $0x11a] sm:$0xff] }
 0x565   :  { %24098 = vmatprep.mubr.msk.f32.mxu0 %vm292_vm1, %v20029_v34  ;;  %v20034_v34 = vld [vmem:[%s33245_s0 + $0x122] sm:$0xff] }
 0x568   :  { %24099 = vmatmul.mubr.msk.f32.gmra.mrb[16].mxu0 %vm292_vm1, %v20030_v6  ;;  %v20035_v6 = vld [vmem:[%s33245_s0 + $0x12a] sm:$0xff] }
 0x569   :  { %24101 = vmatprep.mubr.msk.f32.mxu0 %vm292_vm1, %v20031_v46  ;;  %v20036_v46 = vld [vmem:[%s33245_s0 + $0x132] sm:$0xff] }
 0x56c   :  { %24102 = vmatmul.mubr.msk.f32.gmra.mrb[18].mxu0 %vm292_vm1, %v20032_v28  ;;  %v20037_v28 = vld [vmem:[%s33245_s0 + $0x142] sm:$0xff] }
 0x56d   :  { %24104 = vmatprep.mubr.msk.f32.mxu0 %vm292_vm1, %v20033_v52  ;;  %v20038_v52 = vld [vmem:[%s33245_s0 + $0x14a] sm:$0xff] }
 0x570   :  { %24105 = vmatmul.mubr.msk.f32.gmra.mrb[20].mxu0 %vm292_vm1, %v20034_v34  ;;  %v20039_v34 = vld [vmem:[%s33245_s0 + $0x152] sm:$0xff] }
 0x571   :  { %24107 = vmatprep.mubr.msk.f32.mxu0 %vm292_vm1, %v20035_v6  ;;  %v20040_v6 = vld [vmem:[%s33245_s0 + $0x15a] sm:$0xff] }
 0x574   :  { %24108 = vmatmul.mubr.msk.f32.gmra.mrb[22].mxu0 %vm292_vm1, %v20036_v46  ;;  %v20041_v46 = vld [vmem:[%s33245_s0 + $0x16a] sm:$0xff] }
 0x575   :  { %24110 = vmatprep.mubr.msk.f32.mxu0 %vm292_vm1, %v20037_v28  ;;  %v20042_v28 = vld [vmem:[%s33245_s0 + $0x172] sm:$0xff] }
 0x578   :  { %24111 = vmatmul.mubr.msk.f32.gmra.mrb[24].mxu0 %vm292_vm1, %v20038_v52  ;;  %v20043_v52 = vld [vmem:[%s33245_s0 + $0x17a] sm:$0xff] }
 0x579   :  { %24113 = vmatprep.mubr.msk.f32.mxu0 %vm292_vm1, %v20039_v34  ;;  %v20044_v34 = vld [vmem:[%s33245_s0 + $0x182] sm:$0xff] }
 0x57c   :  { %24114 = vmatmul.mubr.msk.f32.gmra.mrb[26].mxu0 %vm292_vm1, %v20040_v6  ;;  %v20045_v6 = vld [vmem:[%s33245_s0 + $0x192] sm:$0xff] }
 0x57d   :  { %24116 = vmatprep.mubr.msk.f32.mxu0 %vm292_vm1, %v20041_v46  ;;  %v20046_v46 = vld [vmem:[%s33245_s0 + $0x19a] sm:$0xff] }
 0x580   :  { %24117 = vmatmul.mubr.msk.f32.gmra.mrb[28].mxu0 %vm292_vm1, %v20042_v28  ;;  %v20047_v28 = vld [vmem:[%s33245_s0 + $0x1a2] sm:$0xff] }
 0x581   :  { %24119 = vmatprep.mubr.msk.f32.mxu0 %vm292_vm1, %v20043_v52  ;;  %v20048_v52 = vld [vmem:[%s33245_s0 + $0x1aa] sm:$0xff] }
 0x584   :  { %24120 = vmatmul.mubr.msk.f32.gmra.mrb[30].mxu0 %vm292_vm1, %v20044_v34  ;;  %v20049_v34 = vld [vmem:[%s33245_s0 + $0x1ba] sm:$0xff] }
 0x585   :  { %24122 = vmatprep.mubr.msk.f32.mxu0 %vm292_vm1, %v20045_v6  ;;  %v20050_v6 = vld [vmem:[%s33245_s0 + $0x1c2] sm:$0xff] }
 0x588   :  { %24123 = vmatmul.mubr.msk.f32.gmra.mrb[32].mxu0 %vm292_vm1, %v20046_v46  ;;  %v20051_v46 = vld [vmem:[%s33245_s0 + $0x1ca] sm:$0xff] }
 0x589   :  { %24125 = vmatprep.mubr.msk.f32.mxu0 %vm292_vm1, %v20047_v28  ;;  %v20052_v28 = vld [vmem:[%s33245_s0 + $0x1d2] sm:$0xff] }
 0x58c   :  { %24126 = vmatmul.mubr.msk.f32.gmra.mrb[34].mxu0 %vm292_vm1, %v20048_v52  ;;  %v20053_v52 = vld [vmem:[%s33245_s0 + $0x1e2] sm:$0xff] }
 0x58d   :  { %24128 = vmatprep.mubr.msk.f32.mxu0 %vm292_vm1, %v20049_v34  ;;  %v20054_v34 = vld [vmem:[%s33245_s0 + $0x1ea] sm:$0xff] }
 0x590   :  { %24129 = vmatmul.mubr.msk.f32.gmra.mrb[36].mxu0 %vm292_vm1, %v20050_v6  ;;  %v20055_v6 = vld [vmem:[%s33245_s0 + $0x1f2] sm:$0xff] }
 0x591   :  { %24131 = vmatprep.mubr.msk.f32.mxu0 %vm292_vm1, %v20051_v46  ;;  %v20056_v46 = vld [vmem:[%s33245_s0 + $0x1fa] sm:$0xff] }
 0x594   :  { %24132 = vmatmul.mubr.msk.f32.gmra.mrb[38].mxu0 %vm292_vm1, %v20052_v28  ;;  %v20057_v28 = vld [vmem:[%s33245_s0 + $0x20a] sm:$0xff] }
 0x595   :  { %24134 = vmatprep.mubr.msk.f32.mxu0 %vm292_vm1, %v20053_v52  ;;  %v20058_v52 = vld [vmem:[%s33245_s0 + $0x212] sm:$0xff] }
 0x598   :  { %24135 = vmatmul.mubr.msk.f32.gmra.mrb[40].mxu0 %vm292_vm1, %v20054_v34  ;;  %v20059_v34 = vld [vmem:[%s33245_s0 + $0x21a] sm:$0xff] }
 0x599   :  { %24137 = vmatprep.mubr.msk.f32.mxu0 %vm292_vm1, %v20055_v6  ;;  %v20060_v6 = vld [vmem:[%s33245_s0 + $0x222] sm:$0xff] }
 0x59c   :  { %24138 = vmatmul.mubr.msk.f32.gmra.mrb[42].mxu0 %vm292_vm1, %v20056_v46  ;;  %v20061_v46 = vld [vmem:[%s33245_s0 + $0x232] sm:$0xff] }
 0x59d   :  { %24140 = vmatprep.mubr.msk.f32.mxu0 %vm292_vm1, %v20057_v28  ;;  %v20062_v28 = vld [vmem:[%s33245_s0 + $0x23a] sm:$0xff] }
 0x5a0   :  { %24141 = vmatmul.mubr.msk.f32.gmra.mrb[44].mxu0 %vm292_vm1, %v20058_v52  ;;  %v20063_v52 = vld [vmem:[%s33245_s0 + $0x242] sm:$0xff] }
 0x5a1   :  { %24143 = vmatprep.mubr.msk.f32.mxu0 %vm292_vm1, %v20059_v34  ;;  %v20064_v34 = vld [vmem:[%s33245_s0 + $0x24a] sm:$0xff] }
 0x5a4   :  { %24144 = vmatmul.mubr.msk.f32.gmra.mrb[46].mxu0 %vm292_vm1, %v20060_v6  ;;  %v20065_v6 = vld [vmem:[%s33245_s0 + $0x25a] sm:$0xff] }
 0x5a5   :  { %24146 = vmatprep.mubr.msk.f32.mxu0 %vm292_vm1, %v20061_v46  ;;  %v20066_v46 = vld [vmem:[%s33245_s0 + $0x262] sm:$0xff] }
 0x5a8   :  { %24147 = vmatmul.mubr.msk.f32.gmra.mrb[48].mxu0 %vm292_vm1, %v20062_v28  ;;  %v20067_v28 = vld [vmem:[%s33245_s0 + $0x26a] sm:$0xff] }
 0x5a9   :  { %24149 = vmatprep.mubr.msk.f32.mxu0 %vm292_vm1, %v20063_v52  ;;  %v20068_v52 = vld [vmem:[%s33245_s0 + $0x272] sm:$0xff] }
 0x5ac   :  { %24150 = vmatmul.mubr.msk.f32.gmra.mrb[50].mxu0 %vm292_vm1, %v20064_v34  ;;  %v20069_v34 = vld [vmem:[%s33245_s0 + $0x282] sm:$0xff] }
 0x5ad   :  { %24152 = vmatprep.mubr.msk.f32.mxu0 %vm292_vm1, %v20065_v6  ;;  %v20272_v6 = vld [vmem:[%s33246_s3 + $0x20] sm:$0xff] }
 0x5b0   :  { %24153 = vmatmul.mubr.msk.f32.gmra.mrb[52].mxu0 %vm292_vm1, %v20066_v46  ;;  %v31126_v46 = vpack.c.bf16 %v20273_v18, %v20272_v6  ;;  %v20071_v18 = vld [vmem:[%s33245_s0 + $0x292] sm:$0xff]  ;;  %v20072_v6 = vld [vmem:[%s33245_s0 + $0x29a] sm:$0xff] }
 0x5b1   :  { %24155 = vmatprep.mubr.msk.f32.mxu0 %vm292_vm1, %v20067_v28  ;;  %v31132_v28 = vld [vmem:[%s33245_s0 + $0x28a] sm:$0xff] }
 0x5b2   :  { %25046 = vmatprep.subr.bf16.mxu1 %v31126_v46 }
 0x5b3   :  { %25048 = vmatpush3.bf16.msra.mxu1 %v31126_v46  ;;  %v20073_v46 = vld [vmem:[%s33245_s0 + $0x2aa] sm:$0xff] }
 0x5b4   :  { %24156 = vmatmul.mubr.msk.f32.gmra.mrb[54].mxu0 %vm292_vm1, %v20068_v52  ;;  %v20274_v52 = vld [vmem:[%s33246_s3 + $0x30] sm:$0xff] }
 0x5b5   :  { %24158 = vmatprep.mubr.msk.f32.mxu0 %vm292_vm1, %v20069_v34  ;;  %v20275_v34 = vld [vmem:[%s33246_s3 + $0x38] sm:$0xff] }
 0x5b6   :  { %v25049_v44 = vpack.c.bf16 %v20275_v34, %v20274_v52  ;;  %v20075_v52 = vld [vmem:[%s33245_s0 + $0x2ba] sm:$0xff]  ;;  %v20076_v34 = vld [vmem:[%s33245_s0 + $0x2c2] sm:$0xff] }
 0x5b8   :  { %24159 = vmatmul.mubr.msk.f32.gmra.mrb[56].mxu0 %vm292_vm1, %v31132_v28  ;;  %25050 = vmatprep.subr.bf16.mxu1 %v25049_v44  ;;  %v20074_v28 = vld [vmem:[%s33245_s0 + $0x2b2] sm:$0xff] }
 0x5b9   :  { %24161 = vmatprep.mubr.msk.f32.mxu0 %vm292_vm1, %v20071_v18  ;;  %25052 = vmatpush3.bf16.msra.mxu1 %v25049_v44  ;;  %v12623_v18 = vld [vmem:[#allocation2 + $0x10] sm:$0xff] }
 0x5ba   :  { %v20077_v44 = vld [vmem:[%s33245_s0 + $0x2d2] sm:$0xff] }
 0x5bc   :  { %24162 = vmatmul.mubr.msk.f32.gmra.mrb[58].mxu0 %vm292_vm1, %v20072_v6  ;;  %24275 = vmatmul.mubr.msk.f32.vlgmr.msra.gmra.mrb[128].mxu1 %vm12257_vm2, %v12623_v18  ;;  %v20079_v6 = vld [vmem:[%s33245_s0 + $0x2e2] sm:$0xff] }
 0x5bd   :  { %24164 = vmatprep.mubr.msk.f32.mxu0 %vm292_vm1, %v20073_v46  ;;  %v20080_v46 = vld [vmem:[%s33245_s0 + $0x2ea] sm:$0xff]  ;;  %v20082_v18 = vld [vmem:[%s33245_s0 + $0x302] sm:$0xff] }
 0x5c0   :  { %24165 = vmatmul.mubr.msk.f32.gmra.mrb[60].mxu0 %vm292_vm1, %v20074_v28  ;;  %v20081_v28 = vld [vmem:[%s33245_s0 + $0x2fa] sm:$0xff] }
 0x5c1   :  { %24167 = vmatprep.mubr.msk.f32.mxu0 %vm292_vm1, %v20075_v52  ;;  %v20083_v52 = vld [vmem:[%s33245_s0 + $0x30a] sm:$0xff] }
 0x5c4   :  { %24168 = vmatmul.mubr.msk.f32.gmra.mrb[62].mxu0 %vm292_vm1, %v20076_v34  ;;  %v20084_v34 = vld [vmem:[%s33245_s0 + $0x312] sm:$0xff] }
 0x5c5   :  { %24170 = vmatprep.mubr.msk.f32.mxu0 %vm292_vm1, %v20077_v44  ;;  %v20085_v44 = vld [vmem:[%s33245_s0 + $0x322] sm:$0xff] }
 0x5c8   :  { %24171 = vmatmul.mubr.msk.f32.gmra.mrb[64].mxu0 %vm292_vm1, %v20078_v55  ;;  %v20086_v55 = vld [vmem:[%s33245_s0 + $0x32a] sm:$0xff] }
 0x5c9   :  { %24173 = vmatprep.mubr.msk.f32.mxu0 %vm292_vm1, %v20079_v6  ;;  %v20087_v6 = vld [vmem:[%s33245_s0 + $0x332] sm:$0xff] }
 0x5cc   :  { %24174 = vmatmul.mubr.msk.f32.gmra.mrb[66].mxu0 %vm292_vm1, %v20080_v46  ;;  %v20088_v46 = vld [vmem:[%s33245_s0 + $0x33a] sm:$0xff] }
 0x5cd   :  { %24176 = vmatprep.mubr.msk.f32.mxu0 %vm292_vm1, %v20081_v28  ;;  %v20089_v28 = vld [vmem:[%s33245_s0 + $0x34a] sm:$0xff] }
 0x5d0   :  { %24177 = vmatmul.mubr.msk.f32.gmra.mrb[68].mxu0 %vm292_vm1, %v20082_v18  ;;  %v20090_v18 = vld [vmem:[%s33245_s0 + $0x352] sm:$0xff] }
 0x5d1   :  { %24179 = vmatprep.mubr.msk.f32.mxu0 %vm292_vm1, %v20083_v52  ;;  %v20091_v52 = vld [vmem:[%s33245_s0 + $0x35a] sm:$0xff] }
 0x5d4   :  { %24180 = vmatmul.mubr.msk.f32.gmra.mrb[70].mxu0 %vm292_vm1, %v20084_v34  ;;  %v20092_v34 = vld [vmem:[%s33245_s0 + $0x362] sm:$0xff] }
 0x5d5   :  { %24182 = vmatprep.mubr.msk.f32.mxu0 %vm292_vm1, %v20085_v44  ;;  %v20093_v44 = vld [vmem:[%s33245_s0 + $0x372] sm:$0xff] }
 0x5d8   :  { %24183 = vmatmul.mubr.msk.f32.gmra.mrb[72].mxu0 %vm292_vm1, %v20086_v55  ;;  %v20094_v55 = vld [vmem:[%s33245_s0 + $0x37a] sm:$0xff] }
 0x5d9   :  { %24185 = vmatprep.mubr.msk.f32.mxu0 %vm292_vm1, %v20087_v6  ;;  %v20095_v6 = vld [vmem:[%s33245_s0 + $0x382] sm:$0xff] }
 0x5dc   :  { %24186 = vmatmul.mubr.msk.f32.gmra.mrb[74].mxu0 %vm292_vm1, %v20088_v46  ;;  %v20096_v46 = vld [vmem:[%s33245_s0 + $0x38a] sm:$0xff] }
 0x5dd   :  { %24188 = vmatprep.mubr.msk.f32.mxu0 %vm292_vm1, %v20089_v28  ;;  %v20097_v28 = vld [vmem:[%s33245_s0 + $0x39a] sm:$0xff] }
 0x5e0   :  { %24189 = vmatmul.mubr.msk.f32.gmra.mrb[76].mxu0 %vm292_vm1, %v20090_v18  ;;  %v20098_v18 = vld [vmem:[%s33245_s0 + $0x3a2] sm:$0xff] }
 0x5e1   :  { %24191 = vmatprep.mubr.msk.f32.mxu0 %vm292_vm1, %v20091_v52  ;;  %v20099_v52 = vld [vmem:[%s33245_s0 + $0x3aa] sm:$0xff] }
 0x5e4   :  { %24192 = vmatmul.mubr.msk.f32.gmra.mrb[78].mxu0 %vm292_vm1, %v20092_v34  ;;  %v20100_v34 = vld [vmem:[%s33245_s0 + $0x3b2] sm:$0xff] }
 0x5e5   :  { %24194 = vmatprep.mubr.msk.f32.mxu0 %vm292_vm1, %v20093_v44  ;;  %v20101_v44 = vld [vmem:[%s33245_s0 + $0x3c2] sm:$0xff] }
 0x5e8   :  { %24195 = vmatmul.mubr.msk.f32.gmra.mrb[80].mxu0 %vm292_vm1, %v20094_v55  ;;  %v20102_v55 = vld [vmem:[%s33245_s0 + $0x3ca] sm:$0xff] }
 0x5e9   :  { %24197 = vmatprep.mubr.msk.f32.mxu0 %vm292_vm1, %v20095_v6  ;;  %v20103_v6 = vld [vmem:[%s33245_s0 + $0x3d2] sm:$0xff] }
 0x5ec   :  { %24198 = vmatmul.mubr.msk.f32.gmra.mrb[82].mxu0 %vm292_vm1, %v20096_v46  ;;  %v20104_v46 = vld [vmem:[%s33245_s0 + $0x3da] sm:$0xff] }
 0x5ed   :  { %24200 = vmatprep.mubr.msk.f32.mxu0 %vm292_vm1, %v20097_v28  ;;  %v20105_v28 = vld [vmem:[%s33245_s0 + $0x3ea] sm:$0xff] }
 0x5f0   :  { %24201 = vmatmul.mubr.msk.f32.gmra.mrb[84].mxu0 %vm292_vm1, %v20098_v18  ;;  %v20106_v18 = vld [vmem:[%s33245_s0 + $0x3f2] sm:$0xff] }
 0x5f1   :  { %24203 = vmatprep.mubr.msk.f32.mxu0 %vm292_vm1, %v20099_v52  ;;  %v20107_v52 = vld [vmem:[%s33245_s0 + $0x3fa] sm:$0xff] }
 0x5f4   :  { %24204 = vmatmul.mubr.msk.f32.gmra.mrb[86].mxu0 %vm292_vm1, %v20100_v34  ;;  %v20108_v34 = vld [vmem:[%s33245_s0 + $0x402] sm:$0xff] }
 0x5f5   :  { %24206 = vmatprep.mubr.msk.f32.mxu0 %vm292_vm1, %v20101_v44  ;;  %v20109_v44 = vld [vmem:[%s33245_s0 + $0x412] sm:$0xff] }
 0x5f8   :  { %24207 = vmatmul.mubr.msk.f32.gmra.mrb[88].mxu0 %vm292_vm1, %v20102_v55  ;;  %v20110_v55 = vld [vmem:[%s33245_s0 + $0x41a] sm:$0xff] }
 0x5f9   :  { %24209 = vmatprep.mubr.msk.f32.mxu0 %vm292_vm1, %v20103_v6  ;;  %v20111_v6 = vld [vmem:[%s33245_s0 + $0x422] sm:$0xff] }
 0x5fc   :  { %24210 = vmatmul.mubr.msk.f32.gmra.mrb[90].mxu0 %vm292_vm1, %v20104_v46  ;;  %v20112_v46 = vld [vmem:[%s33245_s0 + $0x42a] sm:$0xff] }
 0x5fd   :  { %24212 = vmatprep.mubr.msk.f32.mxu0 %vm292_vm1, %v20105_v28  ;;  %v20113_v28 = vld [vmem:[%s33245_s0 + $0x43a] sm:$0xff] }
 0x600   :  { %24213 = vmatmul.mubr.msk.f32.gmra.mrb[92].mxu0 %vm292_vm1, %v20106_v18  ;;  %v20114_v18 = vld [vmem:[%s33245_s0 + $0x442] sm:$0xff] }
 0x601   :  { %24215 = vmatprep.mubr.msk.f32.mxu0 %vm292_vm1, %v20107_v52  ;;  %v20115_v52 = vld [vmem:[%s33245_s0 + $0x44a] sm:$0xff] }
 0x604   :  { %24216 = vmatmul.mubr.msk.f32.gmra.mrb[94].mxu0 %vm292_vm1, %v20108_v34  ;;  %v20116_v34 = vld [vmem:[%s33245_s0 + $0x452] sm:$0xff] }
 0x605   :  { %24218 = vmatprep.mubr.msk.f32.mxu0 %vm292_vm1, %v20109_v44  ;;  %v20117_v44 = vld [vmem:[%s33245_s0 + $0x462] sm:$0xff] }
 0x608   :  { %24219 = vmatmul.mubr.msk.f32.gmra.mrb[96].mxu0 %vm292_vm1, %v20110_v55  ;;  %v20118_v55 = vld [vmem:[%s33245_s0 + $0x46a] sm:$0xff] }
 0x609   :  { %24221 = vmatprep.mubr.msk.f32.mxu0 %vm292_vm1, %v20111_v6  ;;  %v20119_v6 = vld [vmem:[%s33245_s0 + $0x472] sm:$0xff] }
 0x60c   :  { %24222 = vmatmul.mubr.msk.f32.gmra.mrb[98].mxu0 %vm292_vm1, %v20112_v46  ;;  %v20120_v46 = vld [vmem:[%s33245_s0 + $0x47a] sm:$0xff] }
 0x60d   :  { %24224 = vmatprep.mubr.msk.f32.mxu0 %vm292_vm1, %v20113_v28  ;;  %v20121_v28 = vld [vmem:[%s33245_s0 + $0x48a] sm:$0xff] }
 0x610   :  { %24225 = vmatmul.mubr.msk.f32.gmra.mrb[100].mxu0 %vm292_vm1, %v20114_v18 }
 0x611   :  { %24227 = vmatprep.mubr.msk.f32.mxu0 %vm292_vm1, %v20115_v52 }
 0x614   :  { %24228 = vmatmul.mubr.msk.f32.gmra.mrb[102].mxu0 %vm292_vm1, %v20116_v34 }
 0x615   :  { %24230 = vmatprep.mubr.msk.f32.mxu0 %vm292_vm1, %v20117_v44 }
 0x618   :  { %24231 = vmatmul.mubr.msk.f32.gmra.mrb[104].mxu0 %vm292_vm1, %v20118_v55  ;;  %v20122_v55 = vld [vmem:[%s33245_s0 + $0x492] sm:$0xff] }
 0x619   :  { %24233 = vmatprep.mubr.msk.f32.mxu0 %vm292_vm1, %v20119_v6  ;;  %v20123_v6 = vld [vmem:[%s33245_s0 + $0x49a] sm:$0xff] }
 0x61b   :  { %v24076_v18 = vpop.f32.mrb[0].mxu0 }
 0x61c   :  { %v25151_v52 = vadd.f32 %v24076_v18, %v29915_v13  ;;  %v11163_v34 = vpop.f32.mrb[1].mxu0  ;;  %24234 = vmatmul.mubr.msk.f32.gmra.mrb[106].mxu0 %vm292_vm1, %v20120_v46  ;;  %v31507_v13 = vld [vmem:[%s33247_s2] ss:$0 sm:$0xff]  ;;  %v20124_v46 = vld [vmem:[%s33245_s0 + $0x4a2] sm:$0xff] }
 0x61d   :  { %v25152_v44 = vadd.f32 %v11163_v34, %v29926_v29  ;;  %24236 = vmatprep.mubr.msk.f32.mxu0 %vm292_vm1, %v20121_v28 }
 0x61e   :  { %v11938_v28 = vadd.f32 %v25151_v52, %v31507_v13  ;;  %v20127_v52 = vld [vmem:[%s33245_s0 + $0x4c2] sm:$0xff] }
 0x61f   :  { %v24079_v20 = vpop.f32.mrb[2].mxu0 }
 0x620   :  { %v25153_v4 = vadd.f32 %v24079_v20, %v29931_v37  ;;  %v11173_v2 = vpop.f32.mrb[3].mxu0  ;;  %24237 = vmatmul.mubr.msk.f32.gmra.mrb[108].mxu0 %vm292_vm1, %v20122_v55  ;;  %v20125_v37 = vld [vmem:[%s33245_s0 + $0x4b2] sm:$0xff]  ;;  %v20126_v55 = vld [vmem:[%s33245_s0 + $0x4ba] sm:$0xff] }
 0x621   :  { %v25154_v29 = vadd.f32 %v11173_v2, %v29942_v53  ;;  %24239 = vmatprep.mubr.msk.f32.mxu0 %vm292_vm1, %v20123_v6  ;;  %v11937_v53 = vadd.f32 %v25152_v44, %v31507_v13 }
 0x622   :  { %v11940_v44 = vadd.f32 %v25153_v4, %v31507_v13 }
 0x623   :  { %v24082_v20 = vpop.f32.mrb[4].mxu0  ;;  %v11939_v5 = vadd.f32 %v25154_v29, %v31507_v13 }
 0x624   :  { %v25155_v18 = vadd.f32 %v24082_v20, %v29947_v61  ;;  %v11183_v34 = vpop.f32.mrb[5].mxu0  ;;  %24240 = vmatmul.mubr.msk.f32.gmra.mrb[110].mxu0 %vm292_vm1, %v20124_v46  ;;  %v12066_v46 = vmax.f32 %v11938_v28, 0.0  ;;  %v20128_v28 = vld [vmem:[%s33245_s0 + $0x4ca] sm:$0xff] }
 0x625   :  { %v25156_v2 = vadd.f32 %v11183_v34, %v29958_v25  ;;  %24242 = vmatprep.mubr.msk.f32.mxu0 %vm292_vm1, %v20125_v37  ;;  %v12065_v34 = vmax.f32 %v11937_v53, 0.0 }
 0x626   :  { %v11942_v6 = vadd.f32 %v25155_v18, %v31507_v13 }
 0x627   :  { %v11941_v61 = vadd.f32 %v25156_v2, %v31507_v13  ;;  %v24085_v20 = vpop.f32.mrb[6].mxu0 }
 0x628   :  { %v12070_v49 = vmax.f32 %v11942_v6, 0.0  ;;  %v25157_v25 = vadd.f32 %v24085_v20, %v29963_v41  ;;  %v11193_v37 = vpop.f32.mrb[7].mxu0  ;;  %24243 = vmatmul.mubr.msk.f32.gmra.mrb[112].mxu0 %vm292_vm1, %v20126_v55  ;;  %v20129_v41 = vld [vmem:[%s33245_s0 + $0x4da] sm:$0xff]  ;;  %v12068_v6 = vmax.f32 %v11940_v44, 0.0 }
 0x629   :  { %v12069_v18 = vmax.f32 %v11941_v61, 0.0  ;;  %v25158_v56 = vadd.f32 %v11193_v37, %v29974_v33  ;;  %24245 = vmatprep.mubr.msk.f32.mxu0 %vm292_vm1, %v20127_v52 }
 0x62a   :  { %v12194_v2 = vmax.f32 %v12066_v46, %v12070_v49  ;;  %v11944_v4 = vadd.f32 %v25157_v25, %v31507_v13  ;;  %v12067_v49 = vmax.f32 %v11939_v5, 0.0 }
 0x62b   :  { %v12193_v55 = vmax.f32 %v12065_v34, %v12069_v18  ;;  %v11943_v53 = vadd.f32 %v25158_v56, %v31507_v13  ;;  %v24088_v29 = vpop.f32.mrb[8].mxu0  ;;  %v20130_v56 = vld [vmem:[%s33245_s0 + $0x4e2] sm:$0xff]  ;;  %v20132_v18 = vld [vmem:[%s33245_s0 + $0x4f2] sm:$0xff] }
 0x62c   :  { %12259 = vst.msk [vmem:[#allocation3 + $0x8] sm:$0xff] %vm12257_vm2, %v12194_v2  ;;  %v12072_v33 = vmax.f32 %v11944_v4, 0.0  ;;  %v25159_v52 = vadd.f32 %v24088_v29, %v29979_v17  ;;  %v11203_v61 = vpop.f32.mrb[9].mxu0  ;;  %24246 = vmatmul.mubr.msk.f32.gmra.mrb[114].mxu0 %vm292_vm1, %v20128_v28  ;;  %v20131_v17 = vld [vmem:[%s33245_s0 + $0x4ea] sm:$0xff]  ;;  %v20133_v28 = vld [vmem:[%s33245_s0 + $0x502] sm:$0xff] }
 0x62d   :  { %12258 = vst.msk [vmem:[#allocation3] sm:$0xff] %vm12257_vm2, %v12193_v55  ;;  %v12071_v20 = vmax.f32 %v11943_v53, 0.0  ;;  %v25160_v46 = vadd.f32 %v11203_v61, %v29990_v11  ;;  %24248 = vmatprep.mubr.msk.f32.mxu0 %vm292_vm1, %v20129_v41  ;;  %v20135_v61 = vld [vmem:[%s33245_s0 + $0x512] sm:$0xff] }
 0x62e   :  { %v12196_v44 = vmax.f32 %v12068_v6, %v12072_v33  ;;  %v11946_v2 = vadd.f32 %v25159_v52, %v31507_v13  ;;  %v20134_v6 = vld [vmem:[%s33245_s0 + $0x50a] sm:$0xff] }
 0x62f   :  { %v12195_v25 = vmax.f32 %v12067_v49, %v12071_v20  ;;  %v24091_v37 = vpop.f32.mrb[10].mxu0 }
 0x630   :  { %12261 = vst.msk [vmem:[#allocation3 + $0x18] sm:$0xff] %vm12257_vm2, %v12196_v44  ;;  %v25161_v5 = vadd.f32 %v24091_v37, %v29995_v15  ;;  %v11213_v34 = vpop.f32.mrb[11].mxu0  ;;  %24249 = vmatmul.mubr.msk.f32.gmra.mrb[116].mxu0 %vm292_vm1, %v20130_v56  ;;  %v11945_v15 = vadd.f32 %v25160_v46, %v31507_v13  ;;  %v12074_v49 = vmax.f32 %v11946_v2, 0.0  ;;  %v20136_v2 = vld [vmem:[%s33245_s0 + $0x51a] sm:$0xff] }
 0x631   :  { %12260 = vst.msk [vmem:[#allocation3 + $0x10] sm:$0xff] %vm12257_vm2, %v12195_v25  ;;  %v25162_v11 = vadd.f32 %v11213_v34, %v30006_v23  ;;  %24251 = vmatprep.mubr.msk.f32.mxu0 %vm292_vm1, %v20131_v17 }
 0x632   :  { %v11948_v44 = vadd.f32 %v25161_v5, %v31507_v13 }
 0x633   :  { %v24094_v4 = vpop.f32.mrb[12].mxu0  ;;  %v11947_v34 = vadd.f32 %v25162_v11, %v31507_v13 }
 0x634   :  { %v12322_v41 = vld [vmem:[#allocation3] ss:$2 sm:$0xff]  ;;  %v12386_v55 = vld [vmem:[#allocation3 + $0x1] ss:$2 sm:$0xff]  ;;  %v25163_v53 = vadd.f32 %v24094_v4, %v30011_v27  ;;  %v11223_v23 = vpop.f32.mrb[13].mxu0  ;;  %24252 = vmatmul.mubr.msk.f32.gmra.mrb[118].mxu0 %vm292_vm1, %v20132_v18  ;;  %v12073_v27 = vmax.f32 %v11945_v15, 0.0 }
 0x635   :  { %v25164_v29 = vadd.f32 %v11223_v23, %v30022_v35  ;;  %24254 = vmatprep.mubr.msk.f32.mxu0 %vm292_vm1, %v20133_v28  ;;  %v12449_v33 = vmax.f32 %v12322_v41, %v12386_v55 }
 0x636   :  { %v11950_v52 = vadd.f32 %v25163_v53, %v31507_v13 }
 0x637   :  { %v11949_v20 = vadd.f32 %v25164_v29, %v31507_v13  ;;  %v24097_v46 = vpop.f32.mrb[14].mxu0  ;;  %12554 = vst.msk [vmem:[#allocation2 + $0x28] sm:$0xff] %vm12257_vm2, %v12449_v33 }
 0x638   :  { %v12324_v35 = vld [vmem:[#allocation3 + $0x10] ss:$2 sm:$0xff]  ;;  %v12388_v56 = vld [vmem:[#allocation3 + $0x11] ss:$2 sm:$0xff]  ;;  %v12078_v17 = vmax.f32 %v11950_v52, 0.0  ;;  %v25165_v25 = vadd.f32 %v24097_v46, %v30027_v39  ;;  %v11233_v37 = vpop.f32.mrb[15].mxu0  ;;  %24255 = vmatmul.mubr.msk.f32.gmra.mrb[120].mxu0 %vm292_vm1, %v20134_v6 }
 0x639   :  { %v12077_v18 = vmax.f32 %v11949_v20, 0.0  ;;  %v25166_v28 = vadd.f32 %v11233_v37, %v30038_v47  ;;  %24257 = vmatprep.mubr.msk.f32.mxu0 %vm292_vm1, %v20135_v61  ;;  %v12450_v15 = vmax.f32 %v12324_v35, %v12388_v56  ;;  %v20137_v39 = vld [vmem:[%s33245_s0 + $0x52a] sm:$0xff]  ;;  %v12076_v47 = vmax.f32 %v11948_v44, 0.0  ;;  %v20138_v61 = vld [vmem:[%s33245_s0 + $0x532] sm:$0xff]  ;;  %v20140_v44 = vld [vmem:[%s33245_s0 + $0x542] sm:$0xff] }
 0x63a   :  { %v12198_v4 = vmax.f32 %v12074_v49, %v12078_v17  ;;  %v11952_v5 = vadd.f32 %v25165_v25, %v31507_v13  ;;  %v12075_v6 = vmax.f32 %v11947_v34, 0.0 }
 0x63b   :  { %v12197_v41 = vmax.f32 %v12073_v27, %v12077_v18  ;;  %v11951_v11 = vadd.f32 %v25166_v28, %v31507_v13  ;;  %v24100_v55 = vpop.f32.mrb[16].mxu0  ;;  %12555 = vst.msk [vmem:[#allocation2 + $0x30] sm:$0xff] %vm12257_vm2, %v12450_v15 }
 0x63c   :  { %12263 = vst.msk [vmem:[#allocation3 + $0x28] sm:$0xff] %vm12257_vm2, %v12198_v4  ;;  %v12080_v53 = vmax.f32 %v11952_v5, 0.0  ;;  %v25167_v23 = vadd.f32 %v24100_v55, %v30043_v51  ;;  %v11243_v29 = vpop.f32.mrb[17].mxu0  ;;  %24258 = vmatmul.mubr.msk.f32.gmra.mrb[122].mxu0 %vm292_vm1, %v20136_v2  ;;  %v20139_v51 = vld [vmem:[%s33245_s0 + $0x53a] sm:$0xff]  ;;  %s26672_s0 = smov 123  }
 0x63d   :  { %12262 = vst.msk [vmem:[#allocation3 + $0x20] sm:$0xff] %vm12257_vm2, %v12197_v41  ;;  %v12079_v33 = vmax.f32 %v11951_v11, 0.0  ;;  %v25168_v52 = vadd.f32 %v11243_v29, %v30054_v60  ;;  %24260 = vmatprep.mubr.msk.f32.mxu0 %vm292_vm1, %v20137_v39 }
 0x63e   :  { %v12200_v49 = vmax.f32 %v12076_v47, %v12080_v53  ;;  %v12624_v27 = vld [vmem:[#allocation2 + $0x28] sm:$0xff]  ;;  %v11954_v25 = vadd.f32 %v25167_v23, %v31507_v13 }
 0x63f   :  { %v12199_v20 = vmax.f32 %v12075_v6, %v12079_v33  ;;  %v24103_v46 = vpop.f32.mrb[18].mxu0  ;;  %24277 = vmatprep.mubr.msk.f32.mxu1 %vm12257_vm2, %v12624_v27  ;;  %v11953_v37 = vadd.f32 %v25168_v52, %v31507_v13 }
 0x640   :  { %12265 = vst.msk [vmem:[#allocation3 + $0x38] sm:$0xff] %vm12257_vm2, %v12200_v49  ;;  %v25169_v60 = vadd.f32 %v24103_v46, %v30059_v0  ;;  %v11253_v35 = vpop.f32.mrb[19].mxu0  ;;  %24261 = vmatmul.mubr.msk.f32.gmra.mrb[124].mxu0 %vm292_vm1, %v20138_v61  ;;  %v12082_v5 = vmax.f32 %v11954_v25, 0.0 }
 0x641   :  { %12264 = vst.msk [vmem:[#allocation3 + $0x30] sm:$0xff] %vm12257_vm2, %v12199_v20  ;;  %v25170_v56 = vadd.f32 %v11253_v35, %v30070_v21  ;;  %24263 = vmatprep.mubr.msk.f32.mxu0 %vm292_vm1, %v20139_v51  ;;  %v12081_v39 = vmax.f32 %v11953_v37, 0.0 }
 0x642   :  { %v12625_v17 = vld [vmem:[#allocation2 + $0x30] sm:$0xff]  ;;  %v11956_v53 = vadd.f32 %v25169_v60, %v31507_v13 }
 0x643   :  { %v24106_v34 = vpop.f32.mrb[20].mxu0  ;;  %24278 = vmatmul.mubr.msk.f32.gmra.mrb[130].mxu1 %vm12257_vm2, %v12625_v17 }
 0x644   :  { %v12326_v0 = vld [vmem:[#allocation3 + $0x20] ss:$2 sm:$0xff]  ;;  %v12390_v18 = vld [vmem:[#allocation3 + $0x21] ss:$2 sm:$0xff]  ;;  %v25171_v28 = vadd.f32 %v24106_v34, %v30075_v30  ;;  %v11263_v2 = vpop.f32.mrb[21].mxu0  ;;  %24264 = vmatmul.mubr.msk.f32.gmra.mrb[126].mxu0 %vm292_vm1, %v20140_v44  ;;  %v12084_v46 = vmax.f32 %v11956_v53, 0.0 }
 0x645   :  { %v25172_v21 = vadd.f32 %v11263_v2, %v30086_v54  ;;  %v12451_v15 = vmax.f32 %v12326_v0, %v12390_v18  ;;  %v11955_v54 = vadd.f32 %v25170_v56, %v31507_v13 }
 0x646   :  { %v11958_v4 = vadd.f32 %v25171_v28, %v31507_v13 }
 0x647   :  { %v11957_v41 = vadd.f32 %v25172_v21, %v31507_v13  ;;  %v24109_v11 = vpop.f32.mrb[22].mxu0  ;;  %12556 = vst.msk [vmem:[#allocation2 + $0x48] sm:$0xff] %vm12257_vm2, %v12451_v15  ;;  %v12083_v56 = vmax.f32 %v11955_v54, 0.0 }
 0x648   :  { %v12328_v55 = vld [vmem:[#allocation3 + $0x30] ss:$2 sm:$0xff]  ;;  %v12392_v47 = vld [vmem:[#allocation3 + $0x31] ss:$2 sm:$0xff]  ;;  %v12086_v30 = vmax.f32 %v11958_v4, 0.0  ;;  %v25173_v23 = vadd.f32 %v24109_v11, %v30091_v9  ;;  %v11273_v29 = vpop.f32.mrb[23].mxu0 }
 0x649   :  { %v12085_v6 = vmax.f32 %v11957_v41, 0.0  ;;  %v25174_v33 = vadd.f32 %v11273_v29, %v30095_v26  ;;  %v12452_v52 = vmax.f32 %v12328_v55, %v12392_v47 }
 0x64a   :  { %v12202_v61 = vmax.f32 %v12082_v5, %v12086_v30  ;;  %v11960_v49 = vadd.f32 %v25173_v23, %v31507_v13 }
 0x64b   :  { %v12201_v27 = vmax.f32 %v12081_v39, %v12085_v6  ;;  %v11959_v51 = vadd.f32 %v25174_v33, %v31507_v13  ;;  %v24112_v20 = vpop.f32.mrb[24].mxu0  ;;  %12557 = vst.msk [vmem:[#allocation2 + $0x50] sm:$0xff] %vm12257_vm2, %v12452_v52 }
 0x64c   :  { %12267 = vst.msk [vmem:[#allocation3 + $0x48] sm:$0xff] %vm12257_vm2, %v12202_v61  ;;  %v12088_v9 = vmax.f32 %v11960_v49, 0.0  ;;  %v25175_v60 = vadd.f32 %v24112_v20, %v30099_v57  ;;  %v11283_v35 = vpop.f32.mrb[25].mxu0 }
 0x64d   :  { %12266 = vst.msk [vmem:[#allocation3 + $0x40] sm:$0xff] %vm12257_vm2, %v12201_v27  ;;  %v12087_v26 = vmax.f32 %v11959_v51, 0.0  ;;  %v25176_v44 = vadd.f32 %v11283_v35, %v30103_v3 }
 0x64e   :  { %v12204_v17 = vmax.f32 %v12084_v46, %v12088_v9  ;;  %v12626_v25 = vld [vmem:[#allocation2 + $0x48] sm:$0xff]  ;;  %v11962_v2 = vadd.f32 %v25175_v60, %v31507_v13 }
 0x64f   :  { %v12203_v37 = vmax.f32 %v12083_v56, %v12087_v26  ;;  %v24115_v34 = vpop.f32.mrb[26].mxu0  ;;  %24280 = vmatprep.mubr.msk.f32.mxu1 %vm12257_vm2, %v12626_v25  ;;  %v11961_v3 = vadd.f32 %v25176_v44, %v31507_v13 }
 0x650   :  { %12269 = vst.msk [vmem:[#allocation3 + $0x58] sm:$0xff] %vm12257_vm2, %v12204_v17  ;;  %v25177_v0 = vadd.f32 %v24115_v34, %v30107_v7  ;;  %v11293_v18 = vpop.f32.mrb[27].mxu0  ;;  %v12090_v55 = vmax.f32 %v11962_v2, 0.0 }
 0x651   :  { %12268 = vst.msk [vmem:[#allocation3 + $0x50] sm:$0xff] %vm12257_vm2, %v12203_v37  ;;  %v25178_v57 = vadd.f32 %v11293_v18, %v30111_v12  ;;  %v12089_v12 = vmax.f32 %v11961_v3, 0.0 }
 0x652   :  { %v12627_v28 = vld [vmem:[#allocation2 + $0x50] sm:$0xff]  ;;  %v11964_v29 = vadd.f32 %v25177_v0, %v31507_v13 }
 0x653   :  { %v24118_v21 = vpop.f32.mrb[28].mxu0  ;;  %24281 = vmatmul.mubr.msk.f32.gmra.mrb[132].mxu1 %vm12257_vm2, %v12627_v28 }
 0x654   :  { %v12330_v15 = vld [vmem:[#allocation3 + $0x40] ss:$2 sm:$0xff]  ;;  %v12394_v4 = vld [vmem:[#allocation3 + $0x41] ss:$2 sm:$0xff]  ;;  %v25179_v5 = vadd.f32 %v24118_v21, %v30115_v19  ;;  %v11303_v39 = vpop.f32.mrb[29].mxu0  ;;  %v12092_v9 = vmax.f32 %v11964_v29, 0.0 }
 0x655   :  { %v25180_v7 = vadd.f32 %v11303_v39, %v30119_v24  ;;  %v12453_v41 = vmax.f32 %v12330_v15, %v12394_v4  ;;  %v11963_v24 = vadd.f32 %v25178_v57, %v31507_v13 }
 0x656   :  { %v11966_v11 = vadd.f32 %v25179_v5, %v31507_v13 }
 0x657   :  { %v11965_v47 = vadd.f32 %v25180_v7, %v31507_v13  ;;  %v24121_v53 = vpop.f32.mrb[30].mxu0  ;;  %12558 = vst.msk [vmem:[#allocation2 + $0x68] sm:$0xff] %vm12257_vm2, %v12453_v41  ;;  %v12091_v56 = vmax.f32 %v11963_v24, 0.0 }
 0x658   :  { %v12332_v30 = vld [vmem:[#allocation3 + $0x50] ss:$2 sm:$0xff]  ;;  %v12396_v23 = vld [vmem:[#allocation3 + $0x51] ss:$2 sm:$0xff]  ;;  %v12094_v54 = vmax.f32 %v11966_v11, 0.0  ;;  %v25181_v19 = vadd.f32 %v24121_v53, %v30123_v31  ;;  %v11313_v6 = vpop.f32.mrb[31].mxu0 }
 0x659   :  { %v12093_v33 = vmax.f32 %v11965_v47, 0.0  ;;  %v25182_v52 = vadd.f32 %v11313_v6, %v30127_v36  ;;  %v12454_v61 = vmax.f32 %v12332_v30, %v12396_v23 }
 0x65a   :  { %v12206_v49 = vmax.f32 %v12090_v55, %v12094_v54  ;;  %v11968_v27 = vadd.f32 %v25181_v19, %v31507_v13 }
 0x65b   :  { %v12205_v51 = vmax.f32 %v12089_v12, %v12093_v33  ;;  %v11967_v20 = vadd.f32 %v25182_v52, %v31507_v13  ;;  %v24124_v46 = vpop.f32.mrb[32].mxu0  ;;  %12559 = vst.msk [vmem:[#allocation2 + $0x70] sm:$0xff] %vm12257_vm2, %v12454_v61 }
 0x65c   :  { %12271 = vst.msk [vmem:[#allocation3 + $0x68] sm:$0xff] %vm12257_vm2, %v12206_v49  ;;  %v12096_v31 = vmax.f32 %v11968_v27, 0.0  ;;  %v25183_v60 = vadd.f32 %v24124_v46, %v30131_v43  ;;  %v11323_v35 = vpop.f32.mrb[33].mxu0 }
 0x65d   :  { %12270 = vst.msk [vmem:[#allocation3 + $0x60] sm:$0xff] %vm12257_vm2, %v12205_v51  ;;  %v12095_v36 = vmax.f32 %v11967_v20, 0.0  ;;  %v25184_v26 = vadd.f32 %v11323_v35, %v30135_v48 }
 0x65e   :  { %v12208_v44 = vmax.f32 %v12092_v9, %v12096_v31  ;;  %v12628_v17 = vld [vmem:[#allocation2 + $0x68] sm:$0xff]  ;;  %v11970_v57 = vadd.f32 %v25183_v60, %v31507_v13 }
 0x65f   :  { %v12207_v25 = vmax.f32 %v12091_v56, %v12095_v36  ;;  %v24127_v37 = vpop.f32.mrb[34].mxu0  ;;  %24283 = vmatprep.mubr.msk.f32.mxu1 %vm12257_vm2, %v12628_v17  ;;  %v11969_v48 = vadd.f32 %v25184_v26, %v31507_v13 }
 0x660   :  { %12273 = vst.msk [vmem:[#allocation3 + $0x78] sm:$0xff] %vm12257_vm2, %v12208_v44  ;;  %v25185_v34 = vadd.f32 %v24127_v37, %v30141_v59  ;;  %v11333_v0 = vpop.f32.mrb[35].mxu0  ;;  %v12098_v39 = vmax.f32 %v11970_v57, 0.0 }
 0x661   :  { %12272 = vst.msk [vmem:[#allocation3 + $0x70] sm:$0xff] %vm12257_vm2, %v12207_v25  ;;  %v25186_v43 = vadd.f32 %v11333_v0, %v30143_v63  ;;  %v12097_v63 = vmax.f32 %v11969_v48, 0.0 }
 0x662   :  { %v12629_v18 = vld [vmem:[#allocation2 + $0x70] sm:$0xff]  ;;  %v11972_v12 = vadd.f32 %v25185_v34, %v31507_v13 }
 0x663   :  { %v24130_v28 = vpop.f32.mrb[36].mxu0  ;;  %24284 = vmatmul.mubr.msk.f32.gmra.mrb[134].mxu1 %vm12257_vm2, %v12629_v18 }
 0x664   :  { %v12334_v2 = vld [vmem:[#allocation3 + $0x60] ss:$2 sm:$0xff]  ;;  %v12398_v3 = vld [vmem:[#allocation3 + $0x61] ss:$2 sm:$0xff]  ;;  %v25187_v21 = vadd.f32 %v24130_v28, %v30149_v14  ;;  %v11343_v15 = vpop.f32.mrb[37].mxu0  ;;  %v12100_v52 = vmax.f32 %v11972_v12, 0.0 }
 0x665   :  { %v25188_v59 = vadd.f32 %v11343_v15, %v30151_v22  ;;  %v12455_v4 = vmax.f32 %v12334_v2, %v12398_v3  ;;  %v11971_v22 = vadd.f32 %v25186_v43, %v31507_v13 }
 0x666   :  { %v11974_v5 = vadd.f32 %v25187_v21, %v31507_v13 }
 0x667   :  { %v11973_v7 = vadd.f32 %v25188_v59, %v31507_v13  ;;  %v24133_v41 = vpop.f32.mrb[38].mxu0  ;;  %12560 = vst.msk [vmem:[#allocation2 + $0x88] sm:$0xff] %vm12257_vm2, %v12455_v4  ;;  %v12099_v27 = vmax.f32 %v11971_v22, 0.0 }
 0x668   :  { %v12336_v11 = vld [vmem:[#allocation3 + $0x70] ss:$2 sm:$0xff]  ;;  %v12400_v55 = vld [vmem:[#allocation3 + $0x71] ss:$2 sm:$0xff]  ;;  %v12102_v47 = vmax.f32 %v11974_v5, 0.0  ;;  %v25189_v14 = vadd.f32 %v24133_v41, %v30157_v38  ;;  %v11353_v53 = vpop.f32.mrb[39].mxu0 }
 0x669   :  { %v12101_v30 = vmax.f32 %v11973_v7, 0.0  ;;  %v25190_v23 = vadd.f32 %v11353_v53, %v30159_v45  ;;  %v12456_v29 = vmax.f32 %v12336_v11, %v12400_v55 }
 0x66a   :  { %v12210_v54 = vmax.f32 %v12098_v39, %v12102_v47  ;;  %v11976_v19 = vadd.f32 %v25189_v14, %v31507_v13  ;;  %v12619_v47 = vld [vmem:[%s33246_s3 + $0x8] sm:$0xff] }
 0x66b   :  { %v12209_v6 = vmax.f32 %v12097_v63, %v12101_v30  ;;  %v11975_v24 = vadd.f32 %v25190_v23, %v31507_v13  ;;  %v24136_v33 = vpop.f32.mrb[40].mxu0  ;;  %12561 = vst.msk [vmem:[#allocation2 + $0x90] sm:$0xff] %vm12257_vm2, %v12456_v29 }
 0x66c   :  { %12275 = vst.msk [vmem:[#allocation3 + $0x88] sm:$0xff] %vm12257_vm2, %v12210_v54  ;;  %v12104_v38 = vmax.f32 %v11976_v19, 0.0  ;;  %v25191_v61 = vadd.f32 %v24136_v33, %v30165_v62  ;;  %v11363_v49 = vpop.f32.mrb[41].mxu0  ;;  %v33543_v19 = vld [vmem:[#allocation5_spill] sm:$0xff]  ;;  %v33544_v33 = vld [vmem:[#allocation6_spill] sm:$0xff] }
 0x66d   :  { %12274 = vst.msk [vmem:[#allocation3 + $0x80] sm:$0xff] %vm12257_vm2, %v12209_v6  ;;  %v12103_v45 = vmax.f32 %v11975_v24, 0.0  ;;  %v25192_v51 = vadd.f32 %v11363_v49, %v30167_v10 }
 0x66e   :  { %v12212_v20 = vmax.f32 %v12100_v52, %v12104_v38  ;;  %v12630_v46 = vld [vmem:[#allocation2 + $0x88] sm:$0xff]  ;;  %v11978_v36 = vadd.f32 %v25191_v61, %v31507_v13 }
 0x66f   :  { %v12211_v9 = vmax.f32 %v12099_v27, %v12103_v45  ;;  %v24139_v31 = vpop.f32.mrb[42].mxu0  ;;  %24286 = vmatprep.mubr.msk.f32.mxu1 %vm12257_vm2, %v12630_v46  ;;  %v11977_v10 = vadd.f32 %v25192_v51, %v31507_v13  ;;  %v33545_v51 = vld [vmem:[#allocation7_spill] sm:$0xff] }
 0x670   :  { %12277 = vst.msk [vmem:[#allocation3 + $0x98] sm:$0xff] %vm12257_vm2, %v12212_v20  ;;  %v25193_v60 = vadd.f32 %v24139_v31, %v30176_v1  ;;  %v11373_v35 = vpop.f32.mrb[43].mxu0  ;;  %v12106_v43 = vmax.f32 %v11978_v36, 0.0 }
 0x671   :  { %12276 = vst.msk [vmem:[#allocation3 + $0x90] sm:$0xff] %vm12257_vm2, %v12211_v9  ;;  %v25194_v62 = vadd.f32 %v11373_v35, %v30178_v42  ;;  %v12105_v42 = vmax.f32 %v11977_v10, 0.0  ;;  %v33546_v9 = vld [vmem:[#allocation8_spill] sm:$0xff] }
 0x672   :  { %v12631_v56 = vld [vmem:[#allocation2 + $0x90] sm:$0xff]  ;;  %v11980_v2 = vadd.f32 %v25193_v60, %v31507_v13 }
 0x673   :  { %v24142_v26 = vpop.f32.mrb[44].mxu0  ;;  %24287 = vmatmul.mubr.msk.f32.gmra.mrb[136].mxu1 %vm12257_vm2, %v12631_v56 }
 0x674   :  { %v12338_v44 = vld [vmem:[#allocation3 + $0x80] ss:$2 sm:$0xff]  ;;  %v12402_v17 = vld [vmem:[#allocation3 + $0x81] ss:$2 sm:$0xff]  ;;  %v25195_v25 = vadd.f32 %v24142_v26, %v30189_v50  ;;  %v11383_v37 = vpop.f32.mrb[45].mxu0  ;;  %v12108_v11 = vmax.f32 %v11980_v2, 0.0 }
 0x675   :  { %v25196_v1 = vadd.f32 %v11383_v37, %v30191_v58  ;;  %v12457_v34 = vmax.f32 %v12338_v44, %v12402_v17  ;;  %v11979_v58 = vadd.f32 %v25194_v62, %v31507_v13  ;;  %v33547_v37 = vld [vmem:[#allocation9_spill] sm:$0xff] }
 0x676   :  { %v11982_v0 = vadd.f32 %v25195_v25, %v31507_v13 }
 0x677   :  { %v11981_v18 = vadd.f32 %v25196_v1, %v31507_v13  ;;  %v24145_v57 = vpop.f32.mrb[46].mxu0  ;;  %12562 = vst.msk [vmem:[#allocation2 + $0xa8] sm:$0xff] %vm12257_vm2, %v12457_v34  ;;  %v12107_v14 = vmax.f32 %v11979_v58, 0.0 }
 0x678   :  { %v12340_v48 = vld [vmem:[#allocation3 + $0x90] ss:$2 sm:$0xff]  ;;  %v12404_v28 = vld [vmem:[#allocation3 + $0x91] ss:$2 sm:$0xff]  ;;  %v12110_v3 = vmax.f32 %v11982_v0, 0.0  ;;  %v25197_v50 = vadd.f32 %v24145_v57, %v30201_v8  ;;  %v11393_v21 = vpop.f32.mrb[47].mxu0 }
 0x679   :  { %v12109_v15 = vmax.f32 %v11981_v18, 0.0  ;;  %v25198_v59 = vadd.f32 %v11393_v21, %v30203_v16  ;;  %v12458_v4 = vmax.f32 %v12340_v48, %v12404_v28  ;;  %v12618_v16 = vld [vmem:[%s33246_s3] sm:$0xff] }
 0x67a   :  { %v12214_v5 = vmax.f32 %v12106_v43, %v12110_v3  ;;  %v11984_v39 = vadd.f32 %v25197_v50, %v31507_v13  ;;  %v25053_v30 = vpack.c.bf16 %v12619_v47, %v12618_v16 }
 0x67b   :  { %v12213_v63 = vmax.f32 %v12105_v42, %v12109_v15  ;;  %v11983_v7 = vadd.f32 %v25198_v59, %v31507_v13  ;;  %v24148_v41 = vpop.f32.mrb[48].mxu0  ;;  %12563 = vst.msk [vmem:[#allocation2 + $0xb0] sm:$0xff] %vm12257_vm2, %v12458_v4  ;;  %v33548_v42 = vld [vmem:[#allocation10_spill] sm:$0xff]  ;;  %v33549_v15 = vld [vmem:[#allocation11_spill] sm:$0xff] }
 0x67c   :  { %12279 = vst.msk [vmem:[#allocation3 + $0xa8] sm:$0xff] %vm12257_vm2, %v12214_v5  ;;  %v12112_v8 = vmax.f32 %v11984_v39, 0.0  ;;  %v25199_v55 = vadd.f32 %v24148_v41, %v30213_v32  ;;  %v11403_v12 = vpop.f32.mrb[49].mxu0  ;;  %25054 = vmatprep.subr.bf16.mxu1 %v25053_v30 }
 0x67d   :  { %12278 = vst.msk [vmem:[#allocation3 + $0xa0] sm:$0xff] %vm12257_vm2, %v12213_v63  ;;  %v12111_v53 = vmax.f32 %v11983_v7, 0.0  ;;  %v25200_v22 = vadd.f32 %v11403_v12, %v30215_v40  ;;  %25056 = vmatpush3.bf16.msra.mxu1 %v25053_v30  ;;  %v33550_v63 = vld [vmem:[#allocation12_spill] sm:$0xff]  ;;  %v33551_v12 = vld [vmem:[#allocation13_spill] sm:$0xff] }
 0x67e   :  { %v12216_v23 = vmax.f32 %v12108_v11, %v12112_v8  ;;  %v12632_v29 = vld [vmem:[#allocation2 + $0xa8] sm:$0xff]  ;;  %v11986_v40 = vadd.f32 %v25199_v55, %v31507_v13 }
 0x67f   :  { %v12215_v54 = vmax.f32 %v12107_v14, %v12111_v53  ;;  %v24151_v32 = vpop.f32.mrb[50].mxu0  ;;  %24289 = vmatprep.mubr.msk.f32.mxu1 %vm12257_vm2, %v12632_v29  ;;  %v11985_v61 = vadd.f32 %v25200_v22, %v31507_v13  ;;  %v33552_v14 = vld [vmem:[#allocation14_spill] sm:$0xff] }
 0x680   :  { %12281 = vst.msk [vmem:[#allocation3 + $0xb8] sm:$0xff] %vm12257_vm2, %v12216_v23  ;;  %v25201_v6 = vadd.f32 %v24151_v32, %v33543_v19  ;;  %v11413_v24 = vpop.f32.mrb[51].mxu0  ;;  %v12114_v62 = vmax.f32 %v11986_v40, 0.0  ;;  %v33553_v19 = vld [vmem:[#allocation15_spill] sm:$0xff] }
 0x681   :  { %12280 = vst.msk [vmem:[#allocation3 + $0xb0] sm:$0xff] %vm12257_vm2, %v12215_v54  ;;  %v25202_v52 = vadd.f32 %v11413_v24, %v33544_v33  ;;  %v12113_v56 = vmax.f32 %v11985_v61, 0.0  ;;  %v33554_v33 = vld [vmem:[#allocation16_spill] sm:$0xff] }
 0x682   :  { %v12633_v38 = vld [vmem:[#allocation2 + $0xb0] sm:$0xff]  ;;  %v11988_v17 = vadd.f32 %v25201_v6, %v31507_v13 }
 0x683   :  { %v24154_v49 = vpop.f32.mrb[52].mxu0  ;;  %24290 = vmatmul.mubr.msk.f32.gmra.mrb[138].mxu1 %vm12257_vm2, %v12633_v38  ;;  %v11987_v0 = vadd.f32 %v25202_v52, %v31507_v13 }
 0x684   :  { %v12342_v27 = vld [vmem:[#allocation3 + $0xa0] ss:$2 sm:$0xff]  ;;  %v12406_v45 = vld [vmem:[#allocation3 + $0xa1] ss:$2 sm:$0xff]  ;;  %v25203_v20 = vadd.f32 %v24154_v49, %v33545_v51  ;;  %v11423_v46 = vpop.f32.mrb[53].mxu0  ;;  %v12116_v21 = vmax.f32 %v11988_v17, 0.0 }
 0x685   :  { %v25204_v31 = vadd.f32 %v11423_v46, %v33546_v9  ;;  %v12459_v60 = vmax.f32 %v12342_v27, %v12406_v45  ;;  %v12115_v5 = vmax.f32 %v11987_v0, 0.0 }
 0x686   :  { %v11990_v35 = vadd.f32 %v25203_v20, %v31507_v13 }
 0x687   :  { %v11989_v36 = vadd.f32 %v25204_v31, %v31507_v13  ;;  %v24157_v10 = vpop.f32.mrb[54].mxu0  ;;  %12564 = vst.msk [vmem:[#allocation2 + $0xc8] sm:$0xff] %vm12257_vm2, %v12459_v60  ;;  %v33555_v31 = vld [vmem:[#allocation17_spill] sm:$0xff] }
 0x688   :  { %v12344_v26 = vld [vmem:[#allocation3 + $0xb0] ss:$2 sm:$0xff]  ;;  %v12408_v44 = vld [vmem:[#allocation3 + $0xb1] ss:$2 sm:$0xff]  ;;  %v12118_v25 = vmax.f32 %v11990_v35, 0.0  ;;  %v25205_v1 = vadd.f32 %v24157_v10, %v33547_v37  ;;  %v11433_v34 = vpop.f32.mrb[55].mxu0 }
 0x689   :  { %v12117_v43 = vmax.f32 %v11989_v36, 0.0  ;;  %v25206_v18 = vadd.f32 %v11433_v34, %v33548_v42  ;;  %v12460_v57 = vmax.f32 %v12344_v26, %v12408_v44  ;;  %v33556_v36 = vld [vmem:[#allocation18_spill] sm:$0xff] }
 0x68a   :  { %v12218_v48 = vmax.f32 %v12114_v62, %v12118_v25  ;;  %v11992_v28 = vadd.f32 %v25205_v1, %v31507_v13 }
 0x68b   :  { %v12217_v2 = vmax.f32 %v12113_v56, %v12117_v43  ;;  %v11991_v3 = vadd.f32 %v25206_v18, %v31507_v13  ;;  %v24160_v50 = vpop.f32.mrb[56].mxu0  ;;  %12565 = vst.msk [vmem:[#allocation2 + $0xd0] sm:$0xff] %vm12257_vm2, %v12460_v57  ;;  %v33557_v43 = vld [vmem:[#allocation19_spill] sm:$0xff] }
 0x68c   :  { %12283 = vst.msk [vmem:[#allocation3 + $0xc8] sm:$0xff] %vm12257_vm2, %v12218_v48  ;;  %v12120_v58 = vmax.f32 %v11992_v28, 0.0  ;;  %v25207_v59 = vadd.f32 %v24160_v50, %v33549_v15  ;;  %v11443_v4 = vpop.f32.mrb[57].mxu0  ;;  %v12620_v57 = vld [vmem:[%s33246_s3 + $0x10] sm:$0xff]  ;;  %v12621_v48 = vld [vmem:[%s33246_s3 + $0x18] sm:$0xff] }
 0x68d   :  { %12282 = vst.msk [vmem:[#allocation3 + $0xc0] sm:$0xff] %vm12257_vm2, %v12217_v2  ;;  %v12119_v39 = vmax.f32 %v11991_v3, 0.0  ;;  %v25208_v7 = vadd.f32 %v11443_v4, %v33550_v63  ;;  %v33558_v3 = vld [vmem:[#allocation20_spill] sm:$0xff] }
 0x68e   :  { %v12220_v41 = vmax.f32 %v12116_v21, %v12120_v58  ;;  %v12634_v11 = vld [vmem:[#allocation2 + $0xc8] sm:$0xff]  ;;  %v11994_v30 = vadd.f32 %v25207_v59, %v31507_v13  ;;  %v25057_v21 = vpack.c.bf16 %v12621_v48, %v12620_v57  ;;  %v33567_v57 = vld [vmem:[#allocation29_spill] sm:$0xff] }
 0x68f   :  { %v12219_v8 = vmax.f32 %v12115_v5, %v12119_v39  ;;  %v24163_v55 = vpop.f32.mrb[58].mxu0  ;;  %24292 = vmatprep.mubr.msk.f32.mxu1 %vm12257_vm2, %v12634_v11  ;;  %v11993_v23 = vadd.f32 %v25208_v7, %v31507_v13  ;;  %v33559_v5 = vld [vmem:[#allocation21_spill] sm:$0xff]  ;;  %v33560_v7 = vld [vmem:[#allocation22_spill] sm:$0xff] }
 0x690   :  { %12285 = vst.msk [vmem:[#allocation3 + $0xd8] sm:$0xff] %vm12257_vm2, %v12220_v41  ;;  %v25209_v16 = vadd.f32 %v24163_v55, %v33551_v12  ;;  %v11453_v47 = vpop.f32.mrb[59].mxu0  ;;  %v12122_v61 = vmax.f32 %v11994_v30, 0.0  ;;  %25058 = vmatprep.subr.bf16.mxu1 %v25057_v21  ;;  %v33562_v30 = vld [vmem:[#allocation24_spill] sm:$0xff] }
 0x691   :  { %12284 = vst.msk [vmem:[#allocation3 + $0xd0] sm:$0xff] %vm12257_vm2, %v12219_v8  ;;  %v25210_v53 = vadd.f32 %v11453_v47, %v33552_v14  ;;  %v12121_v49 = vmax.f32 %v11993_v23, 0.0  ;;  %25060 = vmatpush3.bf16.msra.mxu1 %v25057_v21  ;;  %v33561_v14 = vld [vmem:[#allocation23_spill] sm:$0xff] }
 0x692   :  { %v12635_v22 = vld [vmem:[#allocation2 + $0xd0] sm:$0xff]  ;;  %v11996_v46 = vadd.f32 %v25209_v16, %v31507_v13 }
 0x693   :  { %v24166_v29 = vpop.f32.mrb[60].mxu0  ;;  %24293 = vmatmul.mubr.msk.f32.gmra.mrb[140].mxu1 %vm12257_vm2, %v12635_v22  ;;  %v11995_v62 = vadd.f32 %v25210_v53, %v31507_v13 }
 0x694   :  { %v12346_v54 = vld [vmem:[#allocation3 + $0xc0] ss:$2 sm:$0xff]  ;;  %v12410_v32 = vld [vmem:[#allocation3 + $0xc1] ss:$2 sm:$0xff]  ;;  %v25211_v6 = vadd.f32 %v24166_v29, %v33553_v19  ;;  %v11463_v24 = vpop.f32.mrb[61].mxu0  ;;  %v12124_v34 = vmax.f32 %v11996_v46, 0.0 }
 0x695   :  { %v25212_v52 = vadd.f32 %v11463_v24, %v33554_v33  ;;  %v12461_v38 = vmax.f32 %v12346_v54, %v12410_v32  ;;  %v12123_v28 = vmax.f32 %v11995_v62, 0.0 }
 0x696   :  { %v11998_v40 = vadd.f32 %v25211_v6, %v31507_v13 }
 0x697   :  { %v11997_v27 = vadd.f32 %v25212_v52, %v31507_v13  ;;  %v24169_v45 = vpop.f32.mrb[62].mxu0  ;;  %12566 = vst.msk [vmem:[#allocation2 + $0xe8] sm:$0xff] %vm12257_vm2, %v12461_v38 }
 0x698   :  { %v12348_v51 = vld [vmem:[#allocation3 + $0xd0] ss:$2 sm:$0xff]  ;;  %v12412_v20 = vld [vmem:[#allocation3 + $0xd1] ss:$2 sm:$0xff]  ;;  %v12126_v9 = vmax.f32 %v11998_v40, 0.0  ;;  %v25213_v60 = vadd.f32 %v24169_v45, %v33555_v31  ;;  %v11473_v35 = vpop.f32.mrb[63].mxu0 }
 0x699   :  { %v12125_v56 = vmax.f32 %v11997_v27, 0.0  ;;  %v25214_v10 = vadd.f32 %v11473_v35, %v33556_v36  ;;  %v12462_v26 = vmax.f32 %v12348_v51, %v12412_v20  ;;  %v33564_v20 = vld [vmem:[#allocation26_spill] sm:$0xff] }
 0x69a   :  { %v12222_v44 = vmax.f32 %v12122_v61, %v12126_v9  ;;  %v12000_v17 = vadd.f32 %v25213_v60, %v31507_v13  ;;  %v33563_v61 = vld [vmem:[#allocation25_spill] sm:$0xff] }
 0x69b   :  { %v12221_v25 = vmax.f32 %v12121_v49, %v12125_v56  ;;  %v11999_v37 = vadd.f32 %v25214_v10, %v31507_v13  ;;  %v24172_v1 = vpop.f32.mrb[64].mxu0  ;;  %12567 = vst.msk [vmem:[#allocation2 + $0xf0] sm:$0xff] %vm12257_vm2, %v12462_v26  ;;  %v33565_v26 = vld [vmem:[#allocation27_spill] sm:$0xff] }
 0x69c   :  { %12287 = vst.msk [vmem:[#allocation3 + $0xe8] sm:$0xff] %vm12257_vm2, %v12222_v44  ;;  %v12128_v0 = vmax.f32 %v12000_v17, 0.0  ;;  %v25215_v42 = vadd.f32 %v24172_v1, %v33557_v43  ;;  %v11483_v18 = vpop.f32.mrb[65].mxu0  ;;  %v33566_v1 = vld [vmem:[#allocation28_spill] sm:$0xff] }
 0x69d   :  { %12286 = vst.msk [vmem:[#allocation3 + $0xe0] sm:$0xff] %vm12257_vm2, %v12221_v25  ;;  %v12127_v2 = vmax.f32 %v11999_v37, 0.0  ;;  %v25216_v50 = vadd.f32 %v11483_v18, %v33558_v3 }
 0x69e   :  { %v12224_v58 = vmax.f32 %v12124_v34, %v12128_v0  ;;  %v12636_v15 = vld [vmem:[#allocation2 + $0xe8] sm:$0xff]  ;;  %v12002_v8 = vadd.f32 %v25215_v42, %v31507_v13 }
 0x69f   :  { %v12223_v59 = vmax.f32 %v12123_v28, %v12127_v2  ;;  %v24175_v4 = vpop.f32.mrb[66].mxu0  ;;  %24295 = vmatprep.mubr.msk.f32.mxu1 %vm12257_vm2, %v12636_v15  ;;  %v12001_v55 = vadd.f32 %v25216_v50, %v31507_v13  ;;  %v33568_v2 = vld [vmem:[#allocation30_spill] sm:$0xff] }
 0x6a0   :  { %12289 = vst.msk [vmem:[#allocation3 + $0xf8] sm:$0xff] %vm12257_vm2, %v12224_v58  ;;  %v25217_v39 = vadd.f32 %v24175_v4, %v33559_v5  ;;  %v11493_v63 = vpop.f32.mrb[67].mxu0  ;;  %v12130_v32 = vmax.f32 %v12002_v8, 0.0  ;;  %v20341_v4 = vld [vmem:[%s33246_s3 + $0x48] sm:$0xff]  ;;  %v33570_v8 = vld [vmem:[#allocation32_spill] sm:$0xff] }
 0x6a1   :  { %12288 = vst.msk [vmem:[#allocation3 + $0xf0] sm:$0xff] %vm12257_vm2, %v12223_v59  ;;  %v25218_v41 = vadd.f32 %v11493_v63, %v33560_v7  ;;  %v12129_v19 = vmax.f32 %v12001_v55, 0.0  ;;  %v20340_v59 = vld [vmem:[%s33246_s3 + $0x40] sm:$0xff]  ;;  %v33569_v63 = vld [vmem:[#allocation31_spill] sm:$0xff] }
 0x6a2   :  { %v12637_v11 = vld [vmem:[#allocation2 + $0xf0] sm:$0xff]  ;;  %v12004_v38 = vadd.f32 %v25217_v39, %v31507_v13 }
 0x6a3   :  { %v24178_v12 = vpop.f32.mrb[68].mxu0  ;;  %24296 = vmatmul.mubr.msk.f32.gmra.mrb[142].mxu1 %vm12257_vm2, %v12637_v11  ;;  %v12003_v45 = vadd.f32 %v25218_v41, %v31507_v13  ;;  %v31812_v11 = vpack.c.bf16 %v20341_v4, %v20340_v59 }
 0x6a4   :  { %v12350_v16 = vld [vmem:[#allocation3 + $0xe0] ss:$2 sm:$0xff]  ;;  %v12414_v47 = vld [vmem:[#allocation3 + $0xe1] ss:$2 sm:$0xff]  ;;  %v25219_v53 = vadd.f32 %v24178_v12, %v33561_v14  ;;  %v11503_v22 = vpop.f32.mrb[69].mxu0  ;;  %v12132_v36 = vmax.f32 %v12004_v38, 0.0 }
 0x6a5   :  { %v25220_v23 = vadd.f32 %v11503_v22, %v33562_v30  ;;  %v12463_v29 = vmax.f32 %v12350_v16, %v12414_v47  ;;  %v12131_v25 = vmax.f32 %v12003_v45, 0.0  ;;  %v31818_v12 = vld [vmem:[%s33247_s2] ss:$0 sm:$0xff]  ;;  %25062 = vmatprep.subr.bf16.mxu1 %v31812_v11 }
 0x6a6   :  { %v12006_v54 = vadd.f32 %v25219_v53, %v31507_v13 }
 0x6a7   :  { %v12005_v6 = vadd.f32 %v25220_v23, %v31507_v13  ;;  %v24181_v24 = vpop.f32.mrb[70].mxu0  ;;  %12568 = vst.msk [vmem:[#allocation2 + $0x108] sm:$0xff] %vm12257_vm2, %v12463_v29 }
 0x6a8   :  { %v12352_v33 = vld [vmem:[#allocation3 + $0xf0] ss:$2 sm:$0xff]  ;;  %v12416_v52 = vld [vmem:[#allocation3 + $0xf1] ss:$2 sm:$0xff]  ;;  %v12134_v40 = vmax.f32 %v12006_v54, 0.0  ;;  %v25221_v49 = vadd.f32 %v24181_v24, %v33563_v61  ;;  %v11513_v27 = vpop.f32.mrb[71].mxu0 }
 0x6a9   :  { %v12133_v51 = vmax.f32 %v12005_v6, 0.0  ;;  %v25222_v46 = vadd.f32 %v11513_v27, %v33564_v20  ;;  %v12464_v9 = vmax.f32 %v12352_v33, %v12416_v52  ;;  %v33572_v52 = vld [vmem:[#allocation34_spill] sm:$0xff] }
 0x6aa   :  { %v12226_v31 = vmax.f32 %v12130_v32, %v12134_v40  ;;  %v12008_v60 = vadd.f32 %v25221_v49, %v31507_v13  ;;  %v33571_v32 = vld [vmem:[#allocation33_spill] sm:$0xff] }
 0x6ab   :  { %v12225_v35 = vmax.f32 %v12129_v19, %v12133_v51  ;;  %v12007_v62 = vadd.f32 %v25222_v46, %v31507_v13  ;;  %v24184_v56 = vpop.f32.mrb[72].mxu0  ;;  %12569 = vst.msk [vmem:[#allocation2 + $0x110] sm:$0xff] %vm12257_vm2, %v12464_v9  ;;  %v33573_v9 = vld [vmem:[#allocation35_spill] sm:$0xff] }
 0x6ac   :  { %12291 = vst.msk [vmem:[#allocation3 + $0x108] sm:$0xff] %vm12257_vm2, %v12226_v31  ;;  %v12136_v10 = vmax.f32 %v12008_v60, 0.0  ;;  %v25223_v44 = vadd.f32 %v24184_v56, %v33565_v26  ;;  %v11523_v17 = vpop.f32.mrb[73].mxu0  ;;  %v33574_v56 = vld [vmem:[#allocation36_spill] sm:$0xff] }
 0x6ad   :  { %12290 = vst.msk [vmem:[#allocation3 + $0x100] sm:$0xff] %vm12257_vm2, %v12225_v35  ;;  %v12135_v37 = vmax.f32 %v12007_v62, 0.0  ;;  %v25224_v34 = vadd.f32 %v11523_v17, %v33566_v1 }
 0x6ae   :  { %v12228_v0 = vmax.f32 %v12132_v36, %v12136_v10  ;;  %v12638_v43 = vld [vmem:[#allocation2 + $0x108] sm:$0xff]  ;;  %v12010_v21 = vadd.f32 %v25223_v44, %v31507_v13 }
 0x6af   :  { %v12227_v42 = vmax.f32 %v12131_v25, %v12135_v37  ;;  %v24187_v18 = vpop.f32.mrb[74].mxu0  ;;  %24298 = vmatprep.mubr.msk.f32.mxu1 %vm12257_vm2, %v12638_v43  ;;  %v12009_v58 = vadd.f32 %v25224_v34, %v31507_v13  ;;  %v33575_v25 = vld [vmem:[#allocation37_spill] sm:$0xff]  ;;  %v33576_v34 = vld [vmem:[#allocation38_spill] sm:$0xff] }
 0x6b0   :  { %12293 = vst.msk [vmem:[#allocation3 + $0x118] sm:$0xff] %vm12257_vm2, %v12228_v0  ;;  %v25225_v48 = vadd.f32 %v24187_v18, %v33567_v57  ;;  %v11533_v28 = vpop.f32.mrb[75].mxu0  ;;  %v12138_v47 = vmax.f32 %v12010_v21, 0.0  ;;  %v33578_v21 = vld [vmem:[#allocation40_spill] sm:$0xff] }
 0x6b1   :  { %12292 = vst.msk [vmem:[#allocation3 + $0x110] sm:$0xff] %vm12257_vm2, %v12227_v42  ;;  %v25226_v3 = vadd.f32 %v11533_v28, %v33568_v2  ;;  %v12137_v14 = vmax.f32 %v12009_v58, 0.0  ;;  %v33577_v2 = vld [vmem:[#allocation39_spill] sm:$0xff] }
 0x6b2   :  { %v12639_v50 = vld [vmem:[#allocation2 + $0x110] sm:$0xff]  ;;  %v12012_v29 = vadd.f32 %v31818_v12, %v25225_v48 }
 0x6b3   :  { %v24190_v15 = vpop.f32.mrb[76].mxu0  ;;  %24299 = vmatmul.mubr.msk.f32.gmra.mrb[144].mxu1 %vm12257_vm2, %v12639_v50  ;;  %v12011_v24 = vadd.f32 %v31818_v12, %v25226_v3 }
 0x6b4   :  { %v12354_v5 = vld [vmem:[#allocation3 + $0x100] ss:$2 sm:$0xff]  ;;  %v12418_v39 = vld [vmem:[#allocation3 + $0x101] ss:$2 sm:$0xff]  ;;  %v25227_v7 = vadd.f32 %v24190_v15, %v33569_v63  ;;  %v11543_v41 = vpop.f32.mrb[77].mxu0  ;;  %v12140_v20 = vmax.f32 %v12012_v29, 0.0 }
 0x6b5   :  { %v25228_v13 = vadd.f32 %v11543_v41, %v33570_v8  ;;  %v12465_v55 = vmax.f32 %v12354_v5, %v12418_v39  ;;  %v12139_v35 = vmax.f32 %v12011_v24, 0.0 }
 0x6b6   :  { %v12014_v16 = vadd.f32 %v31818_v12, %v25227_v7 }
 0x6b7   :  { %v12013_v53 = vadd.f32 %v31818_v12, %v25228_v13  ;;  %v24193_v22 = vpop.f32.mrb[78].mxu0  ;;  %12570 = vst.msk [vmem:[#allocation2 + $0x128] sm:$0xff] %vm12257_vm2, %v12465_v55  ;;  %v33579_v55 = vld [vmem:[#allocation41_spill] sm:$0xff] }
 0x6b8   :  { %v12356_v30 = vld [vmem:[#allocation3 + $0x110] ss:$2 sm:$0xff]  ;;  %v12420_v23 = vld [vmem:[#allocation3 + $0x111] ss:$2 sm:$0xff]  ;;  %v12142_v54 = vmax.f32 %v12014_v16, 0.0  ;;  %v25229_v19 = vadd.f32 %v24193_v22, %v33571_v32  ;;  %v11553_v6 = vpop.f32.mrb[79].mxu0 }
 0x6b9   :  { %v12141_v33 = vmax.f32 %v12013_v53, 0.0  ;;  %v25230_v38 = vadd.f32 %v11553_v6, %v33572_v52  ;;  %v12466_v40 = vmax.f32 %v12356_v30, %v12420_v23  ;;  %v33580_v22 = vld [vmem:[#allocation42_spill] sm:$0xff]  ;;  %v33581_v52 = vld [vmem:[#allocation43_spill] sm:$0xff] }
 0x6ba   :  { %v12230_v61 = vmax.f32 %v12138_v47, %v12142_v54  ;;  %v12016_v49 = vadd.f32 %v31818_v12, %v25229_v19 }
 0x6bb   :  { %v12229_v27 = vmax.f32 %v12137_v14, %v12141_v33  ;;  %v12015_v45 = vadd.f32 %v31818_v12, %v25230_v38  ;;  %v24196_v51 = vpop.f32.mrb[80].mxu0  ;;  %12571 = vst.msk [vmem:[#allocation2 + $0x130] sm:$0xff] %vm12257_vm2, %v12466_v40 }
 0x6bc   :  { %12295 = vst.msk [vmem:[#allocation3 + $0x128] sm:$0xff] %vm12257_vm2, %v12230_v61  ;;  %v12144_v46 = vmax.f32 %v12016_v49, 0.0  ;;  %v25231_v31 = vadd.f32 %v24196_v51, %v33573_v9  ;;  %v11563_v60 = vpop.f32.mrb[81].mxu0 }
 0x6bd   :  { %12294 = vst.msk [vmem:[#allocation3 + $0x120] sm:$0xff] %vm12257_vm2, %v12229_v27  ;;  %v12143_v62 = vmax.f32 %v12015_v45, 0.0  ;;  %v25232_v36 = vadd.f32 %v11563_v60, %v33574_v56  ;;  %v33582_v27 = vld [vmem:[#allocation44_spill] sm:$0xff] }
 0x6be   :  { %v12232_v10 = vmax.f32 %v12140_v20, %v12144_v46  ;;  %v12640_v26 = vld [vmem:[#allocation2 + $0x128] sm:$0xff]  ;;  %v12018_v42 = vadd.f32 %v31818_v12, %v25231_v31  ;;  %v33583_v31 = vld [vmem:[#allocation45_spill] sm:$0xff] }
 0x6bf   :  { %v12231_v44 = vmax.f32 %v12139_v35, %v12143_v62  ;;  %v24199_v17 = vpop.f32.mrb[82].mxu0  ;;  %24301 = vmatprep.mubr.msk.f32.mxu1 %vm12257_vm2, %v12640_v26  ;;  %v12017_v18 = vadd.f32 %v31818_v12, %v25232_v36  ;;  %v33584_v62 = vld [vmem:[#allocation46_spill] sm:$0xff] }
 0x6c0   :  { %12297 = vst.msk [vmem:[#allocation3 + $0x138] sm:$0xff] %vm12257_vm2, %v12232_v10  ;;  %v25233_v37 = vadd.f32 %v24199_v17, %v33575_v25  ;;  %v11573_v1 = vpop.f32.mrb[83].mxu0  ;;  %v12146_v4 = vmax.f32 %v12018_v42, 0.0 }
 0x6c1   :  { %12296 = vst.msk [vmem:[#allocation3 + $0x130] sm:$0xff] %vm12257_vm2, %v12231_v44  ;;  %v25234_v0 = vadd.f32 %v11573_v1, %v33576_v34  ;;  %v12145_v5 = vmax.f32 %v12017_v18, 0.0 }
 0x6c2   :  { %v12641_v43 = vld [vmem:[#allocation2 + $0x130] sm:$0xff]  ;;  %v12020_v8 = vadd.f32 %v31818_v12, %v25233_v37 }
 0x6c3   :  { %v24202_v57 = vpop.f32.mrb[84].mxu0  ;;  %24302 = vmatmul.mubr.msk.f32.gmra.mrb[146].mxu1 %vm12257_vm2, %v12641_v43  ;;  %v12019_v14 = vadd.f32 %v31818_v12, %v25234_v0  ;;  %v33585_v37 = vld [vmem:[#allocation47_spill] sm:$0xff]  ;;  %v33586_v0 = vld [vmem:[#allocation48_spill] sm:$0xff] }
 0x6c4   :  { %v12358_v48 = vld [vmem:[#allocation3 + $0x120] ss:$2 sm:$0xff]  ;;  %v12422_v28 = vld [vmem:[#allocation3 + $0x121] ss:$2 sm:$0xff]  ;;  %v25235_v3 = vadd.f32 %v24202_v57, %v33577_v2  ;;  %v11583_v50 = vpop.f32.mrb[85].mxu0  ;;  %v12148_v24 = vmax.f32 %v12020_v8, 0.0 }
 0x6c5   :  { %v25236_v58 = vadd.f32 %v11583_v50, %v33578_v21  ;;  %v12467_v15 = vmax.f32 %v12358_v48, %v12422_v28  ;;  %v12147_v61 = vmax.f32 %v12019_v14, 0.0 }
 0x6c6   :  { %v12022_v59 = vadd.f32 %v31818_v12, %v25235_v3 }
 0x6c7   :  { %v12021_v39 = vadd.f32 %v31818_v12, %v25236_v58  ;;  %v24205_v63 = vpop.f32.mrb[86].mxu0  ;;  %12572 = vst.msk [vmem:[#allocation2 + $0x148] sm:$0xff] %vm12257_vm2, %v12467_v15  ;;  %v33587_v15 = vld [vmem:[#allocation49_spill] sm:$0xff] }
 0x6c8   :  { %v12360_v7 = vld [vmem:[#allocation3 + $0x130] ss:$2 sm:$0xff]  ;;  %v12424_v41 = vld [vmem:[#allocation3 + $0x131] ss:$2 sm:$0xff]  ;;  %v12150_v13 = vmax.f32 %v12022_v59, 0.0  ;;  %v25237_v16 = vadd.f32 %v24205_v63, %v33579_v55  ;;  %v11593_v47 = vpop.f32.mrb[87].mxu0 }
 0x6c9   :  { %v12149_v53 = vmax.f32 %v12021_v39, 0.0  ;;  %v25238_v30 = vadd.f32 %v11593_v47, %v33580_v22  ;;  %v12468_v23 = vmax.f32 %v12360_v7, %v12424_v41  ;;  %v33588_v63 = vld [vmem:[#allocation50_spill] sm:$0xff]  ;;  %v33589_v22 = vld [vmem:[#allocation51_spill] sm:$0xff] }
 0x6ca   :  { %v12234_v29 = vmax.f32 %v12146_v4, %v12150_v13  ;;  %v12024_v54 = vadd.f32 %v31818_v12, %v25237_v16 }
 0x6cb   :  { %v12233_v32 = vmax.f32 %v12145_v5, %v12149_v53  ;;  %v12023_v19 = vadd.f32 %v31818_v12, %v25238_v30  ;;  %v24208_v6 = vpop.f32.mrb[88].mxu0  ;;  %12573 = vst.msk [vmem:[#allocation2 + $0x150] sm:$0xff] %vm12257_vm2, %v12468_v23 }
 0x6cc   :  { %12299 = vst.msk [vmem:[#allocation3 + $0x148] sm:$0xff] %vm12257_vm2, %v12234_v29  ;;  %v12152_v33 = vmax.f32 %v12024_v54, 0.0  ;;  %v25239_v38 = vadd.f32 %v24208_v6, %v33581_v52  ;;  %v11603_v40 = vpop.f32.mrb[89].mxu0 }
 0x6cd   :  { %12298 = vst.msk [vmem:[#allocation3 + $0x140] sm:$0xff] %vm12257_vm2, %v12233_v32  ;;  %v12151_v49 = vmax.f32 %v12023_v19, 0.0  ;;  %v25240_v45 = vadd.f32 %v11603_v40, %v33582_v27  ;;  %v33590_v32 = vld [vmem:[#allocation52_spill] sm:$0xff] }
 0x6ce   :  { %v12236_v51 = vmax.f32 %v12148_v24, %v12152_v33  ;;  %v12642_v20 = vld [vmem:[#allocation2 + $0x148] sm:$0xff]  ;;  %v12026_v10 = vadd.f32 %v31818_v12, %v25239_v38  ;;  %v33591_v38 = vld [vmem:[#allocation53_spill] sm:$0xff] }
 0x6cf   :  { %v12235_v46 = vmax.f32 %v12147_v61, %v12151_v49  ;;  %v24211_v9 = vpop.f32.mrb[90].mxu0  ;;  %24304 = vmatprep.mubr.msk.f32.mxu1 %vm12257_vm2, %v12642_v20  ;;  %v12025_v26 = vadd.f32 %v31818_v12, %v25240_v45  ;;  %v33592_v49 = vld [vmem:[#allocation54_spill] sm:$0xff] }
 0x6d0   :  { %12301 = vst.msk [vmem:[#allocation3 + $0x158] sm:$0xff] %vm12257_vm2, %v12236_v51  ;;  %v25241_v60 = vadd.f32 %v24211_v9, %v33583_v31  ;;  %v11613_v35 = vpop.f32.mrb[91].mxu0  ;;  %v12154_v57 = vmax.f32 %v12026_v10, 0.0 }
 0x6d1   :  { %12300 = vst.msk [vmem:[#allocation3 + $0x150] sm:$0xff] %vm12257_vm2, %v12235_v46  ;;  %v25242_v56 = vadd.f32 %v11613_v35, %v33584_v62  ;;  %v12153_v48 = vmax.f32 %v12025_v26, 0.0 }
 0x6d2   :  { %v12643_v36 = vld [vmem:[#allocation2 + $0x150] sm:$0xff]  ;;  %v12028_v21 = vadd.f32 %v31818_v12, %v25241_v60 }
 0x6d3   :  { %v24214_v44 = vpop.f32.mrb[92].mxu0  ;;  %24305 = vmatmul.mubr.msk.f32.gmra.mrb[148].mxu1 %vm12257_vm2, %v12643_v36  ;;  %v12027_v5 = vadd.f32 %v31818_v12, %v25242_v56  ;;  %v33593_v60 = vld [vmem:[#allocation55_spill] sm:$0xff]  ;;  %v33594_v56 = vld [vmem:[#allocation56_spill] sm:$0xff] }
 0x6d4   :  { %v12362_v17 = vld [vmem:[#allocation3 + $0x140] ss:$2 sm:$0xff]  ;;  %v12426_v25 = vld [vmem:[#allocation3 + $0x141] ss:$2 sm:$0xff]  ;;  %v25243_v1 = vadd.f32 %v24214_v44, %v33585_v37  ;;  %v11623_v34 = vpop.f32.mrb[93].mxu0  ;;  %v12156_v14 = vmax.f32 %v12028_v21, 0.0 }
 0x6d5   :  { %v25244_v43 = vadd.f32 %v11623_v34, %v33586_v0  ;;  %v12469_v42 = vmax.f32 %v12362_v17, %v12426_v25  ;;  %v12155_v29 = vmax.f32 %v12027_v5, 0.0 }
 0x6d6   :  { %v12030_v18 = vadd.f32 %v31818_v12, %v25243_v1 }
 0x6d7   :  { %v12029_v28 = vadd.f32 %v31818_v12, %v25244_v43  ;;  %v24217_v2 = vpop.f32.mrb[94].mxu0  ;;  %12574 = vst.msk [vmem:[#allocation2 + $0x168] sm:$0xff] %vm12257_vm2, %v12469_v42  ;;  %v33595_v42 = vld [vmem:[#allocation57_spill] sm:$0xff] }
 0x6d8   :  { %v12364_v3 = vld [vmem:[#allocation3 + $0x150] ss:$2 sm:$0xff]  ;;  %v12428_v50 = vld [vmem:[#allocation3 + $0x151] ss:$2 sm:$0xff]  ;;  %v12158_v58 = vmax.f32 %v12030_v18, 0.0  ;;  %v25245_v59 = vadd.f32 %v24217_v2, %v33587_v15  ;;  %v11633_v4 = vpop.f32.mrb[95].mxu0 }
 0x6d9   :  { %v12157_v39 = vmax.f32 %v12029_v28, 0.0  ;;  %v25246_v7 = vadd.f32 %v11633_v4, %v33588_v63  ;;  %v12470_v41 = vmax.f32 %v12364_v3, %v12428_v50  ;;  %v33596_v2 = vld [vmem:[#allocation58_spill] sm:$0xff]  ;;  %v33597_v63 = vld [vmem:[#allocation59_spill] sm:$0xff] }
 0x6da   :  { %v12238_v8 = vmax.f32 %v12154_v57, %v12158_v58  ;;  %v12032_v13 = vadd.f32 %v31818_v12, %v25245_v59 }
 0x6db   :  { %v12237_v55 = vmax.f32 %v12153_v48, %v12157_v39  ;;  %v12031_v16 = vadd.f32 %v31818_v12, %v25246_v7  ;;  %v24220_v47 = vpop.f32.mrb[96].mxu0  ;;  %12575 = vst.msk [vmem:[#allocation2 + $0x170] sm:$0xff] %vm12257_vm2, %v12470_v41 }
 0x6dc   :  { %12303 = vst.msk [vmem:[#allocation3 + $0x168] sm:$0xff] %vm12257_vm2, %v12238_v8  ;;  %v12160_v53 = vmax.f32 %v12032_v13, 0.0  ;;  %v25247_v30 = vadd.f32 %v24220_v47, %v33589_v22  ;;  %v11643_v23 = vpop.f32.mrb[97].mxu0 }
 0x6dd   :  { %12302 = vst.msk [vmem:[#allocation3 + $0x160] sm:$0xff] %vm12257_vm2, %v12237_v55  ;;  %v12159_v54 = vmax.f32 %v12031_v16, 0.0  ;;  %v25248_v19 = vadd.f32 %v11643_v23, %v33590_v32  ;;  %v33598_v55 = vld [vmem:[#allocation60_spill] sm:$0xff] }
 0x6de   :  { %v12240_v6 = vmax.f32 %v12156_v14, %v12160_v53  ;;  %v31883_v24 = vld [vmem:[#allocation2 + $0x168] sm:$0xff]  ;;  %v12034_v51 = vadd.f32 %v31818_v12, %v25247_v30  ;;  %v33599_v30 = vld [vmem:[#allocation61_spill] sm:$0xff] }
 0x6df   :  { %v12239_v33 = vmax.f32 %v12155_v29, %v12159_v54  ;;  %v24223_v52 = vpop.f32.mrb[98].mxu0  ;;  %24307 = vmatprep.mubr.msk.f32.mxu1 %vm12257_vm2, %v31883_v24  ;;  %v12033_v20 = vadd.f32 %v31818_v12, %v25248_v19  ;;  %v33600_v54 = vld [vmem:[#allocation62_spill] sm:$0xff] }
 0x6e0   :  { %12305 = vst.msk [vmem:[#allocation3 + $0x178] sm:$0xff] %vm12257_vm2, %v12240_v6  ;;  %v25249_v40 = vadd.f32 %v24223_v52, %v33591_v38  ;;  %v11653_v61 = vpop.f32.mrb[99].mxu0  ;;  %v12162_v44 = vmax.f32 %v12034_v51, 0.0  ;;  %v33602_v51 = vld [vmem:[#allocation64_spill] sm:$0xff] }
 0x6e1   :  { %12304 = vst.msk [vmem:[#allocation3 + $0x170] sm:$0xff] %vm12257_vm2, %v12239_v33  ;;  %v25250_v27 = vadd.f32 %v11653_v61, %v33592_v49  ;;  %v12161_v17 = vmax.f32 %v12033_v20, 0.0  ;;  %v33601_v61 = vld [vmem:[#allocation63_spill] sm:$0xff] }
 0x6e2   :  { %v31891_v45 = vld [vmem:[#allocation2 + $0x170] sm:$0xff]  ;;  %v12036_v0 = vadd.f32 %v31818_v12, %v25249_v40 }
 0x6e3   :  { %v24226_v46 = vpop.f32.mrb[100].mxu0  ;;  %24308 = vmatmul.mubr.msk.f32.gmra.mrb[150].mxu1 %vm12257_vm2, %v31891_v45  ;;  %v12035_v48 = vadd.f32 %v31818_v12, %v25250_v27 }
 0x6e4   :  { %v12366_v9 = vld [vmem:[#allocation3 + $0x160] ss:$2 sm:$0xff]  ;;  %v12430_v31 = vld [vmem:[#allocation3 + $0x161] ss:$2 sm:$0xff]  ;;  %v25251_v35 = vadd.f32 %v24226_v46, %v33593_v60  ;;  %v11663_v62 = vpop.f32.mrb[101].mxu0  ;;  %v12164_v5 = vmax.f32 %v12036_v0, 0.0 }
 0x6e5   :  { %v25252_v36 = vadd.f32 %v11663_v62, %v33594_v56  ;;  %v12471_v10 = vmax.f32 %v12366_v9, %v12430_v31  ;;  %v12163_v8 = vmax.f32 %v12035_v48, 0.0 }
 0x6e6   :  { %v12038_v26 = vadd.f32 %v31818_v12, %v25251_v35 }
 0x6e7   :  { %v12037_v25 = vadd.f32 %v31818_v12, %v25252_v36  ;;  %v24229_v37 = vpop.f32.mrb[102].mxu0  ;;  %12576 = vst.msk [vmem:[#allocation2 + $0x188] sm:$0xff] %vm12257_vm2, %v12471_v10 }
 0x6e8   :  { %v12368_v1 = vld [vmem:[#allocation3 + $0x170] ss:$2 sm:$0xff]  ;;  %v12432_v34 = vld [vmem:[#allocation3 + $0x171] ss:$2 sm:$0xff]  ;;  %v12166_v43 = vmax.f32 %v12038_v26, 0.0  ;;  %v25253_v18 = vadd.f32 %v24229_v37, %v33595_v42  ;;  %v11673_v57 = vpop.f32.mrb[103].mxu0 }
 0x6e9   :  { %v12165_v28 = vmax.f32 %v12037_v25, 0.0  ;;  %v25254_v3 = vadd.f32 %v11673_v57, %v33596_v2  ;;  %v12472_v50 = vmax.f32 %v12368_v1, %v12432_v34  ;;  %v33604_v34 = vld [vmem:[#allocation66_spill] sm:$0xff] }
 0x6ea   :  { %v12242_v21 = vmax.f32 %v12162_v44, %v12166_v43  ;;  %v12040_v58 = vadd.f32 %v31818_v12, %v25253_v18  ;;  %v33603_v44 = vld [vmem:[#allocation65_spill] sm:$0xff] }
 0x6eb   :  { %v12241_v15 = vmax.f32 %v12161_v17, %v12165_v28  ;;  %v12039_v59 = vadd.f32 %v31818_v12, %v25254_v3  ;;  %v24232_v4 = vpop.f32.mrb[104].mxu0  ;;  %12577 = vst.msk [vmem:[#allocation2 + $0x190] sm:$0xff] %vm12257_vm2, %v12472_v50  ;;  %v33605_v50 = vld [vmem:[#allocation67_spill] sm:$0xff] }
 0x6ec   :  { %12307 = vst.msk [vmem:[#allocation3 + $0x188] sm:$0xff] %vm12257_vm2, %v12242_v21  ;;  %v12168_v39 = vmax.f32 %v12040_v58, 0.0  ;;  %v25255_v7 = vadd.f32 %v24232_v4, %v33597_v63  ;;  %v11683_v41 = vpop.f32.mrb[105].mxu0  ;;  %v33606_v4 = vld [vmem:[#allocation68_spill] sm:$0xff] }
 0x6ed   :  { %12306 = vst.msk [vmem:[#allocation3 + $0x180] sm:$0xff] %vm12257_vm2, %v12241_v15  ;;  %v12167_v13 = vmax.f32 %v12039_v59, 0.0  ;;  %v25256_v16 = vadd.f32 %v11683_v41, %v33598_v55 }
 0x6ee   :  { %v12244_v47 = vmax.f32 %v12164_v5, %v12168_v39  ;;  %v31913_v14 = vld [vmem:[#allocation2 + $0x188] sm:$0xff]  ;;  %v12042_v6 = vadd.f32 %v31818_v12, %v25255_v7 }
 0x6ef   :  { %v12243_v53 = vmax.f32 %v12163_v8, %v12167_v13  ;;  %v24235_v22 = vpop.f32.mrb[106].mxu0  ;;  %24310 = vmatprep.mubr.msk.f32.mxu1 %vm12257_vm2, %v31913_v14  ;;  %v12041_v33 = vadd.f32 %v31818_v12, %v25256_v16  ;;  %v33607_v8 = vld [vmem:[#allocation69_spill] sm:$0xff]  ;;  %v33608_v16 = vld [vmem:[#allocation70_spill] sm:$0xff] }
 0x6f0   :  { %12309 = vst.msk [vmem:[#allocation3 + $0x198] sm:$0xff] %vm12257_vm2, %v12244_v47  ;;  %v25257_v23 = vadd.f32 %v24235_v22, %v33599_v30  ;;  %v11693_v29 = vpop.f32.mrb[107].mxu0  ;;  %v12170_v31 = vmax.f32 %v12042_v6, 0.0 }
 0x6f1   :  { %12308 = vst.msk [vmem:[#allocation3 + $0x190] sm:$0xff] %vm12257_vm2, %v12243_v53  ;;  %v25258_v32 = vadd.f32 %v11693_v29, %v33600_v54  ;;  %v12169_v60 = vmax.f32 %v12041_v33, 0.0 }
 0x6f2   :  { %v31921_v19 = vld [vmem:[#allocation2 + $0x190] sm:$0xff]  ;;  %v12044_v10 = vadd.f32 %v31818_v12, %v25257_v23 }
 0x6f3   :  { %v24238_v52 = vpop.f32.mrb[108].mxu0  ;;  %24311 = vmatmul.mubr.msk.f32.gmra.mrb[152].mxu1 %vm12257_vm2, %v31921_v19  ;;  %v12043_v37 = vadd.f32 %v31818_v12, %v25258_v32  ;;  %v33609_v32 = vld [vmem:[#allocation71_spill] sm:$0xff] }
 0x6f4   :  { %v12370_v38 = vld [vmem:[#allocation3 + $0x180] ss:$2 sm:$0xff]  ;;  %v12434_v40 = vld [vmem:[#allocation3 + $0x181] ss:$2 sm:$0xff]  ;;  %v25259_v49 = vadd.f32 %v24238_v52, %v33601_v61  ;;  %v11703_v27 = vpop.f32.mrb[109].mxu0  ;;  %v12172_v2 = vmax.f32 %v12044_v10, 0.0 }
 0x6f5   :  { %v25260_v20 = vadd.f32 %v11703_v27, %v33602_v51  ;;  %v12473_v46 = vmax.f32 %v12370_v38, %v12434_v40  ;;  %v12171_v15 = vmax.f32 %v12043_v37, 0.0  ;;  %v33610_v52 = vld [vmem:[#allocation72_spill] sm:$0xff] }
 0x6f6   :  { %v12046_v9 = vadd.f32 %v31818_v12, %v25259_v49 }
 0x6f7   :  { %v12045_v35 = vadd.f32 %v31818_v12, %v25260_v20  ;;  %v24241_v62 = vpop.f32.mrb[110].mxu0  ;;  %12578 = vst.msk [vmem:[#allocation2 + $0x1a8] sm:$0xff] %vm12257_vm2, %v12473_v46 }
 0x6f8   :  { %v12372_v56 = vld [vmem:[#allocation3 + $0x190] ss:$2 sm:$0xff]  ;;  %v12436_v36 = vld [vmem:[#allocation3 + $0x191] ss:$2 sm:$0xff]  ;;  %v12174_v26 = vmax.f32 %v12046_v9, 0.0  ;;  %v25261_v17 = vadd.f32 %v24241_v62, %v33603_v44  ;;  %v11713_v25 = vpop.f32.mrb[111].mxu0 }
 0x6f9   :  { %v12173_v1 = vmax.f32 %v12045_v35, 0.0  ;;  %v25262_v0 = vadd.f32 %v11713_v25, %v33604_v34  ;;  %v12474_v43 = vmax.f32 %v12372_v56, %v12436_v36  ;;  %v33611_v35 = vld [vmem:[#allocation73_spill] sm:$0xff] }
 0x6fa   :  { %v12246_v42 = vmax.f32 %v12170_v31, %v12174_v26  ;;  %v12048_v18 = vadd.f32 %v31818_v12, %v25261_v17  ;;  %v33612_v26 = vld [vmem:[#allocation74_spill] sm:$0xff] }
 0x6fb   :  { %v12245_v57 = vmax.f32 %v12169_v60, %v12173_v1  ;;  %v12047_v48 = vadd.f32 %v31818_v12, %v25262_v0  ;;  %v24244_v28 = vpop.f32.mrb[112].mxu0  ;;  %12579 = vst.msk [vmem:[#allocation2 + $0x1b0] sm:$0xff] %vm12257_vm2, %v12474_v43 }
 0x6fc   :  { %12311 = vst.msk [vmem:[#allocation3 + $0x1a8] sm:$0xff] %vm12257_vm2, %v12246_v42  ;;  %v12176_v3 = vmax.f32 %v12048_v18, 0.0  ;;  %v25263_v21 = vadd.f32 %v24244_v28, %v33605_v50  ;;  %v11723_v58 = vpop.f32.mrb[113].mxu0  ;;  %v33613_v18 = vld [vmem:[#allocation75_spill] sm:$0xff] }
 0x6fd   :  { %12310 = vst.msk [vmem:[#allocation3 + $0x1a0] sm:$0xff] %vm12257_vm2, %v12245_v57  ;;  %v12175_v59 = vmax.f32 %v12047_v48, 0.0  ;;  %v25264_v5 = vadd.f32 %v11723_v58, %v33606_v4  ;;  %v33615_v4 = vld [vmem:[#allocation77_spill] sm:$0xff] }
 0x6fe   :  { %v12248_v39 = vmax.f32 %v12172_v2, %v12176_v3  ;;  %v31943_v63 = vld [vmem:[#allocation2 + $0x1a8] sm:$0xff]  ;;  %v12050_v22 = vadd.f32 %v31818_v12, %v25263_v21  ;;  %v33614_v3 = vld [vmem:[#allocation76_spill] sm:$0xff] }
 0x6ff   :  { %v12247_v7 = vmax.f32 %v12171_v15, %v12175_v59  ;;  %v24247_v41 = vpop.f32.mrb[114].mxu0  ;;  %24313 = vmatprep.mubr.msk.f32.mxu1 %vm12257_vm2, %v31943_v63  ;;  %v12049_v30 = vadd.f32 %v31818_v12, %v25264_v5 }
 0x700   :  { %12313 = vst.msk [vmem:[#allocation3 + $0x1b8] sm:$0xff] %vm12257_vm2, %v12248_v39  ;;  %v25265_v13 = vadd.f32 %v24247_v41, %v33607_v8  ;;  %v11733_v55 = vpop.f32.mrb[115].mxu0  ;;  %v12178_v49 = vmax.f32 %v12050_v22, 0.0 }
 0x701   :  { %12312 = vst.msk [vmem:[#allocation3 + $0x1b0] sm:$0xff] %vm12257_vm2, %v12247_v7  ;;  %v25266_v47 = vadd.f32 %v11733_v55, %v33608_v16  ;;  %v12177_v27 = vmax.f32 %v12049_v30, 0.0  ;;  %v33616_v7 = vld [vmem:[#allocation78_spill] sm:$0xff]  ;;  %v33617_v30 = vld [vmem:[#allocation79_spill] sm:$0xff] }
 0x702   :  { %v31951_v53 = vld [vmem:[#allocation2 + $0x1b0] sm:$0xff]  ;;  %v12052_v31 = vadd.f32 %v31818_v12, %v25265_v13 }
 0x703   :  { %v24250_v23 = vpop.f32.mrb[116].mxu0  ;;  %24314 = vmatmul.mubr.msk.f32.gmra.mrb[154].mxu1 %vm12257_vm2, %v31951_v53  ;;  %v12051_v36 = vadd.f32 %v31818_v12, %v25266_v47 }
 0x704   :  { %v12374_v29 = vld [vmem:[#allocation3 + $0x1a0] ss:$2 sm:$0xff]  ;;  %v12438_v54 = vld [vmem:[#allocation3 + $0x1a1] ss:$2 sm:$0xff]  ;;  %v25267_v6 = vadd.f32 %v24250_v23, %v33609_v32  ;;  %v11743_v33 = vpop.f32.mrb[117].mxu0  ;;  %v12180_v43 = vmax.f32 %v12052_v31, 0.0 }
 0x705   :  { %v25268_v38 = vadd.f32 %v11743_v33, %v33610_v52  ;;  %v12475_v40 = vmax.f32 %v12374_v29, %v12438_v54  ;;  %v12179_v28 = vmax.f32 %v12051_v36, 0.0  ;;  %v33618_v54 = vld [vmem:[#allocation80_spill] sm:$0xff] }
 0x706   :  { %v12054_v61 = vadd.f32 %v31818_v12, %v25267_v6 }
 0x707   :  { %v12053_v51 = vadd.f32 %v31818_v12, %v25268_v38  ;;  %v24253_v20 = vpop.f32.mrb[118].mxu0  ;;  %12580 = vst.msk [vmem:[#allocation2 + $0x1c8] sm:$0xff] %vm12257_vm2, %v12475_v40 }
 0x708   :  { %v12376_v46 = vld [vmem:[#allocation3 + $0x1b0] ss:$2 sm:$0xff]  ;;  %v12440_v9 = vld [vmem:[#allocation3 + $0x1b1] ss:$2 sm:$0xff]  ;;  %v12182_v60 = vmax.f32 %v12054_v61, 0.0  ;;  %v25269_v62 = vadd.f32 %v24253_v20, %v33611_v35  ;;  %v11753_v56 = vpop.f32.mrb[119].mxu0 }
 0x709   :  { %v12181_v10 = vmax.f32 %v12053_v51, 0.0  ;;  %v25270_v44 = vadd.f32 %v11753_v56, %v33612_v26  ;;  %v12476_v17 = vmax.f32 %v12376_v46, %v12440_v9  ;;  %v33619_v46 = vld [vmem:[#allocation81_spill] sm:$0xff] }
 0x70a   :  { %v12250_v25 = vmax.f32 %v12178_v49, %v12182_v60  ;;  %v12056_v37 = vadd.f32 %v31818_v12, %v25269_v62  ;;  %v33620_v62 = vld [vmem:[#allocation82_spill] sm:$0xff] }
 0x70b   :  { %v12249_v1 = vmax.f32 %v12177_v27, %v12181_v10  ;;  %v12055_v34 = vadd.f32 %v31818_v12, %v25270_v44  ;;  %v24256_v0 = vpop.f32.mrb[120].mxu0  ;;  %12581 = vst.msk [vmem:[#allocation2 + $0x1d0] sm:$0xff] %vm12257_vm2, %v12476_v17 }
 0x70c   :  { %12315 = vst.msk [vmem:[#allocation3 + $0x1c8] sm:$0xff] %vm12257_vm2, %v12250_v25  ;;  %v12184_v42 = vmax.f32 %v12056_v37, 0.0  ;;  %v25271_v57 = vadd.f32 %v24256_v0, %v33613_v18  ;;  %v11763_v48 = vpop.f32.mrb[121].mxu0 }
 0x70d   :  { %12314 = vst.msk [vmem:[#allocation3 + $0x1c0] sm:$0xff] %vm12257_vm2, %v12249_v1  ;;  %v12183_v2 = vmax.f32 %v12055_v34, 0.0  ;;  %v25272_v50 = vadd.f32 %v11763_v48, %v33614_v3  ;;  %v20343_v48 = vld [vmem:[%s33246_s3 + $0x58] sm:$0xff]  ;;  %v12587_v3 = vld [vmem:[#allocation2 + $0xf] sm:$0xff] }
 0x70e   :  { %v12252_v21 = vmax.f32 %v12180_v43, %v12184_v42  ;;  %v31973_v58 = vld [vmem:[#allocation2 + $0x1c8] sm:$0xff]  ;;  %v12058_v13 = vadd.f32 %v31818_v12, %v25271_v57  ;;  %v20342_v57 = vld [vmem:[%s33246_s3 + $0x50] sm:$0xff] }
 0x70f   :  { %v12251_v15 = vmax.f32 %v12179_v28, %v12183_v2  ;;  %v24259_v59 = vpop.f32.mrb[122].mxu0  ;;  %24316 = vmatprep.mubr.msk.f32.mxu1 %vm12257_vm2, %v31973_v58  ;;  %v12057_v55 = vadd.f32 %v31818_v12, %v25272_v50  ;;  %v25065_v50 = vpack.c.bf16 %v20343_v48, %v20342_v57  ;;  %v32181_v57 = vld [vmem:[#allocation2 + $0x51] sm:$0xff]  ;;  %v32185_v48 = vld [vmem:[#allocation2 + $0x69] sm:$0xff] }
 0x710   :  { %12317 = vst.msk [vmem:[#allocation3 + $0x1d8] sm:$0xff] %vm12257_vm2, %v12252_v21  ;;  %v25273_v5 = vadd.f32 %v24259_v59, %v33615_v4  ;;  %v11773_v39 = vpop.f32.mrb[123].mxu0  ;;  %v12186_v52 = vmax.f32 %v12058_v13, 0.0  ;;  %v20377_v59 = vld [vmem:[%s33246_s3 + $0x68] sm:$0xff] }
 0x711   :  { %12316 = vst.msk [vmem:[#allocation3 + $0x1d0] sm:$0xff] %vm12257_vm2, %v12251_v15  ;;  %v25274_v41 = vadd.f32 %v11773_v39, %v33616_v7  ;;  %v12185_v38 = vmax.f32 %v12057_v55, 0.0  ;;  %v20376_v15 = vld [vmem:[%s33246_s3 + $0x60] sm:$0xff]  ;;  %v32033_v13 = vld [vmem:[#allocation2 + $0x2f] sm:$0xff] }
 0x712   :  { %v31981_v8 = vld [vmem:[#allocation2 + $0x1d0] sm:$0xff]  ;;  %v12060_v51 = vadd.f32 %v31818_v12, %v25273_v5  ;;  %v32025_v4 = vld [vmem:[#allocation2 + $0x27] sm:$0xff]  ;;  %v32031_v7 = vpack.c.bf16 %v20377_v59, %v20376_v15 }
 0x713   :  { %v24262_v16 = vpop.f32.mrb[124].mxu0  ;;  %24317 = vmatmul.mubr.msk.f32.gmra.mrb[156].mxu1 %vm12257_vm2, %v31981_v8  ;;  %v12059_v60 = vadd.f32 %v31818_v12, %v25274_v41  ;;  %v32037_v55 = vld [vmem:[#allocation2 + $0x47] sm:$0xff]  ;;  %v32213_v59 = vld [vmem:[#allocation2 + $0xd1] sm:$0xff] }
 0x714   :  { %v12378_v47 = vld [vmem:[#allocation3 + $0x1c0] ss:$2 sm:$0xff]  ;;  %v12442_v22 = vld [vmem:[#allocation3 + $0x1c1] ss:$2 sm:$0xff]  ;;  %v25275_v23 = vadd.f32 %v24262_v16, %v33617_v30  ;;  %v11783_v29 = vpop.f32.mrb[125].mxu0  ;;  %v12188_v25 = vmax.f32 %v12060_v51, 0.0 }
 0x715   :  { %v25276_v32 = vadd.f32 %v11783_v29, %v33618_v54  ;;  %v12477_v6 = vmax.f32 %v12378_v47, %v12442_v22  ;;  %v12187_v1 = vmax.f32 %v12059_v60, 0.0  ;;  %v32047_v16 = vld [vmem:[#allocation2 + $0x67] sm:$0xff]  ;;  %v32051_v47 = vld [vmem:[#allocation2 + $0x6f] sm:$0xff] }
 0x716   :  { %v12062_v33 = vadd.f32 %v31818_v12, %v25275_v23  ;;  %v32055_v22 = vld [vmem:[#allocation2 + $0x87] sm:$0xff]  ;;  %v32059_v30 = vld [vmem:[#allocation2 + $0x8f] sm:$0xff] }
 0x717   :  { %v12061_v40 = vadd.f32 %v31818_v12, %v25276_v32  ;;  %v24265_v61 = vpop.f32.mrb[126].mxu0  ;;  %12582 = vst.msk [vmem:[#allocation2 + $0x1e8] sm:$0xff] %vm12257_vm2, %v12477_v6  ;;  %v32063_v23 = vld [vmem:[#allocation2 + $0xa7] sm:$0xff]  ;;  %v32067_v29 = vld [vmem:[#allocation2 + $0xaf] sm:$0xff] }
 0x718   :  { %v12380_v49 = vld [vmem:[#allocation3 + $0x1d0] ss:$2 sm:$0xff]  ;;  %v12444_v27 = vld [vmem:[#allocation3 + $0x1d1] ss:$2 sm:$0xff]  ;;  %v12190_v20 = vmax.f32 %v12062_v33, 0.0  ;;  %v25277_v9 = vadd.f32 %v24265_v61, %v33619_v46  ;;  %v11793_v31 = vpop.f32.mrb[127].mxu0 }
 0x719   :  { %v12189_v35 = vmax.f32 %v12061_v40, 0.0  ;;  %v25278_v56 = vadd.f32 %v11793_v31, %v33620_v62  ;;  %v12478_v36 = vmax.f32 %v12380_v49, %v12444_v27  ;;  %v32071_v54 = vld [vmem:[#allocation2 + $0xc7] sm:$0xff]  ;;  %v32075_v32 = vld [vmem:[#allocation2 + $0xcf] sm:$0xff] }
 0x71a   :  { %v12254_v10 = vmax.f32 %v12186_v52, %v12190_v20  ;;  %v12064_v26 = vadd.f32 %v31818_v12, %v25277_v9  ;;  %v32079_v6 = vld [vmem:[#allocation2 + $0xe7] sm:$0xff]  ;;  %v32083_v33 = vld [vmem:[#allocation2 + $0xef] sm:$0xff] }
 0x71b   :  { %v12253_v44 = vmax.f32 %v12185_v38, %v12189_v35  ;;  %v12063_v17 = vadd.f32 %v31818_v12, %v25278_v56  ;;  %12583 = vst.msk [vmem:[#allocation2 + $0x1f0] sm:$0xff] %vm12257_vm2, %v12478_v36  ;;  %v12586_v12 = vld [vmem:[#allocation2 + $0x7] sm:$0xff]  ;;  %v32091_v38 = vld [vmem:[#allocation2 + $0x10f] sm:$0xff] }
 0x71c   :  { %12319 = vst.msk [vmem:[#allocation3 + $0x1e8] sm:$0xff] %vm12257_vm2, %v12254_v10  ;;  %v12192_v37 = vmax.f32 %v12064_v26, 0.0  ;;  %v32087_v52 = vld [vmem:[#allocation2 + $0x107] sm:$0xff]  ;;  %v32099_v61 = vld [vmem:[#allocation2 + $0x12f] sm:$0xff] }
 0x71d   :  { %12318 = vst.msk [vmem:[#allocation3 + $0x1e0] sm:$0xff] %vm12257_vm2, %v12253_v44  ;;  %v12191_v34 = vmax.f32 %v12063_v17, 0.0  ;;  %v32095_v40 = vld [vmem:[#allocation2 + $0x127] sm:$0xff]  ;;  %v32107_v27 = vld [vmem:[#allocation2 + $0x14f] sm:$0xff]  ;;  %v20379_v44 = vld [vmem:[%s33246_s3 + $0x78] sm:$0xff] }
 0x71e   :  { %v12256_v0 = vmax.f32 %v12188_v25, %v12192_v37  ;;  %v32001_v43 = vld [vmem:[#allocation2 + $0x1e8] sm:$0xff]  ;;  %v20378_v26 = vld [vmem:[%s33246_s3 + $0x70] sm:$0xff]  ;;  %v20412_v37 = vld [vmem:[%s33246_s3 + $0x80] sm:$0xff] }
 0x71f   :  { %v12255_v42 = vmax.f32 %v12187_v1, %v12191_v34  ;;  %24319 = vmatprep.mubr.msk.f32.mxu1 %vm12257_vm2, %v32001_v43  ;;  %v32103_v49 = vld [vmem:[#allocation2 + $0x147] sm:$0xff]  ;;  %v32115_v20 = vld [vmem:[#allocation2 + $0x16f] sm:$0xff]  ;;  %v25073_v25 = vpack.c.bf16 %v20379_v44, %v20378_v26 }
 0x720   :  { %12321 = vst.msk [vmem:[#allocation3 + $0x1f8] sm:$0xff] %vm12257_vm2, %v12256_v0  ;;  %v32111_v51 = vld [vmem:[#allocation2 + $0x167] sm:$0xff]  ;;  %v32123_v9 = vld [vmem:[#allocation2 + $0x18f] sm:$0xff] }
 0x721   :  { %12320 = vst.msk [vmem:[#allocation3 + $0x1f0] sm:$0xff] %vm12257_vm2, %v12255_v42  ;;  %v32119_v46 = vld [vmem:[#allocation2 + $0x187] sm:$0xff]  ;;  %v32131_v60 = vld [vmem:[#allocation2 + $0x1af] sm:$0xff] }
 0x722   :  { %v32007_v18 = vld [vmem:[#allocation2 + $0x1f0] sm:$0xff]  ;;  %v32127_v31 = vld [vmem:[#allocation2 + $0x1a7] sm:$0xff] }
 0x723   :  { %24320 = vmatmul.mubr.msk.f32.gmra.mrb[158].mxu1 %vm12257_vm2, %v32007_v18  ;;  %v32135_v35 = vld [vmem:[#allocation2 + $0x1c7] sm:$0xff]  ;;  %v32139_v62 = vld [vmem:[#allocation2 + $0x1cf] sm:$0xff] }
 0x724   :  { %v12382_v28 = vld [vmem:[#allocation3 + $0x1e0] ss:$2 sm:$0xff]  ;;  %v12446_v2 = vld [vmem:[#allocation3 + $0x1e1] ss:$2 sm:$0xff]  ;;  %24330 = vmatprep.mubr.msk.f32.mxu1 %vm12257_vm2, %v12586_v12  ;;  %v13302_v17 = vld [vmem:[#allocation2 + $0x11] sm:$0xff] }
 0x725   :  { %v12479_v21 = vmax.f32 %v12382_v28, %v12446_v2  ;;  %v32143_v56 = vld [vmem:[#allocation2 + $0x1e7] sm:$0xff]  ;;  %v32147_v10 = vld [vmem:[#allocation2 + $0x1ef] sm:$0xff] }
 0x726   :  { %v13301_v36 = vld [vmem:[#allocation2 + $0x9] sm:$0xff]  ;;  %33621 = vst [vmem:[#allocation5_spill] sm:$0xff] %v32147_v10  ;;  %v32172_v42 = vld [vmem:[#allocation2 + $0x31] sm:$0xff] }
 0x727   :  { %24331 = vmatmul.mubr.msk.f32.vlgmr.msra.gmra.mrb[128].mxu1 %vm12257_vm2, %v12587_v3  ;;  %12584 = vst.msk [vmem:[#allocation2 + $0x208] sm:$0xff] %vm12257_vm2, %v12479_v21  ;;  %v20413_v1 = vld [vmem:[%s33246_s3 + $0x88] sm:$0xff]  ;;  %v32189_v28 = vld [vmem:[#allocation2 + $0x71] sm:$0xff] }
 0x728   :  { %v12384_v5 = vld [vmem:[#allocation3 + $0x1f0] ss:$2 sm:$0xff]  ;;  %v12448_v39 = vld [vmem:[#allocation3 + $0x1f1] ss:$2 sm:$0xff]  ;;  %24333 = vmatprep.mubr.msk.f32.mxu1 %vm12257_vm2, %v32025_v4  ;;  %25064 = vmatpush3.bf16.msra.mxu1 %v31812_v11  ;;  %v32170_v0 = vpack.c.bf16 %v20413_v1, %v20412_v37 }
 0x729   :  { %25066 = vmatprep.subr.bf16.mxu1 %v25065_v50  ;;  %v12480_v41 = vmax.f32 %v12384_v5, %v12448_v39  ;;  %v32043_v11 = vld [vmem:[#allocation2 + $0x4f] sm:$0xff] }
 0x72a   :  { %v32165_v34 = vld [vmem:[#allocation2 + $0x29] sm:$0xff]  ;;  %v32197_v3 = vld [vmem:[#allocation2 + $0x91] sm:$0xff] }
 0x72b   :  { %24334 = vmatmul.mubr.msk.f32.gmra.mrb[130].mxu1 %vm12257_vm2, %v32033_v13  ;;  %12585 = vst.msk [vmem:[#allocation2 + $0x210] sm:$0xff] %vm12257_vm2, %v12480_v41  ;;  %v32176_v12 = vld [vmem:[#allocation2 + $0x49] sm:$0xff]  ;;  %v32205_v21 = vld [vmem:[#allocation2 + $0xb1] sm:$0xff] }
 0x72c   :  { %24336 = vmatprep.mubr.msk.f32.mxu1 %vm12257_vm2, %v32037_v55  ;;  %25068 = vmatpush3.bf16.msra.mxu1 %v25065_v50  ;;  %v32193_v2 = vld [vmem:[#allocation2 + $0x89] sm:$0xff]  ;;  %v32221_v39 = vld [vmem:[#allocation2 + $0xf1] sm:$0xff] }
 0x72d   :  { %25070 = vmatprep.subr.bf16.mxu1 %v32031_v7  ;;  %v32201_v50 = vld [vmem:[#allocation2 + $0xa9] sm:$0xff]  ;;  %v32229_v41 = vld [vmem:[#allocation2 + $0x111] sm:$0xff] }
 0x72e   :  { %v32209_v15 = vld [vmem:[#allocation2 + $0xc9] sm:$0xff]  ;;  %v32237_v26 = vld [vmem:[#allocation2 + $0x131] sm:$0xff] }
 0x72f   :  { %24337 = vmatmul.mubr.msk.f32.gmra.mrb[132].mxu1 %vm12257_vm2, %v32043_v11  ;;  %v32217_v5 = vld [vmem:[#allocation2 + $0xe9] sm:$0xff]  ;;  %33622 = vst [vmem:[#allocation6_spill] sm:$0xff] %v32237_v26  ;;  %v32253_v37 = vld [vmem:[#allocation2 + $0x171] sm:$0xff] }
 0x730   :  { %24339 = vmatprep.mubr.msk.f32.mxu1 %vm12257_vm2, %v32047_v16  ;;  %v32241_v44 = vld [vmem:[#allocation2 + $0x149] sm:$0xff]  ;;  %33626 = vst [vmem:[#allocation10_spill] sm:$0xff] %v32253_v37 }
 0x731   :  { %33623 = vst [vmem:[#allocation7_spill] sm:$0xff] %v32241_v44  ;;  %v32257_v1 = vld [vmem:[#allocation2 + $0x189] sm:$0xff] }
 0x732   :  { %33627 = vst [vmem:[#allocation11_spill] sm:$0xff] %v32257_v1 }
 0x733   :  { %24340 = vmatmul.mubr.msk.f32.gmra.mrb[134].mxu1 %vm12257_vm2, %v32051_v47 }
 0x734   :  { %24342 = vmatprep.mubr.msk.f32.mxu1 %vm12257_vm2, %v32055_v22 }
 0x737   :  { %24343 = vmatmul.mubr.msk.f32.gmra.mrb[136].mxu1 %vm12257_vm2, %v32059_v30 }
 0x738   :  { %24345 = vmatprep.mubr.msk.f32.mxu1 %vm12257_vm2, %v32063_v23 }
 0x73b   :  { %24346 = vmatmul.mubr.msk.f32.gmra.mrb[138].mxu1 %vm12257_vm2, %v32067_v29 }
 0x73c   :  { %24348 = vmatprep.mubr.msk.f32.mxu1 %vm12257_vm2, %v32071_v54 }
 0x73f   :  { %24349 = vmatmul.mubr.msk.f32.gmra.mrb[140].mxu1 %vm12257_vm2, %v32075_v32 }
 0x740   :  { %24351 = vmatprep.mubr.msk.f32.mxu1 %vm12257_vm2, %v32079_v6 }
 0x743   :  { %24352 = vmatmul.mubr.msk.f32.gmra.mrb[142].mxu1 %vm12257_vm2, %v32083_v33 }
 0x744   :  { %24354 = vmatprep.mubr.msk.f32.mxu1 %vm12257_vm2, %v32087_v52 }
 0x747   :  { %24355 = vmatmul.mubr.msk.f32.gmra.mrb[144].mxu1 %vm12257_vm2, %v32091_v38 }
 0x748   :  { %24357 = vmatprep.mubr.msk.f32.mxu1 %vm12257_vm2, %v32095_v40 }
 0x74b   :  { %24358 = vmatmul.mubr.msk.f32.gmra.mrb[146].mxu1 %vm12257_vm2, %v32099_v61 }
 0x74c   :  { %24360 = vmatprep.mubr.msk.f32.mxu1 %vm12257_vm2, %v32103_v49 }
 0x74f   :  { %24361 = vmatmul.mubr.msk.f32.gmra.mrb[148].mxu1 %vm12257_vm2, %v32107_v27 }
 0x750   :  { %24363 = vmatprep.mubr.msk.f32.mxu1 %vm12257_vm2, %v32111_v51 }
 0x753   :  { %24364 = vmatmul.mubr.msk.f32.gmra.mrb[150].mxu1 %vm12257_vm2, %v32115_v20 }
 0x754   :  { %24366 = vmatprep.mubr.msk.f32.mxu1 %vm12257_vm2, %v32119_v46 }
 0x757   :  { %24367 = vmatmul.mubr.msk.f32.gmra.mrb[152].mxu1 %vm12257_vm2, %v32123_v9 }
 0x758   :  { %24369 = vmatprep.mubr.msk.f32.mxu1 %vm12257_vm2, %v32127_v31 }
 0x75b   :  { %24370 = vmatmul.mubr.msk.f32.gmra.mrb[154].mxu1 %vm12257_vm2, %v32131_v60 }
 0x75c   :  { %24372 = vmatprep.mubr.msk.f32.mxu1 %vm12257_vm2, %v32135_v35 }
 0x75f   :  { %24373 = vmatmul.mubr.msk.f32.gmra.mrb[156].mxu1 %vm12257_vm2, %v32139_v62 }
 0x760   :  { %24375 = vmatprep.mubr.msk.f32.mxu1 %vm12257_vm2, %v32143_v56 }
 0x763   :  { %24376 = vmatmul.mubr.msk.f32.gmra.mrb[158].mxu1 %vm12257_vm2, %v32147_v10 }
 0x764   :  { %24386 = vmatprep.mubr.msk.f32.mxu1 %vm12257_vm2, %v13301_v36  ;;  %v32233_v36 = vld [vmem:[#allocation2 + $0x129] sm:$0xff] }
 0x767   :  { %24387 = vmatmul.mubr.msk.f32.vlgmr.msra.gmra.mrb[128].mxu1 %vm12257_vm2, %v13302_v17  ;;  %v32245_v17 = vld [vmem:[#allocation2 + $0x151] sm:$0xff] }
 0x768   :  { %24389 = vmatprep.mubr.msk.f32.mxu1 %vm12257_vm2, %v32165_v34  ;;  %25072 = vmatpush3.bf16.msra.mxu1 %v32031_v7  ;;  %v32225_v7 = vld [vmem:[#allocation2 + $0x109] sm:$0xff]  ;;  %33624 = vst [vmem:[#allocation8_spill] sm:$0xff] %v32245_v17 }
 0x769   :  { %25074 = vmatprep.subr.bf16.mxu1 %v25073_v25 }
 0x76b   :  { %24390 = vmatmul.mubr.msk.f32.gmra.mrb[130].mxu1 %vm12257_vm2, %v32172_v42 }
 0x76c   :  { %24392 = vmatprep.mubr.msk.f32.mxu1 %vm12257_vm2, %v32176_v12  ;;  %25076 = vmatpush3.bf16.msra.mxu1 %v25073_v25  ;;  %v32249_v25 = vld [vmem:[#allocation2 + $0x169] sm:$0xff] }
 0x76d   :  { %25078 = vmatprep.subr.bf16.mxu1 %v32170_v0  ;;  %33625 = vst [vmem:[#allocation9_spill] sm:$0xff] %v32249_v25 }
 0x76f   :  { %24393 = vmatmul.mubr.msk.f32.gmra.mrb[132].mxu1 %vm12257_vm2, %v32181_v57 }
 0x770   :  { %24395 = vmatprep.mubr.msk.f32.mxu1 %vm12257_vm2, %v32185_v48 }
 0x773   :  { %24396 = vmatmul.mubr.msk.f32.gmra.mrb[134].mxu1 %vm12257_vm2, %v32189_v28 }
 0x774   :  { %24398 = vmatprep.mubr.msk.f32.mxu1 %vm12257_vm2, %v32193_v2 }
 0x777   :  { %24399 = vmatmul.mubr.msk.f32.gmra.mrb[136].mxu1 %vm12257_vm2, %v32197_v3 }
 0x778   :  { %24401 = vmatprep.mubr.msk.f32.mxu1 %vm12257_vm2, %v32201_v50 }
 0x77b   :  { %24402 = vmatmul.mubr.msk.f32.gmra.mrb[138].mxu1 %vm12257_vm2, %v32205_v21 }
 0x77c   :  { %24404 = vmatprep.mubr.msk.f32.mxu1 %vm12257_vm2, %v32209_v15 }
 0x77f   :  { %24405 = vmatmul.mubr.msk.f32.gmra.mrb[140].mxu1 %vm12257_vm2, %v32213_v59 }
 0x780   :  { %24407 = vmatprep.mubr.msk.f32.mxu1 %vm12257_vm2, %v32217_v5 }
 0x783   :  { %24408 = vmatmul.mubr.msk.f32.gmra.mrb[142].mxu1 %vm12257_vm2, %v32221_v39 }
 0x784   :  { %24410 = vmatprep.mubr.msk.f32.mxu1 %vm12257_vm2, %v32225_v7 }
 0x787   :  { %24411 = vmatmul.mubr.msk.f32.gmra.mrb[144].mxu1 %vm12257_vm2, %v32229_v41 }
 0x788   :  { %24413 = vmatprep.mubr.msk.f32.mxu1 %vm12257_vm2, %v32233_v36 }
 0x78b   :  { %24414 = vmatmul.mubr.msk.f32.gmra.mrb[146].mxu1 %vm12257_vm2, %v32237_v26  ;;  %v20449_v26 = vld [vmem:[%s33246_s3 + $0xa8] sm:$0xff] }
 0x78c   :  { %24416 = vmatprep.mubr.msk.f32.mxu1 %vm12257_vm2, %v32241_v44  ;;  %v32261_v44 = vld [vmem:[#allocation2 + $0x191] sm:$0xff] }
 0x78d   :  { %33628 = vst [vmem:[#allocation12_spill] sm:$0xff] %v32261_v44 }
 0x78f   :  { %24417 = vmatmul.mubr.msk.f32.gmra.mrb[148].mxu1 %vm12257_vm2, %v32245_v17  ;;  %v32265_v17 = vld [vmem:[#allocation2 + $0x1a9] sm:$0xff] }
 0x790   :  { %24419 = vmatprep.mubr.msk.f32.mxu1 %vm12257_vm2, %v32249_v25  ;;  %33629 = vst [vmem:[#allocation13_spill] sm:$0xff] %v32265_v17  ;;  %v32269_v25 = vld [vmem:[#allocation2 + $0x1b1] sm:$0xff] }
 0x791   :  { %33630 = vst [vmem:[#allocation14_spill] sm:$0xff] %v32269_v25 }
 0x793   :  { %24420 = vmatmul.mubr.msk.f32.gmra.mrb[150].mxu1 %vm12257_vm2, %v32253_v37  ;;  %v32273_v37 = vld [vmem:[#allocation2 + $0x1c9] sm:$0xff] }
 0x794   :  { %24422 = vmatprep.mubr.msk.f32.mxu1 %vm12257_vm2, %v32257_v1  ;;  %33631 = vst [vmem:[#allocation15_spill] sm:$0xff] %v32273_v37  ;;  %v32277_v1 = vld [vmem:[#allocation2 + $0x1d1] sm:$0xff] }
 0x795   :  { %33632 = vst [vmem:[#allocation16_spill] sm:$0xff] %v32277_v1 }
 0x797   :  { %24423 = vmatmul.mubr.msk.f32.gmra.mrb[152].mxu1 %vm12257_vm2, %v32261_v44  ;;  %v32281_v44 = vld [vmem:[#allocation2 + $0x1e9] sm:$0xff] }
 0x798   :  { %24425 = vmatprep.mubr.msk.f32.mxu1 %vm12257_vm2, %v32265_v17  ;;  %33633 = vst [vmem:[#allocation17_spill] sm:$0xff] %v32281_v44  ;;  %v32285_v17 = vld [vmem:[#allocation2 + $0x1f1] sm:$0xff] }
 0x799   :  { %33634 = vst [vmem:[#allocation18_spill] sm:$0xff] %v32285_v17 }
 0x79b   :  { %24426 = vmatmul.mubr.msk.f32.gmra.mrb[154].mxu1 %vm12257_vm2, %v32269_v25  ;;  %v20414_v25 = vld [vmem:[%s33246_s3 + $0x90] sm:$0xff] }
 0x79c   :  { %24428 = vmatprep.mubr.msk.f32.mxu1 %vm12257_vm2, %v32273_v37  ;;  %v20415_v37 = vld [vmem:[%s33246_s3 + $0x98] sm:$0xff] }
 0x79f   :  { %24429 = vmatmul.mubr.msk.f32.gmra.mrb[156].mxu1 %vm12257_vm2, %v32277_v1  ;;  %v25081_v1 = vpack.c.bf16 %v20415_v37, %v20414_v25  ;;  %v14082_v37 = vld [vmem:[#allocation2 + $0x30] sm:$0xff] }
 0x7a0   :  { %24431 = vmatprep.mubr.msk.f32.mxu1 %vm12257_vm2, %v32281_v44  ;;  %v20448_v44 = vld [vmem:[%s33246_s3 + $0xa0] sm:$0xff] }
 0x7a3   :  { %24432 = vmatmul.mubr.msk.f32.gmra.mrb[158].mxu1 %vm12257_vm2, %v32285_v17  ;;  %v25085_v17 = vpack.c.bf16 %v20449_v26, %v20448_v44  ;;  %v20451_v26 = vld [vmem:[%s33246_s3 + $0xb8] sm:$0xff]  ;;  %v14081_v44 = vld [vmem:[#allocation2 + $0x28] sm:$0xff] }
 0x7a4   :  { %24442 = vmatprep.mubr.msk.f32.mxu1 %vm12257_vm2, %v32025_v4  ;;  %v32362_v4 = vld [vmem:[#allocation2 + $0x207] sm:$0xff] }
 0x7a5   :  { %33635 = vst [vmem:[#allocation19_spill] sm:$0xff] %v32362_v4 }
 0x7a7   :  { %24443 = vmatmul.mubr.msk.f32.vlgmr.msra.gmra.mrb[128].mxu1 %vm12257_vm2, %v32033_v13  ;;  %v32366_v13 = vld [vmem:[#allocation2 + $0x20f] sm:$0xff] }
 0x7a8   :  { %24445 = vmatprep.mubr.msk.f32.mxu1 %vm12257_vm2, %v32037_v55  ;;  %25080 = vmatpush3.bf16.msra.mxu1 %v32170_v0  ;;  %v20450_v0 = vld [vmem:[%s33246_s3 + $0xb0] sm:$0xff] }
 0x7a9   :  { %25082 = vmatprep.subr.bf16.mxu1 %v25081_v1  ;;  %v25089_v25 = vpack.c.bf16 %v20451_v26, %v20450_v0  ;;  %v32388_v0 = vld [vmem:[#allocation2 + $0x50] sm:$0xff]  ;;  %v32392_v26 = vld [vmem:[#allocation2 + $0x68] sm:$0xff] }
 0x7ab   :  { %24446 = vmatmul.mubr.msk.f32.gmra.mrb[130].mxu1 %vm12257_vm2, %v32043_v11 }
 0x7ac   :  { %24448 = vmatprep.mubr.msk.f32.mxu1 %vm12257_vm2, %v32047_v16  ;;  %25084 = vmatpush3.bf16.msra.mxu1 %v25081_v1  ;;  %v20484_v1 = vld [vmem:[%s33246_s3 + $0xc0] sm:$0xff] }
 0x7ad   :  { %25086 = vmatprep.subr.bf16.mxu1 %v25085_v17 }
 0x7af   :  { %24449 = vmatmul.mubr.msk.f32.gmra.mrb[132].mxu1 %vm12257_vm2, %v32051_v47 }
 0x7b0   :  { %24451 = vmatprep.mubr.msk.f32.mxu1 %vm12257_vm2, %v32055_v22 }
 0x7b3   :  { %24452 = vmatmul.mubr.msk.f32.gmra.mrb[134].mxu1 %vm12257_vm2, %v32059_v30 }
 0x7b4   :  { %24454 = vmatprep.mubr.msk.f32.mxu1 %vm12257_vm2, %v32063_v23 }
 0x7b7   :  { %24455 = vmatmul.mubr.msk.f32.gmra.mrb[136].mxu1 %vm12257_vm2, %v32067_v29 }
 0x7b8   :  { %24457 = vmatprep.mubr.msk.f32.mxu1 %vm12257_vm2, %v32071_v54 }
 0x7bb   :  { %24458 = vmatmul.mubr.msk.f32.gmra.mrb[138].mxu1 %vm12257_vm2, %v32075_v32 }
 0x7bc   :  { %24460 = vmatprep.mubr.msk.f32.mxu1 %vm12257_vm2, %v32079_v6 }
 0x7bf   :  { %24461 = vmatmul.mubr.msk.f32.gmra.mrb[140].mxu1 %vm12257_vm2, %v32083_v33 }
 0x7c0   :  { %24463 = vmatprep.mubr.msk.f32.mxu1 %vm12257_vm2, %v32087_v52 }
 0x7c3   :  { %24464 = vmatmul.mubr.msk.f32.gmra.mrb[142].mxu1 %vm12257_vm2, %v32091_v38 }
 0x7c4   :  { %24466 = vmatprep.mubr.msk.f32.mxu1 %vm12257_vm2, %v32095_v40 }
 0x7c7   :  { %24467 = vmatmul.mubr.msk.f32.gmra.mrb[144].mxu1 %vm12257_vm2, %v32099_v61 }
 0x7c8   :  { %24469 = vmatprep.mubr.msk.f32.mxu1 %vm12257_vm2, %v32103_v49 }
 0x7cb   :  { %24470 = vmatmul.mubr.msk.f32.gmra.mrb[146].mxu1 %vm12257_vm2, %v32107_v27 }
 0x7cc   :  { %24472 = vmatprep.mubr.msk.f32.mxu1 %vm12257_vm2, %v32111_v51 }
 0x7cf   :  { %24473 = vmatmul.mubr.msk.f32.gmra.mrb[148].mxu1 %vm12257_vm2, %v32115_v20 }
 0x7d0   :  { %24475 = vmatprep.mubr.msk.f32.mxu1 %vm12257_vm2, %v32119_v46 }
 0x7d3   :  { %24476 = vmatmul.mubr.msk.f32.gmra.mrb[150].mxu1 %vm12257_vm2, %v32123_v9 }
 0x7d4   :  { %24478 = vmatprep.mubr.msk.f32.mxu1 %vm12257_vm2, %v32127_v31 }
 0x7d7   :  { %24479 = vmatmul.mubr.msk.f32.gmra.mrb[152].mxu1 %vm12257_vm2, %v32131_v60 }
 0x7d8   :  { %24481 = vmatprep.mubr.msk.f32.mxu1 %vm12257_vm2, %v32135_v35 }
 0x7db   :  { %24482 = vmatmul.mubr.msk.f32.gmra.mrb[154].mxu1 %vm12257_vm2, %v32139_v62 }
 0x7dc   :  { %24484 = vmatprep.mubr.msk.f32.mxu1 %vm12257_vm2, %v32143_v56 }
 0x7df   :  { %24485 = vmatmul.mubr.msk.f32.gmra.mrb[156].mxu1 %vm12257_vm2, %v32147_v10  ;;  %v32384_v10 = vld [vmem:[#allocation2 + $0x48] sm:$0xff] }
 0x7e0   :  { %24487 = vmatprep.mubr.msk.f32.mxu1 %vm12257_vm2, %v32362_v4  ;;  %v20485_v4 = vld [vmem:[%s33246_s3 + $0xc8] sm:$0xff] }
 0x7e3   :  { %24488 = vmatmul.mubr.msk.f32.gmra.mrb[158].mxu1 %vm12257_vm2, %v32366_v13 }
 0x7e4   :  { %24498 = vmatprep.mubr.msk.f32.mxu1 %vm12257_vm2, %v14081_v44  ;;  %v25093_v44 = vpack.c.bf16 %v20485_v4, %v20484_v1  ;;  %v32404_v4 = vld [vmem:[#allocation2 + $0x90] sm:$0xff]  ;;  %v32408_v1 = vld [vmem:[#allocation2 + $0xa8] sm:$0xff] }
 0x7e5   :  { %33638 = vst [vmem:[#allocation22_spill] sm:$0xff] %v32404_v4  ;;  %33639 = vst [vmem:[#allocation23_spill] sm:$0xff] %v32408_v1 }
 0x7e7   :  { %24499 = vmatmul.mubr.msk.f32.vlgmr.msra.gmra.mrb[128].mxu1 %vm12257_vm2, %v14082_v37  ;;  %v32396_v37 = vld [vmem:[#allocation2 + $0x70] sm:$0xff] }
 0x7e8   :  { %24501 = vmatprep.mubr.msk.f32.mxu1 %vm12257_vm2, %v32384_v10  ;;  %25088 = vmatpush3.bf16.msra.mxu1 %v25085_v17  ;;  %33636 = vst [vmem:[#allocation20_spill] sm:$0xff] %v32396_v37  ;;  %v32400_v17 = vld [vmem:[#allocation2 + $0x88] sm:$0xff] }
 0x7e9   :  { %25090 = vmatprep.subr.bf16.mxu1 %v25089_v25  ;;  %33637 = vst [vmem:[#allocation21_spill] sm:$0xff] %v32400_v17 }
 0x7eb   :  { %24502 = vmatmul.mubr.msk.f32.gmra.mrb[130].mxu1 %vm12257_vm2, %v32388_v0 }
 0x7ec   :  { %24504 = vmatprep.mubr.msk.f32.mxu1 %vm12257_vm2, %v32392_v26  ;;  %25092 = vmatpush3.bf16.msra.mxu1 %v25089_v25  ;;  %v32412_v25 = vld [vmem:[#allocation2 + $0xb0] sm:$0xff] }
 0x7ed   :  { %25094 = vmatprep.subr.bf16.mxu1 %v25093_v44  ;;  %33640 = vst [vmem:[#allocation24_spill] sm:$0xff] %v32412_v25 }
 0x7ef   :  { %24505 = vmatmul.mubr.msk.f32.gmra.mrb[132].mxu1 %vm12257_vm2, %v32396_v37  ;;  %v32416_v37 = vld [vmem:[#allocation2 + $0xc8] sm:$0xff] }
 0x7f0   :  { %24507 = vmatprep.mubr.msk.f32.mxu1 %vm12257_vm2, %v32400_v17  ;;  %33641 = vst [vmem:[#allocation25_spill] sm:$0xff] %v32416_v37  ;;  %v32420_v17 = vld [vmem:[#allocation2 + $0xd0] sm:$0xff] }
 0x7f1   :  { %33642 = vst [vmem:[#allocation26_spill] sm:$0xff] %v32420_v17 }
 0x7f3   :  { %24508 = vmatmul.mubr.msk.f32.gmra.mrb[134].mxu1 %vm12257_vm2, %v32404_v4  ;;  %v32424_v4 = vld [vmem:[#allocation2 + $0xe8] sm:$0xff] }
 0x7f4   :  { %24510 = vmatprep.mubr.msk.f32.mxu1 %vm12257_vm2, %v32408_v1  ;;  %33643 = vst [vmem:[#allocation27_spill] sm:$0xff] %v32424_v4  ;;  %v32428_v1 = vld [vmem:[#allocation2 + $0xf0] sm:$0xff] }
 0x7f5   :  { %33644 = vst [vmem:[#allocation28_spill] sm:$0xff] %v32428_v1 }
 0x7f7   :  { %24511 = vmatmul.mubr.msk.f32.gmra.mrb[136].mxu1 %vm12257_vm2, %v32412_v25  ;;  %v32432_v25 = vld [vmem:[#allocation2 + $0x108] sm:$0xff] }
 0x7f8   :  { %24513 = vmatprep.mubr.msk.f32.mxu1 %vm12257_vm2, %v32416_v37  ;;  %33645 = vst [vmem:[#allocation29_spill] sm:$0xff] %v32432_v25  ;;  %v32436_v37 = vld [vmem:[#allocation2 + $0x110] sm:$0xff] }
 0x7fb   :  { %24514 = vmatmul.mubr.msk.f32.gmra.mrb[138].mxu1 %vm12257_vm2, %v32420_v17  ;;  %v32440_v17 = vld [vmem:[#allocation2 + $0x128] sm:$0xff] }
 0x7fc   :  { %24516 = vmatprep.mubr.msk.f32.mxu1 %vm12257_vm2, %v32424_v4  ;;  %v32444_v4 = vld [vmem:[#allocation2 + $0x130] sm:$0xff] }
 0x7ff   :  { %24517 = vmatmul.mubr.msk.f32.gmra.mrb[140].mxu1 %vm12257_vm2, %v32428_v1  ;;  %v32448_v1 = vld [vmem:[#allocation2 + $0x148] sm:$0xff] }
 0x800   :  { %24519 = vmatprep.mubr.msk.f32.mxu1 %vm12257_vm2, %v32432_v25  ;;  %v32452_v25 = vld [vmem:[#allocation2 + $0x150] sm:$0xff] }
 0x803   :  { %24520 = vmatmul.mubr.msk.f32.gmra.mrb[142].mxu1 %vm12257_vm2, %v32436_v37 }
 0x804   :  { %24522 = vmatprep.mubr.msk.f32.mxu1 %vm12257_vm2, %v32440_v17 }
 0x807   :  { %24523 = vmatmul.mubr.msk.f32.gmra.mrb[144].mxu1 %vm12257_vm2, %v32444_v4 }
 0x808   :  { %24525 = vmatprep.mubr.msk.f32.mxu1 %vm12257_vm2, %v32448_v1 }
 0x80b   :  { %24526 = vmatmul.mubr.msk.f32.gmra.mrb[146].mxu1 %vm12257_vm2, %v32452_v25 }
 0x80c   :  { %24528 = vmatprep.mubr.msk.f32.mxu1 %vm12257_vm2, %v31883_v24  ;;  %v32476_v24 = vld [vmem:[#allocation2 + $0x208] sm:$0xff] }
 0x80f   :  { %24529 = vmatmul.mubr.msk.f32.gmra.mrb[148].mxu1 %vm12257_vm2, %v31891_v45  ;;  %v32480_v45 = vld [vmem:[#allocation2 + $0x210] sm:$0xff] }
 0x810   :  { %24531 = vmatprep.mubr.msk.f32.mxu1 %vm12257_vm2, %v31913_v14  ;;  %v20486_v14 = vld [vmem:[%s33246_s3 + $0xd0] sm:$0xff] }
 0x813   :  { %24532 = vmatmul.mubr.msk.f32.gmra.mrb[150].mxu1 %vm12257_vm2, %v31921_v19  ;;  %v20487_v19 = vld [vmem:[%s33246_s3 + $0xd8] sm:$0xff] }
 0x814   :  { %24534 = vmatprep.mubr.msk.f32.mxu1 %vm12257_vm2, %v31943_v63  ;;  %v25097_v63 = vpack.c.bf16 %v20487_v19, %v20486_v14  ;;  %v33651_v14 = vld [vmem:[#allocation11_spill] sm:$0xff]  ;;  %v33652_v19 = vld [vmem:[#allocation12_spill] sm:$0xff] }
 0x817   :  { %24535 = vmatmul.mubr.msk.f32.gmra.mrb[152].mxu1 %vm12257_vm2, %v31951_v53  ;;  %v20520_v53 = vld [vmem:[%s33246_s3 + $0xe0] sm:$0xff] }
 0x818   :  { %24537 = vmatprep.mubr.msk.f32.mxu1 %vm12257_vm2, %v31973_v58  ;;  %v20521_v58 = vld [vmem:[%s33246_s3 + $0xe8] sm:$0xff] }
 0x81b   :  { %24538 = vmatmul.mubr.msk.f32.gmra.mrb[154].mxu1 %vm12257_vm2, %v31981_v8  ;;  %v25101_v8 = vpack.c.bf16 %v20521_v58, %v20520_v53  ;;  %v33654_v53 = vld [vmem:[#allocation14_spill] sm:$0xff]  ;;  %v33655_v58 = vld [vmem:[#allocation15_spill] sm:$0xff] }
 0x81c   :  { %24540 = vmatprep.mubr.msk.f32.mxu1 %vm12257_vm2, %v32001_v43  ;;  %v33646_v43 = vld [vmem:[#allocation6_spill] sm:$0xff] }
 0x81f   :  { %24541 = vmatmul.mubr.msk.f32.gmra.mrb[156].mxu1 %vm12257_vm2, %v32007_v18  ;;  %v33647_v18 = vld [vmem:[#allocation7_spill] sm:$0xff] }
 0x820   :  { %24543 = vmatprep.mubr.msk.f32.mxu1 %vm12257_vm2, %v32476_v24 }
 0x823   :  { %24544 = vmatmul.mubr.msk.f32.gmra.mrb[158].mxu1 %vm12257_vm2, %v32480_v45 }
 0x824   :  { %24554 = vmatprep.mubr.msk.f32.mxu1 %vm12257_vm2, %v32165_v34  ;;  %v33648_v34 = vld [vmem:[#allocation8_spill] sm:$0xff] }
 0x827   :  { %24555 = vmatmul.mubr.msk.f32.vlgmr.msra.gmra.mrb[128].mxu1 %vm12257_vm2, %v32172_v42  ;;  %v33649_v42 = vld [vmem:[#allocation9_spill] sm:$0xff] }
 0x828   :  { %24557 = vmatprep.mubr.msk.f32.mxu1 %vm12257_vm2, %v32176_v12  ;;  %25096 = vmatpush3.bf16.msra.mxu1 %v25093_v44  ;;  %v33650_v44 = vld [vmem:[#allocation10_spill] sm:$0xff] }
 0x829   :  { %25098 = vmatprep.subr.bf16.mxu1 %v25097_v63 }
 0x82b   :  { %24558 = vmatmul.mubr.msk.f32.gmra.mrb[130].mxu1 %vm12257_vm2, %v32181_v57 }
 0x82c   :  { %24560 = vmatprep.mubr.msk.f32.mxu1 %vm12257_vm2, %v32185_v48  ;;  %25100 = vmatpush3.bf16.msra.mxu1 %v25097_v63  ;;  %v33653_v63 = vld [vmem:[#allocation13_spill] sm:$0xff] }
 0x82d   :  { %25102 = vmatprep.subr.bf16.mxu1 %v25101_v8 }
 0x82f   :  { %24561 = vmatmul.mubr.msk.f32.gmra.mrb[132].mxu1 %vm12257_vm2, %v32189_v28 }
 0x830   :  { %24563 = vmatprep.mubr.msk.f32.mxu1 %vm12257_vm2, %v32193_v2 }
 0x833   :  { %24564 = vmatmul.mubr.msk.f32.gmra.mrb[134].mxu1 %vm12257_vm2, %v32197_v3 }
 0x834   :  { %24566 = vmatprep.mubr.msk.f32.mxu1 %vm12257_vm2, %v32201_v50 }
 0x837   :  { %24567 = vmatmul.mubr.msk.f32.gmra.mrb[136].mxu1 %vm12257_vm2, %v32205_v21 }
 0x838   :  { %24569 = vmatprep.mubr.msk.f32.mxu1 %vm12257_vm2, %v32209_v15 }
 0x83b   :  { %24570 = vmatmul.mubr.msk.f32.gmra.mrb[138].mxu1 %vm12257_vm2, %v32213_v59 }
 0x83c   :  { %24572 = vmatprep.mubr.msk.f32.mxu1 %vm12257_vm2, %v32217_v5 }
 0x83f   :  { %24573 = vmatmul.mubr.msk.f32.gmra.mrb[140].mxu1 %vm12257_vm2, %v32221_v39 }
 0x840   :  { %24575 = vmatprep.mubr.msk.f32.mxu1 %vm12257_vm2, %v32225_v7 }
 0x843   :  { %24576 = vmatmul.mubr.msk.f32.gmra.mrb[142].mxu1 %vm12257_vm2, %v32229_v41 }
 0x844   :  { %24578 = vmatprep.mubr.msk.f32.mxu1 %vm12257_vm2, %v32233_v36 }
 0x847   :  { %24579 = vmatmul.mubr.msk.f32.gmra.mrb[144].mxu1 %vm12257_vm2, %v33646_v43 }
 0x848   :  { %24581 = vmatprep.mubr.msk.f32.mxu1 %vm12257_vm2, %v33647_v18 }
 0x84b   :  { %24582 = vmatmul.mubr.msk.f32.gmra.mrb[146].mxu1 %vm12257_vm2, %v33648_v34  ;;  %v33656_v34 = vld [vmem:[#allocation16_spill] sm:$0xff] }
 0x84c   :  { %24584 = vmatprep.mubr.msk.f32.mxu1 %vm12257_vm2, %v33649_v42  ;;  %v33657_v42 = vld [vmem:[#allocation17_spill] sm:$0xff] }
 0x84f   :  { %24585 = vmatmul.mubr.msk.f32.gmra.mrb[148].mxu1 %vm12257_vm2, %v33650_v44  ;;  %v33658_v44 = vld [vmem:[#allocation18_spill] sm:$0xff] }
 0x850   :  { %24587 = vmatprep.mubr.msk.f32.mxu1 %vm12257_vm2, %v33651_v14  ;;  %v32556_v14 = vld [vmem:[#allocation2 + $0x209] sm:$0xff] }
 0x851   :  { %33659 = vst [vmem:[#allocation30_spill] sm:$0xff] %v32556_v14 }
 0x853   :  { %24588 = vmatmul.mubr.msk.f32.gmra.mrb[150].mxu1 %vm12257_vm2, %v33652_v19 }
 0x854   :  { %24590 = vmatprep.mubr.msk.f32.mxu1 %vm12257_vm2, %v33653_v63  ;;  %v32560_v63 = vld [vmem:[#allocation2 + $0x211] sm:$0xff] }
 0x855   :  { %33660 = vst [vmem:[#allocation31_spill] sm:$0xff] %v32560_v63 }
 0x857   :  { %24591 = vmatmul.mubr.msk.f32.gmra.mrb[152].mxu1 %vm12257_vm2, %v33654_v53 }
 0x858   :  { %24593 = vmatprep.mubr.msk.f32.mxu1 %vm12257_vm2, %v33655_v58  ;;  %v20522_v58 = vld [vmem:[%s33246_s3 + $0xf0] sm:$0xff] }
 0x85b   :  { %24594 = vmatmul.mubr.msk.f32.gmra.mrb[154].mxu1 %vm12257_vm2, %v33656_v34  ;;  %v20523_v34 = vld [vmem:[%s33246_s3 + $0xf8] sm:$0xff] }
 0x85c   :  { %24596 = vmatprep.mubr.msk.f32.mxu1 %vm12257_vm2, %v33657_v42  ;;  %v20557_v42 = vld [vmem:[%s33246_s3 + $0x108] sm:$0xff] }
 0x85f   :  { %24597 = vmatmul.mubr.msk.f32.gmra.mrb[156].mxu1 %vm12257_vm2, %v33658_v44  ;;  %v25105_v44 = vpack.c.bf16 %v20523_v34, %v20522_v58 }
 0x860   :  { %24599 = vmatprep.mubr.msk.f32.mxu1 %vm12257_vm2, %v32556_v14  ;;  %v20556_v14 = vld [vmem:[%s33246_s3 + $0x100] sm:$0xff] }
 0x863   :  { %24600 = vmatmul.mubr.msk.f32.gmra.mrb[158].mxu1 %vm12257_vm2, %v32560_v63  ;;  %v25109_v63 = vpack.c.bf16 %v20557_v42, %v20556_v14 }
 0x864   :  { %24610 = vmatprep.mubr.msk.f32.mxu1 %vm12257_vm2, %v32037_v55  ;;  %v33661_v55 = vld [vmem:[#allocation5_spill] sm:$0xff] }
 0x867   :  { %24611 = vmatmul.mubr.msk.f32.vlgmr.msra.gmra.mrb[128].mxu1 %vm12257_vm2, %v32043_v11  ;;  %v33662_v11 = vld [vmem:[#allocation19_spill] sm:$0xff] }
 0x868   :  { %24613 = vmatprep.mubr.msk.f32.mxu1 %vm12257_vm2, %v32047_v16  ;;  %25104 = vmatpush3.bf16.msra.mxu1 %v25101_v8  ;;  %v14892_v16 = vld [vmem:[#allocation2 + $0x227] sm:$0xff] }
 0x869   :  { %25106 = vmatprep.subr.bf16.mxu1 %v25105_v44 }
 0x86b   :  { %24614 = vmatmul.mubr.msk.f32.gmra.mrb[130].mxu1 %vm12257_vm2, %v32051_v47  ;;  %v14893_v47 = vld [vmem:[#allocation2 + $0x22f] sm:$0xff] }
 0x86c   :  { %24616 = vmatprep.mubr.msk.f32.mxu1 %vm12257_vm2, %v32055_v22  ;;  %25108 = vmatpush3.bf16.msra.mxu1 %v25105_v44  ;;  %v20558_v22 = vld [vmem:[%s33246_s3 + $0x110] sm:$0xff] }
 0x86d   :  { %25110 = vmatprep.subr.bf16.mxu1 %v25109_v63 }
 0x86f   :  { %24617 = vmatmul.mubr.msk.f32.gmra.mrb[132].mxu1 %vm12257_vm2, %v32059_v30  ;;  %v20559_v30 = vld [vmem:[%s33246_s3 + $0x118] sm:$0xff] }
 0x870   :  { %24619 = vmatprep.mubr.msk.f32.mxu1 %vm12257_vm2, %v32063_v23  ;;  %v25113_v23 = vpack.c.bf16 %v20559_v30, %v20558_v22 }
 0x873   :  { %24620 = vmatmul.mubr.msk.f32.gmra.mrb[134].mxu1 %vm12257_vm2, %v32067_v29  ;;  %v33663_v29 = vld [vmem:[#allocation20_spill] sm:$0xff] }
 0x874   :  { %24622 = vmatprep.mubr.msk.f32.mxu1 %vm12257_vm2, %v32071_v54  ;;  %v33664_v54 = vld [vmem:[#allocation21_spill] sm:$0xff] }
 0x877   :  { %24623 = vmatmul.mubr.msk.f32.gmra.mrb[136].mxu1 %vm12257_vm2, %v32075_v32  ;;  %v33665_v32 = vld [vmem:[#allocation22_spill] sm:$0xff] }
 0x878   :  { %24625 = vmatprep.mubr.msk.f32.mxu1 %vm12257_vm2, %v32079_v6  ;;  %v33666_v6 = vld [vmem:[#allocation23_spill] sm:$0xff] }
 0x87b   :  { %24626 = vmatmul.mubr.msk.f32.gmra.mrb[138].mxu1 %vm12257_vm2, %v32083_v33  ;;  %v33667_v33 = vld [vmem:[#allocation24_spill] sm:$0xff] }
 0x87c   :  { %24628 = vmatprep.mubr.msk.f32.mxu1 %vm12257_vm2, %v32087_v52  ;;  %v33668_v52 = vld [vmem:[#allocation25_spill] sm:$0xff] }
 0x87f   :  { %24629 = vmatmul.mubr.msk.f32.gmra.mrb[140].mxu1 %vm12257_vm2, %v32091_v38  ;;  %v33669_v38 = vld [vmem:[#allocation26_spill] sm:$0xff] }
 0x880   :  { %24631 = vmatprep.mubr.msk.f32.mxu1 %vm12257_vm2, %v32095_v40  ;;  %v33670_v40 = vld [vmem:[#allocation27_spill] sm:$0xff] }
 0x883   :  { %24632 = vmatmul.mubr.msk.f32.gmra.mrb[142].mxu1 %vm12257_vm2, %v32099_v61  ;;  %v33671_v61 = vld [vmem:[#allocation28_spill] sm:$0xff] }
 0x884   :  { %24634 = vmatprep.mubr.msk.f32.mxu1 %vm12257_vm2, %v32103_v49  ;;  %v33672_v49 = vld [vmem:[#allocation29_spill] sm:$0xff] }
 0x887   :  { %24635 = vmatmul.mubr.msk.f32.gmra.mrb[144].mxu1 %vm12257_vm2, %v32107_v27  ;;  %v15270_v27 = vld [vmem:[#allocation2 + $0x168] sm:$0xff] }
 0x888   :  { %24637 = vmatprep.mubr.msk.f32.mxu1 %vm12257_vm2, %v32111_v51  ;;  %v15271_v51 = vld [vmem:[#allocation2 + $0x170] sm:$0xff] }
 0x88b   :  { %24638 = vmatmul.mubr.msk.f32.gmra.mrb[146].mxu1 %vm12257_vm2, %v32115_v20  ;;  %v15272_v20 = vld [vmem:[#allocation2 + $0x188] sm:$0xff] }
 0x88c   :  { %24640 = vmatprep.mubr.msk.f32.mxu1 %vm12257_vm2, %v32119_v46  ;;  %v15273_v46 = vld [vmem:[#allocation2 + $0x190] sm:$0xff] }
 0x88f   :  { %24641 = vmatmul.mubr.msk.f32.gmra.mrb[148].mxu1 %vm12257_vm2, %v32123_v9  ;;  %v15274_v9 = vld [vmem:[#allocation2 + $0x1a8] sm:$0xff] }
 0x890   :  { %24643 = vmatprep.mubr.msk.f32.mxu1 %vm12257_vm2, %v32127_v31  ;;  %v15275_v31 = vld [vmem:[#allocation2 + $0x1b0] sm:$0xff] }
 0x893   :  { %24644 = vmatmul.mubr.msk.f32.gmra.mrb[150].mxu1 %vm12257_vm2, %v32131_v60  ;;  %v15276_v60 = vld [vmem:[#allocation2 + $0x1c8] sm:$0xff] }
 0x894   :  { %24646 = vmatprep.mubr.msk.f32.mxu1 %vm12257_vm2, %v32135_v35  ;;  %v15277_v35 = vld [vmem:[#allocation2 + $0x1d0] sm:$0xff] }
 0x897   :  { %24647 = vmatmul.mubr.msk.f32.gmra.mrb[152].mxu1 %vm12257_vm2, %v32139_v62  ;;  %v15278_v62 = vld [vmem:[#allocation2 + $0x1e8] sm:$0xff] }
 0x898   :  { %24649 = vmatprep.mubr.msk.f32.mxu1 %vm12257_vm2, %v32143_v56  ;;  %v15279_v56 = vld [vmem:[#allocation2 + $0x1f0] sm:$0xff] }
 0x89b   :  { %24650 = vmatmul.mubr.msk.f32.gmra.mrb[154].mxu1 %vm12257_vm2, %v33661_v55 }
 0x89c   :  { %24652 = vmatprep.mubr.msk.f32.mxu1 %vm12257_vm2, %v33662_v11 }
 0x89f   :  { %24653 = vmatmul.mubr.msk.f32.gmra.mrb[156].mxu1 %vm12257_vm2, %v32366_v13  ;;  %v15283_v13 = vld [vmem:[#allocation2 + $0x230] sm:$0xff] }
 0x8a0   :  { %24655 = vmatprep.mubr.msk.f32.mxu1 %vm12257_vm2, %v14892_v16 }
 0x8a3   :  { %24656 = vmatmul.mubr.msk.f32.gmra.mrb[158].mxu1 %vm12257_vm2, %v14893_v47 }
 0x8a4   :  { %24666 = vmatprep.mubr.msk.f32.mxu1 %vm12257_vm2, %v32384_v10  ;;  %v15282_v10 = vld [vmem:[#allocation2 + $0x228] sm:$0xff] }
 0x8a7   :  { %24667 = vmatmul.mubr.msk.f32.vlgmr.msra.gmra.mrb[128].mxu1 %vm12257_vm2, %v32388_v0 }
 0x8a8   :  { %24669 = vmatprep.mubr.msk.f32.mxu1 %vm12257_vm2, %v32392_v26  ;;  %25112 = vmatpush3.bf16.msra.mxu1 %v25109_v63 }
 0x8a9   :  { %25114 = vmatprep.subr.bf16.mxu1 %v25113_v23 }
 0x8ab   :  { %24670 = vmatmul.mubr.msk.f32.gmra.mrb[130].mxu1 %vm12257_vm2, %v33663_v29 }
 0x8ac   :  { %24672 = vmatprep.mubr.msk.f32.mxu1 %vm12257_vm2, %v33664_v54  ;;  %25116 = vmatpush3.bf16.msra.mxu1 %v25113_v23 }
 0x8af   :  { %24673 = vmatmul.mubr.msk.f32.gmra.mrb[132].mxu1 %vm12257_vm2, %v33665_v32 }
 0x8b0   :  { %24675 = vmatprep.mubr.msk.f32.mxu1 %vm12257_vm2, %v33666_v6 }
 0x8b3   :  { %24676 = vmatmul.mubr.msk.f32.gmra.mrb[134].mxu1 %vm12257_vm2, %v33667_v33 }
 0x8b4   :  { %24678 = vmatprep.mubr.msk.f32.mxu1 %vm12257_vm2, %v33668_v52 }
 0x8b7   :  { %24679 = vmatmul.mubr.msk.f32.gmra.mrb[136].mxu1 %vm12257_vm2, %v33669_v38 }
 0x8b8   :  { %24681 = vmatprep.mubr.msk.f32.mxu1 %vm12257_vm2, %v33670_v40 }
 0x8bb   :  { %24682 = vmatmul.mubr.msk.f32.gmra.mrb[138].mxu1 %vm12257_vm2, %v33671_v61 }
 0x8bc   :  { %24684 = vmatprep.mubr.msk.f32.mxu1 %vm12257_vm2, %v33672_v49 }
 0x8bf   :  { %24685 = vmatmul.mubr.msk.f32.gmra.mrb[140].mxu1 %vm12257_vm2, %v32436_v37 }
 0x8c0   :  { %24687 = vmatprep.mubr.msk.f32.mxu1 %vm12257_vm2, %v32440_v17 }
 0x8c3   :  { %24688 = vmatmul.mubr.msk.f32.gmra.mrb[142].mxu1 %vm12257_vm2, %v32444_v4 }
 0x8c4   :  { %24690 = vmatprep.mubr.msk.f32.mxu1 %vm12257_vm2, %v32448_v1 }
 0x8c7   :  { %24691 = vmatmul.mubr.msk.f32.gmra.mrb[144].mxu1 %vm12257_vm2, %v32452_v25 }
 0x8c8   :  { %24693 = vmatprep.mubr.msk.f32.mxu1 %vm12257_vm2, %v15270_v27 }
 0x8cb   :  { %24694 = vmatmul.mubr.msk.f32.gmra.mrb[146].mxu1 %vm12257_vm2, %v15271_v51 }
 0x8cc   :  { %24696 = vmatprep.mubr.msk.f32.mxu1 %vm12257_vm2, %v15272_v20 }
 0x8cf   :  { %24697 = vmatmul.mubr.msk.f32.gmra.mrb[148].mxu1 %vm12257_vm2, %v15273_v46 }
 0x8d0   :  { %24699 = vmatprep.mubr.msk.f32.mxu1 %vm12257_vm2, %v15274_v9 }
 0x8d3   :  { %24700 = vmatmul.mubr.msk.f32.gmra.mrb[150].mxu1 %vm12257_vm2, %v15275_v31 }
 0x8d4   :  { %24702 = vmatprep.mubr.msk.f32.mxu1 %vm12257_vm2, %v15276_v60 }
 0x8d7   :  { %24703 = vmatmul.mubr.msk.f32.gmra.mrb[152].mxu1 %vm12257_vm2, %v15277_v35 }
 0x8d8   :  { %24705 = vmatprep.mubr.msk.f32.mxu1 %vm12257_vm2, %v15278_v62 }
 0x8db   :  { %24706 = vmatmul.mubr.msk.f32.gmra.mrb[154].mxu1 %vm12257_vm2, %v15279_v56 }
 0x8dc   :  { %24708 = vmatprep.mubr.msk.f32.mxu1 %vm12257_vm2, %v32476_v24 }
 0x8df   :  { %24709 = vmatmul.mubr.msk.f32.gmra.mrb[156].mxu1 %vm12257_vm2, %v32480_v45 }
 0x8e0   :  { %24711 = vmatprep.mubr.msk.f32.mxu1 %vm12257_vm2, %v15282_v10 }
 0x8e3   :  { %24712 = vmatmul.mubr.msk.f32.gmra.mrb[158].mxu1 %vm12257_vm2, %v15283_v13 }
 0x8e4   :  { %24722 = vmatprep.mubr.msk.f32.mxu1 %vm12257_vm2, %v32176_v12  ;;  %v33673_v12 = vld [vmem:[#allocation8_spill] sm:$0xff] }
 0x8e7   :  { %24723 = vmatmul.mubr.msk.f32.vlgmr.msra.gmra.mrb[128].mxu1 %vm12257_vm2, %v32181_v57  ;;  %v33674_v57 = vld [vmem:[#allocation9_spill] sm:$0xff] }
 0x8e8   :  { %24725 = vmatprep.mubr.msk.f32.mxu1 %vm12257_vm2, %v32185_v48  ;;  %v33675_v48 = vld [vmem:[#allocation10_spill] sm:$0xff] }
 0x8eb   :  { %24726 = vmatmul.mubr.msk.f32.gmra.mrb[130].mxu1 %vm12257_vm2, %v32189_v28  ;;  %v33676_v28 = vld [vmem:[#allocation11_spill] sm:$0xff] }
 0x8ec   :  { %24728 = vmatprep.mubr.msk.f32.mxu1 %vm12257_vm2, %v32193_v2  ;;  %v33677_v2 = vld [vmem:[#allocation13_spill] sm:$0xff] }
 0x8ef   :  { %24729 = vmatmul.mubr.msk.f32.gmra.mrb[132].mxu1 %vm12257_vm2, %v32197_v3  ;;  %v33678_v3 = vld [vmem:[#allocation15_spill] sm:$0xff] }
 0x8f0   :  { %24731 = vmatprep.mubr.msk.f32.mxu1 %vm12257_vm2, %v32201_v50  ;;  %v33679_v50 = vld [vmem:[#allocation16_spill] sm:$0xff] }
 0x8f3   :  { %24732 = vmatmul.mubr.msk.f32.gmra.mrb[134].mxu1 %vm12257_vm2, %v32205_v21  ;;  %v33680_v21 = vld [vmem:[#allocation17_spill] sm:$0xff] }
 0x8f4   :  { %24734 = vmatprep.mubr.msk.f32.mxu1 %vm12257_vm2, %v32209_v15  ;;  %v33681_v15 = vld [vmem:[#allocation18_spill] sm:$0xff] }
 0x8f7   :  { %24735 = vmatmul.mubr.msk.f32.gmra.mrb[136].mxu1 %vm12257_vm2, %v32213_v59  ;;  %v33682_v59 = vld [vmem:[#allocation30_spill] sm:$0xff] }
 0x8f8   :  { %24737 = vmatprep.mubr.msk.f32.mxu1 %vm12257_vm2, %v32217_v5  ;;  %v15672_v5 = vld [vmem:[#allocation2 + $0x229] sm:$0xff] }
 0x8fb   :  { %24738 = vmatmul.mubr.msk.f32.gmra.mrb[138].mxu1 %vm12257_vm2, %v32221_v39  ;;  %v33683_v39 = vld [vmem:[#allocation31_spill] sm:$0xff] }
 0x8fc   :  { %24740 = vmatprep.mubr.msk.f32.mxu1 %vm12257_vm2, %v32225_v7  ;;  %v15673_v7 = vld [vmem:[#allocation2 + $0x231] sm:$0xff] }
 0x8ff   :  { %24741 = vmatmul.mubr.msk.f32.gmra.mrb[140].mxu1 %vm12257_vm2, %v32229_v41 }
 0x900   :  { %24743 = vmatprep.mubr.msk.f32.mxu1 %vm12257_vm2, %v32233_v36  ;;  %v32761_v36 = vld [vmem:[%s33248_s4] ss:$0 sm:$0xff]  ;;  %s26668_s4 = smov 127  }
 0x903   :  { %24744 = vmatmul.mubr.msk.f32.gmra.mrb[142].mxu1 %vm12257_vm2, %v33646_v43 }
 0x904   :  { %24746 = vmatprep.mubr.msk.f32.mxu1 %vm12257_vm2, %v33647_v18 }
 0x907   :  { %24747 = vmatmul.mubr.msk.f32.gmra.mrb[144].mxu1 %vm12257_vm2, %v33673_v12 }
 0x908   :  { %24749 = vmatprep.mubr.msk.f32.mxu1 %vm12257_vm2, %v33674_v57 }
 0x90b   :  { %24750 = vmatmul.mubr.msk.f32.gmra.mrb[146].mxu1 %vm12257_vm2, %v33675_v48 }
 0x90c   :  { %24752 = vmatprep.mubr.msk.f32.mxu1 %vm12257_vm2, %v33676_v28 }
 0x90f   :  { %24753 = vmatmul.mubr.msk.f32.gmra.mrb[148].mxu1 %vm12257_vm2, %v33652_v19 }
 0x910   :  { %24755 = vmatprep.mubr.msk.f32.mxu1 %vm12257_vm2, %v33677_v2 }
 0x913   :  { %24756 = vmatmul.mubr.msk.f32.gmra.mrb[150].mxu1 %vm12257_vm2, %v33654_v53 }
 0x914   :  { %24758 = vmatprep.mubr.msk.f32.mxu1 %vm12257_vm2, %v33678_v3 }
 0x917   :  { %24759 = vmatmul.mubr.msk.f32.gmra.mrb[152].mxu1 %vm12257_vm2, %v33679_v50 }
 0x918   :  { %24761 = vmatprep.mubr.msk.f32.mxu1 %vm12257_vm2, %v33680_v21 }
 0x91b   :  { %24762 = vmatmul.mubr.msk.f32.gmra.mrb[154].mxu1 %vm12257_vm2, %v33681_v15 }
 0x91c   :  { %24764 = vmatprep.mubr.msk.f32.mxu1 %vm12257_vm2, %v33682_v59 }
 0x91f   :  { %24765 = vmatmul.mubr.msk.f32.gmra.mrb[156].mxu1 %vm12257_vm2, %v33683_v39 }
 0x920   :  { %24767 = vmatprep.mubr.msk.f32.mxu1 %vm12257_vm2, %v15672_v5 }
 0x923   :  { %24768 = vmatmul.mubr.msk.f32.gmra.mrb[158].mxu1 %vm12257_vm2, %v15673_v7 }
 0x9ba   :  { %v24724_v41 = vpop.f32.mrb[128].mxu1 }
 0x9bb   :  { %v15841_v0 = vpop.f32.mrb[129].mxu1  ;;  %v16040_v26 = vadd.f32 %v24724_v41, %v32761_v36 }
 0x9bc   :  { %v16039_v37 = vadd.f32 %v32761_v36, %v15841_v0 }
 0x9bd   :  { %v16072_v24 = vmax.f32 %v16040_v26, 0.0 }
 0x9be   :  { %v24727_v17 = vpop.f32.mrb[130].mxu1  ;;  %v16071_v8 = vmax.f32 %v16039_v37, 0.0 }
 0x9bf   :  { %v16042_v4 = vadd.f32 %v24727_v17, %v32761_v36  ;;  %v15851_v1 = vpop.f32.mrb[131].mxu1 }
 0x9c0   :  { %v16041_v25 = vadd.f32 %v32761_v36, %v15851_v1 }
 0x9c1   :  { %v16074_v45 = vmax.f32 %v16042_v4, 0.0 }
 0x9c2   :  { %v16073_v43 = vmax.f32 %v16041_v25, 0.0  ;;  %v24730_v18 = vpop.f32.mrb[132].mxu1 }
 0x9c3   :  { %v16104_v34 = vmax.f32 %v16072_v24, %v16074_v45  ;;  %v15861_v42 = vpop.f32.mrb[133].mxu1  ;;  %v16044_v14 = vadd.f32 %v24730_v18, %v32761_v36 }
 0x9c4   :  { %v16103_v44 = vmax.f32 %v16071_v8, %v16073_v43  ;;  %v16043_v19 = vadd.f32 %v32761_v36, %v15861_v42 }
 0x9c5   :  { %16121 = vst.msk [vmem:[#allocation4 + $0x8] sm:$0xff] %vm16119_vm3, %v16104_v34  ;;  %v16076_v11 = vmax.f32 %v16044_v14, 0.0 }
 0x9c6   :  { %16120 = vst.msk [vmem:[#allocation4] sm:$0xff] %vm16119_vm3, %v16103_v44  ;;  %v24733_v63 = vpop.f32.mrb[134].mxu1  ;;  %v16075_v47 = vmax.f32 %v16043_v19, 0.0 }
 0x9c7   :  { %v16046_v53 = vadd.f32 %v24733_v63, %v32761_v36  ;;  %v15871_v58 = vpop.f32.mrb[135].mxu1 }
 0x9c8   :  { %v16045_v55 = vadd.f32 %v32761_v36, %v15871_v58 }
 0x9c9   :  { %v16078_v16 = vmax.f32 %v16046_v53, 0.0 }
 0x9ca   :  { %v16077_v22 = vmax.f32 %v16045_v55, 0.0  ;;  %v24736_v30 = vpop.f32.mrb[136].mxu1 }
 0x9cb   :  { %v16106_v23 = vmax.f32 %v16076_v11, %v16078_v16  ;;  %v15881_v29 = vpop.f32.mrb[137].mxu1  ;;  %v16048_v32 = vadd.f32 %v24736_v30, %v32761_v36 }
 0x9cc   :  { %v16105_v54 = vmax.f32 %v16075_v47, %v16077_v22  ;;  %v16047_v6 = vadd.f32 %v32761_v36, %v15881_v29 }
 0x9cd   :  { %16123 = vst.msk [vmem:[#allocation4 + $0x18] sm:$0xff] %vm16119_vm3, %v16106_v23  ;;  %v16080_v61 = vmax.f32 %v16048_v32, 0.0  ;;  %v16136_v46 = vld [vmem:[#allocation4] ss:$2 sm:$0xff]  ;;  %v16152_v9 = vld [vmem:[#allocation4 + $0x1] ss:$2 sm:$0xff] }
 0x9ce   :  { %16122 = vst.msk [vmem:[#allocation4 + $0x10] sm:$0xff] %vm16119_vm3, %v16105_v54  ;;  %v24739_v33 = vpop.f32.mrb[138].mxu1  ;;  %v16079_v27 = vmax.f32 %v16047_v6, 0.0  ;;  %v16167_v13 = vmax.f32 %v16136_v46, %v16152_v9 }
 0x9cf   :  { %v16050_v52 = vadd.f32 %v24739_v33, %v32761_v36  ;;  %v15891_v38 = vpop.f32.mrb[139].mxu1 }
 0x9d0   :  { %v16049_v40 = vadd.f32 %v32761_v36, %v15891_v38 }
 0x9d1   :  { %v16082_v49 = vmax.f32 %v16050_v52, 0.0 }
 0x9d2   :  { %v16081_v51 = vmax.f32 %v16049_v40, 0.0  ;;  %v24742_v20 = vpop.f32.mrb[140].mxu1 }
 0x9d3   :  { %v16108_v31 = vmax.f32 %v16080_v61, %v16082_v49  ;;  %v15901_v60 = vpop.f32.mrb[141].mxu1  ;;  %v16052_v10 = vadd.f32 %v24742_v20, %v32761_v36 }
 0x9d4   :  { %v16107_v35 = vmax.f32 %v16079_v27, %v16081_v51  ;;  %v16051_v57 = vadd.f32 %v32761_v36, %v15901_v60 }
 0x9d5   :  { %v16138_v62 = vld [vmem:[#allocation4 + $0x10] ss:$2 sm:$0xff]  ;;  %v16154_v56 = vld [vmem:[#allocation4 + $0x11] ss:$2 sm:$0xff]  ;;  %16125 = vst.msk [vmem:[#allocation4 + $0x28] sm:$0xff] %vm16119_vm3, %v16108_v31  ;;  %v16084_v21 = vmax.f32 %v16052_v10, 0.0 }
 0x9d6   :  { %v16168_v12 = vmax.f32 %v16138_v62, %v16154_v56  ;;  %16124 = vst.msk [vmem:[#allocation4 + $0x20] sm:$0xff] %vm16119_vm3, %v16107_v35  ;;  %v24745_v48 = vpop.f32.mrb[142].mxu1  ;;  %v16083_v59 = vmax.f32 %v16051_v57, 0.0 }
 0x9d7   :  { %v16054_v28 = vadd.f32 %v24745_v48, %v32761_v36  ;;  %v15911_v2 = vpop.f32.mrb[143].mxu1 }
 0x9d8   :  { %v32784_v3 = vpack.c.bf16 %v16168_v12, %v16167_v13  ;;  %v16053_v50 = vadd.f32 %v32761_v36, %v15911_v2 }
 0x9d9   :  { %v16086_v15 = vmax.f32 %v16054_v28, 0.0 }
 0x9da   :  { %v16085_v5 = vmax.f32 %v16053_v50, 0.0  ;;  %16256 = vrot.lane.b32.xlu0 %v32784_v3, %s26668_s4  ;;  %v24748_v39 = vpop.f32.mrb[144].mxu1 }
 0x9db   :  { %v16110_v7 = vmax.f32 %v16084_v21, %v16086_v15  ;;  %v15921_v41 = vpop.f32.mrb[145].mxu1  ;;  %v16056_v26 = vadd.f32 %v24748_v39, %v32761_v36 }
 0x9dc   :  { %v16109_v0 = vmax.f32 %v16083_v59, %v16085_v5  ;;  %v16055_v37 = vadd.f32 %v32761_v36, %v15921_v41 }
 0x9dd   :  { %16127 = vst.msk [vmem:[#allocation4 + $0x38] sm:$0xff] %vm16119_vm3, %v16110_v7  ;;  %v16088_v24 = vmax.f32 %v16056_v26, 0.0  ;;  %v16140_v34 = vld [vmem:[#allocation4 + $0x20] ss:$2 sm:$0xff]  ;;  %v16156_v42 = vld [vmem:[#allocation4 + $0x21] ss:$2 sm:$0xff] }
 0x9de   :  { %16126 = vst.msk [vmem:[#allocation4 + $0x30] sm:$0xff] %vm16119_vm3, %v16109_v0  ;;  %v24751_v17 = vpop.f32.mrb[146].mxu1  ;;  %v16087_v8 = vmax.f32 %v16055_v37, 0.0  ;;  %v16169_v55 = vmax.f32 %v16140_v34, %v16156_v42 }
 0x9df   :  { %v16058_v4 = vadd.f32 %v24751_v17, %v32761_v36  ;;  %v15931_v1 = vpop.f32.mrb[147].mxu1 }
 0x9e0   :  { %v16057_v25 = vadd.f32 %v32761_v36, %v15931_v1 }
 0x9e1   :  { %v16090_v45 = vmax.f32 %v16058_v4, 0.0 }
 0x9e2   :  { %v16089_v43 = vmax.f32 %v16057_v25, 0.0  ;;  %v24754_v18 = vpop.f32.mrb[148].mxu1 }
 0x9e3   :  { %v16112_v44 = vmax.f32 %v16088_v24, %v16090_v45  ;;  %v15941_v14 = vpop.f32.mrb[149].mxu1  ;;  %v16060_v58 = vadd.f32 %v24754_v18, %v32761_v36 }
 0x9e4   :  { %v16111_v19 = vmax.f32 %v16087_v8, %v16089_v43  ;;  %v16059_v16 = vadd.f32 %v32761_v36, %v15941_v14 }
 0x9e5   :  { %v16142_v63 = vld [vmem:[#allocation4 + $0x30] ss:$2 sm:$0xff]  ;;  %v16158_v53 = vld [vmem:[#allocation4 + $0x31] ss:$2 sm:$0xff]  ;;  %16129 = vst.msk [vmem:[#allocation4 + $0x48] sm:$0xff] %vm16119_vm3, %v16112_v44  ;;  %v16092_v54 = vmax.f32 %v16060_v58, 0.0 }
 0x9e6   :  { %v16170_v11 = vmax.f32 %v16142_v63, %v16158_v53  ;;  %16128 = vst.msk [vmem:[#allocation4 + $0x40] sm:$0xff] %vm16119_vm3, %v16111_v19  ;;  %v24757_v47 = vpop.f32.mrb[150].mxu1  ;;  %v16091_v6 = vmax.f32 %v16059_v16, 0.0  ;;  %v26586_v53 = vld [vmem:[%s33249_s5 + $0x48] sm:$0xff]   ;;  %v26587_v58 = vld [vmem:[%s33249_s5 + $0x50] sm:$0xff]  }
 0x9e7   :  { %v16062_v22 = vadd.f32 %v24757_v47, %v32761_v36  ;;  %v15951_v30 = vpop.f32.mrb[151].mxu1  ;;  %v26591_v47 = vld [vmem:[%s33249_s5 + $0x70] sm:$0xff]  }
 0x9e8   :  { %v32800_v23 = vpack.c.bf16 %v16170_v11, %v16169_v55  ;;  %v16061_v29 = vadd.f32 %v32761_v36, %v15951_v30  ;;  %v26588_v55 = vld [vmem:[%s33249_s5 + $0x58] sm:$0xff]   ;;  %v26589_v11 = vld [vmem:[%s33249_s5 + $0x60] sm:$0xff]  }
 0x9e9   :  { %v16094_v32 = vmax.f32 %v16062_v22, 0.0  ;;  %v26592_v22 = vld [vmem:[%s33249_s5 + $0x78] sm:$0xff]   ;;  %v26593_v30 = vld [vmem:[%s33249_s5] sm:$0xff]  }
 0x9ea   :  { %v16093_v33 = vmax.f32 %v16061_v29, 0.0  ;;  %16258 = vrot.lane.b32.xlu0 %v32800_v23, %s26668_s4  ;;  %v24760_v52 = vpop.f32.mrb[152].mxu1  ;;  %v26595_v29 = vld [vmem:[%s33249_s5 + $0x10] sm:$0xff]  }
 0x9eb   :  { %v16114_v38 = vmax.f32 %v16092_v54, %v16094_v32  ;;  %v15961_v40 = vpop.f32.mrb[153].mxu1  ;;  %v16064_v49 = vadd.f32 %v24760_v52, %v32761_v36  ;;  %v26596_v32 = vld [vmem:[%s33249_s5 + $0x18] sm:$0xff]  }
 0x9ec   :  { %v16113_v61 = vmax.f32 %v16091_v6, %v16093_v33  ;;  %v16063_v27 = vadd.f32 %v32761_v36, %v15961_v40  ;;  %v26597_v33 = vld [vmem:[%s33249_s5 + $0x20] sm:$0xff]  }
 0x9ed   :  { %16131 = vst.msk [vmem:[#allocation4 + $0x58] sm:$0xff] %vm16119_vm3, %v16114_v38  ;;  %v16096_v31 = vmax.f32 %v16064_v49, 0.0  ;;  %v16144_v10 = vld [vmem:[#allocation4 + $0x40] ss:$2 sm:$0xff]  ;;  %v16160_v13 = vld [vmem:[#allocation4 + $0x41] ss:$2 sm:$0xff] }
 0x9ee   :  { %16130 = vst.msk [vmem:[#allocation4 + $0x50] sm:$0xff] %vm16119_vm3, %v16113_v61  ;;  %16608 = vrot.lane.b32.xlu0 %v32784_v3, %s26669_s17  ;;  %v24763_v51 = vpop.f32.mrb[154].mxu1  ;;  %v16095_v35 = vmax.f32 %v16063_v27, 0.0  ;;  %v16171_v21 = vmax.f32 %v16144_v10, %v16160_v13  ;;  %v26598_v38 = vld [vmem:[%s33249_s5 + $0x28] sm:$0xff]   ;;  %v26599_v61 = vld [vmem:[%s33249_s5 + $0x30] sm:$0xff]   ;;  %v26600_v49 = vld [vmem:[%s33249_s5 + $0x38] sm:$0xff]  }
 0x9ef   :  { %v16066_v20 = vadd.f32 %v24763_v51, %v32761_v36  ;;  %v15971_v46 = vpop.f32.mrb[155].mxu1  ;;  %v26601_v27 = vld [vmem:[%s33249_s5 + $0x80] sm:$0xff]   ;;  %v26602_v51 = vld [vmem:[%s33249_s5 + $0x88] sm:$0xff]   ;;  %v26607_v10 = vld [vmem:[%s33249_s5 + $0xb0] sm:$0xff]  }
 0x9f0   :  { %v16065_v9 = vadd.f32 %v32761_v36, %v15971_v46  ;;  %v26608_v13 = vld [vmem:[%s33249_s5 + $0xb8] sm:$0xff]  }
 0x9f1   :  { %v16098_v60 = vmax.f32 %v16066_v20, 0.0  ;;  %v26603_v20 = vld [vmem:[%s33249_s5 + $0x90] sm:$0xff]  }
 0x9f2   :  { %v16097_v62 = vmax.f32 %v16065_v9, 0.0  ;;  %v24766_v56 = vpop.f32.mrb[156].mxu1  ;;  %v26604_v9 = vld [vmem:[%s33249_s5 + $0x98] sm:$0xff]  }
 0x9f3   :  { %v16116_v12 = vmax.f32 %v16096_v31, %v16098_v60  ;;  %v15981_v57 = vpop.f32.mrb[157].mxu1  ;;  %v16068_v50 = vadd.f32 %v24766_v56, %v32761_v36  ;;  %v26605_v60 = vld [vmem:[%s33249_s5 + $0xa0] sm:$0xff]  }
 0x9f4   :  { %v16115_v48 = vmax.f32 %v16095_v35, %v16097_v62  ;;  %v16067_v59 = vadd.f32 %v32761_v36, %v15981_v57  ;;  %v26606_v62 = vld [vmem:[%s33249_s5 + $0xa8] sm:$0xff]  }
 0x9f5   :  { %v16146_v28 = vld [vmem:[#allocation4 + $0x50] ss:$2 sm:$0xff]  ;;  %v16162_v2 = vld [vmem:[#allocation4 + $0x51] ss:$2 sm:$0xff]  ;;  %16133 = vst.msk [vmem:[#allocation4 + $0x68] sm:$0xff] %vm16119_vm3, %v16116_v12  ;;  %v16100_v26 = vmax.f32 %v16068_v50, 0.0 }
 0x9f6   :  { %v16172_v15 = vmax.f32 %v16146_v28, %v16162_v2  ;;  %16132 = vst.msk [vmem:[#allocation4 + $0x60] sm:$0xff] %vm16119_vm3, %v16115_v48  ;;  %v24769_v5 = vpop.f32.mrb[158].mxu1  ;;  %v16099_v17 = vmax.f32 %v16067_v59, 0.0  ;;  %v26609_v12 = vld [vmem:[%s33249_s5 + $0xc0] sm:$0xff]   ;;  %v26610_v57 = vld [vmem:[%s33249_s5 + $0xc8] sm:$0xff]   ;;  %v26611_v48 = vld [vmem:[%s33249_s5 + $0xd0] sm:$0xff]  }
 0x9f7   :  { %v16070_v39 = vadd.f32 %v24769_v5, %v32761_v36  ;;  %v15991_v7 = vpop.f32.mrb[159].mxu1  ;;  %v26612_v2 = vld [vmem:[%s33249_s5 + $0xd8] sm:$0xff]   ;;  %v26614_v59 = vld [vmem:[%s33249_s5 + $0xe8] sm:$0xff]  }
 0x9f8   :  { %v32818_v41 = vpack.c.bf16 %v16172_v15, %v16171_v21  ;;  %v16069_v0 = vadd.f32 %v32761_v36, %v15991_v7  ;;  %v26585_v36 = vld [vmem:[%s33249_s5 + $0x40] sm:$0xff]   ;;  %v26616_v7 = vld [vmem:[%s33249_s5 + $0xf8] sm:$0xff]  }
 0x9f9   :  { %v16102_v37 = vmax.f32 %v16070_v39, 0.0  ;;  %24778 = vmatprep.mubr.msk.bf16.mxu1 %vm16268_vm4, %v26585_v36  ;;  %v26613_v21 = vld [vmem:[%s33249_s5 + $0xe0] sm:$0xff]   ;;  %v26615_v39 = vld [vmem:[%s33249_s5 + $0xf0] sm:$0xff]   ;;  %v26622_v36 = vld [vmem:[%s33249_s5 + $0x128] sm:$0xff]  }
 0x9fa   :  { %v16101_v4 = vmax.f32 %v16069_v0, 0.0  ;;  %16612 = vrot.lane.b32.xlu0 %v32818_v41, %s26669_s17  ;;  %16260 = vrot.lane.b32.xlu1 %v32818_v41, %s26668_s4  ;;  %v26618_v0 = vld [vmem:[%s33249_s5 + $0x108] sm:$0xff]  }
 0x9fb   :  { %v16118_v1 = vmax.f32 %v16100_v26, %v16102_v37  ;;  %v26619_v26 = vld [vmem:[%s33249_s5 + $0x110] sm:$0xff]  }
 0x9fc   :  { %v16117_v25 = vmax.f32 %v16099_v17, %v16101_v4  ;;  %v26620_v17 = vld [vmem:[%s33249_s5 + $0x118] sm:$0xff]  }
 0x9fd   :  { %16135 = vst.msk [vmem:[#allocation4 + $0x78] sm:$0xff] %vm16119_vm3, %v16118_v1  ;;  %v16148_v24 = vld [vmem:[#allocation4 + $0x60] ss:$2 sm:$0xff]  ;;  %v16164_v45 = vld [vmem:[#allocation4 + $0x61] ss:$2 sm:$0xff] }
 0x9fe   :  { %16134 = vst.msk [vmem:[#allocation4 + $0x70] sm:$0xff] %vm16119_vm3, %v16117_v25  ;;  %16814 = vrot.lane.b32.xlu0 %v32784_v3, %s26670_s18  ;;  %v16173_v18 = vmax.f32 %v16148_v24, %v16164_v45  ;;  %v26621_v1 = vld [vmem:[%s33249_s5 + $0x120] sm:$0xff]   ;;  %v26623_v45 = vld [vmem:[%s33249_s5 + $0x130] sm:$0xff]  }
 0xa02   :  { %16818 = vrot.lane.b32.xlu0 %v32818_v41, %s26670_s18 }
 0xa05   :  { %v16150_v8 = vld [vmem:[#allocation4 + $0x70] ss:$2 sm:$0xff]  ;;  %v16166_v43 = vld [vmem:[#allocation4 + $0x71] ss:$2 sm:$0xff] }
 0xa06   :  { %v16174_v34 = vmax.f32 %v16150_v8, %v16166_v43  ;;  %17020 = vrot.lane.b32.xlu0 %v32784_v3, %s26671_s21  ;;  %v26624_v8 = vld [vmem:[%s33249_s5 + $0x138] sm:$0xff]   ;;  %v26625_v43 = vld [vmem:[%s33249_s5 + $0x140] sm:$0xff]  }
 0xa08   :  { %v16178_v42 = vpack.c.bf16 %v16174_v34, %v16173_v18  ;;  %v26626_v18 = vld [vmem:[%s33249_s5 + $0x148] sm:$0xff]   ;;  %v26627_v34 = vld [vmem:[%s33249_s5 + $0x150] sm:$0xff]  }
 0xa0a   :  { %17024 = vrot.lane.b32.xlu0 %v32818_v41, %s26671_s21  ;;  %16262 = vrot.lane.b32.xlu1 %v16178_v42, %s26668_s4 }
 0xa0e   :  { %17226 = vrot.lane.b32.xlu0 %v32784_v3, %s26672_s0  ;;  %16610 = vrot.lane.b32.xlu1 %v32800_v23, %s26669_s17 }
 0xa12   :  { %17230 = vrot.lane.b32.xlu0 %v32818_v41, %s26672_s0  ;;  %16614 = vrot.lane.b32.xlu1 %v16178_v42, %s26669_s17 }
 0xa16   :  { %17432 = vrot.lane.b32.xlu0 %v32784_v3, %s26673_s22  ;;  %16816 = vrot.lane.b32.xlu1 %v32800_v23, %s26670_s18 }
 0xa1a   :  { %17436 = vrot.lane.b32.xlu0 %v32818_v41, %s26673_s22  ;;  %16820 = vrot.lane.b32.xlu1 %v16178_v42, %s26670_s18 }
 0xa1e   :  { %17638 = vrot.lane.b32.xlu0 %v32784_v3, %s26674_s23  ;;  %17022 = vrot.lane.b32.xlu1 %v32800_v23, %s26671_s21 }
 0xa22   :  { %17642 = vrot.lane.b32.xlu0 %v32818_v41, %s26674_s23  ;;  %17026 = vrot.lane.b32.xlu1 %v16178_v42, %s26671_s21 }
 0xa26   :  { %17844 = vrot.lane.b32.xlu0 %v32784_v3, %s26675_s24  ;;  %17228 = vrot.lane.b32.xlu1 %v32800_v23, %s26672_s0 }
 0xa2a   :  { %17848 = vrot.lane.b32.xlu0 %v32818_v41, %s26675_s24  ;;  %17232 = vrot.lane.b32.xlu1 %v16178_v42, %s26672_s0 }
 0xa2e   :  { %18050 = vrot.lane.b32.xlu0 %v32784_v3, %s26676_s25  ;;  %17434 = vrot.lane.b32.xlu1 %v32800_v23, %s26673_s22 }
 0xa32   :  { %18054 = vrot.lane.b32.xlu0 %v32818_v41, %s26676_s25  ;;  %17438 = vrot.lane.b32.xlu1 %v16178_v42, %s26673_s22 }
 0xa36   :  { %17640 = vrot.lane.b32.xlu1 %v32800_v23, %s26674_s23 }
 0xa3a   :  { %17644 = vrot.lane.b32.xlu1 %v16178_v42, %s26674_s23 }
 0xa3e   :  { %17846 = vrot.lane.b32.xlu1 %v32800_v23, %s26675_s24 }
 0xa42   :  { %17850 = vrot.lane.b32.xlu1 %v16178_v42, %s26675_s24 }
 0xa46   :  { %18052 = vrot.lane.b32.xlu1 %v32800_v23, %s26676_s25 }
 0xa4a   :  { %18056 = vrot.lane.b32.xlu1 %v16178_v42, %s26676_s25 }
 0xa4c   :  { %v16257_v44 = vpop.permute.xlu0 %16256 }
 0xa4d   :  { %24770 = vmatprep.subr.bf16.mxu1 %v16257_v44 }
 0xa4e   :  { %24771 = vmatpush3.bf16.msra.mxu1 %v16257_v44  ;;  %v26628_v44 = vld [vmem:[%s33249_s5 + $0x158] sm:$0xff]  }
 0xa5c   :  { %v16259_v14 = vpop.permute.xlu0 %16258 }
 0xa5d   :  { %24772 = vmatprep.subr.bf16.mxu1 %v16259_v14 }
 0xa5e   :  { %24773 = vmatpush3.bf16.msra.mxu1 %v16259_v14 }
 0xa60   :  { %v16609_v16 = vpop.permute.xlu0 %16608 }
 0xa6c   :  { %v16261_v19 = vpop.permute.xlu1 %16260  ;;  %v16613_v6 = vpop.permute.xlu0 %16612 }
 0xa6d   :  { %24774 = vmatprep.subr.bf16.mxu1 %v16261_v19 }
 0xa6e   :  { %24775 = vmatpush3.bf16.msra.mxu1 %v16261_v19  ;;  %v26629_v19 = vld [vmem:[%s33249_s5 + $0x160] sm:$0xff]  }
 0xa70   :  { %v16815_v40 = vpop.permute.xlu0 %16814 }
 0xa74   :  { %v16819_v31 = vpop.permute.xlu0 %16818 }
 0xa78   :  { %v17021_v56 = vpop.permute.xlu0 %17020 }
 0xa7c   :  { %v16263_v63 = vpop.permute.xlu1 %16262  ;;  %v17025_v50 = vpop.permute.xlu0 %17024 }
 0xa7d   :  { %24776 = vmatprep.subr.bf16.mxu1 %v16263_v63 }
 0xa7e   :  { %24777 = vmatpush3.bf16.msra.mxu1 %v16263_v63 }
 0xa7f   :  { %24794 = vmatprep.subr.bf16.mxu1 %v32784_v3 }
 0xa80   :  { %v16611_v54 = vpop.permute.xlu1 %16610  ;;  %v17227_v5 = vpop.permute.xlu0 %17226 }
 0xa81   :  { %24779 = vmatmul.mubr.msk.bf16.vlgmr.msra.gmra.mrb[160].mxu1 %vm16268_vm4, %v26586_v53  ;;  %v26630_v53 = vld [vmem:[%s33249_s5 + $0x168] sm:$0xff]  }
 0xa82   :  { %24795 = vmatpush3.bf16.msra.mxu1 %v32784_v3  ;;  %24782 = vmatprep.mubr.msk.bf16.mxu1 %vm16268_vm4, %v26587_v58  ;;  %v26590_v3 = vld [vmem:[%s33249_s5 + $0x68] sm:$0xff]  }
 0xa83   :  { %24796 = vmatprep.subr.bf16.mxu1 %v32800_v23 }
 0xa84   :  { %v16615_v52 = vpop.permute.xlu1 %16614  ;;  %v17231_v4 = vpop.permute.xlu0 %17230 }
 0xa86   :  { %24797 = vmatpush3.bf16.msra.mxu1 %v32800_v23  ;;  %v26594_v23 = vld [vmem:[%s33249_s5 + $0x8] sm:$0xff]  }
 0xa87   :  { %24798 = vmatprep.subr.bf16.mxu1 %v32818_v41 }
 0xa88   :  { %v16817_v46 = vpop.permute.xlu1 %16816  ;;  %v17433_v24 = vpop.permute.xlu0 %17432 }
 0xa89   :  { %24783 = vmatmul.mubr.msk.bf16.gmra.mrb[164].mxu1 %vm16268_vm4, %v26588_v55  ;;  %v26631_v55 = vld [vmem:[%s33249_s5 + $0x170] sm:$0xff]  }
 0xa8a   :  { %24799 = vmatpush3.bf16.msra.mxu1 %v32818_v41  ;;  %24786 = vmatprep.mubr.msk.bf16.mxu1 %vm16268_vm4, %v26589_v11  ;;  %v26617_v41 = vld [vmem:[%s33249_s5 + $0x100] sm:$0xff]   ;;  %v26632_v11 = vld [vmem:[%s33249_s5 + $0x178] sm:$0xff]  }
 0xa8b   :  { %24800 = vmatprep.subr.bf16.mxu1 %v16178_v42 }
 0xa8c   :  { %v16821_v35 = vpop.permute.xlu1 %16820  ;;  %v17437_v14 = vpop.permute.xlu0 %17436 }
 0xa8e   :  { %24801 = vmatpush3.bf16.msra.mxu1 %v16178_v42 }
 0xa8f   :  { %24818 = vmatprep.subr.bf16.mxu1 %v16609_v16 }
 0xa90   :  { %v17023_v28 = vpop.permute.xlu1 %17022  ;;  %v17639_v58 = vpop.permute.xlu0 %17638 }
 0xa91   :  { %24787 = vmatmul.mubr.msk.bf16.gmra.mrb[168].mxu1 %vm16268_vm4, %v26590_v3  ;;  %v26633_v3 = vld [vmem:[%s33249_s5 + $0x180] sm:$0xff]  }
 0xa92   :  { %24790 = vmatprep.mubr.msk.bf16.mxu1 %vm16268_vm4, %v26591_v47  ;;  %v26635_v47 = vld [vmem:[%s33249_s5 + $0x190] sm:$0xff]  }
 0xa94   :  { %v17027_v15 = vpop.permute.xlu1 %17026 }
 0xa98   :  { %v17229_v37 = vpop.permute.xlu1 %17228 }
 0xa99   :  { %24791 = vmatmul.mubr.msk.bf16.gmra.mrb[172].mxu1 %vm16268_vm4, %v26592_v22 }
 0xa9a   :  { %24802 = vmatprep.mubr.msk.bf16.mxu1 %vm16268_vm4, %v26593_v30  ;;  %v26636_v30 = vld [vmem:[%s33249_s5 + $0x198] sm:$0xff]  }
 0xa9c   :  { %v17233_v25 = vpop.permute.xlu1 %17232 }
 0xaa0   :  { %v17435_v42 = vpop.permute.xlu1 %17434 }
 0xaa1   :  { %24803 = vmatmul.mubr.msk.bf16.vlgmr.msra.gmra.mrb[160].mxu1 %vm16268_vm4, %v26594_v23  ;;  %v17643_v23 = vpop.permute.xlu0 %17642 }
 0xaa2   :  { %24819 = vmatpush3.bf16.msra.mxu1 %v16609_v16  ;;  %24806 = vmatprep.mubr.msk.bf16.mxu1 %vm16268_vm4, %v26595_v29  ;;  %v26634_v16 = vld [vmem:[%s33249_s5 + $0x188] sm:$0xff]   ;;  %v26637_v29 = vld [vmem:[%s33249_s5 + $0x1a0] sm:$0xff]  }
 0xaa3   :  { %24820 = vmatprep.subr.bf16.mxu1 %v16611_v54 }
 0xaa4   :  { %v17439_v63 = vpop.permute.xlu1 %17438 }
 0xaa6   :  { %24821 = vmatpush3.bf16.msra.mxu1 %v16611_v54 }
 0xaa7   :  { %24822 = vmatprep.subr.bf16.mxu1 %v16613_v6 }
 0xaa8   :  { %v17641_v22 = vpop.permute.xlu1 %17640 }
 0xaa9   :  { %24807 = vmatmul.mubr.msk.bf16.gmra.mrb[164].mxu1 %vm16268_vm4, %v26596_v32  ;;  %v26638_v32 = vld [vmem:[%s33249_s5 + $0x1a8] sm:$0xff]  }
 0xaaa   :  { %24823 = vmatpush3.bf16.msra.mxu1 %v16613_v6  ;;  %24810 = vmatprep.mubr.msk.bf16.mxu1 %vm16268_vm4, %v26597_v33  ;;  %v17845_v6 = vpop.permute.xlu0 %17844  ;;  %v26639_v33 = vld [vmem:[%s33249_s5 + $0x1b0] sm:$0xff]  }
 0xaab   :  { %24824 = vmatprep.subr.bf16.mxu1 %v16615_v52 }
 0xaac   :  { %v17645_v54 = vpop.permute.xlu1 %17644 }
 0xaae   :  { %24825 = vmatpush3.bf16.msra.mxu1 %v16615_v52  ;;  %v26640_v52 = vld [vmem:[%s33249_s5 + $0x1b8] sm:$0xff]  }
 0xaaf   :  { %24842 = vmatprep.subr.bf16.mxu1 %v16815_v40 }
 0xab1   :  { %24811 = vmatmul.mubr.msk.bf16.gmra.mrb[168].mxu1 %vm16268_vm4, %v26598_v38  ;;  %v26641_v38 = vld [vmem:[%s33249_s5 + $0x1c0] sm:$0xff]  }
 0xab2   :  { %24814 = vmatprep.mubr.msk.bf16.mxu1 %vm16268_vm4, %v26599_v61  ;;  %v26643_v61 = vld [vmem:[%s33249_s5 + $0x1d0] sm:$0xff]  }
 0xab9   :  { %24815 = vmatmul.mubr.msk.bf16.gmra.mrb[172].mxu1 %vm16268_vm4, %v26600_v49  ;;  %v17847_v49 = vpop.permute.xlu1 %17846 }
 0xaba   :  { %24826 = vmatprep.mubr.msk.bf16.mxu1 %vm16268_vm4, %v26601_v27  ;;  %v26644_v27 = vld [vmem:[%s33249_s5 + $0x1d8] sm:$0xff]  }
 0xac1   :  { %24827 = vmatmul.mubr.msk.bf16.vlgmr.msra.gmra.mrb[160].mxu1 %vm16268_vm4, %v26602_v51  ;;  %v17849_v51 = vpop.permute.xlu0 %17848 }
 0xac2   :  { %24843 = vmatpush3.bf16.msra.mxu1 %v16815_v40  ;;  %24830 = vmatprep.mubr.msk.bf16.mxu1 %vm16268_vm4, %v26603_v20  ;;  %v26642_v40 = vld [vmem:[%s33249_s5 + $0x1c8] sm:$0xff]   ;;  %v26645_v20 = vld [vmem:[%s33249_s5 + $0x1e0] sm:$0xff]  }
 0xac3   :  { %24844 = vmatprep.subr.bf16.mxu1 %v16817_v46 }
 0xac6   :  { %24845 = vmatpush3.bf16.msra.mxu1 %v16817_v46  ;;  %v17851_v46 = vpop.permute.xlu1 %17850 }
 0xac7   :  { %24846 = vmatprep.subr.bf16.mxu1 %v16819_v31 }
 0xac9   :  { %24831 = vmatmul.mubr.msk.bf16.gmra.mrb[164].mxu1 %vm16268_vm4, %v26604_v9  ;;  %v26646_v9 = vld [vmem:[%s33249_s5 + $0x1e8] sm:$0xff]  }
 0xaca   :  { %24847 = vmatpush3.bf16.msra.mxu1 %v16819_v31  ;;  %24834 = vmatprep.mubr.msk.bf16.mxu1 %vm16268_vm4, %v26605_v60  ;;  %v18051_v31 = vpop.permute.xlu0 %18050  ;;  %v26647_v60 = vld [vmem:[%s33249_s5 + $0x1f0] sm:$0xff]  }
 0xacb   :  { %24848 = vmatprep.subr.bf16.mxu1 %v16821_v35 }
 0xace   :  { %24849 = vmatpush3.bf16.msra.mxu1 %v16821_v35  ;;  %v26648_v35 = vld [vmem:[%s33249_s5 + $0x1f8] sm:$0xff]  }
 0xacf   :  { %24866 = vmatprep.subr.bf16.mxu1 %v17021_v56 }
 0xad1   :  { %24835 = vmatmul.mubr.msk.bf16.gmra.mrb[168].mxu1 %vm16268_vm4, %v26606_v62  ;;  %v26649_v62 = vld [vmem:[%s33249_s5 + $0x200] sm:$0xff]  }
 0xad2   :  { %24838 = vmatprep.mubr.msk.bf16.mxu1 %vm16268_vm4, %v26607_v10  ;;  %v26651_v10 = vld [vmem:[%s33249_s5 + $0x210] sm:$0xff]  }
 0xad9   :  { %24839 = vmatmul.mubr.msk.bf16.gmra.mrb[172].mxu1 %vm16268_vm4, %v26608_v13  ;;  %v18053_v13 = vpop.permute.xlu1 %18052 }
 0xada   :  { %24850 = vmatprep.mubr.msk.bf16.mxu1 %vm16268_vm4, %v26609_v12  ;;  %v26652_v12 = vld [vmem:[%s33249_s5 + $0x218] sm:$0xff]  }
 0xae1   :  { %24851 = vmatmul.mubr.msk.bf16.vlgmr.msra.gmra.mrb[160].mxu1 %vm16268_vm4, %v26610_v57  ;;  %v18055_v57 = vpop.permute.xlu0 %18054 }
 0xae2   :  { %24867 = vmatpush3.bf16.msra.mxu1 %v17021_v56  ;;  %24854 = vmatprep.mubr.msk.bf16.mxu1 %vm16268_vm4, %v26611_v48  ;;  %v26650_v56 = vld [vmem:[%s33249_s5 + $0x208] sm:$0xff]   ;;  %v26653_v48 = vld [vmem:[%s33249_s5 + $0x220] sm:$0xff]  }
 0xae3   :  { %24868 = vmatprep.subr.bf16.mxu1 %v17023_v28 }
 0xae6   :  { %24869 = vmatpush3.bf16.msra.mxu1 %v17023_v28  ;;  %v18057_v28 = vpop.permute.xlu1 %18056 }
 0xae7   :  { %24870 = vmatprep.subr.bf16.mxu1 %v17025_v50 }
 0xae9   :  { %24855 = vmatmul.mubr.msk.bf16.gmra.mrb[164].mxu1 %vm16268_vm4, %v26612_v2  ;;  %v26654_v2 = vld [vmem:[%s33249_s5 + $0x228] sm:$0xff]  }
 0xaea   :  { %24871 = vmatpush3.bf16.msra.mxu1 %v17025_v50  ;;  %24858 = vmatprep.mubr.msk.bf16.mxu1 %vm16268_vm4, %v26613_v21  ;;  %v26655_v50 = vld [vmem:[%s33249_s5 + $0x230] sm:$0xff]   ;;  %v26656_v21 = vld [vmem:[%s33249_s5 + $0x238] sm:$0xff]  }
 0xaeb   :  { %24872 = vmatprep.subr.bf16.mxu1 %v17027_v15 }
 0xaee   :  { %24873 = vmatpush3.bf16.msra.mxu1 %v17027_v15  ;;  %v26657_v15 = vld [vmem:[%s33249_s5 + $0x240] sm:$0xff]  }
 0xaef   :  { %24890 = vmatprep.subr.bf16.mxu1 %v17227_v5 }
 0xaf1   :  { %24859 = vmatmul.mubr.msk.bf16.gmra.mrb[168].mxu1 %vm16268_vm4, %v26614_v59  ;;  %v26658_v59 = vld [vmem:[%s33249_s5 + $0x248] sm:$0xff]  }
 0xaf2   :  { %24862 = vmatprep.mubr.msk.bf16.mxu1 %vm16268_vm4, %v26615_v39  ;;  %v26660_v39 = vld [vmem:[%s33249_s5 + $0x258] sm:$0xff]  }
 0xaf9   :  { %24863 = vmatmul.mubr.msk.bf16.gmra.mrb[172].mxu1 %vm16268_vm4, %v26616_v7  ;;  %v26661_v7 = vld [vmem:[%s33249_s5 + $0x260] sm:$0xff]  }
 0xafa   :  { %24874 = vmatprep.mubr.msk.bf16.mxu1 %vm16268_vm4, %v26617_v41  ;;  %v26662_v41 = vld [vmem:[%s33249_s5 + $0x268] sm:$0xff]  }
 0xb01   :  { %24875 = vmatmul.mubr.msk.bf16.vlgmr.msra.gmra.mrb[160].mxu1 %vm16268_vm4, %v26618_v0  ;;  %v26663_v0 = vld [vmem:[%s33249_s5 + $0x270] sm:$0xff]  }
 0xb02   :  { %24891 = vmatpush3.bf16.msra.mxu1 %v17227_v5  ;;  %24878 = vmatprep.mubr.msk.bf16.mxu1 %vm16268_vm4, %v26619_v26  ;;  %v26659_v5 = vld [vmem:[%s33249_s5 + $0x250] sm:$0xff]   ;;  %v26664_v26 = vld [vmem:[%s33249_s5 + $0x278] sm:$0xff]  }
 0xb03   :  { %24892 = vmatprep.subr.bf16.mxu1 %v17229_v37 }
 0xb06   :  { %24893 = vmatpush3.bf16.msra.mxu1 %v17229_v37  ;;  %v18247_v37 = vld [vmem:[%s33250_s7] sm:$0xff] }
 0xb07   :  { %24894 = vmatprep.subr.bf16.mxu1 %v17231_v4 }
 0xb09   :  { %24879 = vmatmul.mubr.msk.bf16.gmra.mrb[164].mxu1 %vm16268_vm4, %v26620_v17  ;;  %v18201_v17 = vld [vmem:[%s33251_s6 + $0x10] sm:$0xff] }
 0xb0a   :  { %24895 = vmatpush3.bf16.msra.mxu1 %v17231_v4  ;;  %24882 = vmatprep.mubr.msk.bf16.mxu1 %vm16268_vm4, %v26621_v1  ;;  %v18199_v4 = vld [vmem:[%s33251_s6] sm:$0xff] }
 0xb0b   :  { %24896 = vmatprep.subr.bf16.mxu1 %v17233_v25 }
 0xb0e   :  { %24897 = vmatpush3.bf16.msra.mxu1 %v17233_v25  ;;  %v18202_v25 = vld [vmem:[%s33251_s6 + $0x18] sm:$0xff] }
 0xb0f   :  { %24914 = vmatprep.subr.bf16.mxu1 %v17433_v24 }
 0xb11   :  { %24883 = vmatmul.mubr.msk.bf16.gmra.mrb[168].mxu1 %vm16268_vm4, %v26622_v36 }
 0xb12   :  { %24886 = vmatprep.mubr.msk.bf16.mxu1 %vm16268_vm4, %v26623_v45  ;;  %v18200_v45 = vld [vmem:[%s33251_s6 + $0x8] sm:$0xff] }
 0xb19   :  { %24887 = vmatmul.mubr.msk.bf16.gmra.mrb[172].mxu1 %vm16268_vm4, %v26624_v8 }
 0xb1a   :  { %24898 = vmatprep.mubr.msk.bf16.mxu1 %vm16268_vm4, %v26625_v43 }
 0xb21   :  { %24899 = vmatmul.mubr.msk.bf16.vlgmr.msra.gmra.mrb[160].mxu1 %vm16268_vm4, %v26626_v18 }
 0xb22   :  { %24915 = vmatpush3.bf16.msra.mxu1 %v17433_v24  ;;  %24902 = vmatprep.mubr.msk.bf16.mxu1 %vm16268_vm4, %v26627_v34 }
 0xb23   :  { %24916 = vmatprep.subr.bf16.mxu1 %v17435_v42 }
 0xb26   :  { %24917 = vmatpush3.bf16.msra.mxu1 %v17435_v42 }
 0xb27   :  { %24918 = vmatprep.subr.bf16.mxu1 %v17437_v14 }
 0xb29   :  { %24903 = vmatmul.mubr.msk.bf16.gmra.mrb[164].mxu1 %vm16268_vm4, %v26628_v44 }
 0xb2a   :  { %24919 = vmatpush3.bf16.msra.mxu1 %v17437_v14  ;;  %24906 = vmatprep.mubr.msk.bf16.mxu1 %vm16268_vm4, %v26629_v19 }
 0xb2b   :  { %24920 = vmatprep.subr.bf16.mxu1 %v17439_v63 }
 0xb2e   :  { %24921 = vmatpush3.bf16.msra.mxu1 %v17439_v63 }
 0xb2f   :  { %24938 = vmatprep.subr.bf16.mxu1 %v17639_v58 }
 0xb31   :  { %24907 = vmatmul.mubr.msk.bf16.gmra.mrb[168].mxu1 %vm16268_vm4, %v26630_v53  ;;  %v18205_v53 = vld [vmem:[%s33251_s6 + $0x30] sm:$0xff] }
 0xb32   :  { %24910 = vmatprep.mubr.msk.bf16.mxu1 %vm16268_vm4, %v26631_v55  ;;  %v18203_v55 = vld [vmem:[%s33251_s6 + $0x20] sm:$0xff] }
 0xb39   :  { %24911 = vmatmul.mubr.msk.bf16.gmra.mrb[172].mxu1 %vm16268_vm4, %v26632_v11 }
 0xb3a   :  { %24922 = vmatprep.mubr.msk.bf16.mxu1 %vm16268_vm4, %v26633_v3 }
 0xb41   :  { %24923 = vmatmul.mubr.msk.bf16.vlgmr.msra.gmra.mrb[160].mxu1 %vm16268_vm4, %v26634_v16  ;;  %v18206_v16 = vld [vmem:[%s33251_s6 + $0x38] sm:$0xff] }
 0xb42   :  { %24939 = vmatpush3.bf16.msra.mxu1 %v17639_v58  ;;  %24926 = vmatprep.mubr.msk.bf16.mxu1 %vm16268_vm4, %v26635_v47 }
 0xb43   :  { %24940 = vmatprep.subr.bf16.mxu1 %v17641_v22 }
 0xb46   :  { %24941 = vmatpush3.bf16.msra.mxu1 %v17641_v22 }
 0xb47   :  { %24942 = vmatprep.subr.bf16.mxu1 %v17643_v23 }
 0xb49   :  { %24927 = vmatmul.mubr.msk.bf16.gmra.mrb[164].mxu1 %vm16268_vm4, %v26636_v30  ;;  %v18204_v30 = vld [vmem:[%s33251_s6 + $0x28] sm:$0xff] }
 0xb4a   :  { %24943 = vmatpush3.bf16.msra.mxu1 %v17643_v23  ;;  %24930 = vmatprep.mubr.msk.bf16.mxu1 %vm16268_vm4, %v26637_v29 }
 0xb4b   :  { %24944 = vmatprep.subr.bf16.mxu1 %v17645_v54 }
 0xb4e   :  { %24945 = vmatpush3.bf16.msra.mxu1 %v17645_v54 }
 0xb4f   :  { %24962 = vmatprep.subr.bf16.mxu1 %v17845_v6 }
 0xb51   :  { %24931 = vmatmul.mubr.msk.bf16.gmra.mrb[168].mxu1 %vm16268_vm4, %v26638_v32 }
 0xb52   :  { %24934 = vmatprep.mubr.msk.bf16.mxu1 %vm16268_vm4, %v26639_v33 }
 0xb59   :  { %24935 = vmatmul.mubr.msk.bf16.gmra.mrb[172].mxu1 %vm16268_vm4, %v26640_v52 }
 0xb5a   :  { %24946 = vmatprep.mubr.msk.bf16.mxu1 %vm16268_vm4, %v26641_v38 }
 0xb61   :  { %24947 = vmatmul.mubr.msk.bf16.vlgmr.msra.gmra.mrb[160].mxu1 %vm16268_vm4, %v26642_v40 }
 0xb62   :  { %24963 = vmatpush3.bf16.msra.mxu1 %v17845_v6  ;;  %24950 = vmatprep.mubr.msk.bf16.mxu1 %vm16268_vm4, %v26643_v61  ;;  %v18209_v61 = vld [vmem:[%s33251_s6 + $0x50] sm:$0xff] }
 0xb63   :  { %24964 = vmatprep.subr.bf16.mxu1 %v17847_v49 }
 0xb66   :  { %24965 = vmatpush3.bf16.msra.mxu1 %v17847_v49 }
 0xb67   :  { %24966 = vmatprep.subr.bf16.mxu1 %v17849_v51 }
 0xb69   :  { %24951 = vmatmul.mubr.msk.bf16.gmra.mrb[164].mxu1 %vm16268_vm4, %v26644_v27  ;;  %v18207_v27 = vld [vmem:[%s33251_s6 + $0x40] sm:$0xff] }
 0xb6a   :  { %24967 = vmatpush3.bf16.msra.mxu1 %v17849_v51  ;;  %24954 = vmatprep.mubr.msk.bf16.mxu1 %vm16268_vm4, %v26645_v20 }
 0xb6b   :  { %24968 = vmatprep.subr.bf16.mxu1 %v17851_v46 }
 0xb6e   :  { %24969 = vmatpush3.bf16.msra.mxu1 %v17851_v46  ;;  %v18210_v46 = vld [vmem:[%s33251_s6 + $0x58] sm:$0xff] }
 0xb6f   :  { %24986 = vmatprep.subr.bf16.mxu1 %v18051_v31 }
 0xb71   :  { %24955 = vmatmul.mubr.msk.bf16.gmra.mrb[168].mxu1 %vm16268_vm4, %v26646_v9 }
 0xb72   :  { %24958 = vmatprep.mubr.msk.bf16.mxu1 %vm16268_vm4, %v26647_v60  ;;  %v18208_v60 = vld [vmem:[%s33251_s6 + $0x48] sm:$0xff] }
 0xb79   :  { %24959 = vmatmul.mubr.msk.bf16.gmra.mrb[172].mxu1 %vm16268_vm4, %v26648_v35 }
 0xb7a   :  { %24970 = vmatprep.mubr.msk.bf16.mxu1 %vm16268_vm4, %v26649_v62 }
 0xb81   :  { %24971 = vmatmul.mubr.msk.bf16.vlgmr.msra.gmra.mrb[160].mxu1 %vm16268_vm4, %v26650_v56 }
 0xb82   :  { %24987 = vmatpush3.bf16.msra.mxu1 %v18051_v31  ;;  %24974 = vmatprep.mubr.msk.bf16.mxu1 %vm16268_vm4, %v26651_v10 }
 0xb83   :  { %24988 = vmatprep.subr.bf16.mxu1 %v18053_v13 }
 0xb86   :  { %24989 = vmatpush3.bf16.msra.mxu1 %v18053_v13 }
 0xb87   :  { %24990 = vmatprep.subr.bf16.mxu1 %v18055_v57 }
 0xb89   :  { %24975 = vmatmul.mubr.msk.bf16.gmra.mrb[164].mxu1 %vm16268_vm4, %v26652_v12 }
 0xb8a   :  { %24991 = vmatpush3.bf16.msra.mxu1 %v18055_v57  ;;  %24978 = vmatprep.mubr.msk.bf16.mxu1 %vm16268_vm4, %v26653_v48 }
 0xb8b   :  { %24992 = vmatprep.subr.bf16.mxu1 %v18057_v28 }
 0xb8e   :  { %24993 = vmatpush3.bf16.msra.mxu1 %v18057_v28 }
 0xb91   :  { %24979 = vmatmul.mubr.msk.bf16.gmra.mrb[168].mxu1 %vm16268_vm4, %v26654_v2  ;;  %v18213_v2 = vld [vmem:[%s33251_s6 + $0x70] sm:$0xff] }
 0xb92   :  { %24982 = vmatprep.mubr.msk.bf16.mxu1 %vm16268_vm4, %v26655_v50 }
 0xb99   :  { %24983 = vmatmul.mubr.msk.bf16.gmra.mrb[172].mxu1 %vm16268_vm4, %v26656_v21  ;;  %v18211_v21 = vld [vmem:[%s33251_s6 + $0x60] sm:$0xff] }
 0xb9a   :  { %24994 = vmatprep.mubr.msk.bf16.mxu1 %vm16268_vm4, %v26657_v15 }
 0xba1   :  { %24995 = vmatmul.mubr.msk.bf16.vlgmr.msra.gmra.mrb[160].mxu1 %vm16268_vm4, %v26658_v59 }
 0xba2   :  { %24998 = vmatprep.mubr.msk.bf16.mxu1 %vm16268_vm4, %v26659_v5  ;;  %v18214_v5 = vld [vmem:[%s33251_s6 + $0x78] sm:$0xff] }
 0xba9   :  { %24999 = vmatmul.mubr.msk.bf16.gmra.mrb[164].mxu1 %vm16268_vm4, %v26660_v39 }
 0xbaa   :  { %25002 = vmatprep.mubr.msk.bf16.mxu1 %vm16268_vm4, %v26661_v7 }
 0xbb1   :  { %25003 = vmatmul.mubr.msk.bf16.gmra.mrb[168].mxu1 %vm16268_vm4, %v26662_v41  ;;  %v18212_v41 = vld [vmem:[%s33251_s6 + $0x68] sm:$0xff] }
 0xbb2   :  { %25006 = vmatprep.mubr.msk.bf16.mxu1 %vm16268_vm4, %v26663_v0 }
 0xbb9   :  { %25007 = vmatmul.mubr.msk.bf16.gmra.mrb[172].mxu1 %vm16268_vm4, %v26664_v26 }
 0xbba   :  { %25042 = vmatprep.mubr.f32.mxu1 %v18247_v37 }
 0xc74   :  { %v24996_v1 = vpop.f32.mrb[160].mxu1 }
 0xc75   :  { %v18217_v36 = vadd.f32 %v24996_v1, %v18201_v17  ;;  %v18120_v24 = vpop.f32.mrb[161].mxu1 }
 0xc76   :  { %v18215_v8 = vadd.f32 %v18199_v4, %v18120_v24  ;;  %v24997_v43 = vpop.f32.mrb[162].mxu1 }
 0xc77   :  { %v18218_v18 = vadd.f32 %v24997_v43, %v18202_v25  ;;  %v18123_v34 = vpop.f32.mrb[163].mxu1  ;;  %v18233_v44 = vmax.f32 %v18217_v36, 0.0  ;;  %v18248_v43 = vld [vmem:[%s33250_s7 + $0x8] sm:$0x3] }
 0xc78   :  { %v18216_v42 = vadd.f32 %v18200_v45, %v18123_v34  ;;  %v18231_v19 = vmax.f32 %v18215_v8, 0.0  ;;  %v18249_v34 = vld [vmem:[%s33252_s8] sm:$0xff] }
 0xc79   :  { %v18234_v14 = vmax.f32 %v18218_v18, 0.0  ;;  %v18250_v18 = vld [vmem:[%s33252_s8 + $0x8] sm:$0x3] }
 0xc7a   :  { %v18232_v63 = vmax.f32 %v18216_v42, 0.0 }
 0xc7b   :  { %v25121_v58 = vpack.c.bf16 %v18234_v14, %v18233_v44 }
 0xc7c   :  { %v25117_v11 = vpack.c.bf16 %v18232_v63, %v18231_v19  ;;  %v25000_v3 = vpop.f32.mrb[164].mxu1 }
 0xc7d   :  { %v18221_v47 = vadd.f32 %v25000_v3, %v18205_v53  ;;  %v18136_v22 = vpop.f32.mrb[165].mxu1 }
 0xc7e   :  { %v18219_v23 = vadd.f32 %v18203_v55, %v18136_v22  ;;  %v25001_v29 = vpop.f32.mrb[166].mxu1  ;;  %25118 = vmatprep.subr.bf16.mxu1 %v25117_v11 }
 0xc7f   :  { %v18222_v54 = vadd.f32 %v25001_v29, %v18206_v16  ;;  %v18139_v32 = vpop.f32.mrb[167].mxu1  ;;  %25120 = vmatpush3.bf16.msra.mxu1 %v25117_v11  ;;  %v18237_v33 = vmax.f32 %v18221_v47, 0.0 }
 0xc80   :  { %v18220_v6 = vadd.f32 %v18204_v30, %v18139_v32  ;;  %25122 = vmatprep.subr.bf16.mxu1 %v25121_v58  ;;  %v18235_v38 = vmax.f32 %v18219_v23, 0.0 }
 0xc81   :  { %v18238_v52 = vmax.f32 %v18222_v54, 0.0 }
 0xc82   :  { %v18236_v40 = vmax.f32 %v18220_v6, 0.0 }
 0xc83   :  { %v25129_v49 = vpack.c.bf16 %v18238_v52, %v18237_v33  ;;  %25124 = vmatpush3.bf16.msra.mxu1 %v25121_v58 }
 0xc84   :  { %v25125_v51 = vpack.c.bf16 %v18236_v40, %v18235_v38  ;;  %v25004_v20 = vpop.f32.mrb[168].mxu1 }
 0xc85   :  { %v18225_v9 = vadd.f32 %v25004_v20, %v18209_v61  ;;  %v18152_v31 = vpop.f32.mrb[169].mxu1 }
 0xc86   :  { %v18223_v35 = vadd.f32 %v18207_v27, %v18152_v31  ;;  %v25005_v62 = vpop.f32.mrb[170].mxu1  ;;  %25126 = vmatprep.subr.bf16.mxu1 %v25125_v51 }
 0xc87   :  { %v18226_v56 = vadd.f32 %v25005_v62, %v18210_v46  ;;  %v18155_v10 = vpop.f32.mrb[171].mxu1  ;;  %25128 = vmatpush3.bf16.msra.mxu1 %v25125_v51  ;;  %v18241_v12 = vmax.f32 %v18225_v9, 0.0 }
 0xc88   :  { %v18224_v13 = vadd.f32 %v18208_v60, %v18155_v10  ;;  %25130 = vmatprep.subr.bf16.mxu1 %v25129_v49  ;;  %v18239_v48 = vmax.f32 %v18223_v35, 0.0 }
 0xc89   :  { %v18242_v57 = vmax.f32 %v18226_v56, 0.0 }
 0xc8a   :  { %v18240_v28 = vmax.f32 %v18224_v13, 0.0 }
 0xc8b   :  { %v25137_v50 = vpack.c.bf16 %v18242_v57, %v18241_v12  ;;  %25132 = vmatpush3.bf16.msra.mxu1 %v25129_v49 }
 0xc8c   :  { %v25133_v15 = vpack.c.bf16 %v18240_v28, %v18239_v48  ;;  %v25008_v59 = vpop.f32.mrb[172].mxu1 }
 0xc8d   :  { %v18229_v39 = vadd.f32 %v25008_v59, %v18213_v2  ;;  %v18168_v7 = vpop.f32.mrb[173].mxu1 }
 0xc8e   :  { %v18227_v0 = vadd.f32 %v18211_v21, %v18168_v7  ;;  %v25009_v26 = vpop.f32.mrb[174].mxu1  ;;  %25134 = vmatprep.subr.bf16.mxu1 %v25133_v15 }
 0xc8f   :  { %v18230_v37 = vadd.f32 %v25009_v26, %v18214_v5  ;;  %v18171_v17 = vpop.f32.mrb[175].mxu1  ;;  %25136 = vmatpush3.bf16.msra.mxu1 %v25133_v15  ;;  %v18245_v1 = vmax.f32 %v18229_v39, 0.0 }
 0xc90   :  { %v18228_v4 = vadd.f32 %v18212_v41, %v18171_v17  ;;  %25138 = vmatprep.subr.bf16.mxu1 %v25137_v50  ;;  %v18243_v36 = vmax.f32 %v18227_v0, 0.0 }
 0xc91   :  { %v18246_v25 = vmax.f32 %v18230_v37, 0.0 }
 0xc92   :  { %v18244_v24 = vmax.f32 %v18228_v4, 0.0 }
 0xc93   :  { %v25145_v45 = vpack.c.bf16 %v18246_v25, %v18245_v1  ;;  %25140 = vmatpush3.bf16.msra.mxu1 %v25137_v50 }
 0xc94   :  { %v25141_v8 = vpack.c.bf16 %v18244_v24, %v18243_v36 }
 0xc96   :  { %25142 = vmatprep.subr.bf16.mxu1 %v25141_v8 }
 0xc97   :  { %25144 = vmatpush3.bf16.msra.mxu1 %v25141_v8 }
 0xc98   :  { %25146 = vmatprep.subr.bf16.mxu1 %v25145_v45 }
 0xc9b   :  { %25148 = vmatpush3.bf16.msra.mxu1 %v25145_v45 }
 0xc9e   :  { %25043 = vmatmul.mubr.f32.vlgmr.msra.gmra.mrb[176].mxu1 %v18248_v43 }
 0xd71   :  { %v25044_v42 = vpop.f32.mrb[176].mxu1 }
 0xd72   :  { %v18323_v44 = vadd.f32 %v25044_v42, %v18250_v18  ;;  %v18317_v14 = vpop.f32.mrb[177].mxu1 }
 0xd73   :  { %v18318_v19 = vadd.f32 %v18317_v14, %v18249_v34 }
 0xd74   :  { %18329 = vst.msk [vmem:[%s33253_s9 + $0x8] sm:$0x3] %vm18328_vm5, %v18323_v44 }
 0xd75   :  { %18327 = vst.msk [vmem:[%s33253_s9] sm:$0xff] %vm18326_vm6, %v18318_v19 }

</bundles_post_ra>
